<compile_context>
chip_gen: v6e
topology: v6e:2x2x1
jax: 0.10.0
libtpu: 0.0.40
codegen_flags: <defaults>
</compile_context>

<pallas_src>
import functools
import math

import jax
import jax.numpy as jnp
from jax.experimental import pallas as pl
from jax.experimental.pallas import tpu as pltpu


def _round_up(x, m):
    return ((x + m - 1) // m) * m


def _vmem_limit_bytes():
    # Size the scoped VMEM limit per generation (keep >=24 MiB headroom for
    # Mosaic internal scratch); worst per-layer footprint here is ~25 MiB.
    try:
        cap = pltpu.get_tpu_info().vmem_capacity_bytes
    except Exception:
        cap = 128 * 1024 * 1024
    return int(min(100 * 1024 * 1024, max(32 * 1024 * 1024, cap - 24 * 1024 * 1024)))


VMEM_LIMIT = _vmem_limit_bytes()


def _pick_tile_div(n, cap):
    """Largest d <= cap with d | n and (d % 8 == 0 or d == n); fallback n."""
    cap = min(cap, n)
    for d in range(cap, 0, -1):
        if n % d == 0 and (d % 8 == 0 or d == n):
            return d
    return n


def _largest_divisor_le(n, cap):
    cap = max(1, min(cap, n))
    for d in range(cap, 0, -1):
        if n % d == 0:
            return d
    return n


# ---------------------------------------------------------------------------
# Pallas kernels
# ---------------------------------------------------------------------------

def _make_fused_conv_kernel(offsets, m_out, chunk):
    """Conv GEMM with the kh*kw taps folded in as constant row offsets.

    a_ref holds the spatially padded activation flattened to rows (bf16);
    w_ref holds one (Cin, tn) weight slab per tap.  Per-column sum / sum-of-
    squares (masked to valid rows) are fused into the epilogue.
    The output rows are processed in static chunks to bound live VMEM values.
    """
    starts = list(range(0, m_out, chunk))

    def kernel(a_ref, w_ref, bias_ref, mask_ref, y_ref, s_ref, q_ref):
        b = bias_ref[...]                                   # (1, tn) f32
        s_acc = jnp.zeros(b.shape, jnp.float32)
        q_acc = jnp.zeros(b.shape, jnp.float32)
        for c0 in starts:
            cs = min(chunk, m_out - c0)
            acc = jnp.dot(a_ref[pl.ds(c0 + offsets[0], cs), :], w_ref[0],
                          preferred_element_type=jnp.float32)
            for t in range(1, len(offsets)):
                acc = acc + jnp.dot(a_ref[pl.ds(c0 + offsets[t], cs), :], w_ref[t],
                                    preferred_element_type=jnp.float32)
            y = acc + b
            y_ref[pl.ds(c0, cs), :] = y.astype(y_ref.dtype)
            m = mask_ref[pl.ds(c0, cs), :].astype(jnp.float32)   # (cs, 1)
            ym = y * m
            s_acc = s_acc + jnp.sum(ym, axis=0, keepdims=True)
            q_acc = q_acc + jnp.sum(ym * y, axis=0, keepdims=True)
        s_ref[...] = s_acc
        q_ref[...] = q_acc

    return kernel


def _fused_conv_gemm(a, w_taps, bias, mask, *, offsets, m_out, tn):
    """a:(Ma,Cp) bf16, w_taps:(T,Cp,Np) bf16, bias:(1,Np) f32, mask:(m_out,1) bf16."""
    Ma, Cp = a.shape
    T, _, Np = w_taps.shape
    kernel = _make_fused_conv_kernel(tuple(offsets), m_out, 1024)
    return pl.pallas_call(
        kernel,
        out_shape=(
            jax.ShapeDtypeStruct((m_out, Np), jnp.bfloat16),
            jax.ShapeDtypeStruct((1, Np), jnp.float32),
            jax.ShapeDtypeStruct((1, Np), jnp.float32),
        ),
        grid=(Np // tn,),
        in_specs=[
            pl.BlockSpec((Ma, Cp), lambda j: (0, 0)),        # activation, resident
            pl.BlockSpec((T, Cp, tn), lambda j: (0, 0, j)),  # per-tap weights
            pl.BlockSpec((1, tn), lambda j: (0, j)),
            pl.BlockSpec((m_out, 1), lambda j: (0, 0)),      # row-validity mask
        ],
        out_specs=(
            pl.BlockSpec((m_out, tn), lambda j: (0, j)),
            pl.BlockSpec((1, tn), lambda j: (0, j)),
            pl.BlockSpec((1, tn), lambda j: (0, j)),
        ),
        compiler_params=pltpu.CompilerParams(
            dimension_semantics=("parallel",),
            vmem_limit_bytes=VMEM_LIMIT,
        ),
    )(a, w_taps, bias, mask)


def _im2col_gemm_kernel(a_ref, b_ref, bias_ref, y_ref, s_ref, q_ref):
    """Tiled GEMM + bias with per-M-tile partial batch statistics (layer 1)."""
    y = (jnp.dot(a_ref[...], b_ref[...], preferred_element_type=jnp.float32)
         + bias_ref[...])
    y_ref[...] = y.astype(y_ref.dtype)
    s_ref[...] = jnp.sum(y, axis=0)[None, None, :]
    q_ref[...] = jnp.sum(y * y, axis=0)[None, None, :]


def _im2col_gemm(a, b, bias, *, tm, tn):
    M, K = a.shape
    _, Np = b.shape
    nm = M // tm
    return pl.pallas_call(
        _im2col_gemm_kernel,
        out_shape=(
            jax.ShapeDtypeStruct((M, Np), jnp.bfloat16),
            jax.ShapeDtypeStruct((nm, 1, Np), jnp.float32),
            jax.ShapeDtypeStruct((nm, 1, Np), jnp.float32),
        ),
        grid=(Np // tn, nm),
        in_specs=[
            pl.BlockSpec((tm, K), lambda j, i: (i, 0)),
            pl.BlockSpec((K, tn), lambda j, i: (0, j)),   # weight stationary over i
            pl.BlockSpec((1, tn), lambda j, i: (0, j)),
        ],
        out_specs=(
            pl.BlockSpec((tm, tn), lambda j, i: (i, j)),
            pl.BlockSpec((1, 1, tn), lambda j, i: (i, 0, j)),
            pl.BlockSpec((1, 1, tn), lambda j, i: (i, 0, j)),
        ),
        compiler_params=pltpu.CompilerParams(
            dimension_semantics=("parallel", "parallel"),
            vmem_limit_bytes=VMEM_LIMIT,
        ),
    )(a, b, bias)


def _bn_lrelu_kernel(y_ref, scale_ref, shift_ref, o_ref):
    v = y_ref[...].astype(jnp.float32) * scale_ref[...] + shift_ref[...]
    o_ref[...] = jnp.where(v >= 0.0, v, 0.1 * v).astype(o_ref.dtype)


def _bn_lrelu(y, scale, shift, *, tm):
    M, Np = y.shape
    vspec = pl.BlockSpec((1, Np), lambda i: (0, 0))
    return pl.pallas_call(
        _bn_lrelu_kernel,
        out_shape=jax.ShapeDtypeStruct((M, Np), jnp.bfloat16),
        grid=(M // tm,),
        in_specs=[pl.BlockSpec((tm, Np), lambda i: (i, 0)), vspec, vspec],
        out_specs=pl.BlockSpec((tm, Np), lambda i: (i, 0)),
        compiler_params=pltpu.CompilerParams(
            dimension_semantics=("parallel",),
            vmem_limit_bytes=VMEM_LIMIT,
        ),
    )(y, scale, shift)


def _bn_lrelu_pool_kernel(y_ref, scale_ref, shift_ref, o_ref):
    """BN-affine + LeakyReLU(0.1) + 2x2 max-pool from a single reshaped view.

    Input block is (tb, 2, Wq, 2*Np): the two pooled columns live in the lane
    dimension (aligned 128-multiple slices), the two pooled rows in an outer
    dimension, so no strided gathers are needed.
    """
    s = scale_ref[...]
    t = shift_ref[...]
    npc = s.shape[-1]

    def f(v):
        v = v.astype(jnp.float32) * s + t
        return jnp.where(v >= 0.0, v, 0.1 * v)

    v = y_ref[...]
    a = f(v[:, 0, :, :npc])
    b = f(v[:, 0, :, npc:])
    c = f(v[:, 1, :, :npc])
    d = f(v[:, 1, :, npc:])
    o_ref[...] = jnp.maximum(jnp.maximum(a, b), jnp.maximum(c, d)).astype(o_ref.dtype)


def _bn_lrelu_pool(yv, scale, shift, *, tb):
    R, _two, Wq, Np2 = yv.shape
    Np = Np2 // 2
    return pl.pallas_call(
        _bn_lrelu_pool_kernel,
        out_shape=jax.ShapeDtypeStruct((R, Wq, Np), jnp.bfloat16),
        grid=(R // tb,),
        in_specs=[
            pl.BlockSpec((tb, 2, Wq, Np2), lambda i: (i, 0, 0, 0)),
            pl.BlockSpec((1, Np), lambda i: (0, 0)),
            pl.BlockSpec((1, Np), lambda i: (0, 0)),
        ],
        out_specs=pl.BlockSpec((tb, Wq, Np), lambda i: (i, 0, 0)),
        compiler_params=pltpu.CompilerParams(
            dimension_semantics=("parallel",),
            vmem_limit_bytes=VMEM_LIMIT,
        ),
    )(yv, scale, shift)


def _matmul_bias_kernel(a_ref, b_ref, bias_ref, o_ref):
    o_ref[...] = (jnp.dot(a_ref[...], b_ref[...], preferred_element_type=jnp.float32)
                  + bias_ref[...])


def _matmul_bias(a, b, bias, *, tm, tn):
    M, K = a.shape
    _, Np = b.shape
    return pl.pallas_call(
        _matmul_bias_kernel,
        out_shape=jax.ShapeDtypeStruct((M, Np), jnp.float32),
        grid=(M // tm, Np // tn),
        in_specs=[
            pl.BlockSpec((tm, K), lambda i, j: (i, 0)),
            pl.BlockSpec((K, tn), lambda i, j: (0, j)),
            pl.BlockSpec((1, tn), lambda i, j: (0, j)),
        ],
        out_specs=pl.BlockSpec((tm, tn), lambda i, j: (i, j)),
        compiler_params=pltpu.CompilerParams(
            dimension_semantics=("parallel", "parallel"),
            vmem_limit_bytes=VMEM_LIMIT,
        ),
    )(a, b, bias)


# ---------------------------------------------------------------------------
# Layer wrapper (jitted per unique layer configuration)
# ---------------------------------------------------------------------------

@functools.partial(jax.jit, static_argnames=("ksize", "stride", "pad", "pool"))
def conv_block(x, p, *, ksize, stride, pad, pool):
    """x: (B, H, W, C) NHWC bf16 (C channel-padded except for the first layer).

    Conv2d(+bias) -> BatchNorm2d (batch stats) -> LeakyReLU(0.1) [-> MaxPool2d(2)].
    Returns bf16 NHWC with cout padded to a multiple of 128 (padded channels
    are exactly zero, and the next layer's weights are zero-padded to match).
    """
    B, H, W, C = x.shape
    w = p["w"]                                 # (cout, cin, kh, kw) PyTorch layout
    cout, cin, kh, kw = w.shape
    Np = _round_up(cout, 128)

    bias = jnp.pad(p["b"], (0, Np - cout)).reshape(1, Np)
    gamma = jnp.pad(p["gamma"], (0, Np - cout)).reshape(1, Np)
    beta = jnp.pad(p["beta"], (0, Np - cout)).reshape(1, Np)

    if Np >= 512:
        tn = 256            # >= 2 "parallel" N tiles -> v7x megacore
    elif Np >= 256:
        tn = 128
    else:
        tn = Np

    if stride != 1:
        # --- first layer only: 7x7 stride-2 conv via im2col + tiled GEMM ---
        Ho = (H + 2 * pad - kh) // stride + 1
        Wo = (W + 2 * pad - kw) // stride + 1
        xp = jnp.pad(x, ((0, 0), (pad, pad), (pad, pad), (0, 0)))
        cols = []
        for i in range(kh):
            for j in range(kw):
                cols.append(xp[:, i:i + stride * (Ho - 1) + 1:stride,
                                  j:j + stride * (Wo - 1) + 1:stride, :])
        K = kh * kw * C
        Kp = _round_up(K, 128)
        if Kp > K:
            cols.append(jnp.zeros((B, Ho, Wo, Kp - K), x.dtype))
        a = jnp.concatenate(cols, axis=-1).reshape(B * Ho * Wo, Kp)
        M = B * Ho * Wo
        tm = _pick_tile_div(M, 512)
        wm = jnp.transpose(w, (2, 3, 1, 0)).reshape(K, cout).astype(jnp.bfloat16)
        wm = jnp.pad(wm, ((0, Kp - K), (0, Np - cout)))
        y, ps, pq = _im2col_gemm(a, wm, bias, tm=tm, tn=tn)
        ssum = jnp.sum(ps, axis=0)
        ssq = jnp.sum(pq, axis=0)
        y_dense = y
    else:
        # --- 1x1 and 3x3/s1/p1 convs: taps folded into the GEMM, no im2col ---
        Ho, Wo = H, W
        wm = jnp.transpose(w, (2, 3, 1, 0)).reshape(kh * kw, cin, cout)
        wm = jnp.pad(wm.astype(jnp.bfloat16),
                     ((0, 0), (0, C - cin), (0, Np - cout)))
        if ksize == 1:
            m_out = B * H * W
            a = x.reshape(m_out, C)                       # free reshape, no copy
            offsets = (0,)
            valid = jnp.ones((m_out, 1), jnp.bfloat16)
        else:
            # Zero-pad the spatial ring, flatten (B, H+2, W+2) to rows.  For a
            # top-left-anchored output grid every tap is a constant row offset.
            We = W + 2
            S = (H + 2) * We
            m_out = B * S
            xp = jnp.pad(x, ((0, 0), (1, 1), (1, 1), (0, 0)))
            Ma = _round_up(m_out + 2 * We + 2, 8)
            a = jnp.pad(xp.reshape(m_out, C), ((0, Ma - m_out), (0, 0)))
            offsets = tuple(di * We + dj for di in range(3) for dj in range(3))
            rr = jnp.arange(m_out, dtype=jnp.int32) % S
            valid = ((rr // We < H) & (rr % We < W)).astype(jnp.bfloat16)
            valid = valid.reshape(m_out, 1)
        y, ssum, ssq = _fused_conv_gemm(a, wm, bias, valid,
                                        offsets=offsets, m_out=m_out, tn=tn)
        if ksize == 1:
            y_dense = y
        else:
            y_dense = y.reshape(B, H + 2, W + 2, Np)[:, :H, :W, :]
            y_dense = y_dense.reshape(B * H * W, Np)

    # BatchNorm batch statistics (training-mode biased variance) + affine.
    mcount = B * Ho * Wo
    mean = ssum / mcount
    var = jnp.maximum(ssq / mcount - mean * mean, 0.0)
    inv = jax.lax.rsqrt(var + 1e-5)
    scale = gamma * inv
    shift = beta - mean * scale

    if pool:
        Hq, Wq = Ho // 2, Wo // 2
        yv = y_dense.reshape(B * Hq, 2, Wq, 2 * Np)       # free reshape
        row_bytes = 2 * Wq * 2 * Np * 2
        tb = _largest_divisor_le(B * Hq, max(1, (2 << 20) // row_bytes))
        out = _bn_lrelu_pool(yv, scale, shift, tb=tb)
        return out.reshape(B, Hq, Wq, Np)

    tm = _pick_tile_div(B * Ho * Wo, 2048)
    out = _bn_lrelu(y_dense, scale, shift, tm=tm)
    return out.reshape(B, Ho, Wo, Np)


@jax.jit
def head(x, fc_w, fc_b):
    """AvgPool2d(7) + Flatten + Linear(1024, 1000). x: (B, 7, 7, 1024) bf16."""
    B = x.shape[0]
    pooled = x.reshape(B, 49, 1024).astype(jnp.float32).mean(axis=1)
    N, K = fc_w.shape                                      # (1000, 1024)
    Np = _round_up(N, 128)
    Mp = _round_up(B, 8)
    a = jnp.pad(pooled.astype(jnp.bfloat16), ((0, Mp - B), (0, 0)))
    wmat = jnp.pad(fc_w.T.astype(jnp.bfloat16), ((0, 0), (0, Np - N)))
    bias = jnp.pad(fc_b, (0, Np - N)).reshape(1, Np)
    y = _matmul_bias(a, wmat, bias, tm=Mp, tn=min(512, Np))
    return y[:B, :N]


# ---------------------------------------------------------------------------
# Model definition / parameters
# ---------------------------------------------------------------------------

# (cin, cout, kernel, stride, pad) per conv; bool = MaxPool2d(2) after the block.
BLOCKS = [
    ([(3, 64, 7, 2, 3)], True),
    ([(64, 192, 3, 1, 1)], True),
    ([(192, 128, 1, 1, 0), (128, 256, 3, 1, 1),
      (256, 256, 1, 1, 0), (256, 512, 3, 1, 1)], True),
    ([(512, 256, 1, 1, 0), (256, 512, 3, 1, 1)] * 4
     + [(512, 512, 1, 1, 0), (512, 1024, 3, 1, 1)], True),
    ([(1024, 512, 1, 1, 0), (512, 1024, 3, 1, 1)] * 2, False),
]


def init_params(key):
    params = []
    for convs, _ in BLOCKS:
        blk = []
        for (cin, cout, k, _s, _p) in convs:
            key, k1, k2, k3, k4 = jax.random.split(key, 5)
            fan_in = cin * k * k
            blk.append(dict(
                w=jax.random.normal(k1, (cout, cin, k, k), jnp.float32)
                  / math.sqrt(fan_in),
                b=0.1 * jax.random.normal(k2, (cout,), jnp.float32),
                gamma=1.0 + 0.1 * jax.random.normal(k3, (cout,), jnp.float32),
                beta=0.1 * jax.random.normal(k4, (cout,), jnp.float32),
            ))
        params.append(blk)
    key, k1, k2 = jax.random.split(key, 3)
    fc_w = jax.random.normal(k1, (1000, 1024), jnp.float32) / math.sqrt(1024)
    fc_b = 0.1 * jax.random.normal(k2, (1000,), jnp.float32)
    return params, fc_w, fc_b


def darknet_forward(x_nchw, params, fc_w, fc_b):
    """Input [B, 3, 224, 224] NCHW -> logits [B, 1000]."""
    x = jnp.transpose(x_nchw, (0, 2, 3, 1)).astype(jnp.bfloat16)   # NCHW -> NHWC bf16
    for (convs, do_pool), blk in zip(BLOCKS, params):
        n = len(convs)
        for idx, ((_cin, _cout, k, s, pd), p) in enumerate(zip(convs, blk)):
            x = conv_block(x, p, ksize=k, stride=s, pad=pd,
                           pool=do_pool and idx == n - 1)
    return head(x, fc_w, fc_b)


if __name__ == "__main__":
    key = jax.random.PRNGKey(0)
    pkey, xkey = jax.random.split(key)
    params, fc_w, fc_b = init_params(pkey)

    # The module's forward (AvgPool2d(7) after five 2x downsamplings) implies
    # a 224x224 input.
    x = jax.random.normal(xkey, (2, 3, 224, 224), jnp.float32)

    out = darknet_forward(x, params, fc_w, fc_b)
    out = jax.block_until_ready(out)

    assert out.shape == (2, 1000), out.shape
    assert bool(jnp.all(jnp.isfinite(out))), "non-finite output"
    print("KERNEL_OK")
</pallas_src>

<mosaic_0001>
module attributes {stable_mosaic.version = 11 : i64} {
  func.func @_im2col_gemm_kernel(%arg0: i32, %arg1: i32, %arg2: memref<512x256xbf16, #tpu.memory_space<vmem>>, %arg3: memref<256x128xbf16, #tpu.memory_space<vmem>>, %arg4: memref<1x128xf32, #tpu.memory_space<vmem>>, %arg5: memref<512x128xbf16, #tpu.memory_space<vmem>>, %arg6: memref<1x1x128xf32, #tpu.memory_space<vmem>>, %arg7: memref<1x1x128xf32, #tpu.memory_space<vmem>>) attributes {dimension_semantics = [#tpu.dimension_semantics<parallel>, #tpu.dimension_semantics<parallel>], iteration_bounds = array<i64: 1, 49>, scalar_prefetch = 0 : i64, scratch_operands = 0 : i64, tpu.core_type = #tpu.core_type<tc>, window_params = [{transform_indices = @transform_0, window_bounds = array<i64: 512, 256>}, {transform_indices = @transform_1, window_bounds = array<i64: 256, 128>}, {transform_indices = @transform_2, window_bounds = array<i64: 1, 128>}, {transform_indices = @transform_3, window_bounds = array<i64: 512, 128>}, {transform_indices = @transform_4, window_bounds = array<i64: 1, 1, 128>}, {transform_indices = @transform_5, window_bounds = array<i64: 1, 1, 128>}]} {
    %c0 = arith.constant 0 : index
    %c0_0 = arith.constant 0 : index
    %0 = vector.load %arg2[%c0, %c0_0] : memref<512x256xbf16, #tpu.memory_space<vmem>>, vector<512x256xbf16>
    %c0_1 = arith.constant 0 : index
    %c0_2 = arith.constant 0 : index
    %1 = vector.load %arg3[%c0_1, %c0_2] : memref<256x128xbf16, #tpu.memory_space<vmem>>, vector<256x128xbf16>
    %cst = arith.constant dense<0.000000e+00> : vector<512x128xf32>
    %2 = tpu.matmul %0, %1, %cst {dimension_numbers = #tpu.dot_dimension_numbers<[1], [0], [0], [1], [0, 0, 1, 1], [], []>} : vector<512x256xbf16>, vector<256x128xbf16>, vector<512x128xf32> -> vector<512x128xf32>
    %c0_3 = arith.constant 0 : index
    %c0_4 = arith.constant 0 : index
    %3 = vector.load %arg4[%c0_3, %c0_4] : memref<1x128xf32, #tpu.memory_space<vmem>>, vector<1x128xf32>
    %4 = vector.broadcast %3 : vector<1x128xf32> to vector<512x128xf32>
    %5 = arith.addf %2, %4 : vector<512x128xf32>
    %6 = arith.truncf %5 : vector<512x128xf32> to vector<512x128xbf16>
    %c0_5 = arith.constant 0 : index
    %c0_6 = arith.constant 0 : index
    %7 = vector.load %arg5[%c0_5, %c0_6] : memref<512x128xbf16, #tpu.memory_space<vmem>>, vector<512x128xbf16>
    tpu.vector_store %arg5[%c0_5, %c0_6], %6 {strides = array<i32>} : memref<512x128xbf16, #tpu.memory_space<vmem>>, vector<512x128xbf16>,
    %cst_7 = arith.constant dense<0.000000e+00> : vector<128xf32>
    %8 = vector.multi_reduction <add>, %5, %cst_7 [0] : vector<512x128xf32> to vector<128xf32>
    %9 = vector.shape_cast %8 : vector<128xf32> to vector<1x1x128xf32>
    %c0_8 = arith.constant 0 : index
    %c0_9 = arith.constant 0 : index
    %c0_10 = arith.constant 0 : index
    %10 = vector.load %arg6[%c0_8, %c0_9, %c0_10] : memref<1x1x128xf32, #tpu.memory_space<vmem>>, vector<1x1x128xf32>
    tpu.vector_store %arg6[%c0_8, %c0_9, %c0_10], %9 {strides = array<i32>} : memref<1x1x128xf32, #tpu.memory_space<vmem>>, vector<1x1x128xf32>,
    %11 = arith.mulf %5, %5 : vector<512x128xf32>
    %cst_11 = arith.constant dense<0.000000e+00> : vector<128xf32>
    %12 = vector.multi_reduction <add>, %11, %cst_11 [0] : vector<512x128xf32> to vector<128xf32>
    %13 = vector.shape_cast %12 : vector<128xf32> to vector<1x1x128xf32>
    %c0_12 = arith.constant 0 : index
    %c0_13 = arith.constant 0 : index
    %c0_14 = arith.constant 0 : index
    %14 = vector.load %arg7[%c0_12, %c0_13, %c0_14] : memref<1x1x128xf32, #tpu.memory_space<vmem>>, vector<1x1x128xf32>
    tpu.vector_store %arg7[%c0_12, %c0_13, %c0_14], %13 {strides = array<i32>} : memref<1x1x128xf32, #tpu.memory_space<vmem>>, vector<1x1x128xf32>,
    return
  }
  func.func @transform_0(%arg0: i32, %arg1: i32) -> (i32, i32) {
    %c0_i32 = arith.constant 0 : i32
    %c0_i32_0 = arith.constant 0 : i32
    return %arg1, %c0_i32 : i32, i32
  }
  func.func @transform_1(%arg0: i32, %arg1: i32) -> (i32, i32) {
    %c0_i32 = arith.constant 0 : i32
    %c0_i32_0 = arith.constant 0 : i32
    return %c0_i32, %arg0 : i32, i32
  }
  func.func @transform_2(%arg0: i32, %arg1: i32) -> (i32, i32) {
    %c0_i32 = arith.constant 0 : i32
    %c0_i32_0 = arith.constant 0 : i32
    return %c0_i32, %arg0 : i32, i32
  }
  func.func @transform_3(%arg0: i32, %arg1: i32) -> (i32, i32) {
    %c0_i32 = arith.constant 0 : i32
    return %arg1, %arg0 : i32, i32
  }
  func.func @transform_4(%arg0: i32, %arg1: i32) -> (i32, i32, i32) {
    %c0_i32 = arith.constant 0 : i32
    %c0_i32_0 = arith.constant 0 : i32
    return %arg1, %c0_i32, %arg0 : i32, i32, i32
  }
  func.func @transform_5(%arg0: i32, %arg1: i32) -> (i32, i32, i32) {
    %c0_i32 = arith.constant 0 : i32
    %c0_i32_0 = arith.constant 0 : i32
    return %arg1, %c0_i32, %arg0 : i32, i32, i32
  }
}

module attributes {stable_mosaic.version = 11 : i64} {
  func.func @_bn_lrelu_pool_kernel(%arg0: i32, %arg1: memref<28x2x56x256xbf16, #tpu.memory_space<vmem>>, %arg2: memref<1x128xf32, #tpu.memory_space<vmem>>, %arg3: memref<1x128xf32, #tpu.memory_space<vmem>>, %arg4: memref<28x56x128xbf16, #tpu.memory_space<vmem>>) attributes {dimension_semantics = [#tpu.dimension_semantics<parallel>], iteration_bounds = array<i64: 4>, scalar_prefetch = 0 : i64, scratch_operands = 0 : i64, tpu.core_type = #tpu.core_type<tc>, window_params = [{transform_indices = @transform_0, window_bounds = array<i64: 28, 2, 56, 256>}, {pipeline_mode = #tpu.pipeline_mode<synchronous>, transform_indices = @transform_1, window_bounds = array<i64: 1, 128>}, {pipeline_mode = #tpu.pipeline_mode<synchronous>, transform_indices = @transform_2, window_bounds = array<i64: 1, 128>}, {transform_indices = @transform_3, window_bounds = array<i64: 28, 56, 128>}]} {
    %c0 = arith.constant 0 : index
    %c0_0 = arith.constant 0 : index
    %0 = vector.load %arg2[%c0, %c0_0] : memref<1x128xf32, #tpu.memory_space<vmem>>, vector<1x128xf32>
    %c0_1 = arith.constant 0 : index
    %c0_2 = arith.constant 0 : index
    %1 = vector.load %arg3[%c0_1, %c0_2] : memref<1x128xf32, #tpu.memory_space<vmem>>, vector<1x128xf32>
    %c0_3 = arith.constant 0 : index
    %c0_4 = arith.constant 0 : index
    %c0_5 = arith.constant 0 : index
    %c0_6 = arith.constant 0 : index
    %2 = vector.load %arg1[%c0_3, %c0_4, %c0_5, %c0_6] : memref<28x2x56x256xbf16, #tpu.memory_space<vmem>>, vector<28x2x56x256xbf16>
    %3 = vector.extract_strided_slice %2 {offsets = [0, 0, 0, 0], sizes = [28, 1, 56, 128], strides = [1, 1, 1, 1]} : vector<28x2x56x256xbf16> to vector<28x1x56x128xbf16>
    %4 = vector.shape_cast %3 : vector<28x1x56x128xbf16> to vector<28x56x128xbf16>
    %5 = arith.extf %4 : vector<28x56x128xbf16> to vector<28x56x128xf32>
    %6 = vector.shape_cast %0 : vector<1x128xf32> to vector<1x1x128xf32>
    %7 = vector.broadcast %6 : vector<1x1x128xf32> to vector<28x56x128xf32>
    %8 = arith.mulf %5, %7 : vector<28x56x128xf32>
    %9 = vector.shape_cast %1 : vector<1x128xf32> to vector<1x1x128xf32>
    %10 = vector.broadcast %9 : vector<1x1x128xf32> to vector<28x56x128xf32>
    %11 = arith.addf %8, %10 : vector<28x56x128xf32>
    %cst = arith.constant 0.000000e+00 : f32
    %12 = vector.broadcast %cst : f32 to vector<28x56x128xf32>
    %13 = arith.cmpf oge, %11, %12 : vector<28x56x128xf32>
    %cst_7 = arith.constant 1.000000e-01 : f32
    %14 = vector.broadcast %cst_7 : f32 to vector<28x56x128xf32>
    %15 = arith.mulf %14, %11 : vector<28x56x128xf32>
    %16 = arith.select %13, %11, %15 : vector<28x56x128xi1>, vector<28x56x128xf32>
    %17 = vector.extract_strided_slice %2 {offsets = [0, 0, 0, 128], sizes = [28, 1, 56, 128], strides = [1, 1, 1, 1]} : vector<28x2x56x256xbf16> to vector<28x1x56x128xbf16>
    %18 = vector.shape_cast %17 : vector<28x1x56x128xbf16> to vector<28x56x128xbf16>
    %19 = arith.extf %18 : vector<28x56x128xbf16> to vector<28x56x128xf32>
    %20 = vector.shape_cast %0 : vector<1x128xf32> to vector<1x1x128xf32>
    %21 = vector.broadcast %20 : vector<1x1x128xf32> to vector<28x56x128xf32>
    %22 = arith.mulf %19, %21 : vector<28x56x128xf32>
    %23 = vector.shape_cast %1 : vector<1x128xf32> to vector<1x1x128xf32>
    %24 = vector.broadcast %23 : vector<1x1x128xf32> to vector<28x56x128xf32>
    %25 = arith.addf %22, %24 : vector<28x56x128xf32>
    %cst_8 = arith.constant 0.000000e+00 : f32
    %26 = vector.broadcast %cst_8 : f32 to vector<28x56x128xf32>
    %27 = arith.cmpf oge, %25, %26 : vector<28x56x128xf32>
    %cst_9 = arith.constant 1.000000e-01 : f32
    %28 = vector.broadcast %cst_9 : f32 to vector<28x56x128xf32>
    %29 = arith.mulf %28, %25 : vector<28x56x128xf32>
    %30 = arith.select %27, %25, %29 : vector<28x56x128xi1>, vector<28x56x128xf32>
    %31 = vector.extract_strided_slice %2 {offsets = [0, 1, 0, 0], sizes = [28, 1, 56, 128], strides = [1, 1, 1, 1]} : vector<28x2x56x256xbf16> to vector<28x1x56x128xbf16>
    %32 = vector.shape_cast %31 : vector<28x1x56x128xbf16> to vector<28x56x128xbf16>
    %33 = arith.extf %32 : vector<28x56x128xbf16> to vector<28x56x128xf32>
    %34 = vector.shape_cast %0 : vector<1x128xf32> to vector<1x1x128xf32>
    %35 = vector.broadcast %34 : vector<1x1x128xf32> to vector<28x56x128xf32>
    %36 = arith.mulf %33, %35 : vector<28x56x128xf32>
    %37 = vector.shape_cast %1 : vector<1x128xf32> to vector<1x1x128xf32>
    %38 = vector.broadcast %37 : vector<1x1x128xf32> to vector<28x56x128xf32>
    %39 = arith.addf %36, %38 : vector<28x56x128xf32>
    %cst_10 = arith.constant 0.000000e+00 : f32
    %40 = vector.broadcast %cst_10 : f32 to vector<28x56x128xf32>
    %41 = arith.cmpf oge, %39, %40 : vector<28x56x128xf32>
    %cst_11 = arith.constant 1.000000e-01 : f32
    %42 = vector.broadcast %cst_11 : f32 to vector<28x56x128xf32>
    %43 = arith.mulf %42, %39 : vector<28x56x128xf32>
    %44 = arith.select %41, %39, %43 : vector<28x56x128xi1>, vector<28x56x128xf32>
    %45 = vector.extract_strided_slice %2 {offsets = [0, 1, 0, 128], sizes = [28, 1, 56, 128], strides = [1, 1, 1, 1]} : vector<28x2x56x256xbf16> to vector<28x1x56x128xbf16>
    %46 = vector.shape_cast %45 : vector<28x1x56x128xbf16> to vector<28x56x128xbf16>
    %47 = arith.extf %46 : vector<28x56x128xbf16> to vector<28x56x128xf32>
    %48 = vector.shape_cast %0 : vector<1x128xf32> to vector<1x1x128xf32>
    %49 = vector.broadcast %48 : vector<1x1x128xf32> to vector<28x56x128xf32>
    %50 = arith.mulf %47, %49 : vector<28x56x128xf32>
    %51 = vector.shape_cast %1 : vector<1x128xf32> to vector<1x1x128xf32>
    %52 = vector.broadcast %51 : vector<1x1x128xf32> to vector<28x56x128xf32>
    %53 = arith.addf %50, %52 : vector<28x56x128xf32>
    %cst_12 = arith.constant 0.000000e+00 : f32
    %54 = vector.broadcast %cst_12 : f32 to vector<28x56x128xf32>
    %55 = arith.cmpf oge, %53, %54 : vector<28x56x128xf32>
    %cst_13 = arith.constant 1.000000e-01 : f32
    %56 = vector.broadcast %cst_13 : f32 to vector<28x56x128xf32>
    %57 = arith.mulf %56, %53 : vector<28x56x128xf32>
    %58 = arith.select %55, %53, %57 : vector<28x56x128xi1>, vector<28x56x128xf32>
    %59 = arith.maximumf %16, %30 : vector<28x56x128xf32>
    %60 = arith.maximumf %44, %58 : vector<28x56x128xf32>
    %61 = arith.maximumf %59, %60 : vector<28x56x128xf32>
    %62 = arith.truncf %61 : vector<28x56x128xf32> to vector<28x56x128xbf16>
    %c0_14 = arith.constant 0 : index
    %c0_15 = arith.constant 0 : index
    %c0_16 = arith.constant 0 : index
    %63 = vector.load %arg4[%c0_14, %c0_15, %c0_16] : memref<28x56x128xbf16, #tpu.memory_space<vmem>>, vector<28x56x128xbf16>
    tpu.vector_store %arg4[%c0_14, %c0_15, %c0_16], %62 {strides = array<i32>} : memref<28x56x128xbf16, #tpu.memory_space<vmem>>, vector<28x56x128xbf16>,
    return
  }
  func.func @transform_0(%arg0: i32) -> (i32, i32, i32, i32) {
    %c0_i32 = arith.constant 0 : i32
    %c0_i32_0 = arith.constant 0 : i32
    %c0_i32_1 = arith.constant 0 : i32
    %c0_i32_2 = arith.constant 0 : i32
    return %arg0, %c0_i32, %c0_i32_0, %c0_i32_1 : i32, i32, i32, i32
  }
  func.func @transform_1(%arg0: i32) -> (i32, i32) {
    %c0_i32 = arith.constant 0 : i32
    %c0_i32_0 = arith.constant 0 : i32
    %c0_i32_1 = arith.constant 0 : i32
    return %c0_i32, %c0_i32_0 : i32, i32
  }
  func.func @transform_2(%arg0: i32) -> (i32, i32) {
    %c0_i32 = arith.constant 0 : i32
    %c0_i32_0 = arith.constant 0 : i32
    %c0_i32_1 = arith.constant 0 : i32
    return %c0_i32, %c0_i32_0 : i32, i32
  }
  func.func @transform_3(%arg0: i32) -> (i32, i32, i32) {
    %c0_i32 = arith.constant 0 : i32
    %c0_i32_0 = arith.constant 0 : i32
    %c0_i32_1 = arith.constant 0 : i32
    return %arg0, %c0_i32, %c0_i32_0 : i32, i32, i32
  }
}

</mosaic_0001>

<bundles_post_ra>
// kernel: conv_block.2
= control target key start
LH: loop header
LB: loop body
LE: loop exit
PB: predicated region body
PF: predicated region fallthrough
CT: control target
= control target key end

     0   :  { %s2459_s18 = smov 0   ;;  %s2461_s19 = smov 0   ;;  %s3080_s0 = inlined_call_operand.vmem [shape: bf16[25088,256], index: 0, kind: input, shape index: {}]   ;;  %s3081_s1 = inlined_call_operand.vmem [shape: bf16[256,128], index: 1, kind: input, shape index: {}]   ;;  %s3082_s2 = inlined_call_operand.vmem [shape: f32[1,128], index: 2, kind: input, shape index: {}]   ;;  %s3083_s3 = inlined_call_operand.vmem [shape: bf16[25088,128], index: 3, kind: output, shape index: {0}]   ;;  %s3084_s4 = inlined_call_operand.vmem [shape: f32[49,1,128], index: 4, kind: output, shape index: {1}]   ;;  %s3085_s5 = inlined_call_operand.vmem [shape: f32[49,1,128], index: 5, kind: output, shape index: {2}]  }
   0x1   :  { %s2463_s20 = smov 0  }
   0x2 LB: > { %s25_s21 = sadd.s32 1, %s2422_s19  ;;  %p1826_p0 = scmp.ge.s32.totalorder %s2426_s20, 1  ;;  %s2426_s20 = sphi %s2463_s20, %s16_s20   ;;  %s2422_s19 = sphi %s2461_s19, %s3087_s19   ;;  %s2418_s18 = sphi %s2459_s18, %s3086_s18  }
   0x3   : > { %p26_p1 = scmp.ge.s32.totalorder %s25_s21, 49  ;;  %p229_p2 = scmp.lt.s32.totalorder %s2426_s20, 50 }
   0x5   : > { %s3089_s21 = smov (%p26_p1, %s25_s21), 0  ;;  %p230_p3 = pnand %p1826_p0, %p229_p2 }
   0x6   : > { %s1827_s24 = sshll.u32 (!%p230_p3), %s2418_s18, 6  ;;  %p303_p5 = scmp.lt.s32.totalorder (!%p230_p3), %s2418_s18, 48 }
   0x7   : > { %233 = sbr.rel (%p230_p3) target bundleno = 477 (0x1dd), region = 32  ;;  %p281_p4 = scmp.lt.s32.totalorder (!%p230_p3), %s1827_s24, 3135 }
   0xc   : > { %v2292_v0 = vld [vmem:[%s3081_s1 + $0x38] sm:$0xff]   ;;  %v2428_v1 = vmov 0   ;;  %v2293_v2 = vld [vmem:[%s3081_s1 + $0x30] sm:$0xff]   ;;  %v2294_v3 = vld [vmem:[%s3081_s1 + $0x28] sm:$0xff]   ;;  %s3091_s24 = smov (!%p281_p4, %s1827_s24), 3135  ;;  %s3093_s18 = smov (!%p303_p5, %s2418_s18), 48 }
   0xd   : > { %835 = vmatprep.subr.bf16.mxu0 %v2428_v1  ;;  %2235 = vmatprep.subr.bf16.mxu1 %v2428_v1  ;;  %v2295_v4 = vld [vmem:[%s3081_s1 + $0x20] sm:$0xff]   ;;  %s1979_s6 = sshll.u32 %s3091_s24, 3  ;;  %v2296_v5 = vld [vmem:[%s3081_s1 + $0x18] sm:$0xff]   ;;  %v2297_v7 = vld [vmem:[%s3081_s1 + $0x10] sm:$0xff]   ;;  %s1831_s17 = sshll.u32 %s3091_s24, 2 }
   0xe   : > { %836 = vmatpush1.bf16.msra.mxu0 %v2292_v0  ;;  %2251 = vmatpush1.bf16.msra.mxu1 %v2292_v0  ;;  %s2509_s11 = scalar_lea.vmem %s3080_s0, %s1979_s6  ;;  %v2298_v8 = vld [vmem:[%s3081_s1 + $0x8] sm:$0xff]   ;;  %v2299_v9 = vld [vmem:[%s3081_s1] sm:$0xff]   ;;  %v2300_v11 = vld [vmem:[%s3081_s1 + $0x78] sm:$0xff]   ;;  %s2653_s23 = scalar_lea.vmem %s3083_s3, %s1831_s17 }
   0xf   : > { %837 = vmatprep.subr.bf16.mxu0 %v2428_v1  ;;  %2236 = vmatprep.subr.bf16.mxu1 %v2428_v1  ;;  %v2310_v6 = vld [vmem:[%s2509_s11 + $0x4] ss:$8 sps:$4 sm:$0xff]   ;;  %v2301_v12 = vld [vmem:[%s3081_s1 + $0x70] sm:$0xff]   ;;  %v2304_v15 = vld [vmem:[%s3081_s1 + $0x58] sm:$0xff]   ;;  %s308_s26 = scalar_lea.vmem %s3084_s4, %s3093_s18  ;;  %s314_s29 = scalar_lea.vmem %s3085_s5, %s3093_s18 }
  0x10   : > { %867 = vmatprep.mubr.bf16.mxu0 %v2310_v6  ;;  %v2334_v10 = vld [vmem:[%s2509_s11 + $0x104] ss:$8 sps:$4 sm:$0xff]   ;;  %v2305_v16 = vld [vmem:[%s3081_s1 + $0x50] sm:$0xff]   ;;  %v2308_v19 = vld [vmem:[%s2509_s11] ss:$8 sps:$4 sm:$0xff]  }
  0x11   : > { %995 = vmatprep.mubr.bf16.mxu1 %v2334_v10  ;;  %v2302_v13 = vld [vmem:[%s3081_s1 + $0x68] sm:$0xff]   ;;  %v2303_v14 = vld [vmem:[%s3081_s1 + $0x60] sm:$0xff]   ;;  %v2311_v21 = vld [vmem:[%s2509_s11 + $0x14] ss:$8 sps:$4 sm:$0xff]  }
  0x12   : > { %838 = vmatpush1.bf16.msra.mxu0 %v2293_v2  ;;  %2252 = vmatpush1.bf16.msra.mxu1 %v2293_v2  ;;  %v2306_v17 = vld [vmem:[%s3081_s1 + $0x48] sm:$0xff]   ;;  %v2307_v18 = vld [vmem:[%s3081_s1 + $0x40] sm:$0xff]   ;;  %v2338_v22 = vld [vmem:[%s2509_s11 + $0x114] ss:$8 sps:$4 sm:$0xff]  }
  0x13   : > { %839 = vmatprep.subr.bf16.mxu0 %v2428_v1  ;;  %2237 = vmatprep.subr.bf16.mxu1 %v2428_v1  ;;  %v2332_v20 = vld [vmem:[%s2509_s11 + $0x100] ss:$8 sps:$4 sm:$0xff]   ;;  %v2313_v23 = vld [vmem:[%s2509_s11 + $0x10] ss:$8 sps:$4 sm:$0xff]   ;;  %v2314_v25 = vld [vmem:[%s2509_s11 + $0x24] ss:$8 sps:$4 sm:$0xff]  }
  0x14   : > { %v2340_v24 = vld [vmem:[%s2509_s11 + $0x110] ss:$8 sps:$4 sm:$0xff]   ;;  %v2344_v26 = vld [vmem:[%s2509_s11 + $0x124] ss:$8 sps:$4 sm:$0xff]   ;;  %v2316_v27 = vld [vmem:[%s2509_s11 + $0x20] ss:$8 sps:$4 sm:$0xff]  }
  0x15   : > { %v2346_v28 = vld [vmem:[%s2509_s11 + $0x120] ss:$8 sps:$4 sm:$0xff]   ;;  %v2317_v29 = vld [vmem:[%s2509_s11 + $0x34] ss:$8 sps:$4 sm:$0xff]   ;;  %v2319_v31 = vld [vmem:[%s2509_s11 + $0x30] ss:$8 sps:$4 sm:$0xff]  }
  0x16   : > { %840 = vmatpush1.bf16.msra.mxu0 %v2294_v3  ;;  %2253 = vmatpush1.bf16.msra.mxu1 %v2294_v3  ;;  %v2350_v30 = vld [vmem:[%s2509_s11 + $0x134] ss:$8 sps:$4 sm:$0xff]   ;;  %v2352_v32 = vld [vmem:[%s2509_s11 + $0x130] ss:$8 sps:$4 sm:$0xff]   ;;  %v2320_v33 = vld [vmem:[%s2509_s11 + $0x44] ss:$8 sps:$4 sm:$0xff]  }
  0x17   : > { %841 = vmatprep.subr.bf16.mxu0 %v2428_v1  ;;  %2238 = vmatprep.subr.bf16.mxu1 %v2428_v1  ;;  %v2356_v34 = vld [vmem:[%s2509_s11 + $0x144] ss:$8 sps:$4 sm:$0xff]   ;;  %v2322_v35 = vld [vmem:[%s2509_s11 + $0x40] ss:$8 sps:$4 sm:$0xff]   ;;  %v2323_v37 = vld [vmem:[%s2509_s11 + $0x54] ss:$8 sps:$4 sm:$0xff]  }
  0x18   : > { %v2358_v36 = vld [vmem:[%s2509_s11 + $0x140] ss:$8 sps:$4 sm:$0xff]   ;;  %v2362_v38 = vld [vmem:[%s2509_s11 + $0x154] ss:$8 sps:$4 sm:$0xff]   ;;  %v2325_v39 = vld [vmem:[%s2509_s11 + $0x50] ss:$8 sps:$4 sm:$0xff]  }
  0x19   : > { %v2364_v40 = vld [vmem:[%s2509_s11 + $0x150] ss:$8 sps:$4 sm:$0xff]   ;;  %v2326_v41 = vld [vmem:[%s2509_s11 + $0x64] ss:$8 sps:$4 sm:$0xff]   ;;  %v2328_v43 = vld [vmem:[%s2509_s11 + $0x60] ss:$8 sps:$4 sm:$0xff]  }
  0x1a   : > { %842 = vmatpush1.bf16.msra.mxu0 %v2295_v4  ;;  %2254 = vmatpush1.bf16.msra.mxu1 %v2295_v4  ;;  %v2368_v42 = vld [vmem:[%s2509_s11 + $0x164] ss:$8 sps:$4 sm:$0xff]   ;;  %v2370_v44 = vld [vmem:[%s2509_s11 + $0x160] ss:$8 sps:$4 sm:$0xff]   ;;  %v2329_v45 = vld [vmem:[%s2509_s11 + $0x74] ss:$8 sps:$4 sm:$0xff]  }
  0x1b   : > { %843 = vmatprep.subr.bf16.mxu0 %v2428_v1  ;;  %2239 = vmatprep.subr.bf16.mxu1 %v2428_v1  ;;  %v2374_v46 = vld [vmem:[%s2509_s11 + $0x174] ss:$8 sps:$4 sm:$0xff]   ;;  %v2331_v47 = vld [vmem:[%s2509_s11 + $0x70] ss:$8 sps:$4 sm:$0xff]   ;;  %v2335_v49 = vld [vmem:[%s2509_s11 + $0x84] ss:$8 sps:$4 sm:$0xff]  }
  0x1c   : > { %v2376_v48 = vld [vmem:[%s2509_s11 + $0x170] ss:$8 sps:$4 sm:$0xff]   ;;  %v2380_v50 = vld [vmem:[%s2509_s11 + $0x184] ss:$8 sps:$4 sm:$0xff]   ;;  %v2337_v51 = vld [vmem:[%s2509_s11 + $0x80] ss:$8 sps:$4 sm:$0xff]  }
  0x1d   : > { %v2382_v52 = vld [vmem:[%s2509_s11 + $0x180] ss:$8 sps:$4 sm:$0xff]   ;;  %v2341_v53 = vld [vmem:[%s2509_s11 + $0x94] ss:$8 sps:$4 sm:$0xff]   ;;  %v2343_v55 = vld [vmem:[%s2509_s11 + $0x90] ss:$8 sps:$4 sm:$0xff]  }
  0x1e   : > { %844 = vmatpush1.bf16.msra.mxu0 %v2296_v5  ;;  %2255 = vmatpush1.bf16.msra.mxu1 %v2296_v5  ;;  %v2383_v54 = vld [vmem:[%s2509_s11 + $0x194] ss:$8 sps:$4 sm:$0xff]   ;;  %v2385_v56 = vld [vmem:[%s2509_s11 + $0x190] ss:$8 sps:$4 sm:$0xff]   ;;  %v2347_v57 = vld [vmem:[%s2509_s11 + $0xa4] ss:$8 sps:$4 sm:$0xff]  }
  0x1f   : > { %845 = vmatprep.subr.bf16.mxu0 %v2428_v1  ;;  %2240 = vmatprep.subr.bf16.mxu1 %v2428_v1  ;;  %v2386_v58 = vld [vmem:[%s2509_s11 + $0x1a4] ss:$8 sps:$4 sm:$0xff]   ;;  %v2349_v59 = vld [vmem:[%s2509_s11 + $0xa0] ss:$8 sps:$4 sm:$0xff]   ;;  %v2353_v61 = vld [vmem:[%s2509_s11 + $0xb4] ss:$8 sps:$4 sm:$0xff]  }
  0x20   : > { %v2388_v60 = vld [vmem:[%s2509_s11 + $0x1a0] ss:$8 sps:$4 sm:$0xff]   ;;  %v2389_v62 = vld [vmem:[%s2509_s11 + $0x1b4] ss:$8 sps:$4 sm:$0xff]   ;;  %v2355_v63 = vld [vmem:[%s2509_s11 + $0xb0] ss:$8 sps:$4 sm:$0xff]  }
  0x21   : > { %v2391_v0 = vld [vmem:[%s2509_s11 + $0x1b0] ss:$8 sps:$4 sm:$0xff]   ;;  %v2392_v2 = vld [vmem:[%s2509_s11 + $0x1c4] ss:$8 sps:$4 sm:$0xff]   ;;  %v2361_v3 = vld [vmem:[%s2509_s11 + $0xc0] ss:$8 sps:$4 sm:$0xff]  }
  0x22   : > { %846 = vmatpush1.bf16.msra.mxu0 %v2297_v7  ;;  %2256 = vmatpush1.bf16.msra.mxu1 %v2297_v7  ;;  %v2394_v4 = vld [vmem:[%s2509_s11 + $0x1c0] ss:$8 sps:$4 sm:$0xff]   ;;  %v2365_v5 = vld [vmem:[%s2509_s11 + $0xd4] ss:$8 sps:$4 sm:$0xff]   ;;  %v2367_v7 = vld [vmem:[%s2509_s11 + $0xd0] ss:$8 sps:$4 sm:$0xff]  }
  0x23   : > { %847 = vmatprep.subr.bf16.mxu0 %v2428_v1  ;;  %2241 = vmatprep.subr.bf16.mxu1 %v2428_v1  ;;  %v2395_v6 = vld [vmem:[%s2509_s11 + $0x1d4] ss:$8 sps:$4 sm:$0xff]   ;;  %v2398_v10 = vld [vmem:[%s2509_s11 + $0x1e4] ss:$8 sps:$4 sm:$0xff]  }
  0x26   : > { %848 = vmatpush1.bf16.msra.mxu0 %v2298_v8  ;;  %2257 = vmatpush1.bf16.msra.mxu1 %v2298_v8  ;;  %v2397_v8 = vld [vmem:[%s2509_s11 + $0x1d0] ss:$8 sps:$4 sm:$0xff]  }
  0x27   : > { %849 = vmatprep.subr.bf16.mxu0 %v2428_v1  ;;  %2242 = vmatprep.subr.bf16.mxu1 %v2428_v1 }
  0x2a   : > { %850 = vmatpush1.bf16.msra.mxu0 %v2299_v9  ;;  %2258 = vmatpush1.bf16.msra.mxu1 %v2299_v9  ;;  %v2371_v9 = vld [vmem:[%s2509_s11 + $0xe4] ss:$8 sps:$4 sm:$0xff]  }
  0x2b   : > { %851 = vmatprep.subr.bf16.mxu0 %v2428_v1  ;;  %2243 = vmatprep.subr.bf16.mxu1 %v2428_v1 }
  0x2e   : > { %852 = vmatpush2.bf16.msra.mxu0 %v2300_v11  ;;  %2259 = vmatpush2.bf16.msra.mxu1 %v2300_v11  ;;  %v2373_v11 = vld [vmem:[%s2509_s11 + $0xe0] ss:$8 sps:$4 sm:$0xff]  }
  0x2f   : > { %853 = vmatprep.subr.bf16.mxu0 %v2428_v1  ;;  %2244 = vmatprep.subr.bf16.mxu1 %v2428_v1 }
  0x32   : > { %854 = vmatpush2.bf16.msra.mxu0 %v2301_v12  ;;  %2260 = vmatpush2.bf16.msra.mxu1 %v2301_v12  ;;  %v2400_v12 = vld [vmem:[%s2509_s11 + $0x1e0] ss:$8 sps:$4 sm:$0xff]  }
  0x33   : > { %855 = vmatprep.subr.bf16.mxu0 %v2428_v1  ;;  %2245 = vmatprep.subr.bf16.mxu1 %v2428_v1 }
  0x36   : > { %856 = vmatpush2.bf16.msra.mxu0 %v2302_v13  ;;  %2261 = vmatpush2.bf16.msra.mxu1 %v2302_v13  ;;  %v2377_v13 = vld [vmem:[%s2509_s11 + $0xf4] ss:$8 sps:$4 sm:$0xff]  }
  0x37   : > { %857 = vmatprep.subr.bf16.mxu0 %v2428_v1  ;;  %2246 = vmatprep.subr.bf16.mxu1 %v2428_v1 }
  0x3a   : > { %858 = vmatpush2.bf16.msra.mxu0 %v2303_v14  ;;  %2262 = vmatpush2.bf16.msra.mxu1 %v2303_v14  ;;  %v2401_v14 = vld [vmem:[%s2509_s11 + $0x1f4] ss:$8 sps:$4 sm:$0xff]  }
  0x3b   : > { %859 = vmatprep.subr.bf16.mxu0 %v2428_v1  ;;  %2247 = vmatprep.subr.bf16.mxu1 %v2428_v1 }
  0x3e   : > { %860 = vmatpush2.bf16.msra.mxu0 %v2304_v15  ;;  %2263 = vmatpush2.bf16.msra.mxu1 %v2304_v15  ;;  %v2379_v15 = vld [vmem:[%s2509_s11 + $0xf0] ss:$8 sps:$4 sm:$0xff]  }
  0x3f   : > { %861 = vmatprep.subr.bf16.mxu0 %v2428_v1  ;;  %2248 = vmatprep.subr.bf16.mxu1 %v2428_v1 }
  0x42   : > { %862 = vmatpush2.bf16.msra.mxu0 %v2305_v16  ;;  %2264 = vmatpush2.bf16.msra.mxu1 %v2305_v16  ;;  %v2403_v16 = vld [vmem:[%s2509_s11 + $0x1f0] ss:$8 sps:$4 sm:$0xff]  }
  0x43   : > { %863 = vmatprep.subr.bf16.mxu0 %v2428_v1  ;;  %2249 = vmatprep.subr.bf16.mxu1 %v2428_v1 }
  0x46   : > { %864 = vmatpush2.bf16.msra.mxu0 %v2306_v17  ;;  %2265 = vmatpush2.bf16.msra.mxu1 %v2306_v17 }
  0x47   : > { %865 = vmatprep.subr.bf16.mxu0 %v2428_v1  ;;  %2250 = vmatprep.subr.bf16.mxu1 %v2428_v1  ;;  %v2359_v1 = vld [vmem:[%s2509_s11 + $0xc4] ss:$8 sps:$4 sm:$0xff]  }
  0x4a   : > { %866 = vmatpush2.bf16.msra.mxu0 %v2307_v18  ;;  %2266 = vmatpush2.bf16.msra.mxu1 %v2307_v18 }
  0x4d   : > { %868 = vmatmul.mubr.bf16.vlgmr.msra.gmra.mxu0 %v2308_v19  ;;  %996 = vmatmul.mubr.bf16.vlgmr.msra.gmra.mxu1 %v2332_v20  ;;  %v2635_v19 = vld [vmem:[%s3082_s2] ss:$0 sm:$0xff] }
  0x4e   : > { %875 = vmatprep.mubr.bf16.mxu0 %v2311_v21  ;;  %1003 = vmatprep.mubr.bf16.mxu1 %v2338_v22 }
  0x55   : > { %876 = vmatmul.mubr.bf16.gmra.mxu0 %v2313_v23  ;;  %1004 = vmatmul.mubr.bf16.gmra.mxu1 %v2340_v24 }
  0x56   : > { %883 = vmatprep.mubr.bf16.mxu0 %v2314_v25  ;;  %1011 = vmatprep.mubr.bf16.mxu1 %v2344_v26 }
  0x5d   : > { %884 = vmatmul.mubr.bf16.gmra.mxu0 %v2316_v27  ;;  %1012 = vmatmul.mubr.bf16.gmra.mxu1 %v2346_v28 }
  0x5e   : > { %891 = vmatprep.mubr.bf16.mxu0 %v2317_v29  ;;  %1019 = vmatprep.mubr.bf16.mxu1 %v2350_v30 }
  0x65   : > { %892 = vmatmul.mubr.bf16.gmra.mxu0 %v2319_v31  ;;  %1020 = vmatmul.mubr.bf16.gmra.mxu1 %v2352_v32 }
  0x66   : > { %899 = vmatprep.mubr.bf16.mxu0 %v2320_v33  ;;  %1027 = vmatprep.mubr.bf16.mxu1 %v2356_v34 }
  0x6d   : > { %900 = vmatmul.mubr.bf16.gmra.mxu0 %v2322_v35  ;;  %1028 = vmatmul.mubr.bf16.gmra.mxu1 %v2358_v36 }
  0x6e   : > { %907 = vmatprep.mubr.bf16.mxu0 %v2323_v37  ;;  %1035 = vmatprep.mubr.bf16.mxu1 %v2362_v38 }
  0x75   : > { %908 = vmatmul.mubr.bf16.gmra.mxu0 %v2325_v39  ;;  %1036 = vmatmul.mubr.bf16.gmra.mxu1 %v2364_v40 }
  0x76   : > { %915 = vmatprep.mubr.bf16.mxu0 %v2326_v41  ;;  %1043 = vmatprep.mubr.bf16.mxu1 %v2368_v42 }
  0x7d   : > { %916 = vmatmul.mubr.bf16.gmra.mxu0 %v2328_v43  ;;  %1044 = vmatmul.mubr.bf16.gmra.mxu1 %v2370_v44 }
  0x7e   : > { %923 = vmatprep.mubr.bf16.mxu0 %v2329_v45  ;;  %1051 = vmatprep.mubr.bf16.mxu1 %v2374_v46 }
  0x85   : > { %924 = vmatmul.mubr.bf16.gmra.mxu0 %v2331_v47  ;;  %1052 = vmatmul.mubr.bf16.gmra.mxu1 %v2376_v48 }
  0x86   : > { %931 = vmatprep.mubr.bf16.mxu0 %v2335_v49  ;;  %1059 = vmatprep.mubr.bf16.mxu1 %v2380_v50 }
  0x8d   : > { %932 = vmatmul.mubr.bf16.gmra.mxu0 %v2337_v51  ;;  %1060 = vmatmul.mubr.bf16.gmra.mxu1 %v2382_v52 }
  0x8e   : > { %939 = vmatprep.mubr.bf16.mxu0 %v2341_v53  ;;  %1067 = vmatprep.mubr.bf16.mxu1 %v2383_v54 }
  0x95   : > { %940 = vmatmul.mubr.bf16.gmra.mxu0 %v2343_v55  ;;  %1068 = vmatmul.mubr.bf16.gmra.mxu1 %v2385_v56 }
  0x96   : > { %947 = vmatprep.mubr.bf16.mxu0 %v2347_v57  ;;  %1075 = vmatprep.mubr.bf16.mxu1 %v2386_v58 }
  0x9d   : > { %948 = vmatmul.mubr.bf16.gmra.mxu0 %v2349_v59  ;;  %1076 = vmatmul.mubr.bf16.gmra.mxu1 %v2388_v60 }
  0x9e   : > { %955 = vmatprep.mubr.bf16.mxu0 %v2353_v61  ;;  %1083 = vmatprep.mubr.bf16.mxu1 %v2389_v62 }
  0xa5   : > { %956 = vmatmul.mubr.bf16.gmra.mxu0 %v2355_v63  ;;  %1084 = vmatmul.mubr.bf16.gmra.mxu1 %v2391_v0 }
  0xa6   : > { %963 = vmatprep.mubr.bf16.mxu0 %v2359_v1  ;;  %1091 = vmatprep.mubr.bf16.mxu1 %v2392_v2 }
  0xad   : > { %964 = vmatmul.mubr.bf16.gmra.mxu0 %v2361_v3  ;;  %1092 = vmatmul.mubr.bf16.gmra.mxu1 %v2394_v4 }
  0xae   : > { %971 = vmatprep.mubr.bf16.mxu0 %v2365_v5  ;;  %1099 = vmatprep.mubr.bf16.mxu1 %v2395_v6 }
  0xb5   : > { %972 = vmatmul.mubr.bf16.gmra.mxu0 %v2367_v7  ;;  %1100 = vmatmul.mubr.bf16.gmra.mxu1 %v2397_v8 }
  0xb6   : > { %979 = vmatprep.mubr.bf16.mxu0 %v2371_v9  ;;  %1107 = vmatprep.mubr.bf16.mxu1 %v2398_v10 }
  0xbd   : > { %980 = vmatmul.mubr.bf16.gmra.mxu0 %v2373_v11  ;;  %1108 = vmatmul.mubr.bf16.gmra.mxu1 %v2400_v12 }
  0xbe   : > { %987 = vmatprep.mubr.bf16.mxu0 %v2377_v13  ;;  %1115 = vmatprep.mubr.bf16.mxu1 %v2401_v14 }
  0xc5   : > { %988 = vmatmul.mubr.bf16.gmra.mxu0 %v2379_v15  ;;  %1116 = vmatmul.mubr.bf16.gmra.mxu1 %v2403_v16 }
 0x10d   : > { %v869_v17 = vpop.f32.mrf.mxu0  ;;  %v997_v18 = vpop.f32.mrf.mxu1 }
 0x10e   : > { %v2639_v22 = vadd.f32 %v2635_v19, %v997_v18  ;;  %v2642_v25 = vadd.f32 %v2635_v19, %v869_v17 }
 0x10f   : > { %v871_v20 = vpop.f32.mrf.mxu0  ;;  %v999_v21 = vpop.f32.mrf.mxu1 }
 0x111   : > { %v872_v23 = vpop.f32.mrf.mxu0  ;;  %v1000_v24 = vpop.f32.mrf.mxu1 }
 0x112   : > { %v2645_v26 = vadd.f32 %v2635_v19, %v872_v23  ;;  %v2648_v27 = vadd.f32 %v2635_v19, %v1000_v24 }
 0x113   : > { %v874_v28 = vpop.f32.mrf.mxu0  ;;  %v1002_v29 = vpop.f32.mrf.mxu1 }
 0x114   : > { %v2047_v30 = vpack.c.bf16 %v2645_v26, %v2642_v25  ;;  %v2127_v31 = vpack.c.bf16 %v2648_v27, %v2639_v22 }
 0x115   : > { %v877_v32 = vpop.f32.mrf.mxu0  ;;  %v1005_v33 = vpop.f32.mrf.mxu1 }
 0x116   : > { %2048 = vst [vmem:[%s2653_s23] sm:$0xff] %v2047_v30   ;;  %2219 = vst [vmem:[%s2653_s23 + $0x80] sm:$0xff] %v2127_v31   ;;  %v2662_v36 = vadd.f32 %v2635_v19, %v1005_v33  ;;  %v2665_v39 = vadd.f32 %v2635_v19, %v877_v32 }
 0x117   : > { %v879_v34 = vpop.f32.mrf.mxu0  ;;  %v1007_v35 = vpop.f32.mrf.mxu1 }
 0x119   : > { %v880_v37 = vpop.f32.mrf.mxu0  ;;  %v1008_v38 = vpop.f32.mrf.mxu1 }
 0x11a   : > { %v2668_v40 = vadd.f32 %v2635_v19, %v880_v37  ;;  %v2671_v41 = vadd.f32 %v2635_v19, %v1008_v38 }
 0x11b   : > { %v882_v42 = vpop.f32.mrf.mxu0  ;;  %v1010_v43 = vpop.f32.mrf.mxu1 }
 0x11c   : > { %v2052_v44 = vpack.c.bf16 %v2668_v40, %v2665_v39  ;;  %v2132_v45 = vpack.c.bf16 %v2671_v41, %v2662_v36 }
 0x11d   : > { %v885_v46 = vpop.f32.mrf.mxu0  ;;  %v1013_v47 = vpop.f32.mrf.mxu1 }
 0x11e   : > { %2204 = vst [vmem:[%s2653_s23 + $0x8] sm:$0xff] %v2052_v44   ;;  %2220 = vst [vmem:[%s2653_s23 + $0x88] sm:$0xff] %v2132_v45   ;;  %v2680_v50 = vadd.f32 %v2635_v19, %v1013_v47  ;;  %v2683_v53 = vadd.f32 %v2635_v19, %v885_v46 }
 0x11f   : > { %v887_v48 = vpop.f32.mrf.mxu0  ;;  %v1015_v49 = vpop.f32.mrf.mxu1 }
 0x121   : > { %v888_v51 = vpop.f32.mrf.mxu0  ;;  %v1016_v52 = vpop.f32.mrf.mxu1 }
 0x122   : > { %v2686_v54 = vadd.f32 %v2635_v19, %v888_v51  ;;  %v2689_v55 = vadd.f32 %v2635_v19, %v1016_v52 }
 0x123   : > { %v890_v56 = vpop.f32.mrf.mxu0  ;;  %v1018_v57 = vpop.f32.mrf.mxu1 }
 0x124   : > { %v2057_v58 = vpack.c.bf16 %v2686_v54, %v2683_v53  ;;  %v2137_v59 = vpack.c.bf16 %v2689_v55, %v2680_v50 }
 0x125   : > { %v893_v60 = vpop.f32.mrf.mxu0  ;;  %v1021_v61 = vpop.f32.mrf.mxu1 }
 0x126   : > { %2205 = vst [vmem:[%s2653_s23 + $0x10] sm:$0xff] %v2057_v58   ;;  %2221 = vst [vmem:[%s2653_s23 + $0x90] sm:$0xff] %v2137_v59   ;;  %v2698_v0 = vadd.f32 %v2635_v19, %v1021_v61  ;;  %v2701_v3 = vadd.f32 %v2635_v19, %v893_v60 }
 0x127   : > { %v895_v62 = vpop.f32.mrf.mxu0  ;;  %v1023_v63 = vpop.f32.mrf.mxu1 }
 0x129   : > { %v896_v1 = vpop.f32.mrf.mxu0  ;;  %v1024_v2 = vpop.f32.mrf.mxu1 }
 0x12a   : > { %v2704_v4 = vadd.f32 %v2635_v19, %v896_v1  ;;  %v2707_v5 = vadd.f32 %v2635_v19, %v1024_v2 }
 0x12b   : > { %v898_v6 = vpop.f32.mrf.mxu0  ;;  %v1026_v7 = vpop.f32.mrf.mxu1 }
 0x12c   : > { %v2062_v8 = vpack.c.bf16 %v2704_v4, %v2701_v3  ;;  %v2142_v9 = vpack.c.bf16 %v2707_v5, %v2698_v0 }
 0x12d   : > { %v901_v10 = vpop.f32.mrf.mxu0  ;;  %v1029_v11 = vpop.f32.mrf.mxu1 }
 0x12e   : > { %2206 = vst [vmem:[%s2653_s23 + $0x18] sm:$0xff] %v2062_v8   ;;  %2222 = vst [vmem:[%s2653_s23 + $0x98] sm:$0xff] %v2142_v9   ;;  %v2716_v14 = vadd.f32 %v2635_v19, %v1029_v11  ;;  %v2719_v17 = vadd.f32 %v2635_v19, %v901_v10 }
 0x12f   : > { %v903_v12 = vpop.f32.mrf.mxu0  ;;  %v1031_v13 = vpop.f32.mrf.mxu1 }
 0x131   : > { %v904_v15 = vpop.f32.mrf.mxu0  ;;  %v1032_v16 = vpop.f32.mrf.mxu1 }
 0x132   : > { %v2722_v18 = vadd.f32 %v2635_v19, %v904_v15  ;;  %v2725_v20 = vadd.f32 %v2635_v19, %v1032_v16 }
 0x133   : > { %v906_v21 = vpop.f32.mrf.mxu0  ;;  %v1034_v23 = vpop.f32.mrf.mxu1 }
 0x134   : > { %v2067_v24 = vpack.c.bf16 %v2722_v18, %v2719_v17  ;;  %v2147_v28 = vpack.c.bf16 %v2725_v20, %v2716_v14 }
 0x135   : > { %v909_v29 = vpop.f32.mrf.mxu0  ;;  %v1037_v30 = vpop.f32.mrf.mxu1 }
 0x136   : > { %2207 = vst [vmem:[%s2653_s23 + $0x20] sm:$0xff] %v2067_v24   ;;  %2223 = vst [vmem:[%s2653_s23 + $0xa0] sm:$0xff] %v2147_v28   ;;  %v2734_v33 = vadd.f32 %v2635_v19, %v1037_v30  ;;  %v2737_v37 = vadd.f32 %v2635_v19, %v909_v29  ;;  %v1515_v28 = vmul.f32 %v2645_v26, %v2645_v26 }
 0x137   : > { %v911_v31 = vpop.f32.mrf.mxu0  ;;  %v1039_v32 = vpop.f32.mrf.mxu1 }
 0x138   : > { %v1514_v31 = vmul.f32 %v2642_v25, %v2642_v25  ;;  %v1516_v32 = vmul.f32 %v2665_v39, %v2665_v39 }
 0x139   : > { %v912_v34 = vpop.f32.mrf.mxu0  ;;  %v1040_v35 = vpop.f32.mrf.mxu1 }
 0x13a   : > { %v2740_v38 = vadd.f32 %v2635_v19, %v912_v34  ;;  %v2743_v42 = vadd.f32 %v2635_v19, %v1040_v35 }
 0x13b   : > { %v914_v43 = vpop.f32.mrf.mxu0  ;;  %v1042_v44 = vpop.f32.mrf.mxu1 }
 0x13c   : > { %v2072_v45 = vpack.c.bf16 %v2740_v38, %v2737_v37  ;;  %v2152_v46 = vpack.c.bf16 %v2743_v42, %v2734_v33  ;;  %v1444_v43 = vadd.f32 %v2645_v26, %v2642_v25 }
 0x13d   : > { %v917_v47 = vpop.f32.mrf.mxu0  ;;  %v1045_v48 = vpop.f32.mrf.mxu1 }
 0x13e   : > { %2208 = vst [vmem:[%s2653_s23 + $0x28] sm:$0xff] %v2072_v45   ;;  %2224 = vst [vmem:[%s2653_s23 + $0xa8] sm:$0xff] %v2152_v46   ;;  %v2752_v52 = vadd.f32 %v2635_v19, %v1045_v48  ;;  %v2755_v58 = vadd.f32 %v2635_v19, %v917_v47  ;;  %v1578_v45 = vadd.f32 %v1515_v28, %v1514_v31 }
 0x13f   : > { %v919_v49 = vpop.f32.mrf.mxu0  ;;  %v1047_v51 = vpop.f32.mrf.mxu1  ;;  %v1517_v46 = vmul.f32 %v2668_v40, %v2668_v40 }
 0x140   : > { %v1445_v49 = vadd.f32 %v1444_v43, %v2665_v39  ;;  %v1579_v26 = vadd.f32 %v1578_v45, %v1516_v32  ;;  %v1522_v43 = vmul.f32 %v2719_v17, %v2719_v17 }
 0x141   : > { %v920_v56 = vpop.f32.mrf.mxu0  ;;  %v1048_v57 = vpop.f32.mrf.mxu1 }
 0x142   : > { %v2758_v59 = vadd.f32 %v2635_v19, %v920_v56  ;;  %v2761_v60 = vadd.f32 %v2635_v19, %v1048_v57  ;;  %v1518_v57 = vmul.f32 %v2683_v53, %v2683_v53 }
 0x143   : > { %v922_v61 = vpop.f32.mrf.mxu0  ;;  %v1050_v62 = vpop.f32.mrf.mxu1 }
 0x144   : > { %v2077_v63 = vpack.c.bf16 %v2758_v59, %v2755_v58  ;;  %v2157_v1 = vpack.c.bf16 %v2761_v60, %v2752_v52 }
 0x145   : > { %v925_v2 = vpop.f32.mrf.mxu0  ;;  %v1053_v6 = vpop.f32.mrf.mxu1 }
 0x146   : > { %2209 = vst [vmem:[%s2653_s23 + $0x30] sm:$0xff] %v2077_v63   ;;  %2225 = vst [vmem:[%s2653_s23 + $0xb0] sm:$0xff] %v2157_v1   ;;  %v2770_v9 = vadd.f32 %v2635_v19, %v1053_v6  ;;  %v2773_v12 = vadd.f32 %v2635_v19, %v925_v2  ;;  %v1446_v63 = vadd.f32 %v1445_v49, %v2668_v40 }
 0x147   : > { %v927_v7 = vpop.f32.mrf.mxu0  ;;  %v1055_v8 = vpop.f32.mrf.mxu1  ;;  %v1580_v2 = vadd.f32 %v1579_v26, %v1517_v46  ;;  %v1519_v6 = vmul.f32 %v2686_v54, %v2686_v54  ;;  %v1520_v40 = vmul.f32 %v2701_v3, %v2701_v3  ;;  %v1523_v26 = vmul.f32 %v2722_v18, %v2722_v18 }
 0x149   : > { %v928_v10 = vpop.f32.mrf.mxu0  ;;  %v1056_v11 = vpop.f32.mrf.mxu1 }
 0x14a   : > { %v2776_v13 = vadd.f32 %v2635_v19, %v928_v10  ;;  %v2779_v15 = vadd.f32 %v2635_v19, %v1056_v11  ;;  %v1447_v10 = vadd.f32 %v1446_v63, %v2683_v53  ;;  %v1581_v11 = vadd.f32 %v1580_v2, %v1518_v57 }
 0x14b   : > { %v930_v16 = vpop.f32.mrf.mxu0  ;;  %v1058_v21 = vpop.f32.mrf.mxu1 }
 0x14c   : > { %v2082_v23 = vpack.c.bf16 %v2776_v13, %v2773_v12  ;;  %v2162_v24 = vpack.c.bf16 %v2779_v15, %v2770_v9  ;;  %v1582_v28 = vadd.f32 %v1581_v11, %v1519_v6 }
 0x14d   : > { %v933_v29 = vpop.f32.mrf.mxu0  ;;  %v1061_v30 = vpop.f32.mrf.mxu1 }
 0x14e   : > { %2210 = vst [vmem:[%s2653_s23 + $0x38] sm:$0xff] %v2082_v23   ;;  %2226 = vst [vmem:[%s2653_s23 + $0xb8] sm:$0xff] %v2162_v24   ;;  %v2796_v44 = vadd.f32 %v2635_v19, %v1061_v30  ;;  %v2802_v51 = vadd.f32 %v2635_v19, %v933_v29  ;;  %v1448_v23 = vadd.f32 %v1447_v10, %v2686_v54 }
 0x14f   : > { %v935_v34 = vpop.f32.mrf.mxu0  ;;  %v1063_v35 = vpop.f32.mrf.mxu1  ;;  %v1521_v29 = vmul.f32 %v2704_v4, %v2704_v4 }
 0x150   : > { %v1449_v53 = vadd.f32 %v1448_v23, %v2701_v3  ;;  %v1583_v35 = vadd.f32 %v1582_v28, %v1520_v40  ;;  %v1526_v23 = vmul.f32 %v2755_v58, %v2755_v58 }
 0x151   : > { %v936_v47 = vpop.f32.mrf.mxu0  ;;  %v1064_v48 = vpop.f32.mrf.mxu1 }
 0x152   : > { %v2805_v56 = vadd.f32 %v2635_v19, %v936_v47  ;;  %v2808_v25 = vadd.f32 %v2635_v19, %v1064_v48  ;;  %v1450_v47 = vadd.f32 %v1449_v53, %v2704_v4  ;;  %v1584_v49 = vadd.f32 %v1583_v35, %v1521_v29 }
 0x153   : > { %v938_v61 = vpop.f32.mrf.mxu0  ;;  %v1066_v62 = vpop.f32.mrf.mxu1  ;;  %v1524_v4 = vmul.f32 %v2737_v37, %v2737_v37  ;;  %v1527_v35 = vmul.f32 %v2758_v59, %v2758_v59 }
 0x154   : > { %v2087_v39 = vpack.c.bf16 %v2805_v56, %v2802_v51  ;;  %v2167_v1 = vpack.c.bf16 %v2808_v25, %v2796_v44  ;;  %v1451_v62 = vadd.f32 %v1450_v47, %v2719_v17  ;;  %v1585_v63 = vadd.f32 %v1584_v49, %v1522_v43 }
 0x155   : > { %v941_v7 = vpop.f32.mrf.mxu0  ;;  %v1069_v8 = vpop.f32.mrf.mxu1 }
 0x156   : > { %2211 = vst [vmem:[%s2653_s23 + $0x40] sm:$0xff] %v2087_v39   ;;  %2227 = vst [vmem:[%s2653_s23 + $0xc0] sm:$0xff] %v2167_v1   ;;  %v2826_v24 = vadd.f32 %v2635_v19, %v1069_v8  ;;  %v2832_v32 = vadd.f32 %v2635_v19, %v941_v7  ;;  %v1452_v2 = vadd.f32 %v1451_v62, %v2722_v18 }
 0x157   : > { %v943_v16 = vpop.f32.mrf.mxu0  ;;  %v1071_v21 = vpop.f32.mrf.mxu1  ;;  %v1586_v7 = vadd.f32 %v1585_v63, %v1523_v26  ;;  %v1525_v8 = vmul.f32 %v2740_v38, %v2740_v38 }
 0x158   : > { %v1453_v17 = vadd.f32 %v1452_v2, %v2737_v37  ;;  %v1530_v2 = vmul.f32 %v2802_v51, %v2802_v51 }
 0x159   : > { %v944_v30 = vpop.f32.mrf.mxu0  ;;  %v1072_v31 = vpop.f32.mrf.mxu1  ;;  %v1587_v21 = vadd.f32 %v1586_v7, %v1524_v4 }
 0x15a   : > { %v2835_v34 = vadd.f32 %v2635_v19, %v944_v30  ;;  %v2838_v54 = vadd.f32 %v2635_v19, %v1072_v31  ;;  %v1454_v30 = vadd.f32 %v1453_v17, %v2740_v38  ;;  %v1528_v38 = vmul.f32 %v2773_v12, %v2773_v12 }
 0x15b   : > { %v946_v45 = vpop.f32.mrf.mxu0  ;;  %v1074_v46 = vpop.f32.mrf.mxu1  ;;  %v1588_v53 = vadd.f32 %v1587_v21, %v1525_v8  ;;  %v1531_v21 = vmul.f32 %v2805_v56, %v2805_v56 }
 0x15c   : > { %v2092_v3 = vpack.c.bf16 %v2835_v34, %v2832_v32  ;;  %v2172_v48 = vpack.c.bf16 %v2838_v54, %v2826_v24  ;;  %v1455_v46 = vadd.f32 %v1454_v30, %v2755_v58 }
 0x15d   : > { %v949_v57 = vpop.f32.mrf.mxu0  ;;  %v1077_v61 = vpop.f32.mrf.mxu1  ;;  %v1589_v47 = vadd.f32 %v1588_v53, %v1526_v23 }
 0x15e   : > { %2212 = vst [vmem:[%s2653_s23 + $0x48] sm:$0xff] %v2092_v3   ;;  %2228 = vst [vmem:[%s2653_s23 + $0xc8] sm:$0xff] %v2172_v48   ;;  %v2856_v6 = vadd.f32 %v2635_v19, %v1077_v61  ;;  %v2862_v40 = vadd.f32 %v2635_v19, %v949_v57  ;;  %v1456_v49 = vadd.f32 %v1455_v46, %v2758_v59 }
 0x15f   : > { %v951_v39 = vpop.f32.mrf.mxu0  ;;  %v1079_v1 = vpop.f32.mrf.mxu1  ;;  %v1590_v57 = vadd.f32 %v1589_v47, %v1527_v35  ;;  %v1529_v61 = vmul.f32 %v2776_v13, %v2776_v13 }
 0x160   : > { %v1457_v58 = vadd.f32 %v1456_v49, %v2773_v12  ;;  %v1534_v49 = vmul.f32 %v2862_v40, %v2862_v40 }
 0x161   : > { %v952_v10 = vpop.f32.mrf.mxu0  ;;  %v1080_v11 = vpop.f32.mrf.mxu1  ;;  %v1591_v59 = vadd.f32 %v1590_v57, %v1528_v38 }
 0x162   : > { %v2865_v16 = vadd.f32 %v2635_v19, %v952_v10  ;;  %v2868_v18 = vadd.f32 %v2635_v19, %v1080_v11  ;;  %v1458_v10 = vadd.f32 %v1457_v58, %v2776_v13 }
 0x163   : > { %v954_v28 = vpop.f32.mrf.mxu0  ;;  %v1082_v29 = vpop.f32.mrf.mxu1  ;;  %v1592_v17 = vadd.f32 %v1591_v59, %v1529_v61 }
 0x164   : > { %v2097_v37 = vpack.c.bf16 %v2865_v16, %v2862_v40  ;;  %v2177_v31 = vpack.c.bf16 %v2868_v18, %v2856_v6  ;;  %v1459_v29 = vadd.f32 %v1458_v10, %v2802_v51  ;;  %v1535_v59 = vmul.f32 %v2865_v16, %v2865_v16 }
 0x165   : > { %v957_v43 = vpop.f32.mrf.mxu0  ;;  %v1085_v45 = vpop.f32.mrf.mxu1  ;;  %v1593_v30 = vadd.f32 %v1592_v17, %v1530_v2 }
 0x166   : > { %2213 = vst [vmem:[%s2653_s23 + $0x50] sm:$0xff] %v2097_v37   ;;  %2229 = vst [vmem:[%s2653_s23 + $0xd0] sm:$0xff] %v2177_v31   ;;  %v2886_v26 = vadd.f32 %v2635_v19, %v1085_v45  ;;  %v958_v4 = vadd.f32 %v2635_v19, %v957_v43  ;;  %v1532_v37 = vmul.f32 %v2832_v32, %v2832_v32 }
 0x167   : > { %v959_v3 = vpop.f32.mrf.mxu0  ;;  %v1087_v48 = vpop.f32.mrf.mxu1  ;;  %v1460_v53 = vadd.f32 %v1459_v29, %v2805_v56  ;;  %v1594_v43 = vadd.f32 %v1593_v30, %v1531_v21  ;;  %v1533_v45 = vmul.f32 %v2835_v34, %v2835_v34 }
 0x169   : > { %v960_v62 = vpop.f32.mrf.mxu0  ;;  %v1088_v63 = vpop.f32.mrf.mxu1  ;;  %v1461_v51 = vadd.f32 %v1460_v53, %v2832_v32  ;;  %v1595_v56 = vadd.f32 %v1594_v43, %v1532_v37 }
 0x16a   : > { %v961_v39 = vadd.f32 %v2635_v19, %v960_v62  ;;  %v2894_v1 = vadd.f32 %v2635_v19, %v1088_v63 }
 0x16b   : > { %v962_v7 = vpop.f32.mrf.mxu0  ;;  %v1090_v8 = vpop.f32.mrf.mxu1  ;;  %v1462_v62 = vadd.f32 %v1461_v51, %v2835_v34  ;;  %v1596_v58 = vadd.f32 %v1595_v56, %v1533_v45 }
 0x16c   : > { %v2102_v11 = vpack.c.bf16 %v961_v39, %v958_v4  ;;  %v2182_v12 = vpack.c.bf16 %v2894_v1, %v2886_v26 }
 0x16d   : > { %v965_v23 = vpop.f32.mrf.mxu0  ;;  %v1093_v28 = vpop.f32.mrf.mxu1  ;;  %v1463_v8 = vadd.f32 %v1462_v62, %v2862_v40  ;;  %v1597_v10 = vadd.f32 %v1596_v58, %v1534_v49 }
 0x16e   : > { %2214 = vst [vmem:[%s2653_s23 + $0x58] sm:$0xff] %v2102_v11   ;;  %2230 = vst [vmem:[%s2653_s23 + $0xd8] sm:$0xff] %v2182_v12   ;;  %v2910_v35 = vadd.f32 %v2635_v19, %v1093_v28  ;;  %v966_v38 = vadd.f32 %v2635_v19, %v965_v23  ;;  %v1536_v11 = vmul.f32 %v958_v4, %v958_v4 }
 0x16f   : > { %v967_v31 = vpop.f32.mrf.mxu0  ;;  %v1095_v13 = vpop.f32.mrf.mxu1  ;;  %v1464_v34 = vadd.f32 %v1463_v8, %v2865_v16  ;;  %v1598_v23 = vadd.f32 %v1597_v10, %v1535_v59  ;;  %v1537_v28 = vmul.f32 %v961_v39, %v961_v39 }
 0x170   : > { %v1538_v43 = vmul.f32 %v966_v38, %v966_v38 }
 0x171   : > { %v968_v46 = vpop.f32.mrf.mxu0  ;;  %v1096_v47 = vpop.f32.mrf.mxu1  ;;  %v1465_v37 = vadd.f32 %v1464_v34, %v958_v4  ;;  %v1599_v53 = vadd.f32 %v1598_v23, %v1536_v11 }
 0x172   : > { %v969_v3 = vadd.f32 %v2635_v19, %v968_v46  ;;  %v2918_v48 = vadd.f32 %v2635_v19, %v1096_v47 }
 0x173   : > { %v970_v57 = vpop.f32.mrf.mxu0  ;;  %v1098_v61 = vpop.f32.mrf.mxu1  ;;  %v1466_v46 = vadd.f32 %v1465_v37, %v961_v39  ;;  %v1600_v56 = vadd.f32 %v1599_v53, %v1537_v28 }
 0x174   : > { %v2107_v63 = vpack.c.bf16 %v969_v3, %v966_v38  ;;  %v2187_v32 = vpack.c.bf16 %v2918_v48, %v2910_v35  ;;  %v1539_v4 = vmul.f32 %v969_v3, %v969_v3 }
 0x175   : > { %v973_v2 = vpop.f32.mrf.mxu0  ;;  %v1101_v7 = vpop.f32.mrf.mxu1  ;;  %v1467_v61 = vadd.f32 %v1466_v46, %v966_v38  ;;  %v1601_v62 = vadd.f32 %v1600_v56, %v1538_v43 }
 0x176   : > { %2215 = vst [vmem:[%s2653_s23 + $0x60] sm:$0xff] %v2107_v63   ;;  %2231 = vst [vmem:[%s2653_s23 + $0xe0] sm:$0xff] %v2187_v32   ;;  %v2932_v21 = vadd.f32 %v2635_v19, %v1101_v7  ;;  %v974_v31 = vadd.f32 %v2635_v19, %v973_v2 }
 0x177   : > { %v975_v12 = vpop.f32.mrf.mxu0  ;;  %v1103_v17 = vpop.f32.mrf.mxu1  ;;  %v1468_v2 = vadd.f32 %v1467_v61, %v969_v3  ;;  %v1602_v7 = vadd.f32 %v1601_v62, %v1539_v4 }
 0x178   : > { %v1540_v63 = vmul.f32 %v974_v31, %v974_v31 }
 0x179   : > { %v976_v29 = vpop.f32.mrf.mxu0  ;;  %v1104_v30 = vpop.f32.mrf.mxu1  ;;  %v1469_v12 = vadd.f32 %v1468_v2, %v974_v31 }
 0x17a   : > { %v977_v40 = vadd.f32 %v2635_v19, %v976_v29  ;;  %v2937_v13 = vadd.f32 %v2635_v19, %v1104_v30  ;;  %v1603_v34 = vadd.f32 %v1602_v7, %v1540_v63 }
 0x17b   : > { %v978_v16 = vpop.f32.mrf.mxu0  ;;  %v1106_v45 = vpop.f32.mrf.mxu1 }
 0x17c   : > { %v2112_v47 = vpack.c.bf16 %v977_v40, %v974_v31  ;;  %v2192_v51 = vpack.c.bf16 %v2937_v13, %v2932_v21  ;;  %v1541_v8 = vmul.f32 %v977_v40, %v977_v40  ;;  %v1470_v3 = vadd.f32 %v1469_v12, %v977_v40 }
 0x17d   : > { %v981_v49 = vpop.f32.mrf.mxu0  ;;  %v1109_v57 = vpop.f32.mrf.mxu1 }
 0x17e   : > { %2216 = vst [vmem:[%s2653_s23 + $0x68] sm:$0xff] %v2112_v47   ;;  %2232 = vst [vmem:[%s2653_s23 + $0xe8] sm:$0xff] %v2192_v51   ;;  %v982_v32 = vadd.f32 %v2635_v19, %v981_v49  ;;  %v2945_v39 = vadd.f32 %v2635_v19, %v1109_v57  ;;  %v1604_v53 = vadd.f32 %v1603_v34, %v1541_v8 }
 0x17f   : > { %v983_v58 = vpop.f32.mrf.mxu0  ;;  %v1111_v59 = vpop.f32.mrf.mxu1 }
 0x180   : > { %v1542_v23 = vmul.f32 %v982_v32, %v982_v32  ;;  %v1471_v31 = vadd.f32 %v1470_v3, %v982_v32  ;;  %v1548_v3 = vmul.f32 %v2662_v36, %v2662_v36 }
 0x181   : > { %v984_v10 = vpop.f32.mrf.mxu0  ;;  %v1112_v11 = vpop.f32.mrf.mxu1 }
 0x182   : > { %v985_v38 = vadd.f32 %v2635_v19, %v984_v10  ;;  %v2949_v17 = vadd.f32 %v2635_v19, %v1112_v11  ;;  %v1605_v47 = vadd.f32 %v1604_v53, %v1542_v23  ;;  %v1549_v53 = vmul.f32 %v2671_v41, %v2671_v41 }
 0x183   : > { %v986_v28 = vpop.f32.mrf.mxu0  ;;  %v1114_v29 = vpop.f32.mrf.mxu1 }
 0x184   : > { %v2117_v30 = vpack.c.bf16 %v985_v38, %v982_v32  ;;  %v2197_v37 = vpack.c.bf16 %v2949_v17, %v2945_v39  ;;  %v1543_v43 = vmul.f32 %v985_v38, %v985_v38  ;;  %v1472_v4 = vadd.f32 %v1471_v31, %v985_v38 }
 0x185   : > { %v989_v16 = vpop.f32.mrf.mxu0  ;;  %v1117_v45 = vpop.f32.mrf.mxu1  ;;  %v1546_v38 = vmul.f32 %v2639_v22, %v2639_v22 }
 0x186   : > { %2217 = vst [vmem:[%s2653_s23 + $0x70] sm:$0xff] %v2117_v30   ;;  %v990_v46 = vadd.f32 %v2635_v19, %v989_v16  ;;  %2233 = vst [vmem:[%s2653_s23 + $0xf0] sm:$0xff] %v2197_v37   ;;  %v2957_v40 = vadd.f32 %v2635_v19, %v1117_v45  ;;  %v1606_v57 = vadd.f32 %v1605_v47, %v1543_v43 }
 0x187   : > { %v991_v51 = vpop.f32.mrf.mxu0  ;;  %v1119_v56 = vpop.f32.mrf.mxu1  ;;  %v1550_v16 = vmul.f32 %v2680_v50, %v2680_v50 }
 0x188   : > { %v1544_v49 = vmul.f32 %v990_v46, %v990_v46  ;;  %v1473_v63 = vadd.f32 %v1472_v4, %v990_v46 }
 0x189   : > { %v992_v61 = vpop.f32.mrf.mxu0  ;;  %v1120_v62 = vpop.f32.mrf.mxu1 }
 0x18a   : > { %v993_v32 = vadd.f32 %v2635_v19, %v992_v61  ;;  %v2961_v58 = vadd.f32 %v2635_v19, %v1120_v62  ;;  %v1607_v59 = vadd.f32 %v1606_v57, %v1544_v49  ;;  %v1547_v19 = vmul.f32 %v2648_v27, %v2648_v27 }
 0x18b   : > { %v994_v2 = vpop.f32.mrf.mxu0  ;;  %v1122_v7 = vpop.f32.mrf.mxu1 }
 0x18c   : > { %v2122_v8 = vpack.c.bf16 %v993_v32, %v990_v46  ;;  %v1474_v10 = vadd.f32 %v1473_v63, %v993_v32  ;;  %v1545_v11 = vmul.f32 %v993_v32, %v993_v32  ;;  %v2202_v12 = vpack.c.bf16 %v2961_v58, %v2957_v40 }
 0x18e   : > { %2218 = vst [vmem:[%s2653_s23 + $0x78] sm:$0xff] %v2122_v8   ;;  %v1475_v34 = vadd.f32 %v1474_v10, %v2639_v22  ;;  %v1608_v23 = vadd.f32 %v1607_v59, %v1545_v11  ;;  %2234 = vst [vmem:[%s2653_s23 + $0xf8] sm:$0xff] %v2202_v12  }
 0x190   : > { %v1476_v28 = vadd.f32 %v1475_v34, %v2648_v27  ;;  %v1609_v29 = vadd.f32 %v1608_v23, %v1546_v38  ;;  %v1551_v27 = vmul.f32 %v2689_v55, %v2689_v55 }
 0x192   : > { %v1477_v30 = vadd.f32 %v1476_v28, %v2662_v36  ;;  %v1610_v37 = vadd.f32 %v1609_v29, %v1547_v19  ;;  %v1552_v36 = vmul.f32 %v2698_v0, %v2698_v0 }
 0x194   : > { %v1478_v43 = vadd.f32 %v1477_v30, %v2671_v41  ;;  %v1611_v22 = vadd.f32 %v1610_v37, %v1548_v3  ;;  %v1553_v41 = vmul.f32 %v2707_v5, %v2707_v5  ;;  %v1563_v3 = vmul.f32 %v2808_v25, %v2808_v25 }
 0x196   : > { %v1479_v45 = vadd.f32 %v1478_v43, %v2680_v50  ;;  %v1612_v31 = vadd.f32 %v1611_v22, %v1549_v53  ;;  %v1554_v50 = vmul.f32 %v2716_v14, %v2716_v14  ;;  %v1564_v53 = vmul.f32 %v2826_v24, %v2826_v24 }
 0x197   : > { %v1565_v22 = vmul.f32 %v2838_v54, %v2838_v54 }
 0x198   : > { %v1480_v46 = vadd.f32 %v1479_v45, %v2689_v55  ;;  %v1613_v47 = vadd.f32 %v1612_v31, %v1550_v16  ;;  %v1555_v55 = vmul.f32 %v2725_v20, %v2725_v20  ;;  %v1566_v45 = vmul.f32 %v2856_v6, %v2856_v6 }
 0x19a   : > { %v1481_v51 = vadd.f32 %v1480_v46, %v2698_v0  ;;  %v1614_v56 = vadd.f32 %v1613_v47, %v1551_v27  ;;  %v1556_v0 = vmul.f32 %v2734_v33, %v2734_v33  ;;  %v1567_v27 = vmul.f32 %v2868_v18, %v2868_v18 }
 0x19b   : > { %v1568_v47 = vmul.f32 %v2886_v26, %v2886_v26 }
 0x19c   : > { %v1482_v4 = vadd.f32 %v1481_v51, %v2707_v5  ;;  %v1615_v49 = vadd.f32 %v1614_v56, %v1552_v36  ;;  %v1557_v5 = vmul.f32 %v2743_v42, %v2743_v42  ;;  %v1569_v51 = vmul.f32 %v2894_v1, %v2894_v1 }
 0x19e   : > { %v1616_v57 = vadd.f32 %v1615_v49, %v1553_v41  ;;  %v1483_v61 = vadd.f32 %v1482_v4, %v2716_v14  ;;  %v1558_v14 = vmul.f32 %v2752_v52, %v2752_v52  ;;  %v1570_v41 = vmul.f32 %v2910_v35, %v2910_v35 }
 0x19f   : > { %v1571_v49 = vmul.f32 %v2918_v48, %v2918_v48 }
 0x1a0   : > { %v1484_v62 = vadd.f32 %v1483_v61, %v2725_v20  ;;  %v1617_v63 = vadd.f32 %v1616_v57, %v1554_v50  ;;  %v1559_v20 = vmul.f32 %v2761_v60, %v2761_v60  ;;  %v1572_v57 = vmul.f32 %v2932_v21, %v2932_v21 }
 0x1a2   : > { %v1485_v32 = vadd.f32 %v1484_v62, %v2734_v33  ;;  %v1618_v59 = vadd.f32 %v1617_v63, %v1555_v55  ;;  %v1560_v33 = vmul.f32 %v2770_v9, %v2770_v9  ;;  %v1573_v55 = vmul.f32 %v2937_v13, %v2937_v13 }
 0x1a3   : > { %v1574_v63 = vmul.f32 %v2945_v39, %v2945_v39 }
 0x1a4   : > { %v1486_v2 = vadd.f32 %v1485_v32, %v2743_v42  ;;  %v1619_v7 = vadd.f32 %v1618_v59, %v1556_v0  ;;  %v1561_v42 = vmul.f32 %v2779_v15, %v2779_v15 }
 0x1a6   : > { %v1487_v8 = vadd.f32 %v1486_v2, %v2752_v52  ;;  %v1620_v10 = vadd.f32 %v1619_v7, %v1557_v5  ;;  %v1562_v52 = vmul.f32 %v2796_v44, %v2796_v44  ;;  %v1576_v5 = vmul.f32 %v2957_v40, %v2957_v40 }
 0x1a7   : > { %v1577_v7 = vmul.f32 %v2961_v58, %v2961_v58 }
 0x1a8   : > { %v1488_v11 = vadd.f32 %v1487_v8, %v2761_v60  ;;  %v1621_v12 = vadd.f32 %v1620_v10, %v1558_v14 }
 0x1aa   : > { %v1489_v38 = vadd.f32 %v1488_v11, %v2770_v9  ;;  %v1622_v34 = vadd.f32 %v1621_v12, %v1559_v20 }
 0x1ac   : > { %v1490_v23 = vadd.f32 %v1489_v38, %v2779_v15  ;;  %v1623_v19 = vadd.f32 %v1622_v34, %v1560_v33 }
 0x1ae   : > { %v1491_v28 = vadd.f32 %v1490_v23, %v2796_v44  ;;  %v1624_v29 = vadd.f32 %v1623_v19, %v1561_v42 }
 0x1b0   : > { %v1492_v60 = vadd.f32 %v1491_v28, %v2808_v25  ;;  %v1625_v30 = vadd.f32 %v1624_v29, %v1562_v52 }
 0x1b2   : > { %v1626_v9 = vadd.f32 %v1625_v30, %v1563_v3  ;;  %v1493_v37 = vadd.f32 %v1492_v60, %v2826_v24 }
 0x1b4   : > { %v1627_v15 = vadd.f32 %v1626_v9, %v1564_v53  ;;  %v1494_v43 = vadd.f32 %v1493_v37, %v2838_v54 }
 0x1b6   : > { %v1628_v44 = vadd.f32 %v1627_v15, %v1565_v22  ;;  %v1495_v16 = vadd.f32 %v1494_v43, %v2856_v6 }
 0x1b8   : > { %v1629_v25 = vadd.f32 %v1628_v44, %v1566_v45  ;;  %v1496_v31 = vadd.f32 %v1495_v16, %v2868_v18 }
 0x1ba   : > { %v1630_v46 = vadd.f32 %v1629_v25, %v1567_v27  ;;  %v1497_v24 = vadd.f32 %v1496_v31, %v2886_v26 }
 0x1bc   : > { %v1631_v36 = vadd.f32 %v1630_v46, %v1568_v47  ;;  %v1498_v54 = vadd.f32 %v1497_v24, %v2894_v1 }
 0x1be   : > { %v1632_v56 = vadd.f32 %v1631_v36, %v1569_v51  ;;  %v1499_v6 = vadd.f32 %v1498_v54, %v2910_v35 }
 0x1c0   : > { %v1633_v4 = vadd.f32 %v1632_v56, %v1570_v41  ;;  %v1500_v18 = vadd.f32 %v1499_v6, %v2918_v48 }
 0x1c2   : > { %v1634_v50 = vadd.f32 %v1633_v4, %v1571_v49  ;;  %v1501_v26 = vadd.f32 %v1500_v18, %v2932_v21  ;;  %v1575_v21 = vmul.f32 %v2949_v17, %v2949_v17 }
 0x1c4   : > { %v1635_v61 = vadd.f32 %v1634_v50, %v1572_v57  ;;  %v1502_v1 = vadd.f32 %v1501_v26, %v2937_v13 }
 0x1c6   : > { %v1636_v35 = vadd.f32 %v1635_v61, %v1573_v55  ;;  %v1503_v62 = vadd.f32 %v1502_v1, %v2945_v39 }
 0x1c8   : > { %v1637_v48 = vadd.f32 %v1636_v35, %v1574_v63  ;;  %v1504_v0 = vadd.f32 %v1503_v62, %v2949_v17 }
 0x1ca   : > { %v1638_v32 = vadd.f32 %v1637_v48, %v1575_v21  ;;  %v1505_v59 = vadd.f32 %v1504_v0, %v2957_v40 }
 0x1cc   : > { %v1639_v13 = vadd.f32 %v1638_v32, %v1576_v5  ;;  %v1506_v2 = vadd.f32 %v1505_v59, %v2961_v58 }
 0x1ce   : > { %v1507_v39 = vrot.slane %v1506_v2, 4  ;;  %v1640_v14 = vadd.f32 %v1639_v13, %v1577_v7 }
 0x1d0   : > { %v1508_v8 = vadd.f32 %v1507_v39, %v1506_v2  ;;  %v1641_v10 = vrot.slane %v1640_v14, 4 }
 0x1d2   : > { %v1509_v20 = vrot.slane %v1508_v8, 2  ;;  %v1642_v11 = vadd.f32 %v1641_v10, %v1640_v14 }
 0x1d4   : > { %v1510_v17 = vadd.f32 %v1509_v20, %v1508_v8  ;;  %v1643_v12 = vrot.slane %v1642_v11, 2 }
 0x1d6   : > { %v1511_v33 = vrot.slane %v1510_v17, 1  ;;  %v1644_v38 = vadd.f32 %v1643_v12, %v1642_v11 }
 0x1d8   : > { %v1512_v40 = vadd.f32 %v1511_v33, %v1510_v17  ;;  %v1645_v34 = vrot.slane %v1644_v38, 1 }
 0x1da   : > { %1513 = vst [vmem:[%s308_s26] sm:$0x1] %v1512_v40  ;;  %v1646_v58 = vadd.f32 %v1645_v34, %v1644_v38 }
 0x1dc   : > { %1647 = vst [vmem:[%s314_s29] sm:$0x1] %v1646_v58 }
 0x1dd PF: > { %s16_s20 = sadd.s32 1, %s2426_s20   ;;  %s3086_s18 = smov %s2422_s19 }
 0x1de   : > { %p13_p6 = scmp.ge.s32.totalorder %s16_s20, 51   ;;  %s3087_s19 = smov %s3089_s21 }
 0x1e0   :  { %15 = sbr.rel (!%p13_p6) target bundleno = 2 (0x2), region = 92 }

// kernel: conv_block.3
= control target key start
LH: loop header
LB: loop body
LE: loop exit
PB: predicated region body
PF: predicated region fallthrough
CT: control target
= control target key end

     0   :  { %8 = vsyncpa [#allocation3], 0  ;;  %s12136_s0 = inlined_call_operand.vmem [shape: bf16[112,2,56,256], index: 0, kind: input, shape index: {}]   ;;  %s12137_s1 = inlined_call_operand.vmem [shape: f32[1,128], index: 1, kind: input, shape index: {}]   ;;  %s12138_s2 = inlined_call_operand.vmem [shape: f32[1,128], index: 2, kind: input, shape index: {}]   ;;  %s12139_s3 = inlined_call_operand.hbm [shape: bf16[112,56,128], index: 3, kind: output, shape index: {}]  }
   0x1   :  { %10 = vsyncpa [#allocation3 + $0x1], 0  ;;  %s9277_s12 = smov 0   ;;  %s9279_s13 = smov 0  }
   0x2   :  { %s9281_s14 = smov 0   ;;  %s9283_s15 = smov 0  }
   0x3 LB: > { %s9298_s16 = sadd.s32 4294967295, %s9252_s15   ;;  %s8134_s17 = sadd.s32 4294967294, %s9252_s15   ;;  %s9252_s15 = sphi %s9283_s15, %s12145_s15   ;;  %s9248_s14 = sphi %s9281_s14, %s12144_s14   ;;  %s9244_s13 = sphi %s9279_s13, %s12143_s13   ;;  %s9240_s12 = sphi %s9277_s12, %s12142_s12  }
   0x4   : > { %s9302_s18 = sadd.s32 1, %s9252_s15   ;;  %s91_s19 = sadd.s32 1, %s9248_s14 }
   0x5   : > { %s88_s20 = ssub.s32 %s9252_s15, %s9302_s18  ;;  %p101_p0 = scmp.ne.s32.totalorder %s9248_s14, %s9244_s13 }
   0x6   : > { %p89_p1 = scmp.eq.s32.totalorder %s88_s20, 0  ;;  %p102_p2 = scmp.eq.s32.totalorder %s9298_s16, 3 }
   0x7   : > { %p107_p3 = scmp.ne.s32.totalorder %s9244_s13, %s9240_s12  ;;  %p108_p4 = scmp.eq.s32.totalorder %s8134_s17, 3 }
   0x8   : > { %s9313_s21 = scalar_select %p89_p1, %s9248_s14, %s91_s19  }
   0x9   : > { %p9315_p5 = por %p102_p2, %p101_p0  ;;  %p9319_p6 = por %p108_p4, %p107_p3 }
   0xa   : > { %p8137_p7 = scmp.ge.s32.totalorder %s9252_s15, 1  ;;  %p142_p8 = scmp.lt.s32.totalorder %s9252_s15, 5 }
   0xc   : > { %p143_p9 = pnand %p8137_p7, %p142_p8 }
   0xd   : > { %s167_s24 = smul.u32 (!%p143_p9), 28, %s9298_s16  ;;  %s164_s6 = sand.u32 (!%p143_p9), 1, %s9244_s13  }
   0xe   : > { %146 = sbr.rel (%p143_p9) target bundleno = 1491 (0x5d3), region = 32  ;;  %s9254_s26 = smov (!%p143_p9), [#allocation2]  }
   0xf   : > { %p168_p10 = scmp.lt.s32.totalorder (!%p143_p9), %s167_s24, 111  ;;  %s9368_s7 = smul.u32 (!%p143_p9), 784, %s164_s6 }
  0x10   : > { %s9196_s27 = sshll.u32 (!%p143_p9), %s9254_s26, 4  ;;  %s9197_s27 = int_to_ptr.vmem [resolvable:$false] %s9196_s27 }
  0x11   : > { %s9383_s8 = scalar_lea.vmem (!%p143_p9), [#allocation2], %s9368_s7  ;;  %s9198_s29 = scalar_lea.vmem (!%p143_p9), %s9197_s27, 25088 }
  0x12   : > { %s8072_s17 = sshll.u32 (!%p143_p9), %s9383_s8, 4  ;;  %s12091_s17 = int_to_ptr.vmem [resolvable:$true] %s8072_s17 }
  0x13   : > { %s12147_s24 = smov (!%p168_p10, %s167_s24), 111  ;;  %v9334_v0 = vld [vmem:[%s12137_s1] ss:$0 sm:$0xff]  ;;  %p9199_p0 = scmp.lt.s32.totalorder %s12091_s17, %s9197_s27 }
  0x14   : > { %s9124_s25 = smul.u32 112, %s12147_s24  ;;  %v9343_v9 = vld [vmem:[%s12138_s2] ss:$0 sm:$0xff] }
  0x16   : > { %s9329_s28 = scalar_lea.vmem %s12136_s0, %s9124_s25  ;;  %s12096_s25 = scalar_lea.sflag [#allocation3], %s164_s6 }
  0x17   : > { %v177_v1 = vld [vmem:[%s9329_s28] sm:$0xff]  ;;  %v178_v2 = vld [vmem:[%s9329_s28 + $0x8] sm:$0xff]  ;;  %v184_v3 = vld [vmem:[%s9329_s28 + $0x38] sm:$0xff] }
  0x18   : > { %v185_v4 = vld [vmem:[%s9329_s28 + $0x40] sm:$0xff]  ;;  %v569_v5 = vunpack.c.l.bf16 %v177_v1  ;;  %v570_v6 = vunpack.c.l.bf16 %v178_v2  ;;  %v1953_v7 = vrot.slane %v177_v1, 4  ;;  %v1954_v8 = vrot.slane %v178_v2, 4  ;;  %v179_v44 = vld [vmem:[%s9329_s28 + $0x10] sm:$0xff]  ;;  %v180_v45 = vld [vmem:[%s9329_s28 + $0x18] sm:$0xff] }
  0x19   : > { %v3521_v10 = vunpack.c.l.bf16 %v184_v3  ;;  %v3522_v11 = vunpack.c.l.bf16 %v185_v4  ;;  %v4893_v12 = vrot.slane %v184_v3, 4  ;;  %v4894_v13 = vrot.slane %v185_v4, 4  ;;  %v186_v62 = vld [vmem:[%s9329_s28 + $0x48] sm:$0xff]  ;;  %v187_v63 = vld [vmem:[%s9329_s28 + $0x50] sm:$0xff] }
  0x1a   : > { %v771_v14 = vmul.f32 %v9334_v0, %v569_v5  ;;  %v772_v15 = vmul.f32 %v9334_v0, %v570_v6  ;;  %v2345_v16 = vunpack.c.l.bf16 %v1953_v7  ;;  %v2346_v17 = vunpack.c.l.bf16 %v1954_v8 }
  0x1b   : > { %v3717_v18 = vmul.f32 %v9334_v0, %v3521_v10  ;;  %v3718_v19 = vmul.f32 %v9334_v0, %v3522_v11  ;;  %v5285_v20 = vunpack.c.l.bf16 %v4893_v12  ;;  %v5286_v21 = vunpack.c.l.bf16 %v4894_v13 }
  0x1c   : > { %v973_v22 = vadd.f32 %v9343_v9, %v771_v14  ;;  %v974_v23 = vadd.f32 %v9343_v9, %v772_v15  ;;  %v2541_v24 = vmul.f32 %v9334_v0, %v2345_v16  ;;  %v2542_v25 = vmul.f32 %v9334_v0, %v2346_v17 }
  0x1d   : > { %v3913_v26 = vadd.f32 %v9343_v9, %v3717_v18  ;;  %v3914_v27 = vadd.f32 %v9343_v9, %v3718_v19  ;;  %v5481_v28 = vmul.f32 %v9334_v0, %v5285_v20  ;;  %v5482_v29 = vmul.f32 %v9334_v0, %v5286_v21 }
  0x1e   : > { %vm1169_vm0 = vcmp.ge.f32.partialorder %v973_v22, 0.0  ;;  %vm1170_vm1 = vcmp.ge.f32.partialorder %v974_v23, 0.0  ;;  %v1365_v30 = vmul.f32 0.1, %v973_v22  ;;  %v1366_v31 = vmul.f32 0.1, %v974_v23 }
  0x1f   : > { %v2737_v32 = vadd.f32 %v9343_v9, %v2541_v24  ;;  %v2738_v33 = vadd.f32 %v9343_v9, %v2542_v25  ;;  %vm4109_vm2 = vcmp.ge.f32.partialorder %v3913_v26, 0.0  ;;  %vm4110_vm3 = vcmp.ge.f32.partialorder %v3914_v27, 0.0 }
  0x20   : > { %v1561_v34 = vsel %vm1169_vm0, %v973_v22, %v1365_v30  ;;  %v1562_v35 = vsel %vm1170_vm1, %v974_v23, %v1366_v31  ;;  %v4305_v36 = vmul.f32 0.1, %v3913_v26  ;;  %v4306_v37 = vmul.f32 0.1, %v3914_v27 }
  0x21   : > { %vm2933_vm4 = vcmp.ge.f32.partialorder %v2737_v32, 0.0  ;;  %vm2934_vm5 = vcmp.ge.f32.partialorder %v2738_v33, 0.0  ;;  %v3129_v38 = vmul.f32 0.1, %v2737_v32  ;;  %v3130_v39 = vmul.f32 0.1, %v2738_v33 }
  0x22   : > { %v4501_v40 = vsel %vm4109_vm2, %v3913_v26, %v4305_v36  ;;  %v4502_v41 = vsel %vm4110_vm3, %v3914_v27, %v4306_v37  ;;  %v5677_v42 = vadd.f32 %v9343_v9, %v5481_v28  ;;  %v5678_v43 = vadd.f32 %v9343_v9, %v5482_v29 }
  0x23   : > { %v3325_v46 = vsel %vm2933_vm4, %v2737_v32, %v3129_v38  ;;  %v3326_v47 = vsel %vm2934_vm5, %v2738_v33, %v3130_v39  ;;  %v571_v48 = vunpack.c.l.bf16 %v179_v44  ;;  %v572_v49 = vunpack.c.l.bf16 %v180_v45 }
  0x24   : > { %vm5873_vm6 = vcmp.ge.f32.partialorder %v5677_v42, 0.0  ;;  %vm5874_vm7 = vcmp.ge.f32.partialorder %v5678_v43, 0.0  ;;  %v6069_v50 = vmul.f32 0.1, %v5677_v42  ;;  %v6070_v51 = vmul.f32 0.1, %v5678_v43 }
  0x25   : > { %v6461_v52 = vmax.f32 %v1561_v34, %v3325_v46  ;;  %v6462_v53 = vmax.f32 %v1562_v35, %v3326_v47  ;;  %v773_v54 = vmul.f32 %v9334_v0, %v571_v48  ;;  %v774_v55 = vmul.f32 %v9334_v0, %v572_v49  ;;  %v181_v34 = vld [vmem:[%s9329_s28 + $0x20] sm:$0xff]  ;;  %v182_v35 = vld [vmem:[%s9329_s28 + $0x28] sm:$0xff] }
  0x26   : > { %v6265_v56 = vsel %vm5873_vm6, %v5677_v42, %v6069_v50  ;;  %v6266_v57 = vsel %vm5874_vm7, %v5678_v43, %v6070_v51  ;;  %v1955_v58 = vrot.slane %v179_v44, 4  ;;  %v1956_v59 = vrot.slane %v180_v45, 4  ;;  %v188_v42 = vld [vmem:[%s9329_s28 + $0x58] sm:$0xff]  ;;  %v189_v43 = vld [vmem:[%s9329_s28 + $0x60] sm:$0xff] }
  0x27   : > { %v6657_v60 = vmax.f32 %v4501_v40, %v6265_v56  ;;  %v6658_v61 = vmax.f32 %v4502_v41, %v6266_v57  ;;  %v975_v1 = vadd.f32 %v9343_v9, %v773_v54  ;;  %v976_v2 = vadd.f32 %v9343_v9, %v774_v55 }
  0x28   : > { %v2347_v3 = vunpack.c.l.bf16 %v1955_v58  ;;  %v2348_v4 = vunpack.c.l.bf16 %v1956_v59  ;;  %v3523_v5 = vunpack.c.l.bf16 %v186_v62  ;;  %v3524_v6 = vunpack.c.l.bf16 %v187_v63 }
  0x29   : > { %v6853_v7 = vmax.f32 %v6461_v52, %v6657_v60  ;;  %v6854_v8 = vmax.f32 %v6462_v53, %v6658_v61  ;;  %vm1171_vm8 = vcmp.ge.f32.partialorder %v975_v1, 0.0  ;;  %vm1172_vm9 = vcmp.ge.f32.partialorder %v976_v2, 0.0 }
  0x2a   : > { %v1367_v10 = vmul.f32 0.1, %v975_v1  ;;  %v1368_v11 = vmul.f32 0.1, %v976_v2  ;;  %v2543_v12 = vmul.f32 %v9334_v0, %v2347_v3  ;;  %v2544_v13 = vmul.f32 %v9334_v0, %v2348_v4 }
  0x2b   : > { %v8539_v14 = vpack.c.bf16 %v6854_v8, %v6853_v7  ;;  %v3719_v15 = vmul.f32 %v9334_v0, %v3523_v5  ;;  %v3720_v16 = vmul.f32 %v9334_v0, %v3524_v6  ;;  %v4895_v17 = vrot.slane %v186_v62, 4 }
  0x2c   : > { %v1563_v18 = vsel %vm1171_vm8, %v975_v1, %v1367_v10  ;;  %v9378_v19 = vsel %vm1172_vm9, %v976_v2, %v1368_v11  ;;  %v2739_v20 = vadd.f32 %v9343_v9, %v2543_v12  ;;  %v2740_v21 = vadd.f32 %v9343_v9, %v2544_v13 }
  0x2d   : > { %8540 = vst [vmem:[%s9383_s8] sm:$0xff] %v8539_v14   ;;  %v3915_v22 = vadd.f32 %v9343_v9, %v3719_v15  ;;  %v3916_v23 = vadd.f32 %v9343_v9, %v3720_v16  ;;  %v4896_v24 = vrot.slane %v187_v63, 4  ;;  %v5287_v25 = vunpack.c.l.bf16 %v4895_v17 }
  0x2e   : > { %vm2935_vm10 = vcmp.ge.f32.partialorder %v2739_v20, 0.0  ;;  %vm2936_vm11 = vcmp.ge.f32.partialorder %v2740_v21, 0.0  ;;  %v3131_v26 = vmul.f32 0.1, %v2739_v20  ;;  %v3132_v27 = vmul.f32 0.1, %v2740_v21 }
  0x2f   : > { %vm4111_vm12 = vcmp.ge.f32.partialorder %v3915_v22, 0.0  ;;  %vm4112_vm13 = vcmp.ge.f32.partialorder %v3916_v23, 0.0  ;;  %v4307_v28 = vmul.f32 0.1, %v3915_v22  ;;  %v4308_v29 = vmul.f32 0.1, %v3916_v23 }
  0x30   : > { %v3327_v30 = vsel %vm2935_vm10, %v2739_v20, %v3131_v26  ;;  %v3328_v31 = vsel %vm2936_vm11, %v2740_v21, %v3132_v27  ;;  %v5288_v32 = vunpack.c.l.bf16 %v4896_v24  ;;  %v5483_v33 = vmul.f32 %v9334_v0, %v5287_v25  ;;  %v183_v24 = vld [vmem:[%s9329_s28 + $0x30] sm:$0xff] }
  0x31   : > { %v4503_v36 = vsel %vm4111_vm12, %v3915_v22, %v4307_v28  ;;  %v4504_v37 = vsel %vm4112_vm13, %v3916_v23, %v4308_v29  ;;  %v6463_v38 = vmax.f32 %v1563_v18, %v3327_v30  ;;  %v6464_v39 = vmax.f32 %v9378_v19, %v3328_v31  ;;  %v191_v25 = vld [vmem:[%s9329_s28 + $0x70] sm:$0xff] }
  0x32   : > { %v5484_v40 = vmul.f32 %v9334_v0, %v5288_v32  ;;  %v5679_v41 = vadd.f32 %v9343_v9, %v5483_v33  ;;  %v573_v44 = vunpack.c.l.bf16 %v181_v34  ;;  %v574_v45 = vunpack.c.l.bf16 %v182_v35  ;;  %v190_v32 = vld [vmem:[%s9329_s28 + $0x68] sm:$0xff] }
  0x33   : > { %v1957_v46 = vrot.slane %v181_v34, 4  ;;  %v1958_v47 = vrot.slane %v182_v35, 4  ;;  %v3525_v48 = vunpack.c.l.bf16 %v188_v42  ;;  %v3526_v49 = vunpack.c.l.bf16 %v189_v43 }
  0x34   : > { %v5680_v50 = vadd.f32 %v9343_v9, %v5484_v40  ;;  %vm5875_vm14 = vcmp.ge.f32.partialorder %v5679_v41, 0.0  ;;  %v6071_v51 = vmul.f32 0.1, %v5679_v41  ;;  %v775_v52 = vmul.f32 %v9334_v0, %v573_v44 }
  0x35   : > { %v776_v53 = vmul.f32 %v9334_v0, %v574_v45  ;;  %v2349_v54 = vunpack.c.l.bf16 %v1957_v46  ;;  %v2350_v55 = vunpack.c.l.bf16 %v1958_v47  ;;  %v3721_v56 = vmul.f32 %v9334_v0, %v3525_v48 }
  0x36   : > { %vm5876_vm15 = vcmp.ge.f32.partialorder %v5680_v50, 0.0  ;;  %v6072_v57 = vmul.f32 0.1, %v5680_v50  ;;  %v6267_v58 = vsel %vm5875_vm14, %v5679_v41, %v6071_v51  ;;  %v977_v59 = vadd.f32 %v9343_v9, %v775_v52 }
  0x37   : > { %v6659_v60 = vmax.f32 %v4503_v36, %v6267_v58  ;;  %v978_v61 = vadd.f32 %v9343_v9, %v776_v53  ;;  %v2545_v62 = vmul.f32 %v9334_v0, %v2349_v54  ;;  %v2546_v63 = vmul.f32 %v9334_v0, %v2350_v55  ;;  %v198_v36 = vld [vmem:[%s9329_s28 + $0xa8] sm:$0xff] }
  0x38   : > { %v6268_v1 = vsel %vm5876_vm15, %v5680_v50, %v6072_v57  ;;  %vm1173_vm0 = vcmp.ge.f32.partialorder %v977_v59, 0.0  ;;  %v1369_v2 = vmul.f32 0.1, %v977_v59  ;;  %v3722_v3 = vmul.f32 %v9334_v0, %v3526_v49 }
  0x39   : > { %v6660_v4 = vmax.f32 %v4504_v37, %v6268_v1  ;;  %v6855_v5 = vmax.f32 %v6463_v38, %v6659_v60  ;;  %vm1174_vm1 = vcmp.ge.f32.partialorder %v978_v61, 0.0  ;;  %v1370_v6 = vmul.f32 0.1, %v978_v61 }
  0x3a   : > { %v9405_v7 = vsel %vm1173_vm0, %v977_v59, %v1369_v2  ;;  %v2741_v8 = vadd.f32 %v9343_v9, %v2545_v62  ;;  %v2742_v10 = vadd.f32 %v9343_v9, %v2546_v63  ;;  %v3917_v11 = vadd.f32 %v9343_v9, %v3721_v56 }
  0x3b   : > { %v6856_v12 = vmax.f32 %v6464_v39, %v6660_v4  ;;  %v9410_v13 = vsel %vm1174_vm1, %v978_v61, %v1370_v6  ;;  %v3918_v14 = vadd.f32 %v9343_v9, %v3722_v3  ;;  %v4897_v15 = vrot.slane %v188_v42, 4 }
  0x3c   : > { %vm2937_vm2 = vcmp.ge.f32.partialorder %v2741_v8, 0.0  ;;  %vm2938_vm3 = vcmp.ge.f32.partialorder %v2742_v10, 0.0  ;;  %v3133_v16 = vmul.f32 0.1, %v2741_v8  ;;  %v3134_v17 = vmul.f32 0.1, %v2742_v10 }
  0x3d   : > { %v8544_v18 = vpack.c.bf16 %v6856_v12, %v6855_v5  ;;  %vm4113_vm4 = vcmp.ge.f32.partialorder %v3917_v11, 0.0  ;;  %vm4114_vm5 = vcmp.ge.f32.partialorder %v3918_v14, 0.0  ;;  %v4309_v19 = vmul.f32 0.1, %v3917_v11 }
  0x3e   : > { %v3329_v20 = vsel %vm2937_vm2, %v2741_v8, %v3133_v16  ;;  %v3330_v21 = vsel %vm2938_vm3, %v2742_v10, %v3134_v17  ;;  %v4310_v22 = vmul.f32 0.1, %v3918_v14  ;;  %v4898_v23 = vrot.slane %v189_v43, 4 }
  0x3f   : > { %9026 = vst [vmem:[%s9383_s8 + $0x8] sm:$0xff] %v8544_v18   ;;  %v4505_v26 = vsel %vm4113_vm4, %v3917_v11, %v4309_v19  ;;  %v5289_v27 = vunpack.c.l.bf16 %v4897_v15  ;;  %v6465_v28 = vmax.f32 %v9405_v7, %v3329_v20  ;;  %v6466_v29 = vmax.f32 %v9410_v13, %v3330_v21  ;;  %v192_v15 = vld [vmem:[%s9329_s28 + $0x78] sm:$0xff]  ;;  %v193_v19 = vld [vmem:[%s9329_s28 + $0x80] sm:$0xff] }
  0x40   : > { %v4506_v30 = vsel %vm4114_vm5, %v3918_v14, %v4310_v22  ;;  %v5290_v31 = vunpack.c.l.bf16 %v4898_v23  ;;  %v575_v33 = vunpack.c.l.bf16 %v183_v24  ;;  %v576_v34 = vunpack.c.l.bf16 %v191_v25 }
  0x41   : > { %v5485_v35 = vmul.f32 %v9334_v0, %v5289_v27  ;;  %v1959_v37 = vrot.slane %v183_v24, 4  ;;  %v1960_v38 = vrot.slane %v191_v25, 4  ;;  %v3527_v39 = vunpack.c.l.bf16 %v190_v32  ;;  %v199_v25 = vld [vmem:[%s9329_s28 + $0xb0] sm:$0xff] }
  0x42   : > { %v5486_v40 = vmul.f32 %v9334_v0, %v5290_v31  ;;  %v777_v41 = vmul.f32 %v9334_v0, %v575_v33  ;;  %v778_v42 = vmul.f32 %v9334_v0, %v576_v34  ;;  %v3528_v43 = vunpack.c.l.bf16 %v198_v36  ;;  %v200_v31 = vld [vmem:[%s9329_s28 + $0xb8] sm:$0xff] }
  0x43   : > { %v5681_v44 = vadd.f32 %v9343_v9, %v5485_v35  ;;  %v2351_v45 = vunpack.c.l.bf16 %v1959_v37  ;;  %v2352_v46 = vunpack.c.l.bf16 %v1960_v38  ;;  %v3723_v47 = vmul.f32 %v9334_v0, %v3527_v39 }
  0x44   : > { %v5682_v48 = vadd.f32 %v9343_v9, %v5486_v40  ;;  %v979_v49 = vadd.f32 %v9343_v9, %v777_v41  ;;  %v980_v50 = vadd.f32 %v9343_v9, %v778_v42  ;;  %v3724_v51 = vmul.f32 %v9334_v0, %v3528_v43 }
  0x45   : > { %vm5877_vm6 = vcmp.ge.f32.partialorder %v5681_v44, 0.0  ;;  %v6073_v52 = vmul.f32 0.1, %v5681_v44  ;;  %v2547_v53 = vmul.f32 %v9334_v0, %v2351_v45  ;;  %v2548_v54 = vmul.f32 %v9334_v0, %v2352_v46 }
  0x46   : > { %vm5878_vm7 = vcmp.ge.f32.partialorder %v5682_v48, 0.0  ;;  %v6074_v55 = vmul.f32 0.1, %v5682_v48  ;;  %vm1175_vm8 = vcmp.ge.f32.partialorder %v979_v49, 0.0  ;;  %vm1176_vm9 = vcmp.ge.f32.partialorder %v980_v50, 0.0 }
  0x47   : > { %v6269_v56 = vsel %vm5877_vm6, %v5681_v44, %v6073_v52  ;;  %v1371_v57 = vmul.f32 0.1, %v979_v49  ;;  %v1372_v58 = vmul.f32 0.1, %v980_v50  ;;  %v2743_v59 = vadd.f32 %v9343_v9, %v2547_v53 }
  0x48   : > { %v6270_v60 = vsel %vm5878_vm7, %v5682_v48, %v6074_v55  ;;  %v6661_v61 = vmax.f32 %v4505_v26, %v6269_v56  ;;  %v2744_v62 = vadd.f32 %v9343_v9, %v2548_v54  ;;  %v3919_v63 = vadd.f32 %v9343_v9, %v3723_v47 }
  0x49   : > { %v6662_v1 = vmax.f32 %v4506_v30, %v6270_v60  ;;  %v9435_v2 = vsel %vm1175_vm8, %v979_v49, %v1371_v57  ;;  %v9437_v3 = vsel %vm1176_vm9, %v980_v50, %v1372_v58  ;;  %vm2939_vm10 = vcmp.ge.f32.partialorder %v2743_v59, 0.0 }
  0x4a   : > { %v6857_v4 = vmax.f32 %v6465_v28, %v6661_v61  ;;  %vm2940_vm11 = vcmp.ge.f32.partialorder %v2744_v62, 0.0  ;;  %v3135_v5 = vmul.f32 0.1, %v2743_v59  ;;  %v3136_v6 = vmul.f32 0.1, %v2744_v62 }
  0x4b   : > { %v6858_v7 = vmax.f32 %v6466_v29, %v6662_v1  ;;  %v3920_v8 = vadd.f32 %v9343_v9, %v3724_v51  ;;  %vm4115_vm12 = vcmp.ge.f32.partialorder %v3919_v63, 0.0  ;;  %v4311_v10 = vmul.f32 0.1, %v3919_v63 }
  0x4c   : > { %v3331_v11 = vsel %vm2939_vm10, %v2743_v59, %v3135_v5  ;;  %v3332_v12 = vsel %vm2940_vm11, %v2744_v62, %v3136_v6  ;;  %v4899_v13 = vrot.slane %v190_v32, 4  ;;  %v4900_v14 = vrot.slane %v198_v36, 4 }
  0x4d   : > { %v8549_v16 = vpack.c.bf16 %v6858_v7, %v6857_v4  ;;  %vm4116_vm13 = vcmp.ge.f32.partialorder %v3920_v8, 0.0  ;;  %v4312_v17 = vmul.f32 0.1, %v3920_v8  ;;  %v4507_v18 = vsel %vm4115_vm12, %v3919_v63, %v4311_v10  ;;  %v194_v7 = vld [vmem:[%s9329_s28 + $0x88] sm:$0xff] }
  0x4e   : > { %v5291_v20 = vunpack.c.l.bf16 %v4899_v13  ;;  %v5292_v21 = vunpack.c.l.bf16 %v4900_v14  ;;  %v6467_v22 = vmax.f32 %v9435_v2, %v3331_v11  ;;  %v6468_v23 = vmax.f32 %v9437_v3, %v3332_v12  ;;  %v195_v13 = vld [vmem:[%s9329_s28 + $0x90] sm:$0xff] }
  0x4f   : > { %9027 = vst [vmem:[%s9383_s8 + $0x10] sm:$0xff] %v8549_v16   ;;  %v4508_v24 = vsel %vm4116_vm13, %v3920_v8, %v4312_v17  ;;  %v577_v26 = vunpack.c.l.bf16 %v192_v15  ;;  %v578_v27 = vunpack.c.l.bf16 %v193_v19  ;;  %v1961_v28 = vrot.slane %v192_v15, 4 }
  0x50   : > { %v5487_v29 = vmul.f32 %v9334_v0, %v5291_v20  ;;  %v5488_v30 = vmul.f32 %v9334_v0, %v5292_v21  ;;  %v1962_v32 = vrot.slane %v193_v19, 4  ;;  %v3529_v33 = vunpack.c.l.bf16 %v199_v25  ;;  %v201_v20 = vld [vmem:[%s9329_s28 + $0xc0] sm:$0xff]  ;;  %v202_v21 = vld [vmem:[%s9329_s28 + $0xc8] sm:$0xff] }
  0x51   : > { %v779_v34 = vmul.f32 %v9334_v0, %v577_v26  ;;  %v780_v35 = vmul.f32 %v9334_v0, %v578_v27  ;;  %v2353_v36 = vunpack.c.l.bf16 %v1961_v28  ;;  %v3530_v37 = vunpack.c.l.bf16 %v200_v31 }
  0x52   : > { %v5683_v38 = vadd.f32 %v9343_v9, %v5487_v29  ;;  %v5684_v39 = vadd.f32 %v9343_v9, %v5488_v30  ;;  %v2354_v40 = vunpack.c.l.bf16 %v1962_v32  ;;  %v3725_v41 = vmul.f32 %v9334_v0, %v3529_v33 }
  0x53   : > { %v981_v42 = vadd.f32 %v9343_v9, %v779_v34  ;;  %v982_v43 = vadd.f32 %v9343_v9, %v780_v35  ;;  %v2549_v44 = vmul.f32 %v9334_v0, %v2353_v36  ;;  %v3726_v45 = vmul.f32 %v9334_v0, %v3530_v37 }
  0x54   : > { %vm5879_vm14 = vcmp.ge.f32.partialorder %v5683_v38, 0.0  ;;  %vm5880_vm15 = vcmp.ge.f32.partialorder %v5684_v39, 0.0  ;;  %v6075_v46 = vmul.f32 0.1, %v5683_v38  ;;  %v6076_v47 = vmul.f32 0.1, %v5684_v39 }
  0x55   : > { %vm1177_vm0 = vcmp.ge.f32.partialorder %v981_v42, 0.0  ;;  %vm1178_vm1 = vcmp.ge.f32.partialorder %v982_v43, 0.0  ;;  %v1373_v48 = vmul.f32 0.1, %v981_v42  ;;  %v1374_v49 = vmul.f32 0.1, %v982_v43 }
  0x56   : > { %v6271_v50 = vsel %vm5879_vm14, %v5683_v38, %v6075_v46  ;;  %v6272_v51 = vsel %vm5880_vm15, %v5684_v39, %v6076_v47  ;;  %v2550_v52 = vmul.f32 %v9334_v0, %v2354_v40  ;;  %v2745_v53 = vadd.f32 %v9343_v9, %v2549_v44 }
  0x57   : > { %v6663_v54 = vmax.f32 %v4507_v18, %v6271_v50  ;;  %v6664_v55 = vmax.f32 %v4508_v24, %v6272_v51  ;;  %v9460_v56 = vsel %vm1177_vm0, %v981_v42, %v1373_v48  ;;  %v9462_v57 = vsel %vm1178_vm1, %v982_v43, %v1374_v49 }
  0x58   : > { %v2746_v58 = vadd.f32 %v9343_v9, %v2550_v52  ;;  %vm2941_vm2 = vcmp.ge.f32.partialorder %v2745_v53, 0.0  ;;  %v3137_v59 = vmul.f32 0.1, %v2745_v53  ;;  %v3921_v60 = vadd.f32 %v9343_v9, %v3725_v41 }
  0x59   : > { %v6859_v61 = vmax.f32 %v6467_v22, %v6663_v54  ;;  %v6860_v62 = vmax.f32 %v6468_v23, %v6664_v55  ;;  %v3922_v63 = vadd.f32 %v9343_v9, %v3726_v45  ;;  %v4901_v1 = vrot.slane %v199_v25, 4 }
  0x5a   : > { %vm2942_vm3 = vcmp.ge.f32.partialorder %v2746_v58, 0.0  ;;  %v3138_v2 = vmul.f32 0.1, %v2746_v58  ;;  %v3333_v3 = vsel %vm2941_vm2, %v2745_v53, %v3137_v59  ;;  %vm4117_vm4 = vcmp.ge.f32.partialorder %v3921_v60, 0.0 }
  0x5b   : > { %v8554_v4 = vpack.c.bf16 %v6860_v62, %v6859_v61  ;;  %vm4118_vm5 = vcmp.ge.f32.partialorder %v3922_v63, 0.0  ;;  %v4313_v5 = vmul.f32 0.1, %v3921_v60  ;;  %v4314_v6 = vmul.f32 0.1, %v3922_v63 }
  0x5c   : > { %v3334_v8 = vsel %vm2942_vm3, %v2746_v58, %v3138_v2  ;;  %v4902_v10 = vrot.slane %v200_v31, 4  ;;  %v5293_v11 = vunpack.c.l.bf16 %v4901_v1  ;;  %v6469_v12 = vmax.f32 %v9460_v56, %v3333_v3  ;;  %v196_v1 = vld [vmem:[%s9329_s28 + $0x98] sm:$0xff]  ;;  %v197_v2 = vld [vmem:[%s9329_s28 + $0xa0] sm:$0xff] }
  0x5d   : > { %9028 = vst [vmem:[%s9383_s8 + $0x18] sm:$0xff] %v8554_v4   ;;  %v4509_v14 = vsel %vm4117_vm4, %v3921_v60, %v4313_v5  ;;  %v4510_v15 = vsel %vm4118_vm5, %v3922_v63, %v4314_v6  ;;  %v6470_v16 = vmax.f32 %v9462_v57, %v3334_v8  ;;  %v579_v17 = vunpack.c.l.bf16 %v194_v7 }
  0x5e   : > { %v5294_v18 = vunpack.c.l.bf16 %v4902_v10  ;;  %v5489_v19 = vmul.f32 %v9334_v0, %v5293_v11  ;;  %v580_v22 = vunpack.c.l.bf16 %v195_v13  ;;  %v1963_v23 = vrot.slane %v194_v7, 4  ;;  %v203_v11 = vld [vmem:[%s9329_s28 + $0xd0] sm:$0xff] }
  0x5f   : > { %v781_v24 = vmul.f32 %v9334_v0, %v579_v17  ;;  %v1964_v25 = vrot.slane %v195_v13, 4  ;;  %v3531_v26 = vunpack.c.l.bf16 %v201_v20  ;;  %v3532_v27 = vunpack.c.l.bf16 %v202_v21  ;;  %v204_v13 = vld [vmem:[%s9329_s28 + $0xd8] sm:$0xff] }
  0x60   : > { %v5490_v28 = vmul.f32 %v9334_v0, %v5294_v18  ;;  %v5685_v29 = vadd.f32 %v9343_v9, %v5489_v19  ;;  %v782_v30 = vmul.f32 %v9334_v0, %v580_v22  ;;  %v2355_v31 = vunpack.c.l.bf16 %v1963_v23 }
  0x61   : > { %v983_v32 = vadd.f32 %v9343_v9, %v781_v24  ;;  %v2356_v33 = vunpack.c.l.bf16 %v1964_v25  ;;  %v3727_v34 = vmul.f32 %v9334_v0, %v3531_v26  ;;  %v3728_v35 = vmul.f32 %v9334_v0, %v3532_v27 }
  0x62   : > { %v5686_v36 = vadd.f32 %v9343_v9, %v5490_v28  ;;  %vm5881_vm6 = vcmp.ge.f32.partialorder %v5685_v29, 0.0  ;;  %v6077_v37 = vmul.f32 0.1, %v5685_v29  ;;  %v984_v38 = vadd.f32 %v9343_v9, %v782_v30 }
  0x63   : > { %vm1179_vm7 = vcmp.ge.f32.partialorder %v983_v32, 0.0  ;;  %v1375_v39 = vmul.f32 0.1, %v983_v32  ;;  %v2551_v40 = vmul.f32 %v9334_v0, %v2355_v31  ;;  %v2552_v41 = vmul.f32 %v9334_v0, %v2356_v33 }
  0x64   : > { %vm5882_vm8 = vcmp.ge.f32.partialorder %v5686_v36, 0.0  ;;  %v6078_v42 = vmul.f32 0.1, %v5686_v36  ;;  %v6273_v43 = vsel %vm5881_vm6, %v5685_v29, %v6077_v37  ;;  %vm1180_vm9 = vcmp.ge.f32.partialorder %v984_v38, 0.0 }
  0x65   : > { %v6665_v44 = vmax.f32 %v4509_v14, %v6273_v43  ;;  %v1376_v45 = vmul.f32 0.1, %v984_v38  ;;  %v9486_v46 = vsel %vm1179_vm7, %v983_v32, %v1375_v39  ;;  %v2747_v47 = vadd.f32 %v9343_v9, %v2551_v40 }
  0x66   : > { %v6274_v48 = vsel %vm5882_vm8, %v5686_v36, %v6078_v42  ;;  %v2748_v49 = vadd.f32 %v9343_v9, %v2552_v41  ;;  %v3923_v50 = vadd.f32 %v9343_v9, %v3727_v34  ;;  %v3924_v51 = vadd.f32 %v9343_v9, %v3728_v35 }
  0x67   : > { %v6666_v52 = vmax.f32 %v4510_v15, %v6274_v48  ;;  %v6861_v53 = vmax.f32 %v6469_v12, %v6665_v44  ;;  %v9492_v54 = vsel %vm1180_vm9, %v984_v38, %v1376_v45  ;;  %vm2943_vm10 = vcmp.ge.f32.partialorder %v2747_v47, 0.0 }
  0x68   : > { %vm2944_vm11 = vcmp.ge.f32.partialorder %v2748_v49, 0.0  ;;  %v3139_v55 = vmul.f32 0.1, %v2747_v47  ;;  %v3140_v56 = vmul.f32 0.1, %v2748_v49  ;;  %vm4119_vm12 = vcmp.ge.f32.partialorder %v3923_v50, 0.0 }
  0x69   : > { %v6862_v57 = vmax.f32 %v6470_v16, %v6666_v52  ;;  %vm4120_vm13 = vcmp.ge.f32.partialorder %v3924_v51, 0.0  ;;  %v4315_v58 = vmul.f32 0.1, %v3923_v50  ;;  %v4316_v59 = vmul.f32 0.1, %v3924_v51 }
  0x6a   : > { %v3335_v60 = vsel %vm2943_vm10, %v2747_v47, %v3139_v55  ;;  %v3336_v61 = vsel %vm2944_vm11, %v2748_v49, %v3140_v56  ;;  %v4903_v62 = vrot.slane %v201_v20, 4  ;;  %v4904_v63 = vrot.slane %v202_v21, 4 }
  0x6b   : > { %v8559_v3 = vpack.c.bf16 %v6862_v57, %v6861_v53  ;;  %v4511_v4 = vsel %vm4119_vm12, %v3923_v50, %v4315_v58  ;;  %v4512_v5 = vsel %vm4120_vm13, %v3924_v51, %v4316_v59  ;;  %v6471_v6 = vmax.f32 %v9486_v46, %v3335_v60  ;;  %v205_v58 = vld [vmem:[%s9329_s28 + $0xe0] sm:$0xff]  ;;  %v206_v59 = vld [vmem:[%s9329_s28 + $0xe8] sm:$0xff] }
  0x6c   : > { %v5295_v7 = vunpack.c.l.bf16 %v4903_v62  ;;  %v5296_v8 = vunpack.c.l.bf16 %v4904_v63  ;;  %v6472_v10 = vmax.f32 %v9492_v54, %v3336_v61  ;;  %v581_v12 = vunpack.c.l.bf16 %v196_v1 }
  0x6d   : > { %9029 = vst [vmem:[%s9383_s8 + $0x20] sm:$0xff] %v8559_v3   ;;  %v582_v14 = vunpack.c.l.bf16 %v197_v2  ;;  %v1965_v15 = vrot.slane %v196_v1, 4  ;;  %v1966_v16 = vrot.slane %v197_v2, 4  ;;  %v3533_v17 = vunpack.c.l.bf16 %v203_v11  ;;  %v212_v3 = vld [vmem:[%s9329_s28 + $0x118] sm:$0xff] }
  0x6e   : > { %v5491_v18 = vmul.f32 %v9334_v0, %v5295_v7  ;;  %v5492_v19 = vmul.f32 %v9334_v0, %v5296_v8  ;;  %v783_v20 = vmul.f32 %v9334_v0, %v581_v12  ;;  %v3534_v21 = vunpack.c.l.bf16 %v204_v13  ;;  %v213_v7 = vld [vmem:[%s9329_s28 + $0x120] sm:$0xff] }
  0x6f   : > { %v784_v22 = vmul.f32 %v9334_v0, %v582_v14  ;;  %v2357_v23 = vunpack.c.l.bf16 %v1965_v15  ;;  %v2358_v24 = vunpack.c.l.bf16 %v1966_v16  ;;  %v3729_v25 = vmul.f32 %v9334_v0, %v3533_v17 }
  0x70   : > { %v5687_v26 = vadd.f32 %v9343_v9, %v5491_v18  ;;  %v5688_v27 = vadd.f32 %v9343_v9, %v5492_v19  ;;  %v985_v28 = vadd.f32 %v9343_v9, %v783_v20  ;;  %v3730_v29 = vmul.f32 %v9334_v0, %v3534_v21 }
  0x71   : > { %v986_v30 = vadd.f32 %v9343_v9, %v784_v22  ;;  %v2553_v31 = vmul.f32 %v9334_v0, %v2357_v23  ;;  %v2554_v32 = vmul.f32 %v9334_v0, %v2358_v24  ;;  %v3925_v33 = vadd.f32 %v9343_v9, %v3729_v25 }
  0x72   : > { %vm5883_vm14 = vcmp.ge.f32.partialorder %v5687_v26, 0.0  ;;  %vm5884_vm15 = vcmp.ge.f32.partialorder %v5688_v27, 0.0  ;;  %v6079_v34 = vmul.f32 0.1, %v5687_v26  ;;  %v6080_v35 = vmul.f32 0.1, %v5688_v27 }
  0x73   : > { %vm1181_vm0 = vcmp.ge.f32.partialorder %v985_v28, 0.0  ;;  %vm1182_vm1 = vcmp.ge.f32.partialorder %v986_v30, 0.0  ;;  %v1377_v36 = vmul.f32 0.1, %v985_v28  ;;  %v1378_v37 = vmul.f32 0.1, %v986_v30 }
  0x74   : > { %v6275_v38 = vsel %vm5883_vm14, %v5687_v26, %v6079_v34  ;;  %v6276_v39 = vsel %vm5884_vm15, %v5688_v27, %v6080_v35  ;;  %v2749_v40 = vadd.f32 %v9343_v9, %v2553_v31  ;;  %v2750_v41 = vadd.f32 %v9343_v9, %v2554_v32 }
  0x75   : > { %v6667_v42 = vmax.f32 %v4511_v4, %v6275_v38  ;;  %v6668_v43 = vmax.f32 %v4512_v5, %v6276_v39  ;;  %v9516_v44 = vsel %vm1181_vm0, %v985_v28, %v1377_v36  ;;  %v9518_v45 = vsel %vm1182_vm1, %v986_v30, %v1378_v37 }
  0x76   : > { %vm2945_vm2 = vcmp.ge.f32.partialorder %v2749_v40, 0.0  ;;  %vm2946_vm3 = vcmp.ge.f32.partialorder %v2750_v41, 0.0  ;;  %v3141_v46 = vmul.f32 0.1, %v2749_v40  ;;  %v3142_v47 = vmul.f32 0.1, %v2750_v41 }
  0x77   : > { %v6863_v48 = vmax.f32 %v6471_v6, %v6667_v42  ;;  %v6864_v49 = vmax.f32 %v6472_v10, %v6668_v43  ;;  %v3926_v50 = vadd.f32 %v9343_v9, %v3730_v29  ;;  %vm4121_vm4 = vcmp.ge.f32.partialorder %v3925_v33, 0.0 }
  0x78   : > { %v3337_v51 = vsel %vm2945_vm2, %v2749_v40, %v3141_v46  ;;  %v3338_v52 = vsel %vm2946_vm3, %v2750_v41, %v3142_v47  ;;  %v4317_v53 = vmul.f32 0.1, %v3925_v33  ;;  %v4905_v54 = vrot.slane %v203_v11, 4 }
  0x79   : > { %v8564_v55 = vpack.c.bf16 %v6864_v49, %v6863_v48  ;;  %vm4122_vm5 = vcmp.ge.f32.partialorder %v3926_v50, 0.0  ;;  %v4318_v56 = vmul.f32 0.1, %v3926_v50  ;;  %v4906_v57 = vrot.slane %v204_v13, 4  ;;  %v207_v49 = vld [vmem:[%s9329_s28 + $0xf0] sm:$0xff] }
  0x7a   : > { %v4513_v60 = vsel %vm4121_vm4, %v3925_v33, %v4317_v53  ;;  %v5297_v61 = vunpack.c.l.bf16 %v4905_v54  ;;  %v6473_v62 = vmax.f32 %v9516_v44, %v3337_v51  ;;  %v6474_v63 = vmax.f32 %v9518_v45, %v3338_v52  ;;  %v208_v53 = vld [vmem:[%s9329_s28 + $0xf8] sm:$0xff] }
  0x7b   : > { %9030 = vst [vmem:[%s9383_s8 + $0x28] sm:$0xff] %v8564_v55   ;;  %v4514_v1 = vsel %vm4122_vm5, %v3926_v50, %v4318_v56  ;;  %v5298_v2 = vunpack.c.l.bf16 %v4906_v57  ;;  %v583_v4 = vunpack.c.l.bf16 %v205_v58  ;;  %v584_v5 = vunpack.c.l.bf16 %v206_v59 }
  0x7c   : > { %v5493_v6 = vmul.f32 %v9334_v0, %v5297_v61  ;;  %v1967_v8 = vrot.slane %v205_v58, 4  ;;  %v1968_v10 = vrot.slane %v206_v59, 4  ;;  %v3535_v11 = vunpack.c.l.bf16 %v212_v3  ;;  %v214_v59 = vld [vmem:[%s9329_s28 + $0x128] sm:$0xff] }
  0x7d   : > { %v5494_v12 = vmul.f32 %v9334_v0, %v5298_v2  ;;  %v785_v13 = vmul.f32 %v9334_v0, %v583_v4  ;;  %v786_v14 = vmul.f32 %v9334_v0, %v584_v5  ;;  %v3536_v15 = vunpack.c.l.bf16 %v213_v7  ;;  %v215_v2 = vld [vmem:[%s9329_s28 + $0x130] sm:$0xff]  ;;  %v9560_v5 = vld [vmem:[%s12137_s1] ss:$0 sm:$0xff] }
  0x7e   : > { %v5689_v16 = vadd.f32 %v9343_v9, %v5493_v6  ;;  %v2359_v17 = vunpack.c.l.bf16 %v1967_v8  ;;  %v2360_v18 = vunpack.c.l.bf16 %v1968_v10  ;;  %v3731_v19 = vmul.f32 %v9334_v0, %v3535_v11 }
  0x7f   : > { %v5690_v20 = vadd.f32 %v9343_v9, %v5494_v12  ;;  %v987_v21 = vadd.f32 %v9343_v9, %v785_v13  ;;  %v988_v22 = vadd.f32 %v9343_v9, %v786_v14  ;;  %v3732_v23 = vmul.f32 %v9334_v0, %v3536_v15  ;;  %v9571_v15 = vld [vmem:[%s12138_s2] ss:$0 sm:$0xff] }
  0x80   : > { %vm5885_vm6 = vcmp.ge.f32.partialorder %v5689_v16, 0.0  ;;  %v6081_v24 = vmul.f32 0.1, %v5689_v16  ;;  %v2555_v25 = vmul.f32 %v9334_v0, %v2359_v17  ;;  %v2556_v26 = vmul.f32 %v9334_v0, %v2360_v18 }
  0x81   : > { %vm5886_vm7 = vcmp.ge.f32.partialorder %v5690_v20, 0.0  ;;  %v6082_v27 = vmul.f32 0.1, %v5690_v20  ;;  %vm1183_vm8 = vcmp.ge.f32.partialorder %v987_v21, 0.0  ;;  %vm1184_vm9 = vcmp.ge.f32.partialorder %v988_v22, 0.0 }
  0x82   : > { %v6277_v28 = vsel %vm5885_vm6, %v5689_v16, %v6081_v24  ;;  %v1379_v29 = vmul.f32 0.1, %v987_v21  ;;  %v1380_v30 = vmul.f32 0.1, %v988_v22  ;;  %v2751_v31 = vadd.f32 %v9343_v9, %v2555_v25 }
  0x83   : > { %v6278_v32 = vsel %vm5886_vm7, %v5690_v20, %v6082_v27  ;;  %v6669_v33 = vmax.f32 %v4513_v60, %v6277_v28  ;;  %v2752_v34 = vadd.f32 %v9343_v9, %v2556_v26  ;;  %v3927_v35 = vadd.f32 %v9343_v9, %v3731_v19 }
  0x84   : > { %v6670_v36 = vmax.f32 %v4514_v1, %v6278_v32  ;;  %v9543_v37 = vsel %vm1183_vm8, %v987_v21, %v1379_v29  ;;  %v9545_v38 = vsel %vm1184_vm9, %v988_v22, %v1380_v30  ;;  %vm2947_vm10 = vcmp.ge.f32.partialorder %v2751_v31, 0.0 }
  0x85   : > { %v6865_v39 = vmax.f32 %v6473_v62, %v6669_v33  ;;  %vm2948_vm11 = vcmp.ge.f32.partialorder %v2752_v34, 0.0  ;;  %v3143_v40 = vmul.f32 0.1, %v2751_v31  ;;  %v3144_v41 = vmul.f32 0.1, %v2752_v34 }
  0x86   : > { %v6866_v42 = vmax.f32 %v6474_v63, %v6670_v36  ;;  %v3928_v43 = vadd.f32 %v9343_v9, %v3732_v23  ;;  %vm4123_vm12 = vcmp.ge.f32.partialorder %v3927_v35, 0.0  ;;  %v4319_v44 = vmul.f32 0.1, %v3927_v35 }
  0x87   : > { %v3339_v45 = vsel %vm2947_vm10, %v2751_v31, %v3143_v40  ;;  %v3340_v46 = vsel %vm2948_vm11, %v2752_v34, %v3144_v41  ;;  %v4907_v47 = vrot.slane %v212_v3, 4  ;;  %v4908_v48 = vrot.slane %v213_v7, 4 }
  0x88   : > { %v8569_v50 = vpack.c.bf16 %v6866_v42, %v6865_v39  ;;  %vm4124_vm13 = vcmp.ge.f32.partialorder %v3928_v43, 0.0  ;;  %v4320_v51 = vmul.f32 0.1, %v3928_v43  ;;  %v4515_v52 = vsel %vm4123_vm12, %v3927_v35, %v4319_v44  ;;  %v209_v42 = vld [vmem:[%s9329_s28 + $0x100] sm:$0xff] }
  0x89   : > { %v5299_v54 = vunpack.c.l.bf16 %v4907_v47  ;;  %v5300_v55 = vunpack.c.l.bf16 %v4908_v48  ;;  %v6475_v56 = vmax.f32 %v9543_v37, %v3339_v45  ;;  %v6476_v57 = vmax.f32 %v9545_v38, %v3340_v46  ;;  %v210_v47 = vld [vmem:[%s9329_s28 + $0x108] sm:$0xff] }
  0x8a   : > { %9031 = vst [vmem:[%s9383_s8 + $0x30] sm:$0xff] %v8569_v50   ;;  %v4516_v58 = vsel %vm4124_vm13, %v3928_v43, %v4320_v51  ;;  %v585_v60 = vunpack.c.l.bf16 %v207_v49  ;;  %v586_v61 = vunpack.c.l.bf16 %v208_v53  ;;  %v1969_v62 = vrot.slane %v207_v49, 4 }
  0x8b   : > { %v5495_v63 = vmul.f32 %v9334_v0, %v5299_v54  ;;  %v5496_v1 = vmul.f32 %v9334_v0, %v5300_v55  ;;  %v1970_v3 = vrot.slane %v208_v53, 4  ;;  %v3537_v4 = vunpack.c.l.bf16 %v214_v59  ;;  %v216_v54 = vld [vmem:[%s9329_s28 + $0x138] sm:$0xff]  ;;  %v217_v55 = vld [vmem:[%s9329_s28 + $0x140] sm:$0xff] }
  0x8c   : > { %v787_v6 = vmul.f32 %v9560_v5, %v585_v60  ;;  %v788_v7 = vmul.f32 %v9560_v5, %v586_v61  ;;  %v2361_v8 = vunpack.c.l.bf16 %v1969_v62  ;;  %v3538_v10 = vunpack.c.l.bf16 %v215_v2 }
  0x8d   : > { %v5691_v11 = vadd.f32 %v9343_v9, %v5495_v63  ;;  %v5692_v12 = vadd.f32 %v9343_v9, %v5496_v1  ;;  %v2362_v13 = vunpack.c.l.bf16 %v1970_v3  ;;  %v3733_v0 = vmul.f32 %v9560_v5, %v3537_v4 }
  0x8e   : > { %v989_v14 = vadd.f32 %v9343_v9, %v787_v6  ;;  %v990_v16 = vadd.f32 %v9571_v15, %v788_v7  ;;  %v2557_v17 = vmul.f32 %v9560_v5, %v2361_v8  ;;  %v3734_v18 = vmul.f32 %v9560_v5, %v3538_v10 }
  0x8f   : > { %vm5887_vm14 = vcmp.ge.f32.partialorder %v5691_v11, 0.0  ;;  %vm5888_vm15 = vcmp.ge.f32.partialorder %v5692_v12, 0.0  ;;  %v6083_v19 = vmul.f32 0.1, %v5691_v11  ;;  %v6084_v20 = vmul.f32 0.1, %v5692_v12 }
  0x90   : > { %vm1185_vm0 = vcmp.ge.f32.partialorder %v989_v14, 0.0  ;;  %vm1186_vm1 = vcmp.ge.f32.partialorder %v990_v16, 0.0  ;;  %v1381_v21 = vmul.f32 0.1, %v989_v14  ;;  %v1382_v22 = vmul.f32 0.1, %v990_v16 }
  0x91   : > { %v6279_v9 = vsel %vm5887_vm14, %v5691_v11, %v6083_v19  ;;  %v6280_v23 = vsel %vm5888_vm15, %v5692_v12, %v6084_v20  ;;  %v2558_v24 = vmul.f32 %v9560_v5, %v2362_v13  ;;  %v2753_v25 = vadd.f32 %v9571_v15, %v2557_v17 }
  0x92   : > { %v6671_v26 = vmax.f32 %v4515_v52, %v6279_v9  ;;  %v6672_v27 = vmax.f32 %v4516_v58, %v6280_v23  ;;  %v9578_v28 = vsel %vm1185_vm0, %v989_v14, %v1381_v21  ;;  %v9580_v29 = vsel %vm1186_vm1, %v990_v16, %v1382_v22 }
  0x93   : > { %v2754_v30 = vadd.f32 %v9571_v15, %v2558_v24  ;;  %vm2949_vm2 = vcmp.ge.f32.partialorder %v2753_v25, 0.0  ;;  %v3145_v31 = vmul.f32 0.1, %v2753_v25  ;;  %v3929_v32 = vadd.f32 %v9571_v15, %v3733_v0 }
  0x94   : > { %v6867_v33 = vmax.f32 %v6475_v56, %v6671_v26  ;;  %v6868_v34 = vmax.f32 %v6476_v57, %v6672_v27  ;;  %v3930_v35 = vadd.f32 %v9571_v15, %v3734_v18  ;;  %v4909_v36 = vrot.slane %v214_v59, 4 }
  0x95   : > { %vm2950_vm3 = vcmp.ge.f32.partialorder %v2754_v30, 0.0  ;;  %v3146_v37 = vmul.f32 0.1, %v2754_v30  ;;  %v3341_v38 = vsel %vm2949_vm2, %v2753_v25, %v3145_v31  ;;  %vm4125_vm4 = vcmp.ge.f32.partialorder %v3929_v32, 0.0 }
  0x96   : > { %v8574_v39 = vpack.c.bf16 %v6868_v34, %v6867_v33  ;;  %vm4126_vm5 = vcmp.ge.f32.partialorder %v3930_v35, 0.0  ;;  %v4321_v40 = vmul.f32 0.1, %v3929_v32  ;;  %v4322_v41 = vmul.f32 0.1, %v3930_v35 }
  0x97   : > { %v3342_v43 = vsel %vm2950_vm3, %v2754_v30, %v3146_v37  ;;  %v4910_v44 = vrot.slane %v215_v2, 4  ;;  %v5301_v45 = vunpack.c.l.bf16 %v4909_v36  ;;  %v6477_v46 = vmax.f32 %v9578_v28, %v3341_v38  ;;  %v211_v36 = vld [vmem:[%s9329_s28 + $0x110] sm:$0xff] }
  0x98   : > { %9032 = vst [vmem:[%s9383_s8 + $0x38] sm:$0xff] %v8574_v39   ;;  %v4517_v48 = vsel %vm4125_vm4, %v3929_v32, %v4321_v40  ;;  %v4518_v49 = vsel %vm4126_vm5, %v3930_v35, %v4322_v41  ;;  %v6478_v50 = vmax.f32 %v9580_v29, %v3342_v43  ;;  %v587_v51 = vunpack.c.l.bf16 %v209_v42  ;;  %v219_v37 = vld [vmem:[%s9329_s28 + $0x150] sm:$0xff] }
  0x99   : > { %v5302_v52 = vunpack.c.l.bf16 %v4910_v44  ;;  %v5497_v53 = vmul.f32 %v9560_v5, %v5301_v45  ;;  %v588_v56 = vunpack.c.l.bf16 %v210_v47  ;;  %v1971_v57 = vrot.slane %v209_v42, 4  ;;  %v218_v45 = vld [vmem:[%s9329_s28 + $0x148] sm:$0xff] }
  0x9a   : > { %v789_v58 = vmul.f32 %v9560_v5, %v587_v51  ;;  %v1972_v59 = vrot.slane %v210_v47, 4  ;;  %v3539_v60 = vunpack.c.l.bf16 %v216_v54  ;;  %v3540_v61 = vunpack.c.l.bf16 %v217_v55  ;;  %v226_v47 = vld [vmem:[%s9329_s28 + $0x188] sm:$0xff] }
  0x9b   : > { %v5498_v62 = vmul.f32 %v9560_v5, %v5302_v52  ;;  %v5693_v63 = vadd.f32 %v9571_v15, %v5497_v53  ;;  %v790_v1 = vmul.f32 %v9560_v5, %v588_v56  ;;  %v2363_v2 = vunpack.c.l.bf16 %v1971_v57 }
  0x9c   : > { %v991_v3 = vadd.f32 %v9571_v15, %v789_v58  ;;  %v2364_v4 = vunpack.c.l.bf16 %v1972_v59  ;;  %v3735_v6 = vmul.f32 %v9560_v5, %v3539_v60  ;;  %v3736_v7 = vmul.f32 %v9560_v5, %v3540_v61 }
  0x9d   : > { %v5694_v8 = vadd.f32 %v9571_v15, %v5498_v62  ;;  %vm5889_vm6 = vcmp.ge.f32.partialorder %v5693_v63, 0.0  ;;  %v6085_v10 = vmul.f32 0.1, %v5693_v63  ;;  %v992_v11 = vadd.f32 %v9571_v15, %v790_v1 }
  0x9e   : > { %vm1187_vm7 = vcmp.ge.f32.partialorder %v991_v3, 0.0  ;;  %v1383_v12 = vmul.f32 0.1, %v991_v3  ;;  %v2559_v13 = vmul.f32 %v9560_v5, %v2363_v2  ;;  %v2560_v0 = vmul.f32 %v9560_v5, %v2364_v4 }
  0x9f   : > { %vm5890_vm8 = vcmp.ge.f32.partialorder %v5694_v8, 0.0  ;;  %v6086_v14 = vmul.f32 0.1, %v5694_v8  ;;  %v6281_v16 = vsel %vm5889_vm6, %v5693_v63, %v6085_v10  ;;  %vm1188_vm9 = vcmp.ge.f32.partialorder %v992_v11, 0.0 }
  0xa0   : > { %v6673_v17 = vmax.f32 %v4517_v48, %v6281_v16  ;;  %v1384_v18 = vmul.f32 0.1, %v992_v11  ;;  %v9604_v19 = vsel %vm1187_vm7, %v991_v3, %v1383_v12  ;;  %v2755_v20 = vadd.f32 %v9571_v15, %v2559_v13 }
  0xa1   : > { %v6282_v21 = vsel %vm5890_vm8, %v5694_v8, %v6086_v14  ;;  %v2756_v22 = vadd.f32 %v9571_v15, %v2560_v0  ;;  %v3931_v9 = vadd.f32 %v9571_v15, %v3735_v6  ;;  %v3932_v23 = vadd.f32 %v9571_v15, %v3736_v7 }
  0xa2   : > { %v6674_v24 = vmax.f32 %v4518_v49, %v6282_v21  ;;  %v6869_v25 = vmax.f32 %v6477_v46, %v6673_v17  ;;  %v9610_v26 = vsel %vm1188_vm9, %v992_v11, %v1384_v18  ;;  %vm2951_vm10 = vcmp.ge.f32.partialorder %v2755_v20, 0.0 }
  0xa3   : > { %vm2952_vm11 = vcmp.ge.f32.partialorder %v2756_v22, 0.0  ;;  %v3147_v27 = vmul.f32 0.1, %v2755_v20  ;;  %v3148_v28 = vmul.f32 0.1, %v2756_v22  ;;  %vm4127_vm12 = vcmp.ge.f32.partialorder %v3931_v9, 0.0 }
  0xa4   : > { %v6870_v29 = vmax.f32 %v6478_v50, %v6674_v24  ;;  %vm4128_vm13 = vcmp.ge.f32.partialorder %v3932_v23, 0.0  ;;  %v4323_v30 = vmul.f32 0.1, %v3931_v9  ;;  %v4324_v31 = vmul.f32 0.1, %v3932_v23 }
  0xa5   : > { %v3343_v32 = vsel %vm2951_vm10, %v2755_v20, %v3147_v27  ;;  %v3344_v33 = vsel %vm2952_vm11, %v2756_v22, %v3148_v28  ;;  %v4911_v34 = vrot.slane %v216_v54, 4  ;;  %v4912_v35 = vrot.slane %v217_v55, 4 }
  0xa6   : > { %v8579_v38 = vpack.c.bf16 %v6870_v29, %v6869_v25  ;;  %v4519_v39 = vsel %vm4127_vm12, %v3931_v9, %v4323_v30  ;;  %v4520_v40 = vsel %vm4128_vm13, %v3932_v23, %v4324_v31  ;;  %v6479_v41 = vmax.f32 %v9604_v19, %v3343_v32  ;;  %v220_v30 = vld [vmem:[%s9329_s28 + $0x158] sm:$0xff]  ;;  %v221_v31 = vld [vmem:[%s9329_s28 + $0x160] sm:$0xff] }
  0xa7   : > { %v5303_v42 = vunpack.c.l.bf16 %v4911_v34  ;;  %v5304_v43 = vunpack.c.l.bf16 %v4912_v35  ;;  %v6480_v44 = vmax.f32 %v9610_v26, %v3344_v33  ;;  %v589_v46 = vunpack.c.l.bf16 %v211_v36 }
  0xa8   : > { %9033 = vst [vmem:[%s9383_s8 + $0x40] sm:$0xff] %v8579_v38   ;;  %v590_v48 = vunpack.c.l.bf16 %v219_v37  ;;  %v1973_v49 = vrot.slane %v211_v36, 4  ;;  %v1974_v50 = vrot.slane %v219_v37, 4  ;;  %v3541_v51 = vunpack.c.l.bf16 %v218_v45  ;;  %v227_v38 = vld [vmem:[%s9329_s28 + $0x190] sm:$0xff] }
  0xa9   : > { %v5499_v52 = vmul.f32 %v9560_v5, %v5303_v42  ;;  %v5500_v53 = vmul.f32 %v9560_v5, %v5304_v43  ;;  %v791_v54 = vmul.f32 %v9560_v5, %v589_v46  ;;  %v3542_v55 = vunpack.c.l.bf16 %v226_v47  ;;  %v228_v42 = vld [vmem:[%s9329_s28 + $0x198] sm:$0xff] }
  0xaa   : > { %v792_v56 = vmul.f32 %v9560_v5, %v590_v48  ;;  %v2365_v57 = vunpack.c.l.bf16 %v1973_v49  ;;  %v2366_v58 = vunpack.c.l.bf16 %v1974_v50  ;;  %v3737_v59 = vmul.f32 %v9560_v5, %v3541_v51 }
  0xab   : > { %v5695_v60 = vadd.f32 %v9571_v15, %v5499_v52  ;;  %v5696_v61 = vadd.f32 %v9571_v15, %v5500_v53  ;;  %v993_v62 = vadd.f32 %v9571_v15, %v791_v54  ;;  %v3738_v63 = vmul.f32 %v9560_v5, %v3542_v55 }
  0xac   : > { %v994_v1 = vadd.f32 %v9571_v15, %v792_v56  ;;  %v2561_v2 = vmul.f32 %v9560_v5, %v2365_v57  ;;  %v2562_v3 = vmul.f32 %v9560_v5, %v2366_v58  ;;  %v3933_v4 = vadd.f32 %v9571_v15, %v3737_v59 }
  0xad   : > { %vm5891_vm14 = vcmp.ge.f32.partialorder %v5695_v60, 0.0  ;;  %vm5892_vm15 = vcmp.ge.f32.partialorder %v5696_v61, 0.0  ;;  %v6087_v6 = vmul.f32 0.1, %v5695_v60  ;;  %v6088_v7 = vmul.f32 0.1, %v5696_v61 }
  0xae   : > { %vm1189_vm0 = vcmp.ge.f32.partialorder %v993_v62, 0.0  ;;  %vm1190_vm1 = vcmp.ge.f32.partialorder %v994_v1, 0.0  ;;  %v1385_v8 = vmul.f32 0.1, %v993_v62  ;;  %v1386_v10 = vmul.f32 0.1, %v994_v1 }
  0xaf   : > { %v6283_v11 = vsel %vm5891_vm14, %v5695_v60, %v6087_v6  ;;  %v6284_v12 = vsel %vm5892_vm15, %v5696_v61, %v6088_v7  ;;  %v2757_v13 = vadd.f32 %v9571_v15, %v2561_v2  ;;  %v2758_v0 = vadd.f32 %v9571_v15, %v2562_v3 }
  0xb0   : > { %v6675_v14 = vmax.f32 %v4519_v39, %v6283_v11  ;;  %v6676_v16 = vmax.f32 %v4520_v40, %v6284_v12  ;;  %v9634_v17 = vsel %vm1189_vm0, %v993_v62, %v1385_v8  ;;  %v9636_v18 = vsel %vm1190_vm1, %v994_v1, %v1386_v10 }
  0xb1   : > { %vm2953_vm2 = vcmp.ge.f32.partialorder %v2757_v13, 0.0  ;;  %vm2954_vm3 = vcmp.ge.f32.partialorder %v2758_v0, 0.0  ;;  %v3149_v19 = vmul.f32 0.1, %v2757_v13  ;;  %v3150_v20 = vmul.f32 0.1, %v2758_v0 }
  0xb2   : > { %v6871_v21 = vmax.f32 %v6479_v41, %v6675_v14  ;;  %v6872_v22 = vmax.f32 %v6480_v44, %v6676_v16  ;;  %v3934_v9 = vadd.f32 %v9571_v15, %v3738_v63  ;;  %vm4129_vm4 = vcmp.ge.f32.partialorder %v3933_v4, 0.0 }
  0xb3   : > { %v3345_v23 = vsel %vm2953_vm2, %v2757_v13, %v3149_v19  ;;  %v3346_v24 = vsel %vm2954_vm3, %v2758_v0, %v3150_v20  ;;  %v4325_v25 = vmul.f32 0.1, %v3933_v4  ;;  %v4913_v26 = vrot.slane %v218_v45, 4 }
  0xb4   : > { %v8584_v27 = vpack.c.bf16 %v6872_v22, %v6871_v21  ;;  %vm4130_vm5 = vcmp.ge.f32.partialorder %v3934_v9, 0.0  ;;  %v4326_v28 = vmul.f32 0.1, %v3934_v9  ;;  %v4914_v29 = vrot.slane %v226_v47, 4  ;;  %v222_v22 = vld [vmem:[%s9329_s28 + $0x168] sm:$0xff] }
  0xb5   : > { %v4521_v32 = vsel %vm4129_vm4, %v3933_v4, %v4325_v25  ;;  %v5305_v33 = vunpack.c.l.bf16 %v4913_v26  ;;  %v6481_v34 = vmax.f32 %v9634_v17, %v3345_v23  ;;  %v6482_v35 = vmax.f32 %v9636_v18, %v3346_v24  ;;  %v223_v25 = vld [vmem:[%s9329_s28 + $0x170] sm:$0xff] }
  0xb6   : > { %9034 = vst [vmem:[%s9383_s8 + $0x48] sm:$0xff] %v8584_v27   ;;  %v4522_v36 = vsel %vm4130_vm5, %v3934_v9, %v4326_v28  ;;  %v5306_v37 = vunpack.c.l.bf16 %v4914_v29  ;;  %v591_v39 = vunpack.c.l.bf16 %v220_v30  ;;  %v592_v40 = vunpack.c.l.bf16 %v221_v31 }
  0xb7   : > { %v5501_v41 = vmul.f32 %v9560_v5, %v5305_v33  ;;  %v1975_v43 = vrot.slane %v220_v30, 4  ;;  %v1976_v44 = vrot.slane %v221_v31, 4  ;;  %v3543_v45 = vunpack.c.l.bf16 %v227_v38  ;;  %v229_v31 = vld [vmem:[%s9329_s28 + $0x1a0] sm:$0xff] }
  0xb8   : > { %v5502_v46 = vmul.f32 %v9560_v5, %v5306_v37  ;;  %v793_v47 = vmul.f32 %v9560_v5, %v591_v39  ;;  %v794_v48 = vmul.f32 %v9560_v5, %v592_v40  ;;  %v3544_v49 = vunpack.c.l.bf16 %v228_v42  ;;  %v230_v37 = vld [vmem:[%s9329_s28 + $0x1a8] sm:$0xff] }
  0xb9   : > { %v5697_v50 = vadd.f32 %v9571_v15, %v5501_v41  ;;  %v2367_v51 = vunpack.c.l.bf16 %v1975_v43  ;;  %v2368_v52 = vunpack.c.l.bf16 %v1976_v44  ;;  %v3739_v53 = vmul.f32 %v9560_v5, %v3543_v45 }
  0xba   : > { %v5698_v54 = vadd.f32 %v9571_v15, %v5502_v46  ;;  %v995_v55 = vadd.f32 %v9571_v15, %v793_v47  ;;  %v996_v56 = vadd.f32 %v9571_v15, %v794_v48  ;;  %v3740_v57 = vmul.f32 %v9560_v5, %v3544_v49 }
  0xbb   : > { %vm5893_vm6 = vcmp.ge.f32.partialorder %v5697_v50, 0.0  ;;  %v6089_v58 = vmul.f32 0.1, %v5697_v50  ;;  %v2563_v59 = vmul.f32 %v9560_v5, %v2367_v51  ;;  %v2564_v60 = vmul.f32 %v9560_v5, %v2368_v52 }
  0xbc   : > { %vm5894_vm7 = vcmp.ge.f32.partialorder %v5698_v54, 0.0  ;;  %v6090_v61 = vmul.f32 0.1, %v5698_v54  ;;  %vm1191_vm8 = vcmp.ge.f32.partialorder %v995_v55, 0.0  ;;  %vm1192_vm9 = vcmp.ge.f32.partialorder %v996_v56, 0.0 }
  0xbd   : > { %v6285_v62 = vsel %vm5893_vm6, %v5697_v50, %v6089_v58  ;;  %v1387_v63 = vmul.f32 0.1, %v995_v55  ;;  %v1388_v1 = vmul.f32 0.1, %v996_v56  ;;  %v2759_v2 = vadd.f32 %v9571_v15, %v2563_v59 }
  0xbe   : > { %v6286_v3 = vsel %vm5894_vm7, %v5698_v54, %v6090_v61  ;;  %v6677_v4 = vmax.f32 %v4521_v32, %v6285_v62  ;;  %v2760_v6 = vadd.f32 %v9571_v15, %v2564_v60  ;;  %v3935_v7 = vadd.f32 %v9571_v15, %v3739_v53 }
  0xbf   : > { %v6678_v8 = vmax.f32 %v4522_v36, %v6286_v3  ;;  %v9661_v10 = vsel %vm1191_vm8, %v995_v55, %v1387_v63  ;;  %v9663_v11 = vsel %vm1192_vm9, %v996_v56, %v1388_v1  ;;  %vm2955_vm10 = vcmp.ge.f32.partialorder %v2759_v2, 0.0 }
  0xc0   : > { %v6873_v12 = vmax.f32 %v6481_v34, %v6677_v4  ;;  %vm2956_vm11 = vcmp.ge.f32.partialorder %v2760_v6, 0.0  ;;  %v3151_v13 = vmul.f32 0.1, %v2759_v2  ;;  %v3152_v0 = vmul.f32 0.1, %v2760_v6 }
  0xc1   : > { %v6874_v14 = vmax.f32 %v6482_v35, %v6678_v8  ;;  %v3936_v16 = vadd.f32 %v9571_v15, %v3740_v57  ;;  %vm4131_vm12 = vcmp.ge.f32.partialorder %v3935_v7, 0.0  ;;  %v4327_v17 = vmul.f32 0.1, %v3935_v7 }
  0xc2   : > { %v3347_v18 = vsel %vm2955_vm10, %v2759_v2, %v3151_v13  ;;  %v3348_v19 = vsel %vm2956_vm11, %v2760_v6, %v3152_v0  ;;  %v4915_v20 = vrot.slane %v227_v38, 4  ;;  %v4916_v21 = vrot.slane %v228_v42, 4 }
  0xc3   : > { %v8589_v9 = vpack.c.bf16 %v6874_v14, %v6873_v12  ;;  %vm4132_vm13 = vcmp.ge.f32.partialorder %v3936_v16, 0.0  ;;  %v4328_v23 = vmul.f32 0.1, %v3936_v16  ;;  %v4523_v24 = vsel %vm4131_vm12, %v3935_v7, %v4327_v17  ;;  %v224_v14 = vld [vmem:[%s9329_s28 + $0x178] sm:$0xff] }
  0xc4   : > { %v5307_v26 = vunpack.c.l.bf16 %v4915_v20  ;;  %v5308_v27 = vunpack.c.l.bf16 %v4916_v21  ;;  %v6483_v28 = vmax.f32 %v9661_v10, %v3347_v18  ;;  %v6484_v29 = vmax.f32 %v9663_v11, %v3348_v19  ;;  %v225_v20 = vld [vmem:[%s9329_s28 + $0x180] sm:$0xff] }
  0xc5   : > { %9035 = vst [vmem:[%s9383_s8 + $0x50] sm:$0xff] %v8589_v9   ;;  %v4524_v30 = vsel %vm4132_vm13, %v3936_v16, %v4328_v23  ;;  %v593_v32 = vunpack.c.l.bf16 %v222_v22  ;;  %v594_v33 = vunpack.c.l.bf16 %v223_v25  ;;  %v1977_v34 = vrot.slane %v222_v22, 4 }
  0xc6   : > { %v5503_v35 = vmul.f32 %v9560_v5, %v5307_v26  ;;  %v5504_v36 = vmul.f32 %v9560_v5, %v5308_v27  ;;  %v1978_v38 = vrot.slane %v223_v25, 4  ;;  %v3545_v39 = vunpack.c.l.bf16 %v229_v31  ;;  %v231_v26 = vld [vmem:[%s9329_s28 + $0x1b0] sm:$0xff]  ;;  %v232_v27 = vld [vmem:[%s9329_s28 + $0x1b8] sm:$0xff] }
  0xc7   : > { %v795_v40 = vmul.f32 %v9560_v5, %v593_v32  ;;  %v796_v41 = vmul.f32 %v9560_v5, %v594_v33  ;;  %v2369_v42 = vunpack.c.l.bf16 %v1977_v34  ;;  %v3546_v43 = vunpack.c.l.bf16 %v230_v37 }
  0xc8   : > { %v5699_v44 = vadd.f32 %v9571_v15, %v5503_v35  ;;  %v5700_v45 = vadd.f32 %v9571_v15, %v5504_v36  ;;  %v2370_v46 = vunpack.c.l.bf16 %v1978_v38  ;;  %v3741_v47 = vmul.f32 %v9560_v5, %v3545_v39 }
  0xc9   : > { %v997_v48 = vadd.f32 %v9571_v15, %v795_v40  ;;  %v998_v49 = vadd.f32 %v9571_v15, %v796_v41  ;;  %v2565_v50 = vmul.f32 %v9560_v5, %v2369_v42  ;;  %v3742_v51 = vmul.f32 %v9560_v5, %v3546_v43 }
  0xca   : > { %vm5895_vm14 = vcmp.ge.f32.partialorder %v5699_v44, 0.0  ;;  %vm5896_vm15 = vcmp.ge.f32.partialorder %v5700_v45, 0.0  ;;  %v6091_v52 = vmul.f32 0.1, %v5699_v44  ;;  %v6092_v53 = vmul.f32 0.1, %v5700_v45 }
  0xcb   : > { %vm1193_vm0 = vcmp.ge.f32.partialorder %v997_v48, 0.0  ;;  %vm1194_vm1 = vcmp.ge.f32.partialorder %v998_v49, 0.0  ;;  %v1389_v54 = vmul.f32 0.1, %v997_v48  ;;  %v1390_v55 = vmul.f32 0.1, %v998_v49 }
  0xcc   : > { %v6287_v56 = vsel %vm5895_vm14, %v5699_v44, %v6091_v52  ;;  %v6288_v57 = vsel %vm5896_vm15, %v5700_v45, %v6092_v53  ;;  %v2566_v58 = vmul.f32 %v9560_v5, %v2370_v46  ;;  %v2761_v59 = vadd.f32 %v9571_v15, %v2565_v50 }
  0xcd   : > { %v6679_v60 = vmax.f32 %v4523_v24, %v6287_v56  ;;  %v6680_v61 = vmax.f32 %v4524_v30, %v6288_v57  ;;  %v9686_v62 = vsel %vm1193_vm0, %v997_v48, %v1389_v54  ;;  %v9688_v63 = vsel %vm1194_vm1, %v998_v49, %v1390_v55 }
  0xce   : > { %v2762_v1 = vadd.f32 %v9571_v15, %v2566_v58  ;;  %vm2957_vm2 = vcmp.ge.f32.partialorder %v2761_v59, 0.0  ;;  %v3153_v2 = vmul.f32 0.1, %v2761_v59  ;;  %v3937_v3 = vadd.f32 %v9571_v15, %v3741_v47 }
  0xcf   : > { %v6875_v4 = vmax.f32 %v6483_v28, %v6679_v60  ;;  %v6876_v6 = vmax.f32 %v6484_v29, %v6680_v61  ;;  %v3938_v7 = vadd.f32 %v9571_v15, %v3742_v51  ;;  %v4917_v8 = vrot.slane %v229_v31, 4 }
  0xd0   : > { %vm2958_vm3 = vcmp.ge.f32.partialorder %v2762_v1, 0.0  ;;  %v3154_v10 = vmul.f32 0.1, %v2762_v1  ;;  %v3349_v11 = vsel %vm2957_vm2, %v2761_v59, %v3153_v2  ;;  %vm4133_vm4 = vcmp.ge.f32.partialorder %v3937_v3, 0.0 }
  0xd1   : > { %v8594_v12 = vpack.c.bf16 %v6876_v6, %v6875_v4  ;;  %vm4134_vm5 = vcmp.ge.f32.partialorder %v3938_v7, 0.0  ;;  %v4329_v13 = vmul.f32 0.1, %v3937_v3  ;;  %v4330_v0 = vmul.f32 0.1, %v3938_v7 }
  0xd2   : > { %v3350_v16 = vsel %vm2958_vm3, %v2762_v1, %v3154_v10  ;;  %v4918_v17 = vrot.slane %v230_v37, 4  ;;  %v5309_v18 = vunpack.c.l.bf16 %v4917_v8  ;;  %v6485_v19 = vmax.f32 %v9686_v62, %v3349_v11  ;;  %v233_v8 = vld [vmem:[%s9329_s28 + $0x1c0] sm:$0xff]  ;;  %v234_v10 = vld [vmem:[%s9329_s28 + $0x1c8] sm:$0xff] }
  0xd3   : > { %9036 = vst [vmem:[%s9383_s8 + $0x58] sm:$0xff] %v8594_v12   ;;  %v4525_v21 = vsel %vm4133_vm4, %v3937_v3, %v4329_v13  ;;  %v4526_v22 = vsel %vm4134_vm5, %v3938_v7, %v4330_v0  ;;  %v6486_v9 = vmax.f32 %v9688_v63, %v3350_v16  ;;  %v595_v23 = vunpack.c.l.bf16 %v224_v14 }
  0xd4   : > { %v5310_v24 = vunpack.c.l.bf16 %v4918_v17  ;;  %v5505_v25 = vmul.f32 %v9560_v5, %v5309_v18  ;;  %v596_v28 = vunpack.c.l.bf16 %v225_v20  ;;  %v1979_v29 = vrot.slane %v224_v14, 4  ;;  %v240_v18 = vld [vmem:[%s9329_s28 + $0x1f8] sm:$0xff] }
  0xd5   : > { %v797_v30 = vmul.f32 %v9560_v5, %v595_v23  ;;  %v1980_v31 = vrot.slane %v225_v20, 4  ;;  %v3547_v32 = vunpack.c.l.bf16 %v231_v26  ;;  %v3548_v33 = vunpack.c.l.bf16 %v232_v27  ;;  %v241_v20 = vld [vmem:[%s9329_s28 + $0x200] sm:$0xff] }
  0xd6   : > { %v5506_v34 = vmul.f32 %v9560_v5, %v5310_v24  ;;  %v5701_v35 = vadd.f32 %v9571_v15, %v5505_v25  ;;  %v798_v36 = vmul.f32 %v9560_v5, %v596_v28  ;;  %v2371_v37 = vunpack.c.l.bf16 %v1979_v29 }
  0xd7   : > { %v999_v38 = vadd.f32 %v9571_v15, %v797_v30  ;;  %v2372_v39 = vunpack.c.l.bf16 %v1980_v31  ;;  %v3743_v40 = vmul.f32 %v9560_v5, %v3547_v32  ;;  %v3744_v41 = vmul.f32 %v9560_v5, %v3548_v33 }
  0xd8   : > { %v5702_v42 = vadd.f32 %v9571_v15, %v5506_v34  ;;  %vm5897_vm6 = vcmp.ge.f32.partialorder %v5701_v35, 0.0  ;;  %v6093_v43 = vmul.f32 0.1, %v5701_v35  ;;  %v1000_v44 = vadd.f32 %v9571_v15, %v798_v36 }
  0xd9   : > { %vm1195_vm7 = vcmp.ge.f32.partialorder %v999_v38, 0.0  ;;  %v1391_v45 = vmul.f32 0.1, %v999_v38  ;;  %v2567_v46 = vmul.f32 %v9560_v5, %v2371_v37  ;;  %v2568_v47 = vmul.f32 %v9560_v5, %v2372_v39 }
  0xda   : > { %vm5898_vm8 = vcmp.ge.f32.partialorder %v5702_v42, 0.0  ;;  %v6094_v48 = vmul.f32 0.1, %v5702_v42  ;;  %v6289_v49 = vsel %vm5897_vm6, %v5701_v35, %v6093_v43  ;;  %vm1196_vm9 = vcmp.ge.f32.partialorder %v1000_v44, 0.0 }
  0xdb   : > { %v6681_v50 = vmax.f32 %v4525_v21, %v6289_v49  ;;  %v1392_v51 = vmul.f32 0.1, %v1000_v44  ;;  %v9712_v52 = vsel %vm1195_vm7, %v999_v38, %v1391_v45  ;;  %v2763_v53 = vadd.f32 %v9571_v15, %v2567_v46 }
  0xdc   : > { %v6290_v54 = vsel %vm5898_vm8, %v5702_v42, %v6094_v48  ;;  %v2764_v55 = vadd.f32 %v9571_v15, %v2568_v47  ;;  %v3939_v56 = vadd.f32 %v9571_v15, %v3743_v40  ;;  %v3940_v57 = vadd.f32 %v9571_v15, %v3744_v41 }
  0xdd   : > { %v6682_v58 = vmax.f32 %v4526_v22, %v6290_v54  ;;  %v6877_v59 = vmax.f32 %v6485_v19, %v6681_v50  ;;  %v9718_v60 = vsel %vm1196_vm9, %v1000_v44, %v1392_v51  ;;  %vm2959_vm10 = vcmp.ge.f32.partialorder %v2763_v53, 0.0 }
  0xde   : > { %vm2960_vm11 = vcmp.ge.f32.partialorder %v2764_v55, 0.0  ;;  %v3155_v61 = vmul.f32 0.1, %v2763_v53  ;;  %v3156_v62 = vmul.f32 0.1, %v2764_v55  ;;  %vm4135_vm12 = vcmp.ge.f32.partialorder %v3939_v56, 0.0 }
  0xdf   : > { %v6878_v63 = vmax.f32 %v6486_v9, %v6682_v58  ;;  %vm4136_vm13 = vcmp.ge.f32.partialorder %v3940_v57, 0.0  ;;  %v4331_v1 = vmul.f32 0.1, %v3939_v56  ;;  %v4332_v2 = vmul.f32 0.1, %v3940_v57 }
  0xe0   : > { %v3351_v3 = vsel %vm2959_vm10, %v2763_v53, %v3155_v61  ;;  %v3352_v4 = vsel %vm2960_vm11, %v2764_v55, %v3156_v62  ;;  %v4919_v6 = vrot.slane %v231_v26, 4  ;;  %v4920_v7 = vrot.slane %v232_v27, 4 }
  0xe1   : > { %v8599_v11 = vpack.c.bf16 %v6878_v63, %v6877_v59  ;;  %v4527_v12 = vsel %vm4135_vm12, %v3939_v56, %v4331_v1  ;;  %v4528_v13 = vsel %vm4136_vm13, %v3940_v57, %v4332_v2  ;;  %v6487_v0 = vmax.f32 %v9712_v52, %v3351_v3  ;;  %v235_v1 = vld [vmem:[%s9329_s28 + $0x1d0] sm:$0xff]  ;;  %v236_v2 = vld [vmem:[%s9329_s28 + $0x1d8] sm:$0xff] }
  0xe2   : > { %v5311_v14 = vunpack.c.l.bf16 %v4919_v6  ;;  %v5312_v16 = vunpack.c.l.bf16 %v4920_v7  ;;  %v6488_v17 = vmax.f32 %v9718_v60, %v3352_v4  ;;  %v597_v19 = vunpack.c.l.bf16 %v233_v8 }
  0xe3   : > { %9037 = vst [vmem:[%s9383_s8 + $0x60] sm:$0xff] %v8599_v11   ;;  %v598_v21 = vunpack.c.l.bf16 %v234_v10  ;;  %v1981_v22 = vrot.slane %v233_v8, 4  ;;  %v1982_v9 = vrot.slane %v234_v10, 4  ;;  %v3549_v23 = vunpack.c.l.bf16 %v240_v18  ;;  %v242_v11 = vld [vmem:[%s9329_s28 + $0x208] sm:$0xff] }
  0xe4   : > { %v5507_v24 = vmul.f32 %v9560_v5, %v5311_v14  ;;  %v5508_v25 = vmul.f32 %v9560_v5, %v5312_v16  ;;  %v799_v26 = vmul.f32 %v9560_v5, %v597_v19  ;;  %v3550_v27 = vunpack.c.l.bf16 %v241_v20  ;;  %v243_v14 = vld [vmem:[%s9329_s28 + $0x210] sm:$0xff] }
  0xe5   : > { %v800_v28 = vmul.f32 %v9560_v5, %v598_v21  ;;  %v2373_v29 = vunpack.c.l.bf16 %v1981_v22  ;;  %v2374_v30 = vunpack.c.l.bf16 %v1982_v9  ;;  %v3745_v31 = vmul.f32 %v9560_v5, %v3549_v23 }
  0xe6   : > { %v5703_v32 = vadd.f32 %v9571_v15, %v5507_v24  ;;  %v5704_v33 = vadd.f32 %v9571_v15, %v5508_v25  ;;  %v1001_v34 = vadd.f32 %v9571_v15, %v799_v26  ;;  %v3746_v35 = vmul.f32 %v9560_v5, %v3550_v27 }
  0xe7   : > { %v1002_v36 = vadd.f32 %v9571_v15, %v800_v28  ;;  %v2569_v37 = vmul.f32 %v9560_v5, %v2373_v29  ;;  %v2570_v38 = vmul.f32 %v9560_v5, %v2374_v30  ;;  %v3941_v39 = vadd.f32 %v9571_v15, %v3745_v31 }
  0xe8   : > { %vm5899_vm14 = vcmp.ge.f32.partialorder %v5703_v32, 0.0  ;;  %vm5900_vm15 = vcmp.ge.f32.partialorder %v5704_v33, 0.0  ;;  %v6095_v40 = vmul.f32 0.1, %v5703_v32  ;;  %v6096_v41 = vmul.f32 0.1, %v5704_v33 }
  0xe9   : > { %vm1197_vm0 = vcmp.ge.f32.partialorder %v1001_v34, 0.0  ;;  %vm1198_vm1 = vcmp.ge.f32.partialorder %v1002_v36, 0.0  ;;  %v1393_v42 = vmul.f32 0.1, %v1001_v34  ;;  %v1394_v43 = vmul.f32 0.1, %v1002_v36 }
  0xea   : > { %v6291_v44 = vsel %vm5899_vm14, %v5703_v32, %v6095_v40  ;;  %v6292_v45 = vsel %vm5900_vm15, %v5704_v33, %v6096_v41  ;;  %v2765_v46 = vadd.f32 %v9571_v15, %v2569_v37  ;;  %v2766_v47 = vadd.f32 %v9571_v15, %v2570_v38 }
  0xeb   : > { %v6683_v48 = vmax.f32 %v4527_v12, %v6291_v44  ;;  %v6684_v49 = vmax.f32 %v4528_v13, %v6292_v45  ;;  %v9742_v50 = vsel %vm1197_vm0, %v1001_v34, %v1393_v42  ;;  %v9744_v51 = vsel %vm1198_vm1, %v1002_v36, %v1394_v43 }
  0xec   : > { %vm2961_vm2 = vcmp.ge.f32.partialorder %v2765_v46, 0.0  ;;  %vm2962_vm3 = vcmp.ge.f32.partialorder %v2766_v47, 0.0  ;;  %v3157_v52 = vmul.f32 0.1, %v2765_v46  ;;  %v3158_v53 = vmul.f32 0.1, %v2766_v47 }
  0xed   : > { %v6879_v54 = vmax.f32 %v6487_v0, %v6683_v48  ;;  %v6880_v55 = vmax.f32 %v6488_v17, %v6684_v49  ;;  %v3942_v56 = vadd.f32 %v9571_v15, %v3746_v35  ;;  %vm4137_vm4 = vcmp.ge.f32.partialorder %v3941_v39, 0.0 }
  0xee   : > { %v3353_v57 = vsel %vm2961_vm2, %v2765_v46, %v3157_v52  ;;  %v3354_v58 = vsel %vm2962_vm3, %v2766_v47, %v3158_v53  ;;  %v4333_v59 = vmul.f32 0.1, %v3941_v39  ;;  %v4921_v60 = vrot.slane %v240_v18, 4 }
  0xef   : > { %v8604_v61 = vpack.c.bf16 %v6880_v55, %v6879_v54  ;;  %vm4138_vm5 = vcmp.ge.f32.partialorder %v3942_v56, 0.0  ;;  %v4334_v62 = vmul.f32 0.1, %v3942_v56  ;;  %v4922_v63 = vrot.slane %v241_v20, 4  ;;  %v237_v55 = vld [vmem:[%s9329_s28 + $0x1e0] sm:$0xff] }
  0xf0   : > { %v4529_v3 = vsel %vm4137_vm4, %v3941_v39, %v4333_v59  ;;  %v5313_v4 = vunpack.c.l.bf16 %v4921_v60  ;;  %v6489_v6 = vmax.f32 %v9742_v50, %v3353_v57  ;;  %v6490_v7 = vmax.f32 %v9744_v51, %v3354_v58  ;;  %v238_v59 = vld [vmem:[%s9329_s28 + $0x1e8] sm:$0xff] }
  0xf1   : > { %9038 = vst [vmem:[%s9383_s8 + $0x68] sm:$0xff] %v8604_v61   ;;  %v4530_v8 = vsel %vm4138_vm5, %v3942_v56, %v4334_v62  ;;  %v5314_v10 = vunpack.c.l.bf16 %v4922_v63  ;;  %v599_v12 = vunpack.c.l.bf16 %v235_v1  ;;  %v600_v13 = vunpack.c.l.bf16 %v236_v2 }
  0xf2   : > { %v5509_v0 = vmul.f32 %v9560_v5, %v5313_v4  ;;  %v1983_v16 = vrot.slane %v235_v1, 4  ;;  %v1984_v17 = vrot.slane %v236_v2, 4  ;;  %v3551_v18 = vunpack.c.l.bf16 %v242_v11  ;;  %v244_v2 = vld [vmem:[%s9329_s28 + $0x218] sm:$0xff] }
  0xf3   : > { %v5510_v19 = vmul.f32 %v9560_v5, %v5314_v10  ;;  %v801_v20 = vmul.f32 %v9560_v5, %v599_v12  ;;  %v802_v21 = vmul.f32 %v9560_v5, %v600_v13  ;;  %v3552_v22 = vunpack.c.l.bf16 %v243_v14  ;;  %v245_v10 = vld [vmem:[%s9329_s28 + $0x220] sm:$0xff] }
  0xf4   : > { %v5705_v9 = vadd.f32 %v9571_v15, %v5509_v0  ;;  %v2375_v23 = vunpack.c.l.bf16 %v1983_v16  ;;  %v2376_v24 = vunpack.c.l.bf16 %v1984_v17  ;;  %v3747_v25 = vmul.f32 %v9560_v5, %v3551_v18  ;;  %v9786_v13 = vld [vmem:[%s12137_s1] ss:$0 sm:$0xff] }
  0xf5   : > { %v5706_v26 = vadd.f32 %v9571_v15, %v5510_v19  ;;  %v1003_v27 = vadd.f32 %v9571_v15, %v801_v20  ;;  %v1004_v28 = vadd.f32 %v9571_v15, %v802_v21  ;;  %v3748_v29 = vmul.f32 %v9560_v5, %v3552_v22  ;;  %v9797_v22 = vld [vmem:[%s12138_s2] ss:$0 sm:$0xff] }
  0xf6   : > { %vm5901_vm6 = vcmp.ge.f32.partialorder %v5705_v9, 0.0  ;;  %v6097_v30 = vmul.f32 0.1, %v5705_v9  ;;  %v2571_v31 = vmul.f32 %v9560_v5, %v2375_v23  ;;  %v2572_v32 = vmul.f32 %v9560_v5, %v2376_v24 }
  0xf7   : > { %vm5902_vm7 = vcmp.ge.f32.partialorder %v5706_v26, 0.0  ;;  %v6098_v33 = vmul.f32 0.1, %v5706_v26  ;;  %vm1199_vm8 = vcmp.ge.f32.partialorder %v1003_v27, 0.0  ;;  %vm1200_vm9 = vcmp.ge.f32.partialorder %v1004_v28, 0.0 }
  0xf8   : > { %v6293_v34 = vsel %vm5901_vm6, %v5705_v9, %v6097_v30  ;;  %v1395_v35 = vmul.f32 0.1, %v1003_v27  ;;  %v1396_v36 = vmul.f32 0.1, %v1004_v28  ;;  %v2767_v37 = vadd.f32 %v9571_v15, %v2571_v31 }
  0xf9   : > { %v6294_v38 = vsel %vm5902_vm7, %v5706_v26, %v6098_v33  ;;  %v6685_v39 = vmax.f32 %v4529_v3, %v6293_v34  ;;  %v2768_v40 = vadd.f32 %v9571_v15, %v2572_v32  ;;  %v3943_v41 = vadd.f32 %v9571_v15, %v3747_v25 }
  0xfa   : > { %v6686_v42 = vmax.f32 %v4530_v8, %v6294_v38  ;;  %v9769_v43 = vsel %vm1199_vm8, %v1003_v27, %v1395_v35  ;;  %v9771_v44 = vsel %vm1200_vm9, %v1004_v28, %v1396_v36  ;;  %vm2963_vm10 = vcmp.ge.f32.partialorder %v2767_v37, 0.0 }
  0xfb   : > { %v6881_v45 = vmax.f32 %v6489_v6, %v6685_v39  ;;  %vm2964_vm11 = vcmp.ge.f32.partialorder %v2768_v40, 0.0  ;;  %v3159_v46 = vmul.f32 0.1, %v2767_v37  ;;  %v3160_v47 = vmul.f32 0.1, %v2768_v40 }
  0xfc   : > { %v6882_v48 = vmax.f32 %v6490_v7, %v6686_v42  ;;  %v3944_v49 = vadd.f32 %v9571_v15, %v3748_v29  ;;  %vm4139_vm12 = vcmp.ge.f32.partialorder %v3943_v41, 0.0  ;;  %v4335_v50 = vmul.f32 0.1, %v3943_v41 }
  0xfd   : > { %v3355_v51 = vsel %vm2963_vm10, %v2767_v37, %v3159_v46  ;;  %v3356_v52 = vsel %vm2964_vm11, %v2768_v40, %v3160_v47  ;;  %v4923_v53 = vrot.slane %v242_v11, 4  ;;  %v4924_v54 = vrot.slane %v243_v14, 4 }
  0xfe   : > { %v8609_v56 = vpack.c.bf16 %v6882_v48, %v6881_v45  ;;  %vm4140_vm13 = vcmp.ge.f32.partialorder %v3944_v49, 0.0  ;;  %v4336_v57 = vmul.f32 0.1, %v3944_v49  ;;  %v4531_v58 = vsel %vm4139_vm12, %v3943_v41, %v4335_v50  ;;  %v239_v48 = vld [vmem:[%s9329_s28 + $0x1f0] sm:$0xff] }
  0xff   : > { %v5315_v60 = vunpack.c.l.bf16 %v4923_v53  ;;  %v5316_v61 = vunpack.c.l.bf16 %v4924_v54  ;;  %v6491_v62 = vmax.f32 %v9769_v43, %v3355_v51  ;;  %v6492_v63 = vmax.f32 %v9771_v44, %v3356_v52  ;;  %v247_v53 = vld [vmem:[%s9329_s28 + $0x230] sm:$0xff] }
 0x100   : > { %9039 = vst [vmem:[%s9383_s8 + $0x70] sm:$0xff] %v8609_v56   ;;  %v4532_v1 = vsel %vm4140_vm13, %v3944_v49, %v4336_v57  ;;  %v601_v3 = vunpack.c.l.bf16 %v237_v55  ;;  %v602_v4 = vunpack.c.l.bf16 %v238_v59  ;;  %v1985_v6 = vrot.slane %v237_v55, 4 }
 0x101   : > { %v5511_v7 = vmul.f32 %v9560_v5, %v5315_v60  ;;  %v5512_v8 = vmul.f32 %v9560_v5, %v5316_v61  ;;  %v1986_v11 = vrot.slane %v238_v59, 4  ;;  %v3553_v12 = vunpack.c.l.bf16 %v244_v2  ;;  %v246_v60 = vld [vmem:[%s9329_s28 + $0x228] sm:$0xff] }
 0x102   : > { %v803_v0 = vmul.f32 %v9786_v13, %v601_v3  ;;  %v804_v14 = vmul.f32 %v9786_v13, %v602_v4  ;;  %v2377_v16 = vunpack.c.l.bf16 %v1985_v6  ;;  %v3554_v17 = vunpack.c.l.bf16 %v245_v10  ;;  %v254_v61 = vld [vmem:[%s9329_s28 + $0x268] sm:$0xff] }
 0x103   : > { %v5707_v18 = vadd.f32 %v9571_v15, %v5511_v7  ;;  %v5708_v19 = vadd.f32 %v9571_v15, %v5512_v8  ;;  %v2378_v20 = vunpack.c.l.bf16 %v1986_v11  ;;  %v3749_v5 = vmul.f32 %v9786_v13, %v3553_v12 }
 0x104   : > { %v1005_v21 = vadd.f32 %v9571_v15, %v803_v0  ;;  %v1006_v9 = vadd.f32 %v9797_v22, %v804_v14  ;;  %v2573_v23 = vmul.f32 %v9786_v13, %v2377_v16  ;;  %v3750_v24 = vmul.f32 %v9786_v13, %v3554_v17 }
 0x105   : > { %vm5903_vm14 = vcmp.ge.f32.partialorder %v5707_v18, 0.0  ;;  %vm5904_vm15 = vcmp.ge.f32.partialorder %v5708_v19, 0.0  ;;  %v6099_v25 = vmul.f32 0.1, %v5707_v18  ;;  %v6100_v26 = vmul.f32 0.1, %v5708_v19 }
 0x106   : > { %vm1201_vm0 = vcmp.ge.f32.partialorder %v1005_v21, 0.0  ;;  %vm1202_vm1 = vcmp.ge.f32.partialorder %v1006_v9, 0.0  ;;  %v1397_v27 = vmul.f32 0.1, %v1005_v21  ;;  %v1398_v28 = vmul.f32 0.1, %v1006_v9 }
 0x107   : > { %v6295_v15 = vsel %vm5903_vm14, %v5707_v18, %v6099_v25  ;;  %v6296_v29 = vsel %vm5904_vm15, %v5708_v19, %v6100_v26  ;;  %v2574_v30 = vmul.f32 %v9786_v13, %v2378_v20  ;;  %v2769_v31 = vadd.f32 %v9797_v22, %v2573_v23 }
 0x108   : > { %v6687_v32 = vmax.f32 %v4531_v58, %v6295_v15  ;;  %v6688_v33 = vmax.f32 %v4532_v1, %v6296_v29  ;;  %v9804_v34 = vsel %vm1201_vm0, %v1005_v21, %v1397_v27  ;;  %v9806_v35 = vsel %vm1202_vm1, %v1006_v9, %v1398_v28 }
 0x109   : > { %v2770_v36 = vadd.f32 %v9797_v22, %v2574_v30  ;;  %vm2965_vm2 = vcmp.ge.f32.partialorder %v2769_v31, 0.0  ;;  %v3161_v37 = vmul.f32 0.1, %v2769_v31  ;;  %v3945_v38 = vadd.f32 %v9797_v22, %v3749_v5 }
 0x10a   : > { %v6883_v39 = vmax.f32 %v6491_v62, %v6687_v32  ;;  %v6884_v40 = vmax.f32 %v6492_v63, %v6688_v33  ;;  %v3946_v41 = vadd.f32 %v9797_v22, %v3750_v24  ;;  %v4925_v42 = vrot.slane %v244_v2, 4 }
 0x10b   : > { %vm2966_vm3 = vcmp.ge.f32.partialorder %v2770_v36, 0.0  ;;  %v3162_v43 = vmul.f32 0.1, %v2770_v36  ;;  %v3357_v44 = vsel %vm2965_vm2, %v2769_v31, %v3161_v37  ;;  %vm4141_vm4 = vcmp.ge.f32.partialorder %v3945_v38, 0.0 }
 0x10c   : > { %v8614_v45 = vpack.c.bf16 %v6884_v40, %v6883_v39  ;;  %vm4142_vm5 = vcmp.ge.f32.partialorder %v3946_v41, 0.0  ;;  %v4337_v46 = vmul.f32 0.1, %v3945_v38  ;;  %v4338_v47 = vmul.f32 0.1, %v3946_v41 }
 0x10d   : > { %v3358_v49 = vsel %vm2966_vm3, %v2770_v36, %v3162_v43  ;;  %v4926_v50 = vrot.slane %v245_v10, 4  ;;  %v5317_v51 = vunpack.c.l.bf16 %v4925_v42  ;;  %v6493_v52 = vmax.f32 %v9804_v34, %v3357_v44  ;;  %v248_v42 = vld [vmem:[%s9329_s28 + $0x238] sm:$0xff]  ;;  %v249_v43 = vld [vmem:[%s9329_s28 + $0x240] sm:$0xff] }
 0x10e   : > { %9040 = vst [vmem:[%s9383_s8 + $0x78] sm:$0xff] %v8614_v45   ;;  %v4533_v54 = vsel %vm4141_vm4, %v3945_v38, %v4337_v46  ;;  %v4534_v55 = vsel %vm4142_vm5, %v3946_v41, %v4338_v47  ;;  %v6494_v56 = vmax.f32 %v9806_v35, %v3358_v49  ;;  %v603_v57 = vunpack.c.l.bf16 %v239_v48 }
 0x10f   : > { %v5318_v58 = vunpack.c.l.bf16 %v4926_v50  ;;  %v5513_v59 = vmul.f32 %v9786_v13, %v5317_v51  ;;  %v604_v62 = vunpack.c.l.bf16 %v247_v53  ;;  %v1987_v63 = vrot.slane %v239_v48, 4  ;;  %v255_v51 = vld [vmem:[%s9329_s28 + $0x270] sm:$0xff] }
 0x110   : > { %v805_v1 = vmul.f32 %v9786_v13, %v603_v57  ;;  %v1988_v2 = vrot.slane %v247_v53, 4  ;;  %v3555_v3 = vunpack.c.l.bf16 %v246_v60  ;;  %v3556_v4 = vunpack.c.l.bf16 %v254_v61  ;;  %v256_v53 = vld [vmem:[%s9329_s28 + $0x278] sm:$0xff] }
 0x111   : > { %v5514_v6 = vmul.f32 %v9786_v13, %v5318_v58  ;;  %v5709_v7 = vadd.f32 %v9797_v22, %v5513_v59  ;;  %v806_v8 = vmul.f32 %v9786_v13, %v604_v62  ;;  %v2379_v10 = vunpack.c.l.bf16 %v1987_v63 }
 0x112   : > { %v1007_v11 = vadd.f32 %v9797_v22, %v805_v1  ;;  %v2380_v12 = vunpack.c.l.bf16 %v1988_v2  ;;  %v3751_v0 = vmul.f32 %v9786_v13, %v3555_v3  ;;  %v3752_v14 = vmul.f32 %v9786_v13, %v3556_v4 }
 0x113   : > { %v5710_v16 = vadd.f32 %v9797_v22, %v5514_v6  ;;  %vm5905_vm6 = vcmp.ge.f32.partialorder %v5709_v7, 0.0  ;;  %v6101_v17 = vmul.f32 0.1, %v5709_v7  ;;  %v1008_v18 = vadd.f32 %v9797_v22, %v806_v8 }
 0x114   : > { %vm1203_vm7 = vcmp.ge.f32.partialorder %v1007_v11, 0.0  ;;  %v1399_v19 = vmul.f32 0.1, %v1007_v11  ;;  %v2575_v20 = vmul.f32 %v9786_v13, %v2379_v10  ;;  %v2576_v5 = vmul.f32 %v9786_v13, %v2380_v12 }
 0x115   : > { %vm5906_vm8 = vcmp.ge.f32.partialorder %v5710_v16, 0.0  ;;  %v6102_v21 = vmul.f32 0.1, %v5710_v16  ;;  %v6297_v9 = vsel %vm5905_vm6, %v5709_v7, %v6101_v17  ;;  %vm1204_vm9 = vcmp.ge.f32.partialorder %v1008_v18, 0.0 }
 0x116   : > { %v6689_v23 = vmax.f32 %v4533_v54, %v6297_v9  ;;  %v1400_v24 = vmul.f32 0.1, %v1008_v18  ;;  %v9830_v25 = vsel %vm1203_vm7, %v1007_v11, %v1399_v19  ;;  %v2771_v26 = vadd.f32 %v9797_v22, %v2575_v20 }
 0x117   : > { %v6298_v27 = vsel %vm5906_vm8, %v5710_v16, %v6102_v21  ;;  %v2772_v28 = vadd.f32 %v9797_v22, %v2576_v5  ;;  %v3947_v15 = vadd.f32 %v9797_v22, %v3751_v0  ;;  %v3948_v29 = vadd.f32 %v9797_v22, %v3752_v14 }
 0x118   : > { %v6690_v30 = vmax.f32 %v4534_v55, %v6298_v27  ;;  %v6885_v31 = vmax.f32 %v6493_v52, %v6689_v23  ;;  %v9836_v32 = vsel %vm1204_vm9, %v1008_v18, %v1400_v24  ;;  %vm2967_vm10 = vcmp.ge.f32.partialorder %v2771_v26, 0.0 }
 0x119   : > { %vm2968_vm11 = vcmp.ge.f32.partialorder %v2772_v28, 0.0  ;;  %v3163_v33 = vmul.f32 0.1, %v2771_v26  ;;  %v3164_v34 = vmul.f32 0.1, %v2772_v28  ;;  %vm4143_vm12 = vcmp.ge.f32.partialorder %v3947_v15, 0.0 }
 0x11a   : > { %v6886_v35 = vmax.f32 %v6494_v56, %v6690_v30  ;;  %vm4144_vm13 = vcmp.ge.f32.partialorder %v3948_v29, 0.0  ;;  %v4339_v36 = vmul.f32 0.1, %v3947_v15  ;;  %v4340_v37 = vmul.f32 0.1, %v3948_v29 }
 0x11b   : > { %v3359_v38 = vsel %vm2967_vm10, %v2771_v26, %v3163_v33  ;;  %v3360_v39 = vsel %vm2968_vm11, %v2772_v28, %v3164_v34  ;;  %v4927_v40 = vrot.slane %v246_v60, 4  ;;  %v4928_v41 = vrot.slane %v254_v61, 4 }
 0x11c   : > { %v8619_v44 = vpack.c.bf16 %v6886_v35, %v6885_v31  ;;  %v4535_v45 = vsel %vm4143_vm12, %v3947_v15, %v4339_v36  ;;  %v4536_v46 = vsel %vm4144_vm13, %v3948_v29, %v4340_v37  ;;  %v6495_v47 = vmax.f32 %v9830_v25, %v3359_v38  ;;  %v250_v36 = vld [vmem:[%s9329_s28 + $0x248] sm:$0xff]  ;;  %v251_v37 = vld [vmem:[%s9329_s28 + $0x250] sm:$0xff] }
 0x11d   : > { %v5319_v48 = vunpack.c.l.bf16 %v4927_v40  ;;  %v5320_v49 = vunpack.c.l.bf16 %v4928_v41  ;;  %v6496_v50 = vmax.f32 %v9836_v32, %v3360_v39  ;;  %v605_v52 = vunpack.c.l.bf16 %v248_v42 }
 0x11e   : > { %9041 = vst [vmem:[%s9383_s8 + $0x80] sm:$0xff] %v8619_v44   ;;  %v606_v54 = vunpack.c.l.bf16 %v249_v43  ;;  %v1989_v55 = vrot.slane %v248_v42, 4  ;;  %v1990_v56 = vrot.slane %v249_v43, 4  ;;  %v3557_v57 = vunpack.c.l.bf16 %v255_v51  ;;  %v257_v44 = vld [vmem:[%s9329_s28 + $0x280] sm:$0xff] }
 0x11f   : > { %v5515_v58 = vmul.f32 %v9786_v13, %v5319_v48  ;;  %v5516_v59 = vmul.f32 %v9786_v13, %v5320_v49  ;;  %v807_v60 = vmul.f32 %v9786_v13, %v605_v52  ;;  %v3558_v61 = vunpack.c.l.bf16 %v256_v53  ;;  %v258_v48 = vld [vmem:[%s9329_s28 + $0x288] sm:$0xff] }
 0x120   : > { %v808_v62 = vmul.f32 %v9786_v13, %v606_v54  ;;  %v2381_v63 = vunpack.c.l.bf16 %v1989_v55  ;;  %v2382_v1 = vunpack.c.l.bf16 %v1990_v56  ;;  %v3753_v2 = vmul.f32 %v9786_v13, %v3557_v57 }
 0x121   : > { %v5711_v3 = vadd.f32 %v9797_v22, %v5515_v58  ;;  %v5712_v4 = vadd.f32 %v9797_v22, %v5516_v59  ;;  %v1009_v6 = vadd.f32 %v9797_v22, %v807_v60  ;;  %v3754_v7 = vmul.f32 %v9786_v13, %v3558_v61 }
 0x122   : > { %v1010_v8 = vadd.f32 %v9797_v22, %v808_v62  ;;  %v2577_v10 = vmul.f32 %v9786_v13, %v2381_v63  ;;  %v2578_v11 = vmul.f32 %v9786_v13, %v2382_v1  ;;  %v3949_v12 = vadd.f32 %v9797_v22, %v3753_v2 }
 0x123   : > { %vm5907_vm14 = vcmp.ge.f32.partialorder %v5711_v3, 0.0  ;;  %vm5908_vm15 = vcmp.ge.f32.partialorder %v5712_v4, 0.0  ;;  %v6103_v0 = vmul.f32 0.1, %v5711_v3  ;;  %v6104_v14 = vmul.f32 0.1, %v5712_v4 }
 0x124   : > { %vm1205_vm0 = vcmp.ge.f32.partialorder %v1009_v6, 0.0  ;;  %vm1206_vm1 = vcmp.ge.f32.partialorder %v1010_v8, 0.0  ;;  %v1401_v16 = vmul.f32 0.1, %v1009_v6  ;;  %v1402_v17 = vmul.f32 0.1, %v1010_v8 }
 0x125   : > { %v6299_v18 = vsel %vm5907_vm14, %v5711_v3, %v6103_v0  ;;  %v6300_v19 = vsel %vm5908_vm15, %v5712_v4, %v6104_v14  ;;  %v2773_v20 = vadd.f32 %v9797_v22, %v2577_v10  ;;  %v2774_v5 = vadd.f32 %v9797_v22, %v2578_v11 }
 0x126   : > { %v6691_v21 = vmax.f32 %v4535_v45, %v6299_v18  ;;  %v6692_v9 = vmax.f32 %v4536_v46, %v6300_v19  ;;  %v9860_v23 = vsel %vm1205_vm0, %v1009_v6, %v1401_v16  ;;  %v9862_v24 = vsel %vm1206_vm1, %v1010_v8, %v1402_v17 }
 0x127   : > { %vm2969_vm2 = vcmp.ge.f32.partialorder %v2773_v20, 0.0  ;;  %vm2970_vm3 = vcmp.ge.f32.partialorder %v2774_v5, 0.0  ;;  %v3165_v25 = vmul.f32 0.1, %v2773_v20  ;;  %v3166_v26 = vmul.f32 0.1, %v2774_v5 }
 0x128   : > { %v6887_v27 = vmax.f32 %v6495_v47, %v6691_v21  ;;  %v6888_v28 = vmax.f32 %v6496_v50, %v6692_v9  ;;  %v3950_v15 = vadd.f32 %v9797_v22, %v3754_v7  ;;  %vm4145_vm4 = vcmp.ge.f32.partialorder %v3949_v12, 0.0 }
 0x129   : > { %v3361_v29 = vsel %vm2969_vm2, %v2773_v20, %v3165_v25  ;;  %v3362_v30 = vsel %vm2970_vm3, %v2774_v5, %v3166_v26  ;;  %v4341_v31 = vmul.f32 0.1, %v3949_v12  ;;  %v4929_v32 = vrot.slane %v255_v51, 4 }
 0x12a   : > { %v8624_v33 = vpack.c.bf16 %v6888_v28, %v6887_v27  ;;  %vm4146_vm5 = vcmp.ge.f32.partialorder %v3950_v15, 0.0  ;;  %v4342_v34 = vmul.f32 0.1, %v3950_v15  ;;  %v4930_v35 = vrot.slane %v256_v53, 4  ;;  %v252_v28 = vld [vmem:[%s9329_s28 + $0x258] sm:$0xff] }
 0x12b   : > { %v4537_v38 = vsel %vm4145_vm4, %v3949_v12, %v4341_v31  ;;  %v5321_v39 = vunpack.c.l.bf16 %v4929_v32  ;;  %v6497_v40 = vmax.f32 %v9860_v23, %v3361_v29  ;;  %v6498_v41 = vmax.f32 %v9862_v24, %v3362_v30  ;;  %v253_v31 = vld [vmem:[%s9329_s28 + $0x260] sm:$0xff] }
 0x12c   : > { %9042 = vst [vmem:[%s9383_s8 + $0x88] sm:$0xff] %v8624_v33   ;;  %v4538_v42 = vsel %vm4146_vm5, %v3950_v15, %v4342_v34  ;;  %v5322_v43 = vunpack.c.l.bf16 %v4930_v35  ;;  %v607_v45 = vunpack.c.l.bf16 %v250_v36  ;;  %v608_v46 = vunpack.c.l.bf16 %v251_v37 }
 0x12d   : > { %v5517_v47 = vmul.f32 %v9786_v13, %v5321_v39  ;;  %v1991_v49 = vrot.slane %v250_v36, 4  ;;  %v1992_v50 = vrot.slane %v251_v37, 4  ;;  %v3559_v51 = vunpack.c.l.bf16 %v257_v44  ;;  %v259_v37 = vld [vmem:[%s9329_s28 + $0x290] sm:$0xff] }
 0x12e   : > { %v5518_v52 = vmul.f32 %v9786_v13, %v5322_v43  ;;  %v809_v53 = vmul.f32 %v9786_v13, %v607_v45  ;;  %v810_v54 = vmul.f32 %v9786_v13, %v608_v46  ;;  %v3560_v55 = vunpack.c.l.bf16 %v258_v48  ;;  %v260_v43 = vld [vmem:[%s9329_s28 + $0x298] sm:$0xff] }
 0x12f   : > { %v5713_v56 = vadd.f32 %v9797_v22, %v5517_v47  ;;  %v2383_v57 = vunpack.c.l.bf16 %v1991_v49  ;;  %v2384_v58 = vunpack.c.l.bf16 %v1992_v50  ;;  %v3755_v59 = vmul.f32 %v9786_v13, %v3559_v51 }
 0x130   : > { %v5714_v60 = vadd.f32 %v9797_v22, %v5518_v52  ;;  %v1011_v61 = vadd.f32 %v9797_v22, %v809_v53  ;;  %v1012_v62 = vadd.f32 %v9797_v22, %v810_v54  ;;  %v3756_v63 = vmul.f32 %v9786_v13, %v3560_v55 }
 0x131   : > { %vm5909_vm6 = vcmp.ge.f32.partialorder %v5713_v56, 0.0  ;;  %v6105_v1 = vmul.f32 0.1, %v5713_v56  ;;  %v2579_v2 = vmul.f32 %v9786_v13, %v2383_v57  ;;  %v2580_v3 = vmul.f32 %v9786_v13, %v2384_v58 }
 0x132   : > { %vm5910_vm7 = vcmp.ge.f32.partialorder %v5714_v60, 0.0  ;;  %v6106_v4 = vmul.f32 0.1, %v5714_v60  ;;  %vm1207_vm8 = vcmp.ge.f32.partialorder %v1011_v61, 0.0  ;;  %vm1208_vm9 = vcmp.ge.f32.partialorder %v1012_v62, 0.0 }
 0x133   : > { %v6301_v6 = vsel %vm5909_vm6, %v5713_v56, %v6105_v1  ;;  %v1403_v7 = vmul.f32 0.1, %v1011_v61  ;;  %v1404_v8 = vmul.f32 0.1, %v1012_v62  ;;  %v2775_v10 = vadd.f32 %v9797_v22, %v2579_v2 }
 0x134   : > { %v6302_v11 = vsel %vm5910_vm7, %v5714_v60, %v6106_v4  ;;  %v6693_v12 = vmax.f32 %v4537_v38, %v6301_v6  ;;  %v2776_v0 = vadd.f32 %v9797_v22, %v2580_v3  ;;  %v3951_v14 = vadd.f32 %v9797_v22, %v3755_v59 }
 0x135   : > { %v6694_v16 = vmax.f32 %v4538_v42, %v6302_v11  ;;  %v9887_v17 = vsel %vm1207_vm8, %v1011_v61, %v1403_v7  ;;  %v9889_v18 = vsel %vm1208_vm9, %v1012_v62, %v1404_v8  ;;  %vm2971_vm10 = vcmp.ge.f32.partialorder %v2775_v10, 0.0 }
 0x136   : > { %v6889_v19 = vmax.f32 %v6497_v40, %v6693_v12  ;;  %vm2972_vm11 = vcmp.ge.f32.partialorder %v2776_v0, 0.0  ;;  %v3167_v20 = vmul.f32 0.1, %v2775_v10  ;;  %v3168_v5 = vmul.f32 0.1, %v2776_v0 }
 0x137   : > { %v6890_v21 = vmax.f32 %v6498_v41, %v6694_v16  ;;  %v3952_v9 = vadd.f32 %v9797_v22, %v3756_v63  ;;  %vm4147_vm12 = vcmp.ge.f32.partialorder %v3951_v14, 0.0  ;;  %v4343_v23 = vmul.f32 0.1, %v3951_v14 }
 0x138   : > { %v3363_v24 = vsel %vm2971_vm10, %v2775_v10, %v3167_v20  ;;  %v3364_v25 = vsel %vm2972_vm11, %v2776_v0, %v3168_v5  ;;  %v4931_v26 = vrot.slane %v257_v44, 4  ;;  %v4932_v27 = vrot.slane %v258_v48, 4 }
 0x139   : > { %v8629_v15 = vpack.c.bf16 %v6890_v21, %v6889_v19  ;;  %vm4148_vm13 = vcmp.ge.f32.partialorder %v3952_v9, 0.0  ;;  %v4344_v29 = vmul.f32 0.1, %v3952_v9  ;;  %v4539_v30 = vsel %vm4147_vm12, %v3951_v14, %v4343_v23  ;;  %v261_v21 = vld [vmem:[%s9329_s28 + $0x2a0] sm:$0xff] }
 0x13a   : > { %v5323_v32 = vunpack.c.l.bf16 %v4931_v26  ;;  %v5324_v33 = vunpack.c.l.bf16 %v4932_v27  ;;  %v6499_v34 = vmax.f32 %v9887_v17, %v3363_v24  ;;  %v6500_v35 = vmax.f32 %v9889_v18, %v3364_v25  ;;  %v262_v26 = vld [vmem:[%s9329_s28 + $0x2a8] sm:$0xff] }
 0x13b   : > { %9043 = vst [vmem:[%s9383_s8 + $0x90] sm:$0xff] %v8629_v15   ;;  %v4540_v36 = vsel %vm4148_vm13, %v3952_v9, %v4344_v29  ;;  %v609_v38 = vunpack.c.l.bf16 %v252_v28  ;;  %v610_v39 = vunpack.c.l.bf16 %v253_v31  ;;  %v1993_v40 = vrot.slane %v252_v28, 4 }
 0x13c   : > { %v5519_v41 = vmul.f32 %v9786_v13, %v5323_v32  ;;  %v5520_v42 = vmul.f32 %v9786_v13, %v5324_v33  ;;  %v1994_v44 = vrot.slane %v253_v31, 4  ;;  %v3561_v45 = vunpack.c.l.bf16 %v259_v37  ;;  %v268_v32 = vld [vmem:[%s9329_s28 + $0x2d8] sm:$0xff]  ;;  %v269_v33 = vld [vmem:[%s9329_s28 + $0x2e0] sm:$0xff] }
 0x13d   : > { %v811_v46 = vmul.f32 %v9786_v13, %v609_v38  ;;  %v812_v47 = vmul.f32 %v9786_v13, %v610_v39  ;;  %v2385_v48 = vunpack.c.l.bf16 %v1993_v40  ;;  %v3562_v49 = vunpack.c.l.bf16 %v260_v43 }
 0x13e   : > { %v5715_v50 = vadd.f32 %v9797_v22, %v5519_v41  ;;  %v5716_v51 = vadd.f32 %v9797_v22, %v5520_v42  ;;  %v2386_v52 = vunpack.c.l.bf16 %v1994_v44  ;;  %v3757_v53 = vmul.f32 %v9786_v13, %v3561_v45 }
 0x13f   : > { %v1013_v54 = vadd.f32 %v9797_v22, %v811_v46  ;;  %v1014_v55 = vadd.f32 %v9797_v22, %v812_v47  ;;  %v2581_v56 = vmul.f32 %v9786_v13, %v2385_v48  ;;  %v3758_v57 = vmul.f32 %v9786_v13, %v3562_v49 }
 0x140   : > { %vm5911_vm14 = vcmp.ge.f32.partialorder %v5715_v50, 0.0  ;;  %vm5912_vm15 = vcmp.ge.f32.partialorder %v5716_v51, 0.0  ;;  %v6107_v58 = vmul.f32 0.1, %v5715_v50  ;;  %v6108_v59 = vmul.f32 0.1, %v5716_v51 }
 0x141   : > { %vm1209_vm0 = vcmp.ge.f32.partialorder %v1013_v54, 0.0  ;;  %vm1210_vm1 = vcmp.ge.f32.partialorder %v1014_v55, 0.0  ;;  %v1405_v60 = vmul.f32 0.1, %v1013_v54  ;;  %v1406_v61 = vmul.f32 0.1, %v1014_v55 }
 0x142   : > { %v6303_v62 = vsel %vm5911_vm14, %v5715_v50, %v6107_v58  ;;  %v6304_v63 = vsel %vm5912_vm15, %v5716_v51, %v6108_v59  ;;  %v2582_v1 = vmul.f32 %v9786_v13, %v2386_v52  ;;  %v2777_v2 = vadd.f32 %v9797_v22, %v2581_v56 }
 0x143   : > { %v6695_v3 = vmax.f32 %v4539_v30, %v6303_v62  ;;  %v6696_v4 = vmax.f32 %v4540_v36, %v6304_v63  ;;  %v9912_v6 = vsel %vm1209_vm0, %v1013_v54, %v1405_v60  ;;  %v9914_v7 = vsel %vm1210_vm1, %v1014_v55, %v1406_v61 }
 0x144   : > { %v2778_v8 = vadd.f32 %v9797_v22, %v2582_v1  ;;  %vm2973_vm2 = vcmp.ge.f32.partialorder %v2777_v2, 0.0  ;;  %v3169_v10 = vmul.f32 0.1, %v2777_v2  ;;  %v3953_v11 = vadd.f32 %v9797_v22, %v3757_v53 }
 0x145   : > { %v6891_v12 = vmax.f32 %v6499_v34, %v6695_v3  ;;  %v6892_v0 = vmax.f32 %v6500_v35, %v6696_v4  ;;  %v3954_v14 = vadd.f32 %v9797_v22, %v3758_v57  ;;  %v4933_v16 = vrot.slane %v259_v37, 4 }
 0x146   : > { %vm2974_vm3 = vcmp.ge.f32.partialorder %v2778_v8, 0.0  ;;  %v3170_v17 = vmul.f32 0.1, %v2778_v8  ;;  %v3365_v18 = vsel %vm2973_vm2, %v2777_v2, %v3169_v10  ;;  %vm4149_vm4 = vcmp.ge.f32.partialorder %v3953_v11, 0.0 }
 0x147   : > { %v8634_v19 = vpack.c.bf16 %v6892_v0, %v6891_v12  ;;  %vm4150_vm5 = vcmp.ge.f32.partialorder %v3954_v14, 0.0  ;;  %v4345_v20 = vmul.f32 0.1, %v3953_v11  ;;  %v4346_v5 = vmul.f32 0.1, %v3954_v14 }
 0x148   : > { %v3366_v9 = vsel %vm2974_vm3, %v2778_v8, %v3170_v17  ;;  %v4934_v23 = vrot.slane %v260_v43, 4  ;;  %v5325_v24 = vunpack.c.l.bf16 %v4933_v16  ;;  %v6501_v25 = vmax.f32 %v9912_v6, %v3365_v18  ;;  %v263_v16 = vld [vmem:[%s9329_s28 + $0x2b0] sm:$0xff]  ;;  %v264_v17 = vld [vmem:[%s9329_s28 + $0x2b8] sm:$0xff] }
 0x149   : > { %9044 = vst [vmem:[%s9383_s8 + $0x98] sm:$0xff] %v8634_v19   ;;  %v4541_v27 = vsel %vm4149_vm4, %v3953_v11, %v4345_v20  ;;  %v4542_v28 = vsel %vm4150_vm5, %v3954_v14, %v4346_v5  ;;  %v6502_v15 = vmax.f32 %v9914_v7, %v3366_v9  ;;  %v611_v29 = vunpack.c.l.bf16 %v261_v21 }
 0x14a   : > { %v5326_v30 = vunpack.c.l.bf16 %v4934_v23  ;;  %v5521_v31 = vmul.f32 %v9786_v13, %v5325_v24  ;;  %v612_v34 = vunpack.c.l.bf16 %v262_v26  ;;  %v1995_v35 = vrot.slane %v261_v21, 4  ;;  %v270_v24 = vld [vmem:[%s9329_s28 + $0x2e8] sm:$0xff] }
 0x14b   : > { %v813_v36 = vmul.f32 %v9786_v13, %v611_v29  ;;  %v1996_v37 = vrot.slane %v262_v26, 4  ;;  %v3563_v38 = vunpack.c.l.bf16 %v268_v32  ;;  %v3564_v39 = vunpack.c.l.bf16 %v269_v33  ;;  %v271_v26 = vld [vmem:[%s9329_s28 + $0x2f0] sm:$0xff] }
 0x14c   : > { %v5522_v40 = vmul.f32 %v9786_v13, %v5326_v30  ;;  %v5717_v41 = vadd.f32 %v9797_v22, %v5521_v31  ;;  %v814_v42 = vmul.f32 %v9786_v13, %v612_v34  ;;  %v2387_v43 = vunpack.c.l.bf16 %v1995_v35 }
 0x14d   : > { %v1015_v44 = vadd.f32 %v9797_v22, %v813_v36  ;;  %v2388_v45 = vunpack.c.l.bf16 %v1996_v37  ;;  %v3759_v46 = vmul.f32 %v9786_v13, %v3563_v38  ;;  %v3760_v47 = vmul.f32 %v9786_v13, %v3564_v39 }
 0x14e   : > { %v5718_v48 = vadd.f32 %v9797_v22, %v5522_v40  ;;  %vm5913_vm6 = vcmp.ge.f32.partialorder %v5717_v41, 0.0  ;;  %v6109_v49 = vmul.f32 0.1, %v5717_v41  ;;  %v1016_v50 = vadd.f32 %v9797_v22, %v814_v42 }
 0x14f   : > { %vm1211_vm7 = vcmp.ge.f32.partialorder %v1015_v44, 0.0  ;;  %v1407_v51 = vmul.f32 0.1, %v1015_v44  ;;  %v2583_v52 = vmul.f32 %v9786_v13, %v2387_v43  ;;  %v2584_v53 = vmul.f32 %v9786_v13, %v2388_v45 }
 0x150   : > { %vm5914_vm8 = vcmp.ge.f32.partialorder %v5718_v48, 0.0  ;;  %v6110_v54 = vmul.f32 0.1, %v5718_v48  ;;  %v6305_v55 = vsel %vm5913_vm6, %v5717_v41, %v6109_v49  ;;  %vm1212_vm9 = vcmp.ge.f32.partialorder %v1016_v50, 0.0 }
 0x151   : > { %v6697_v56 = vmax.f32 %v4541_v27, %v6305_v55  ;;  %v1408_v57 = vmul.f32 0.1, %v1016_v50  ;;  %v9938_v58 = vsel %vm1211_vm7, %v1015_v44, %v1407_v51  ;;  %v2779_v59 = vadd.f32 %v9797_v22, %v2583_v52 }
 0x152   : > { %v6306_v60 = vsel %vm5914_vm8, %v5718_v48, %v6110_v54  ;;  %v2780_v61 = vadd.f32 %v9797_v22, %v2584_v53  ;;  %v3955_v62 = vadd.f32 %v9797_v22, %v3759_v46  ;;  %v3956_v63 = vadd.f32 %v9797_v22, %v3760_v47 }
 0x153   : > { %v6698_v1 = vmax.f32 %v4542_v28, %v6306_v60  ;;  %v6893_v2 = vmax.f32 %v6501_v25, %v6697_v56  ;;  %v9944_v3 = vsel %vm1212_vm9, %v1016_v50, %v1408_v57  ;;  %vm2975_vm10 = vcmp.ge.f32.partialorder %v2779_v59, 0.0 }
 0x154   : > { %vm2976_vm11 = vcmp.ge.f32.partialorder %v2780_v61, 0.0  ;;  %v3171_v4 = vmul.f32 0.1, %v2779_v59  ;;  %v3172_v6 = vmul.f32 0.1, %v2780_v61  ;;  %vm4151_vm12 = vcmp.ge.f32.partialorder %v3955_v62, 0.0 }
 0x155   : > { %v6894_v7 = vmax.f32 %v6502_v15, %v6698_v1  ;;  %vm4152_vm13 = vcmp.ge.f32.partialorder %v3956_v63, 0.0  ;;  %v4347_v8 = vmul.f32 0.1, %v3955_v62  ;;  %v4348_v10 = vmul.f32 0.1, %v3956_v63 }
 0x156   : > { %v3367_v11 = vsel %vm2975_vm10, %v2779_v59, %v3171_v4  ;;  %v3368_v12 = vsel %vm2976_vm11, %v2780_v61, %v3172_v6  ;;  %v4935_v0 = vrot.slane %v268_v32, 4  ;;  %v4936_v14 = vrot.slane %v269_v33, 4 }
 0x157   : > { %v8639_v18 = vpack.c.bf16 %v6894_v7, %v6893_v2  ;;  %v4543_v19 = vsel %vm4151_vm12, %v3955_v62, %v4347_v8  ;;  %v4544_v20 = vsel %vm4152_vm13, %v3956_v63, %v4348_v10  ;;  %v6503_v5 = vmax.f32 %v9938_v58, %v3367_v11  ;;  %v265_v8 = vld [vmem:[%s9329_s28 + $0x2c0] sm:$0xff]  ;;  %v266_v10 = vld [vmem:[%s9329_s28 + $0x2c8] sm:$0xff] }
 0x158   : > { %v5327_v21 = vunpack.c.l.bf16 %v4935_v0  ;;  %v5328_v9 = vunpack.c.l.bf16 %v4936_v14  ;;  %v6504_v23 = vmax.f32 %v9944_v3, %v3368_v12  ;;  %v613_v25 = vunpack.c.l.bf16 %v263_v16 }
 0x159   : > { %9045 = vst [vmem:[%s9383_s8 + $0xa0] sm:$0xff] %v8639_v18   ;;  %v614_v27 = vunpack.c.l.bf16 %v264_v17  ;;  %v1997_v28 = vrot.slane %v263_v16, 4  ;;  %v1998_v15 = vrot.slane %v264_v17, 4  ;;  %v3565_v29 = vunpack.c.l.bf16 %v270_v24  ;;  %v272_v18 = vld [vmem:[%s9329_s28 + $0x2f8] sm:$0xff] }
 0x15a   : > { %v5523_v30 = vmul.f32 %v9786_v13, %v5327_v21  ;;  %v5524_v31 = vmul.f32 %v9786_v13, %v5328_v9  ;;  %v815_v32 = vmul.f32 %v9786_v13, %v613_v25  ;;  %v3566_v33 = vunpack.c.l.bf16 %v271_v26  ;;  %v273_v21 = vld [vmem:[%s9329_s28 + $0x300] sm:$0xff] }
 0x15b   : > { %v816_v34 = vmul.f32 %v9786_v13, %v614_v27  ;;  %v2389_v35 = vunpack.c.l.bf16 %v1997_v28  ;;  %v2390_v36 = vunpack.c.l.bf16 %v1998_v15  ;;  %v3761_v37 = vmul.f32 %v9786_v13, %v3565_v29 }
 0x15c   : > { %v5719_v38 = vadd.f32 %v9797_v22, %v5523_v30  ;;  %v5720_v39 = vadd.f32 %v9797_v22, %v5524_v31  ;;  %v1017_v40 = vadd.f32 %v9797_v22, %v815_v32  ;;  %v3762_v41 = vmul.f32 %v9786_v13, %v3566_v33 }
 0x15d   : > { %v1018_v42 = vadd.f32 %v9797_v22, %v816_v34  ;;  %v2585_v43 = vmul.f32 %v9786_v13, %v2389_v35  ;;  %v2586_v44 = vmul.f32 %v9786_v13, %v2390_v36  ;;  %v3957_v45 = vadd.f32 %v9797_v22, %v3761_v37 }
 0x15e   : > { %vm5915_vm14 = vcmp.ge.f32.partialorder %v5719_v38, 0.0  ;;  %vm5916_vm15 = vcmp.ge.f32.partialorder %v5720_v39, 0.0  ;;  %v6111_v46 = vmul.f32 0.1, %v5719_v38  ;;  %v6112_v47 = vmul.f32 0.1, %v5720_v39 }
 0x15f   : > { %vm1213_vm0 = vcmp.ge.f32.partialorder %v1017_v40, 0.0  ;;  %vm1214_vm1 = vcmp.ge.f32.partialorder %v1018_v42, 0.0  ;;  %v1409_v48 = vmul.f32 0.1, %v1017_v40  ;;  %v1410_v49 = vmul.f32 0.1, %v1018_v42 }
 0x160   : > { %v6307_v50 = vsel %vm5915_vm14, %v5719_v38, %v6111_v46  ;;  %v6308_v51 = vsel %vm5916_vm15, %v5720_v39, %v6112_v47  ;;  %v2781_v52 = vadd.f32 %v9797_v22, %v2585_v43  ;;  %v2782_v53 = vadd.f32 %v9797_v22, %v2586_v44 }
 0x161   : > { %v6699_v54 = vmax.f32 %v4543_v19, %v6307_v50  ;;  %v6700_v55 = vmax.f32 %v4544_v20, %v6308_v51  ;;  %v9968_v56 = vsel %vm1213_vm0, %v1017_v40, %v1409_v48  ;;  %v9970_v57 = vsel %vm1214_vm1, %v1018_v42, %v1410_v49 }
 0x162   : > { %vm2977_vm2 = vcmp.ge.f32.partialorder %v2781_v52, 0.0  ;;  %vm2978_vm3 = vcmp.ge.f32.partialorder %v2782_v53, 0.0  ;;  %v3173_v58 = vmul.f32 0.1, %v2781_v52  ;;  %v3174_v59 = vmul.f32 0.1, %v2782_v53 }
 0x163   : > { %v6895_v60 = vmax.f32 %v6503_v5, %v6699_v54  ;;  %v6896_v61 = vmax.f32 %v6504_v23, %v6700_v55  ;;  %v3958_v62 = vadd.f32 %v9797_v22, %v3762_v41  ;;  %vm4153_vm4 = vcmp.ge.f32.partialorder %v3957_v45, 0.0 }
 0x164   : > { %v3369_v63 = vsel %vm2977_vm2, %v2781_v52, %v3173_v58  ;;  %v3370_v1 = vsel %vm2978_vm3, %v2782_v53, %v3174_v59  ;;  %v4349_v2 = vmul.f32 0.1, %v3957_v45  ;;  %v4937_v3 = vrot.slane %v270_v24, 4 }
 0x165   : > { %v8644_v4 = vpack.c.bf16 %v6896_v61, %v6895_v60  ;;  %vm4154_vm5 = vcmp.ge.f32.partialorder %v3958_v62, 0.0  ;;  %v4350_v6 = vmul.f32 0.1, %v3958_v62  ;;  %v4938_v7 = vrot.slane %v271_v26, 4  ;;  %v267_v61 = vld [vmem:[%s9329_s28 + $0x2d0] sm:$0xff] }
 0x166   : > { %v4545_v11 = vsel %vm4153_vm4, %v3957_v45, %v4349_v2  ;;  %v5329_v12 = vunpack.c.l.bf16 %v4937_v3  ;;  %v6505_v0 = vmax.f32 %v9968_v56, %v3369_v63  ;;  %v6506_v14 = vmax.f32 %v9970_v57, %v3370_v1  ;;  %v275_v2 = vld [vmem:[%s9329_s28 + $0x310] sm:$0xff] }
 0x167   : > { %9046 = vst [vmem:[%s9383_s8 + $0xa8] sm:$0xff] %v8644_v4   ;;  %v4546_v16 = vsel %vm4154_vm5, %v3958_v62, %v4350_v6  ;;  %v5330_v17 = vunpack.c.l.bf16 %v4938_v7  ;;  %v615_v19 = vunpack.c.l.bf16 %v265_v8  ;;  %v616_v20 = vunpack.c.l.bf16 %v266_v10 }
 0x168   : > { %v5525_v5 = vmul.f32 %v9786_v13, %v5329_v12  ;;  %v1999_v9 = vrot.slane %v265_v8, 4  ;;  %v2000_v23 = vrot.slane %v266_v10, 4  ;;  %v3567_v24 = vunpack.c.l.bf16 %v272_v18  ;;  %v274_v10 = vld [vmem:[%s9329_s28 + $0x308] sm:$0xff] }
 0x169   : > { %v5526_v25 = vmul.f32 %v9786_v13, %v5330_v17  ;;  %v817_v26 = vmul.f32 %v9786_v13, %v615_v19  ;;  %v818_v27 = vmul.f32 %v9786_v13, %v616_v20  ;;  %v3568_v28 = vunpack.c.l.bf16 %v273_v21  ;;  %v282_v17 = vld [vmem:[%s9329_s28 + $0x348] sm:$0xff]  ;;  %v10012_v20 = vld [vmem:[%s12137_s1] ss:$0 sm:$0xff] }
 0x16a   : > { %v5721_v15 = vadd.f32 %v9797_v22, %v5525_v5  ;;  %v2391_v29 = vunpack.c.l.bf16 %v1999_v9  ;;  %v2392_v30 = vunpack.c.l.bf16 %v2000_v23  ;;  %v3763_v31 = vmul.f32 %v9786_v13, %v3567_v24 }
 0x16b   : > { %v5722_v32 = vadd.f32 %v9797_v22, %v5526_v25  ;;  %v1019_v33 = vadd.f32 %v9797_v22, %v817_v26  ;;  %v1020_v34 = vadd.f32 %v9797_v22, %v818_v27  ;;  %v3764_v35 = vmul.f32 %v9786_v13, %v3568_v28  ;;  %v10023_v28 = vld [vmem:[%s12138_s2] ss:$0 sm:$0xff] }
 0x16c   : > { %vm5917_vm6 = vcmp.ge.f32.partialorder %v5721_v15, 0.0  ;;  %v6113_v36 = vmul.f32 0.1, %v5721_v15  ;;  %v2587_v37 = vmul.f32 %v9786_v13, %v2391_v29  ;;  %v2588_v38 = vmul.f32 %v9786_v13, %v2392_v30 }
 0x16d   : > { %vm5918_vm7 = vcmp.ge.f32.partialorder %v5722_v32, 0.0  ;;  %v6114_v39 = vmul.f32 0.1, %v5722_v32  ;;  %vm1215_vm8 = vcmp.ge.f32.partialorder %v1019_v33, 0.0  ;;  %vm1216_vm9 = vcmp.ge.f32.partialorder %v1020_v34, 0.0 }
 0x16e   : > { %v6309_v40 = vsel %vm5917_vm6, %v5721_v15, %v6113_v36  ;;  %v1411_v41 = vmul.f32 0.1, %v1019_v33  ;;  %v1412_v42 = vmul.f32 0.1, %v1020_v34  ;;  %v2783_v43 = vadd.f32 %v9797_v22, %v2587_v37 }
 0x16f   : > { %v6310_v44 = vsel %vm5918_vm7, %v5722_v32, %v6114_v39  ;;  %v6701_v45 = vmax.f32 %v4545_v11, %v6309_v40  ;;  %v2784_v46 = vadd.f32 %v9797_v22, %v2588_v38  ;;  %v3959_v47 = vadd.f32 %v9797_v22, %v3763_v31 }
 0x170   : > { %v6702_v48 = vmax.f32 %v4546_v16, %v6310_v44  ;;  %v9995_v49 = vsel %vm1215_vm8, %v1019_v33, %v1411_v41  ;;  %v9997_v50 = vsel %vm1216_vm9, %v1020_v34, %v1412_v42  ;;  %vm2979_vm10 = vcmp.ge.f32.partialorder %v2783_v43, 0.0 }
 0x171   : > { %v6897_v51 = vmax.f32 %v6505_v0, %v6701_v45  ;;  %vm2980_vm11 = vcmp.ge.f32.partialorder %v2784_v46, 0.0  ;;  %v3175_v52 = vmul.f32 0.1, %v2783_v43  ;;  %v3176_v53 = vmul.f32 0.1, %v2784_v46 }
 0x172   : > { %v6898_v54 = vmax.f32 %v6506_v14, %v6702_v48  ;;  %v3960_v55 = vadd.f32 %v9797_v22, %v3764_v35  ;;  %vm4155_vm12 = vcmp.ge.f32.partialorder %v3959_v47, 0.0  ;;  %v4351_v56 = vmul.f32 0.1, %v3959_v47 }
 0x173   : > { %v3371_v57 = vsel %vm2979_vm10, %v2783_v43, %v3175_v52  ;;  %v3372_v58 = vsel %vm2980_vm11, %v2784_v46, %v3176_v53  ;;  %v4939_v59 = vrot.slane %v272_v18, 4  ;;  %v4940_v60 = vrot.slane %v273_v21, 4 }
 0x174   : > { %v8649_v62 = vpack.c.bf16 %v6898_v54, %v6897_v51  ;;  %vm4156_vm13 = vcmp.ge.f32.partialorder %v3960_v55, 0.0  ;;  %v4352_v63 = vmul.f32 0.1, %v3960_v55  ;;  %v4547_v1 = vsel %vm4155_vm12, %v3959_v47, %v4351_v56  ;;  %v276_v54 = vld [vmem:[%s9329_s28 + $0x318] sm:$0xff] }
 0x175   : > { %v5331_v3 = vunpack.c.l.bf16 %v4939_v59  ;;  %v5332_v4 = vunpack.c.l.bf16 %v4940_v60  ;;  %v6507_v6 = vmax.f32 %v9995_v49, %v3371_v57  ;;  %v6508_v7 = vmax.f32 %v9997_v50, %v3372_v58  ;;  %v277_v59 = vld [vmem:[%s9329_s28 + $0x320] sm:$0xff] }
 0x176   : > { %9047 = vst [vmem:[%s9383_s8 + $0xb0] sm:$0xff] %v8649_v62   ;;  %v4548_v8 = vsel %vm4156_vm13, %v3960_v55, %v4352_v63  ;;  %v617_v11 = vunpack.c.l.bf16 %v267_v61  ;;  %v618_v12 = vunpack.c.l.bf16 %v275_v2  ;;  %v2001_v0 = vrot.slane %v267_v61, 4 }
 0x177   : > { %v5527_v14 = vmul.f32 %v9786_v13, %v5331_v3  ;;  %v5528_v16 = vmul.f32 %v9786_v13, %v5332_v4  ;;  %v2002_v18 = vrot.slane %v275_v2, 4  ;;  %v3569_v19 = vunpack.c.l.bf16 %v274_v10  ;;  %v283_v3 = vld [vmem:[%s9329_s28 + $0x350] sm:$0xff]  ;;  %v284_v4 = vld [vmem:[%s9329_s28 + $0x358] sm:$0xff] }
 0x178   : > { %v819_v5 = vmul.f32 %v10012_v20, %v617_v11  ;;  %v820_v21 = vmul.f32 %v10012_v20, %v618_v12  ;;  %v2393_v9 = vunpack.c.l.bf16 %v2001_v0  ;;  %v3570_v23 = vunpack.c.l.bf16 %v282_v17 }
 0x179   : > { %v5723_v24 = vadd.f32 %v9797_v22, %v5527_v14  ;;  %v5724_v25 = vadd.f32 %v9797_v22, %v5528_v16  ;;  %v2394_v26 = vunpack.c.l.bf16 %v2002_v18  ;;  %v3765_v13 = vmul.f32 %v10012_v20, %v3569_v19 }
 0x17a   : > { %v1021_v27 = vadd.f32 %v9797_v22, %v819_v5  ;;  %v1022_v15 = vadd.f32 %v10023_v28, %v820_v21  ;;  %v2589_v29 = vmul.f32 %v10012_v20, %v2393_v9  ;;  %v3766_v30 = vmul.f32 %v10012_v20, %v3570_v23 }
 0x17b   : > { %vm5919_vm14 = vcmp.ge.f32.partialorder %v5723_v24, 0.0  ;;  %vm5920_vm15 = vcmp.ge.f32.partialorder %v5724_v25, 0.0  ;;  %v6115_v31 = vmul.f32 0.1, %v5723_v24  ;;  %v6116_v32 = vmul.f32 0.1, %v5724_v25 }
 0x17c   : > { %vm1217_vm0 = vcmp.ge.f32.partialorder %v1021_v27, 0.0  ;;  %vm1218_vm1 = vcmp.ge.f32.partialorder %v1022_v15, 0.0  ;;  %v1413_v33 = vmul.f32 0.1, %v1021_v27  ;;  %v1414_v34 = vmul.f32 0.1, %v1022_v15 }
 0x17d   : > { %v6311_v22 = vsel %vm5919_vm14, %v5723_v24, %v6115_v31  ;;  %v6312_v35 = vsel %vm5920_vm15, %v5724_v25, %v6116_v32  ;;  %v2590_v36 = vmul.f32 %v10012_v20, %v2394_v26  ;;  %v2785_v37 = vadd.f32 %v10023_v28, %v2589_v29 }
 0x17e   : > { %v6703_v38 = vmax.f32 %v4547_v1, %v6311_v22  ;;  %v6704_v39 = vmax.f32 %v4548_v8, %v6312_v35  ;;  %v10030_v40 = vsel %vm1217_vm0, %v1021_v27, %v1413_v33  ;;  %v10032_v41 = vsel %vm1218_vm1, %v1022_v15, %v1414_v34 }
 0x17f   : > { %v2786_v42 = vadd.f32 %v10023_v28, %v2590_v36  ;;  %vm2981_vm2 = vcmp.ge.f32.partialorder %v2785_v37, 0.0  ;;  %v3177_v43 = vmul.f32 0.1, %v2785_v37  ;;  %v3961_v44 = vadd.f32 %v10023_v28, %v3765_v13 }
 0x180   : > { %v6899_v45 = vmax.f32 %v6507_v6, %v6703_v38  ;;  %v6900_v46 = vmax.f32 %v6508_v7, %v6704_v39  ;;  %v3962_v47 = vadd.f32 %v10023_v28, %v3766_v30  ;;  %v4941_v48 = vrot.slane %v274_v10, 4 }
 0x181   : > { %vm2982_vm3 = vcmp.ge.f32.partialorder %v2786_v42, 0.0  ;;  %v3178_v49 = vmul.f32 0.1, %v2786_v42  ;;  %v3373_v50 = vsel %vm2981_vm2, %v2785_v37, %v3177_v43  ;;  %vm4157_vm4 = vcmp.ge.f32.partialorder %v3961_v44, 0.0 }
 0x182   : > { %v8654_v51 = vpack.c.bf16 %v6900_v46, %v6899_v45  ;;  %vm4158_vm5 = vcmp.ge.f32.partialorder %v3962_v47, 0.0  ;;  %v4353_v52 = vmul.f32 0.1, %v3961_v44  ;;  %v4354_v53 = vmul.f32 0.1, %v3962_v47 }
 0x183   : > { %v3374_v55 = vsel %vm2982_vm3, %v2786_v42, %v3178_v49  ;;  %v4942_v56 = vrot.slane %v282_v17, 4  ;;  %v5333_v57 = vunpack.c.l.bf16 %v4941_v48  ;;  %v6509_v58 = vmax.f32 %v10030_v40, %v3373_v50  ;;  %v278_v48 = vld [vmem:[%s9329_s28 + $0x328] sm:$0xff]  ;;  %v279_v49 = vld [vmem:[%s9329_s28 + $0x330] sm:$0xff] }
 0x184   : > { %9048 = vst [vmem:[%s9383_s8 + $0xb8] sm:$0xff] %v8654_v51   ;;  %v4549_v60 = vsel %vm4157_vm4, %v3961_v44, %v4353_v52  ;;  %v4550_v61 = vsel %vm4158_vm5, %v3962_v47, %v4354_v53  ;;  %v6510_v62 = vmax.f32 %v10032_v41, %v3374_v55  ;;  %v619_v63 = vunpack.c.l.bf16 %v276_v54 }
 0x185   : > { %v5334_v1 = vunpack.c.l.bf16 %v4942_v56  ;;  %v5529_v2 = vmul.f32 %v10012_v20, %v5333_v57  ;;  %v620_v6 = vunpack.c.l.bf16 %v277_v59  ;;  %v2003_v7 = vrot.slane %v276_v54, 4  ;;  %v285_v57 = vld [vmem:[%s9329_s28 + $0x360] sm:$0xff] }
 0x186   : > { %v821_v8 = vmul.f32 %v10012_v20, %v619_v63  ;;  %v2004_v10 = vrot.slane %v277_v59, 4  ;;  %v3571_v11 = vunpack.c.l.bf16 %v283_v3  ;;  %v3572_v12 = vunpack.c.l.bf16 %v284_v4  ;;  %v286_v59 = vld [vmem:[%s9329_s28 + $0x368] sm:$0xff] }
 0x187   : > { %v5530_v0 = vmul.f32 %v10012_v20, %v5334_v1  ;;  %v5725_v14 = vadd.f32 %v10023_v28, %v5529_v2  ;;  %v822_v16 = vmul.f32 %v10012_v20, %v620_v6  ;;  %v2395_v17 = vunpack.c.l.bf16 %v2003_v7 }
 0x188   : > { %v1023_v18 = vadd.f32 %v10023_v28, %v821_v8  ;;  %v2396_v19 = vunpack.c.l.bf16 %v2004_v10  ;;  %v3767_v5 = vmul.f32 %v10012_v20, %v3571_v11  ;;  %v3768_v21 = vmul.f32 %v10012_v20, %v3572_v12 }
 0x189   : > { %v5726_v9 = vadd.f32 %v10023_v28, %v5530_v0  ;;  %vm5921_vm6 = vcmp.ge.f32.partialorder %v5725_v14, 0.0  ;;  %v6117_v23 = vmul.f32 0.1, %v5725_v14  ;;  %v1024_v24 = vadd.f32 %v10023_v28, %v822_v16 }
 0x18a   : > { %vm1219_vm7 = vcmp.ge.f32.partialorder %v1023_v18, 0.0  ;;  %v1415_v25 = vmul.f32 0.1, %v1023_v18  ;;  %v2591_v26 = vmul.f32 %v10012_v20, %v2395_v17  ;;  %v2592_v13 = vmul.f32 %v10012_v20, %v2396_v19 }
 0x18b   : > { %vm5922_vm8 = vcmp.ge.f32.partialorder %v5726_v9, 0.0  ;;  %v6118_v27 = vmul.f32 0.1, %v5726_v9  ;;  %v6313_v15 = vsel %vm5921_vm6, %v5725_v14, %v6117_v23  ;;  %vm1220_vm9 = vcmp.ge.f32.partialorder %v1024_v24, 0.0 }
 0x18c   : > { %v6705_v29 = vmax.f32 %v4549_v60, %v6313_v15  ;;  %v1416_v30 = vmul.f32 0.1, %v1024_v24  ;;  %v10056_v31 = vsel %vm1219_vm7, %v1023_v18, %v1415_v25  ;;  %v2787_v32 = vadd.f32 %v10023_v28, %v2591_v26 }
 0x18d   : > { %v6314_v33 = vsel %vm5922_vm8, %v5726_v9, %v6118_v27  ;;  %v2788_v34 = vadd.f32 %v10023_v28, %v2592_v13  ;;  %v3963_v22 = vadd.f32 %v10023_v28, %v3767_v5  ;;  %v3964_v35 = vadd.f32 %v10023_v28, %v3768_v21 }
 0x18e   : > { %v6706_v36 = vmax.f32 %v4550_v61, %v6314_v33  ;;  %v6901_v37 = vmax.f32 %v6509_v58, %v6705_v29  ;;  %v10062_v38 = vsel %vm1220_vm9, %v1024_v24, %v1416_v30  ;;  %vm2983_vm10 = vcmp.ge.f32.partialorder %v2787_v32, 0.0 }
 0x18f   : > { %vm2984_vm11 = vcmp.ge.f32.partialorder %v2788_v34, 0.0  ;;  %v3179_v39 = vmul.f32 0.1, %v2787_v32  ;;  %v3180_v40 = vmul.f32 0.1, %v2788_v34  ;;  %vm4159_vm12 = vcmp.ge.f32.partialorder %v3963_v22, 0.0 }
 0x190   : > { %v6902_v41 = vmax.f32 %v6510_v62, %v6706_v36  ;;  %vm4160_vm13 = vcmp.ge.f32.partialorder %v3964_v35, 0.0  ;;  %v4355_v42 = vmul.f32 0.1, %v3963_v22  ;;  %v4356_v43 = vmul.f32 0.1, %v3964_v35 }
 0x191   : > { %v3375_v44 = vsel %vm2983_vm10, %v2787_v32, %v3179_v39  ;;  %v3376_v45 = vsel %vm2984_vm11, %v2788_v34, %v3180_v40  ;;  %v4943_v46 = vrot.slane %v283_v3, 4  ;;  %v4944_v47 = vrot.slane %v284_v4, 4 }
 0x192   : > { %v8659_v50 = vpack.c.bf16 %v6902_v41, %v6901_v37  ;;  %v4551_v51 = vsel %vm4159_vm12, %v3963_v22, %v4355_v42  ;;  %v4552_v52 = vsel %vm4160_vm13, %v3964_v35, %v4356_v43  ;;  %v6511_v53 = vmax.f32 %v10056_v31, %v3375_v44  ;;  %v280_v42 = vld [vmem:[%s9329_s28 + $0x338] sm:$0xff]  ;;  %v281_v43 = vld [vmem:[%s9329_s28 + $0x340] sm:$0xff] }
 0x193   : > { %v5335_v54 = vunpack.c.l.bf16 %v4943_v46  ;;  %v5336_v55 = vunpack.c.l.bf16 %v4944_v47  ;;  %v6512_v56 = vmax.f32 %v10062_v38, %v3376_v45  ;;  %v621_v58 = vunpack.c.l.bf16 %v278_v48 }
 0x194   : > { %9049 = vst [vmem:[%s9383_s8 + $0xc0] sm:$0xff] %v8659_v50   ;;  %v622_v60 = vunpack.c.l.bf16 %v279_v49  ;;  %v2005_v61 = vrot.slane %v278_v48, 4  ;;  %v2006_v62 = vrot.slane %v279_v49, 4  ;;  %v3573_v63 = vunpack.c.l.bf16 %v285_v57  ;;  %v287_v50 = vld [vmem:[%s9329_s28 + $0x370] sm:$0xff] }
 0x195   : > { %v5531_v1 = vmul.f32 %v10012_v20, %v5335_v54  ;;  %v5532_v2 = vmul.f32 %v10012_v20, %v5336_v55  ;;  %v823_v3 = vmul.f32 %v10012_v20, %v621_v58  ;;  %v3574_v4 = vunpack.c.l.bf16 %v286_v59  ;;  %v288_v54 = vld [vmem:[%s9329_s28 + $0x378] sm:$0xff] }
 0x196   : > { %v824_v6 = vmul.f32 %v10012_v20, %v622_v60  ;;  %v2397_v7 = vunpack.c.l.bf16 %v2005_v61  ;;  %v2398_v8 = vunpack.c.l.bf16 %v2006_v62  ;;  %v3769_v10 = vmul.f32 %v10012_v20, %v3573_v63 }
 0x197   : > { %v5727_v11 = vadd.f32 %v10023_v28, %v5531_v1  ;;  %v5728_v12 = vadd.f32 %v10023_v28, %v5532_v2  ;;  %v1025_v0 = vadd.f32 %v10023_v28, %v823_v3  ;;  %v3770_v14 = vmul.f32 %v10012_v20, %v3574_v4 }
 0x198   : > { %v1026_v16 = vadd.f32 %v10023_v28, %v824_v6  ;;  %v2593_v17 = vmul.f32 %v10012_v20, %v2397_v7  ;;  %v2594_v18 = vmul.f32 %v10012_v20, %v2398_v8  ;;  %v3965_v19 = vadd.f32 %v10023_v28, %v3769_v10 }
 0x199   : > { %vm5923_vm14 = vcmp.ge.f32.partialorder %v5727_v11, 0.0  ;;  %vm5924_vm15 = vcmp.ge.f32.partialorder %v5728_v12, 0.0  ;;  %v6119_v5 = vmul.f32 0.1, %v5727_v11  ;;  %v6120_v21 = vmul.f32 0.1, %v5728_v12 }
 0x19a   : > { %vm1221_vm0 = vcmp.ge.f32.partialorder %v1025_v0, 0.0  ;;  %vm1222_vm1 = vcmp.ge.f32.partialorder %v1026_v16, 0.0  ;;  %v1417_v9 = vmul.f32 0.1, %v1025_v0  ;;  %v1418_v23 = vmul.f32 0.1, %v1026_v16 }
 0x19b   : > { %v6315_v24 = vsel %vm5923_vm14, %v5727_v11, %v6119_v5  ;;  %v6316_v25 = vsel %vm5924_vm15, %v5728_v12, %v6120_v21  ;;  %v2789_v26 = vadd.f32 %v10023_v28, %v2593_v17  ;;  %v2790_v13 = vadd.f32 %v10023_v28, %v2594_v18 }
 0x19c   : > { %v6707_v27 = vmax.f32 %v4551_v51, %v6315_v24  ;;  %v6708_v15 = vmax.f32 %v4552_v52, %v6316_v25  ;;  %v10086_v29 = vsel %vm1221_vm0, %v1025_v0, %v1417_v9  ;;  %v10088_v30 = vsel %vm1222_vm1, %v1026_v16, %v1418_v23 }
 0x19d   : > { %vm2985_vm2 = vcmp.ge.f32.partialorder %v2789_v26, 0.0  ;;  %vm2986_vm3 = vcmp.ge.f32.partialorder %v2790_v13, 0.0  ;;  %v3181_v31 = vmul.f32 0.1, %v2789_v26  ;;  %v3182_v32 = vmul.f32 0.1, %v2790_v13 }
 0x19e   : > { %v6903_v33 = vmax.f32 %v6511_v53, %v6707_v27  ;;  %v6904_v34 = vmax.f32 %v6512_v56, %v6708_v15  ;;  %v3966_v22 = vadd.f32 %v10023_v28, %v3770_v14  ;;  %vm4161_vm4 = vcmp.ge.f32.partialorder %v3965_v19, 0.0 }
 0x19f   : > { %v3377_v35 = vsel %vm2985_vm2, %v2789_v26, %v3181_v31  ;;  %v3378_v36 = vsel %vm2986_vm3, %v2790_v13, %v3182_v32  ;;  %v4357_v37 = vmul.f32 0.1, %v3965_v19  ;;  %v4945_v38 = vrot.slane %v285_v57, 4 }
 0x1a0   : > { %v8664_v39 = vpack.c.bf16 %v6904_v34, %v6903_v33  ;;  %vm4162_vm5 = vcmp.ge.f32.partialorder %v3966_v22, 0.0  ;;  %v4358_v40 = vmul.f32 0.1, %v3966_v22  ;;  %v4946_v41 = vrot.slane %v286_v59, 4  ;;  %v289_v34 = vld [vmem:[%s9329_s28 + $0x380] sm:$0xff] }
 0x1a1   : > { %v4553_v44 = vsel %vm4161_vm4, %v3965_v19, %v4357_v37  ;;  %v5337_v45 = vunpack.c.l.bf16 %v4945_v38  ;;  %v6513_v46 = vmax.f32 %v10086_v29, %v3377_v35  ;;  %v6514_v47 = vmax.f32 %v10088_v30, %v3378_v36  ;;  %v290_v37 = vld [vmem:[%s9329_s28 + $0x388] sm:$0xff] }
 0x1a2   : > { %9050 = vst [vmem:[%s9383_s8 + $0xc8] sm:$0xff] %v8664_v39   ;;  %v4554_v48 = vsel %vm4162_vm5, %v3966_v22, %v4358_v40  ;;  %v5338_v49 = vunpack.c.l.bf16 %v4946_v41  ;;  %v623_v51 = vunpack.c.l.bf16 %v280_v42  ;;  %v624_v52 = vunpack.c.l.bf16 %v281_v43 }
 0x1a3   : > { %v5533_v53 = vmul.f32 %v10012_v20, %v5337_v45  ;;  %v2007_v55 = vrot.slane %v280_v42, 4  ;;  %v2008_v56 = vrot.slane %v281_v43, 4  ;;  %v3575_v57 = vunpack.c.l.bf16 %v287_v50  ;;  %v296_v43 = vld [vmem:[%s9329_s28 + $0x3b8] sm:$0xff] }
 0x1a4   : > { %v5534_v58 = vmul.f32 %v10012_v20, %v5338_v49  ;;  %v825_v59 = vmul.f32 %v10012_v20, %v623_v51  ;;  %v826_v60 = vmul.f32 %v10012_v20, %v624_v52  ;;  %v3576_v61 = vunpack.c.l.bf16 %v288_v54  ;;  %v297_v49 = vld [vmem:[%s9329_s28 + $0x3c0] sm:$0xff] }
 0x1a5   : > { %v5729_v62 = vadd.f32 %v10023_v28, %v5533_v53  ;;  %v2399_v63 = vunpack.c.l.bf16 %v2007_v55  ;;  %v2400_v1 = vunpack.c.l.bf16 %v2008_v56  ;;  %v3771_v2 = vmul.f32 %v10012_v20, %v3575_v57 }
 0x1a6   : > { %v5730_v3 = vadd.f32 %v10023_v28, %v5534_v58  ;;  %v1027_v4 = vadd.f32 %v10023_v28, %v825_v59  ;;  %v1028_v6 = vadd.f32 %v10023_v28, %v826_v60  ;;  %v3772_v7 = vmul.f32 %v10012_v20, %v3576_v61 }
 0x1a7   : > { %vm5925_vm6 = vcmp.ge.f32.partialorder %v5729_v62, 0.0  ;;  %v6121_v8 = vmul.f32 0.1, %v5729_v62  ;;  %v2595_v10 = vmul.f32 %v10012_v20, %v2399_v63  ;;  %v2596_v11 = vmul.f32 %v10012_v20, %v2400_v1 }
 0x1a8   : > { %vm5926_vm7 = vcmp.ge.f32.partialorder %v5730_v3, 0.0  ;;  %v6122_v12 = vmul.f32 0.1, %v5730_v3  ;;  %vm1223_vm8 = vcmp.ge.f32.partialorder %v1027_v4, 0.0  ;;  %vm1224_vm9 = vcmp.ge.f32.partialorder %v1028_v6, 0.0 }
 0x1a9   : > { %v6317_v0 = vsel %vm5925_vm6, %v5729_v62, %v6121_v8  ;;  %v1419_v14 = vmul.f32 0.1, %v1027_v4  ;;  %v1420_v16 = vmul.f32 0.1, %v1028_v6  ;;  %v2791_v17 = vadd.f32 %v10023_v28, %v2595_v10 }
 0x1aa   : > { %v6318_v18 = vsel %vm5926_vm7, %v5730_v3, %v6122_v12  ;;  %v6709_v19 = vmax.f32 %v4553_v44, %v6317_v0  ;;  %v2792_v5 = vadd.f32 %v10023_v28, %v2596_v11  ;;  %v3967_v21 = vadd.f32 %v10023_v28, %v3771_v2 }
 0x1ab   : > { %v6710_v9 = vmax.f32 %v4554_v48, %v6318_v18  ;;  %v10113_v23 = vsel %vm1223_vm8, %v1027_v4, %v1419_v14  ;;  %v10115_v24 = vsel %vm1224_vm9, %v1028_v6, %v1420_v16  ;;  %vm2987_vm10 = vcmp.ge.f32.partialorder %v2791_v17, 0.0 }
 0x1ac   : > { %v6905_v25 = vmax.f32 %v6513_v46, %v6709_v19  ;;  %vm2988_vm11 = vcmp.ge.f32.partialorder %v2792_v5, 0.0  ;;  %v3183_v26 = vmul.f32 0.1, %v2791_v17  ;;  %v3184_v13 = vmul.f32 0.1, %v2792_v5 }
 0x1ad   : > { %v6906_v27 = vmax.f32 %v6514_v47, %v6710_v9  ;;  %v3968_v15 = vadd.f32 %v10023_v28, %v3772_v7  ;;  %vm4163_vm12 = vcmp.ge.f32.partialorder %v3967_v21, 0.0  ;;  %v4359_v29 = vmul.f32 0.1, %v3967_v21 }
 0x1ae   : > { %v3379_v30 = vsel %vm2987_vm10, %v2791_v17, %v3183_v26  ;;  %v3380_v31 = vsel %vm2988_vm11, %v2792_v5, %v3184_v13  ;;  %v4947_v32 = vrot.slane %v287_v50, 4  ;;  %v4948_v33 = vrot.slane %v288_v54, 4 }
 0x1af   : > { %v8669_v22 = vpack.c.bf16 %v6906_v27, %v6905_v25  ;;  %vm4164_vm13 = vcmp.ge.f32.partialorder %v3968_v15, 0.0  ;;  %v4360_v35 = vmul.f32 0.1, %v3968_v15  ;;  %v4555_v36 = vsel %vm4163_vm12, %v3967_v21, %v4359_v29  ;;  %v291_v27 = vld [vmem:[%s9329_s28 + $0x390] sm:$0xff] }
 0x1b0   : > { %v5339_v38 = vunpack.c.l.bf16 %v4947_v32  ;;  %v5340_v39 = vunpack.c.l.bf16 %v4948_v33  ;;  %v6515_v40 = vmax.f32 %v10113_v23, %v3379_v30  ;;  %v6516_v41 = vmax.f32 %v10115_v24, %v3380_v31  ;;  %v292_v32 = vld [vmem:[%s9329_s28 + $0x398] sm:$0xff] }
 0x1b1   : > { %9051 = vst [vmem:[%s9383_s8 + $0xd0] sm:$0xff] %v8669_v22   ;;  %v4556_v42 = vsel %vm4164_vm13, %v3968_v15, %v4360_v35  ;;  %v625_v44 = vunpack.c.l.bf16 %v289_v34  ;;  %v626_v45 = vunpack.c.l.bf16 %v290_v37  ;;  %v2009_v46 = vrot.slane %v289_v34, 4 }
 0x1b2   : > { %v5535_v47 = vmul.f32 %v10012_v20, %v5339_v38  ;;  %v5536_v48 = vmul.f32 %v10012_v20, %v5340_v39  ;;  %v2010_v50 = vrot.slane %v290_v37, 4  ;;  %v3577_v51 = vunpack.c.l.bf16 %v296_v43  ;;  %v298_v38 = vld [vmem:[%s9329_s28 + $0x3c8] sm:$0xff]  ;;  %v299_v39 = vld [vmem:[%s9329_s28 + $0x3d0] sm:$0xff] }
 0x1b3   : > { %v827_v52 = vmul.f32 %v10012_v20, %v625_v44  ;;  %v828_v53 = vmul.f32 %v10012_v20, %v626_v45  ;;  %v2401_v54 = vunpack.c.l.bf16 %v2009_v46  ;;  %v3578_v55 = vunpack.c.l.bf16 %v297_v49 }
 0x1b4   : > { %v5731_v56 = vadd.f32 %v10023_v28, %v5535_v47  ;;  %v5732_v57 = vadd.f32 %v10023_v28, %v5536_v48  ;;  %v2402_v58 = vunpack.c.l.bf16 %v2010_v50  ;;  %v3773_v59 = vmul.f32 %v10012_v20, %v3577_v51 }
 0x1b5   : > { %v1029_v60 = vadd.f32 %v10023_v28, %v827_v52  ;;  %v1030_v61 = vadd.f32 %v10023_v28, %v828_v53  ;;  %v2597_v62 = vmul.f32 %v10012_v20, %v2401_v54  ;;  %v3774_v63 = vmul.f32 %v10012_v20, %v3578_v55 }
 0x1b6   : > { %vm5927_vm14 = vcmp.ge.f32.partialorder %v5731_v56, 0.0  ;;  %vm5928_vm15 = vcmp.ge.f32.partialorder %v5732_v57, 0.0  ;;  %v6123_v1 = vmul.f32 0.1, %v5731_v56  ;;  %v6124_v2 = vmul.f32 0.1, %v5732_v57 }
 0x1b7   : > { %vm1225_vm0 = vcmp.ge.f32.partialorder %v1029_v60, 0.0  ;;  %vm1226_vm1 = vcmp.ge.f32.partialorder %v1030_v61, 0.0  ;;  %v1421_v3 = vmul.f32 0.1, %v1029_v60  ;;  %v1422_v4 = vmul.f32 0.1, %v1030_v61 }
 0x1b8   : > { %v6319_v6 = vsel %vm5927_vm14, %v5731_v56, %v6123_v1  ;;  %v6320_v7 = vsel %vm5928_vm15, %v5732_v57, %v6124_v2  ;;  %v2598_v8 = vmul.f32 %v10012_v20, %v2402_v58  ;;  %v2793_v10 = vadd.f32 %v10023_v28, %v2597_v62 }
 0x1b9   : > { %v6711_v11 = vmax.f32 %v4555_v36, %v6319_v6  ;;  %v6712_v12 = vmax.f32 %v4556_v42, %v6320_v7  ;;  %v10138_v0 = vsel %vm1225_vm0, %v1029_v60, %v1421_v3  ;;  %v10140_v14 = vsel %vm1226_vm1, %v1030_v61, %v1422_v4 }
 0x1ba   : > { %v2794_v16 = vadd.f32 %v10023_v28, %v2598_v8  ;;  %vm2989_vm2 = vcmp.ge.f32.partialorder %v2793_v10, 0.0  ;;  %v3185_v17 = vmul.f32 0.1, %v2793_v10  ;;  %v3969_v18 = vadd.f32 %v10023_v28, %v3773_v59 }
 0x1bb   : > { %v6907_v19 = vmax.f32 %v6515_v40, %v6711_v11  ;;  %v6908_v5 = vmax.f32 %v6516_v41, %v6712_v12  ;;  %v3970_v21 = vadd.f32 %v10023_v28, %v3774_v63  ;;  %v4949_v9 = vrot.slane %v296_v43, 4 }
 0x1bc   : > { %vm2990_vm3 = vcmp.ge.f32.partialorder %v2794_v16, 0.0  ;;  %v3186_v23 = vmul.f32 0.1, %v2794_v16  ;;  %v3381_v24 = vsel %vm2989_vm2, %v2793_v10, %v3185_v17  ;;  %vm4165_vm4 = vcmp.ge.f32.partialorder %v3969_v18, 0.0 }
 0x1bd   : > { %v8674_v25 = vpack.c.bf16 %v6908_v5, %v6907_v19  ;;  %vm4166_vm5 = vcmp.ge.f32.partialorder %v3970_v21, 0.0  ;;  %v4361_v26 = vmul.f32 0.1, %v3969_v18  ;;  %v4362_v13 = vmul.f32 0.1, %v3970_v21 }
 0x1be   : > { %v3382_v15 = vsel %vm2990_vm3, %v2794_v16, %v3186_v23  ;;  %v4950_v29 = vrot.slane %v297_v49, 4  ;;  %v5341_v30 = vunpack.c.l.bf16 %v4949_v9  ;;  %v6517_v31 = vmax.f32 %v10138_v0, %v3381_v24  ;;  %v293_v9 = vld [vmem:[%s9329_s28 + $0x3a0] sm:$0xff]  ;;  %v294_v23 = vld [vmem:[%s9329_s28 + $0x3a8] sm:$0xff] }
 0x1bf   : > { %9052 = vst [vmem:[%s9383_s8 + $0xd8] sm:$0xff] %v8674_v25   ;;  %v4557_v33 = vsel %vm4165_vm4, %v3969_v18, %v4361_v26  ;;  %v4558_v34 = vsel %vm4166_vm5, %v3970_v21, %v4362_v13  ;;  %v6518_v22 = vmax.f32 %v10140_v14, %v3382_v15  ;;  %v627_v35 = vunpack.c.l.bf16 %v291_v27 }
 0x1c0   : > { %v5342_v36 = vunpack.c.l.bf16 %v4950_v29  ;;  %v5537_v37 = vmul.f32 %v10012_v20, %v5341_v30  ;;  %v628_v40 = vunpack.c.l.bf16 %v292_v32  ;;  %v2011_v41 = vrot.slane %v291_v27, 4  ;;  %v300_v30 = vld [vmem:[%s9329_s28 + $0x3d8] sm:$0xff] }
 0x1c1   : > { %v829_v42 = vmul.f32 %v10012_v20, %v627_v35  ;;  %v2012_v43 = vrot.slane %v292_v32, 4  ;;  %v3579_v44 = vunpack.c.l.bf16 %v298_v38  ;;  %v3580_v45 = vunpack.c.l.bf16 %v299_v39  ;;  %v301_v32 = vld [vmem:[%s9329_s28 + $0x3e0] sm:$0xff] }
 0x1c2   : > { %v5538_v46 = vmul.f32 %v10012_v20, %v5342_v36  ;;  %v5733_v47 = vadd.f32 %v10023_v28, %v5537_v37  ;;  %v830_v48 = vmul.f32 %v10012_v20, %v628_v40  ;;  %v2403_v49 = vunpack.c.l.bf16 %v2011_v41 }
 0x1c3   : > { %v1031_v50 = vadd.f32 %v10023_v28, %v829_v42  ;;  %v2404_v51 = vunpack.c.l.bf16 %v2012_v43  ;;  %v3775_v52 = vmul.f32 %v10012_v20, %v3579_v44  ;;  %v3776_v53 = vmul.f32 %v10012_v20, %v3580_v45 }
 0x1c4   : > { %v5734_v54 = vadd.f32 %v10023_v28, %v5538_v46  ;;  %vm5929_vm6 = vcmp.ge.f32.partialorder %v5733_v47, 0.0  ;;  %v6125_v55 = vmul.f32 0.1, %v5733_v47  ;;  %v1032_v56 = vadd.f32 %v10023_v28, %v830_v48 }
 0x1c5   : > { %vm1227_vm7 = vcmp.ge.f32.partialorder %v1031_v50, 0.0  ;;  %v1423_v57 = vmul.f32 0.1, %v1031_v50  ;;  %v2599_v58 = vmul.f32 %v10012_v20, %v2403_v49  ;;  %v2600_v59 = vmul.f32 %v10012_v20, %v2404_v51 }
 0x1c6   : > { %vm5930_vm8 = vcmp.ge.f32.partialorder %v5734_v54, 0.0  ;;  %v6126_v60 = vmul.f32 0.1, %v5734_v54  ;;  %v6321_v61 = vsel %vm5929_vm6, %v5733_v47, %v6125_v55  ;;  %vm1228_vm9 = vcmp.ge.f32.partialorder %v1032_v56, 0.0 }
 0x1c7   : > { %v6713_v62 = vmax.f32 %v4557_v33, %v6321_v61  ;;  %v1424_v63 = vmul.f32 0.1, %v1032_v56  ;;  %v10164_v1 = vsel %vm1227_vm7, %v1031_v50, %v1423_v57  ;;  %v2795_v2 = vadd.f32 %v10023_v28, %v2599_v58 }
 0x1c8   : > { %v6322_v3 = vsel %vm5930_vm8, %v5734_v54, %v6126_v60  ;;  %v2796_v4 = vadd.f32 %v10023_v28, %v2600_v59  ;;  %v3971_v6 = vadd.f32 %v10023_v28, %v3775_v52  ;;  %v3972_v7 = vadd.f32 %v10023_v28, %v3776_v53 }
 0x1c9   : > { %v6714_v8 = vmax.f32 %v4558_v34, %v6322_v3  ;;  %v6909_v10 = vmax.f32 %v6517_v31, %v6713_v62  ;;  %v10170_v11 = vsel %vm1228_vm9, %v1032_v56, %v1424_v63  ;;  %vm2991_vm10 = vcmp.ge.f32.partialorder %v2795_v2, 0.0 }
 0x1ca   : > { %vm2992_vm11 = vcmp.ge.f32.partialorder %v2796_v4, 0.0  ;;  %v3187_v12 = vmul.f32 0.1, %v2795_v2  ;;  %v3188_v0 = vmul.f32 0.1, %v2796_v4  ;;  %vm4167_vm12 = vcmp.ge.f32.partialorder %v3971_v6, 0.0 }
 0x1cb   : > { %v6910_v14 = vmax.f32 %v6518_v22, %v6714_v8  ;;  %vm4168_vm13 = vcmp.ge.f32.partialorder %v3972_v7, 0.0  ;;  %v4363_v16 = vmul.f32 0.1, %v3971_v6  ;;  %v4364_v17 = vmul.f32 0.1, %v3972_v7 }
 0x1cc   : > { %v3383_v18 = vsel %vm2991_vm10, %v2795_v2, %v3187_v12  ;;  %v3384_v19 = vsel %vm2992_vm11, %v2796_v4, %v3188_v0  ;;  %v4951_v5 = vrot.slane %v298_v38, 4  ;;  %v4952_v21 = vrot.slane %v299_v39, 4 }
 0x1cd   : > { %v8679_v24 = vpack.c.bf16 %v6910_v14, %v6909_v10  ;;  %v4559_v25 = vsel %vm4167_vm12, %v3971_v6, %v4363_v16  ;;  %v4560_v26 = vsel %vm4168_vm13, %v3972_v7, %v4364_v17  ;;  %v6519_v13 = vmax.f32 %v10164_v1, %v3383_v18  ;;  %v295_v16 = vld [vmem:[%s9329_s28 + $0x3b0] sm:$0xff] }
 0x1ce   : > { %v5343_v27 = vunpack.c.l.bf16 %v4951_v5  ;;  %v5344_v15 = vunpack.c.l.bf16 %v4952_v21  ;;  %v6520_v29 = vmax.f32 %v10170_v11, %v3384_v19  ;;  %v629_v31 = vunpack.c.l.bf16 %v293_v9  ;;  %v303_v17 = vld [vmem:[%s9329_s28 + $0x3f0] sm:$0xff] }
 0x1cf   : > { %9053 = vst [vmem:[%s9383_s8 + $0xe0] sm:$0xff] %v8679_v24   ;;  %v630_v33 = vunpack.c.l.bf16 %v294_v23  ;;  %v2013_v34 = vrot.slane %v293_v9, 4  ;;  %v2014_v22 = vrot.slane %v294_v23, 4  ;;  %v3581_v35 = vunpack.c.l.bf16 %v300_v30  ;;  %v302_v24 = vld [vmem:[%s9329_s28 + $0x3e8] sm:$0xff] }
 0x1d0   : > { %v5539_v36 = vmul.f32 %v10012_v20, %v5343_v27  ;;  %v5540_v37 = vmul.f32 %v10012_v20, %v5344_v15  ;;  %v831_v38 = vmul.f32 %v10012_v20, %v629_v31  ;;  %v3582_v39 = vunpack.c.l.bf16 %v301_v32  ;;  %v310_v27 = vld [vmem:[%s9329_s28 + $0x428] sm:$0xff] }
 0x1d1   : > { %v832_v40 = vmul.f32 %v10012_v20, %v630_v33  ;;  %v2405_v41 = vunpack.c.l.bf16 %v2013_v34  ;;  %v2406_v42 = vunpack.c.l.bf16 %v2014_v22  ;;  %v3777_v43 = vmul.f32 %v10012_v20, %v3581_v35 }
 0x1d2   : > { %v5735_v44 = vadd.f32 %v10023_v28, %v5539_v36  ;;  %v5736_v45 = vadd.f32 %v10023_v28, %v5540_v37  ;;  %v1033_v46 = vadd.f32 %v10023_v28, %v831_v38  ;;  %v3778_v47 = vmul.f32 %v10012_v20, %v3582_v39 }
 0x1d3   : > { %v1034_v48 = vadd.f32 %v10023_v28, %v832_v40  ;;  %v2601_v49 = vmul.f32 %v10012_v20, %v2405_v41  ;;  %v2602_v50 = vmul.f32 %v10012_v20, %v2406_v42  ;;  %v3973_v51 = vadd.f32 %v10023_v28, %v3777_v43 }
 0x1d4   : > { %vm5931_vm14 = vcmp.ge.f32.partialorder %v5735_v44, 0.0  ;;  %vm5932_vm15 = vcmp.ge.f32.partialorder %v5736_v45, 0.0  ;;  %v6127_v52 = vmul.f32 0.1, %v5735_v44  ;;  %v6128_v53 = vmul.f32 0.1, %v5736_v45 }
 0x1d5   : > { %vm1229_vm0 = vcmp.ge.f32.partialorder %v1033_v46, 0.0  ;;  %vm1230_vm1 = vcmp.ge.f32.partialorder %v1034_v48, 0.0  ;;  %v1425_v54 = vmul.f32 0.1, %v1033_v46  ;;  %v1426_v55 = vmul.f32 0.1, %v1034_v48 }
 0x1d6   : > { %v6323_v56 = vsel %vm5931_vm14, %v5735_v44, %v6127_v52  ;;  %v6324_v57 = vsel %vm5932_vm15, %v5736_v45, %v6128_v53  ;;  %v2797_v58 = vadd.f32 %v10023_v28, %v2601_v49  ;;  %v2798_v59 = vadd.f32 %v10023_v28, %v2602_v50 }
 0x1d7   : > { %v6715_v60 = vmax.f32 %v4559_v25, %v6323_v56  ;;  %v6716_v61 = vmax.f32 %v4560_v26, %v6324_v57  ;;  %v10194_v62 = vsel %vm1229_vm0, %v1033_v46, %v1425_v54  ;;  %v10196_v63 = vsel %vm1230_vm1, %v1034_v48, %v1426_v55 }
 0x1d8   : > { %vm2993_vm2 = vcmp.ge.f32.partialorder %v2797_v58, 0.0  ;;  %vm2994_vm3 = vcmp.ge.f32.partialorder %v2798_v59, 0.0  ;;  %v3189_v1 = vmul.f32 0.1, %v2797_v58  ;;  %v3190_v2 = vmul.f32 0.1, %v2798_v59 }
 0x1d9   : > { %v6911_v3 = vmax.f32 %v6519_v13, %v6715_v60  ;;  %v6912_v4 = vmax.f32 %v6520_v29, %v6716_v61  ;;  %v3974_v6 = vadd.f32 %v10023_v28, %v3778_v47  ;;  %vm4169_vm4 = vcmp.ge.f32.partialorder %v3973_v51, 0.0 }
 0x1da   : > { %v3385_v7 = vsel %vm2993_vm2, %v2797_v58, %v3189_v1  ;;  %v3386_v8 = vsel %vm2994_vm3, %v2798_v59, %v3190_v2  ;;  %v4365_v10 = vmul.f32 0.1, %v3973_v51  ;;  %v4953_v11 = vrot.slane %v300_v30, 4 }
 0x1db   : > { %v8684_v12 = vpack.c.bf16 %v6912_v4, %v6911_v3  ;;  %vm4170_vm5 = vcmp.ge.f32.partialorder %v3974_v6, 0.0  ;;  %v4366_v0 = vmul.f32 0.1, %v3974_v6  ;;  %v4954_v14 = vrot.slane %v301_v32, 4  ;;  %v304_v4 = vld [vmem:[%s9329_s28 + $0x3f8] sm:$0xff] }
 0x1dc   : > { %v4561_v18 = vsel %vm4169_vm4, %v3973_v51, %v4365_v10  ;;  %v5345_v19 = vunpack.c.l.bf16 %v4953_v11  ;;  %v6521_v5 = vmax.f32 %v10194_v62, %v3385_v7  ;;  %v6522_v21 = vmax.f32 %v10196_v63, %v3386_v8  ;;  %v305_v10 = vld [vmem:[%s9329_s28 + $0x400] sm:$0xff] }
 0x1dd   : > { %9054 = vst [vmem:[%s9383_s8 + $0xe8] sm:$0xff] %v8684_v12   ;;  %v4562_v9 = vsel %vm4170_vm5, %v3974_v6, %v4366_v0  ;;  %v5346_v23 = vunpack.c.l.bf16 %v4954_v14  ;;  %v631_v25 = vunpack.c.l.bf16 %v295_v16  ;;  %v632_v26 = vunpack.c.l.bf16 %v303_v17 }
 0x1de   : > { %v5541_v13 = vmul.f32 %v10012_v20, %v5345_v19  ;;  %v2015_v15 = vrot.slane %v295_v16, 4  ;;  %v2016_v29 = vrot.slane %v303_v17, 4  ;;  %v3583_v30 = vunpack.c.l.bf16 %v302_v24  ;;  %v311_v17 = vld [vmem:[%s9329_s28 + $0x430] sm:$0xff] }
 0x1df   : > { %v5542_v31 = vmul.f32 %v10012_v20, %v5346_v23  ;;  %v833_v32 = vmul.f32 %v10012_v20, %v631_v25  ;;  %v834_v33 = vmul.f32 %v10012_v20, %v632_v26  ;;  %v3584_v34 = vunpack.c.l.bf16 %v310_v27  ;;  %v312_v23 = vld [vmem:[%s9329_s28 + $0x438] sm:$0xff]  ;;  %v10238_v26 = vld [vmem:[%s12137_s1] ss:$0 sm:$0xff] }
 0x1e0   : > { %v5737_v22 = vadd.f32 %v10023_v28, %v5541_v13  ;;  %v2407_v35 = vunpack.c.l.bf16 %v2015_v15  ;;  %v2408_v36 = vunpack.c.l.bf16 %v2016_v29  ;;  %v3779_v37 = vmul.f32 %v10012_v20, %v3583_v30 }
 0x1e1   : > { %v5738_v38 = vadd.f32 %v10023_v28, %v5542_v31  ;;  %v1035_v39 = vadd.f32 %v10023_v28, %v833_v32  ;;  %v1036_v40 = vadd.f32 %v10023_v28, %v834_v33  ;;  %v3780_v41 = vmul.f32 %v10012_v20, %v3584_v34  ;;  %v10249_v34 = vld [vmem:[%s12138_s2] ss:$0 sm:$0xff] }
 0x1e2   : > { %vm5933_vm6 = vcmp.ge.f32.partialorder %v5737_v22, 0.0  ;;  %v6129_v42 = vmul.f32 0.1, %v5737_v22  ;;  %v2603_v43 = vmul.f32 %v10012_v20, %v2407_v35  ;;  %v2604_v44 = vmul.f32 %v10012_v20, %v2408_v36 }
 0x1e3   : > { %vm5934_vm7 = vcmp.ge.f32.partialorder %v5738_v38, 0.0  ;;  %v6130_v45 = vmul.f32 0.1, %v5738_v38  ;;  %vm1231_vm8 = vcmp.ge.f32.partialorder %v1035_v39, 0.0  ;;  %vm1232_vm9 = vcmp.ge.f32.partialorder %v1036_v40, 0.0 }
 0x1e4   : > { %v6325_v46 = vsel %vm5933_vm6, %v5737_v22, %v6129_v42  ;;  %v1427_v47 = vmul.f32 0.1, %v1035_v39  ;;  %v1428_v48 = vmul.f32 0.1, %v1036_v40  ;;  %v2799_v49 = vadd.f32 %v10023_v28, %v2603_v43 }
 0x1e5   : > { %v6326_v50 = vsel %vm5934_vm7, %v5738_v38, %v6130_v45  ;;  %v6717_v51 = vmax.f32 %v4561_v18, %v6325_v46  ;;  %v2800_v52 = vadd.f32 %v10023_v28, %v2604_v44  ;;  %v3975_v53 = vadd.f32 %v10023_v28, %v3779_v37 }
 0x1e6   : > { %v6718_v54 = vmax.f32 %v4562_v9, %v6326_v50  ;;  %v10221_v55 = vsel %vm1231_vm8, %v1035_v39, %v1427_v47  ;;  %v10223_v56 = vsel %vm1232_vm9, %v1036_v40, %v1428_v48  ;;  %vm2995_vm10 = vcmp.ge.f32.partialorder %v2799_v49, 0.0 }
 0x1e7   : > { %v6913_v57 = vmax.f32 %v6521_v5, %v6717_v51  ;;  %vm2996_vm11 = vcmp.ge.f32.partialorder %v2800_v52, 0.0  ;;  %v3191_v58 = vmul.f32 0.1, %v2799_v49  ;;  %v3192_v59 = vmul.f32 0.1, %v2800_v52 }
 0x1e8   : > { %v6914_v60 = vmax.f32 %v6522_v21, %v6718_v54  ;;  %v3976_v61 = vadd.f32 %v10023_v28, %v3780_v41  ;;  %vm4171_vm12 = vcmp.ge.f32.partialorder %v3975_v53, 0.0  ;;  %v4367_v62 = vmul.f32 0.1, %v3975_v53 }
 0x1e9   : > { %v3387_v63 = vsel %vm2995_vm10, %v2799_v49, %v3191_v58  ;;  %v3388_v1 = vsel %vm2996_vm11, %v2800_v52, %v3192_v59  ;;  %v4955_v2 = vrot.slane %v302_v24, 4  ;;  %v4956_v3 = vrot.slane %v310_v27, 4 }
 0x1ea   : > { %v8689_v6 = vpack.c.bf16 %v6914_v60, %v6913_v57  ;;  %vm4172_vm13 = vcmp.ge.f32.partialorder %v3976_v61, 0.0  ;;  %v4368_v7 = vmul.f32 0.1, %v3976_v61  ;;  %v4563_v8 = vsel %vm4171_vm12, %v3975_v53, %v4367_v62  ;;  %v306_v60 = vld [vmem:[%s9329_s28 + $0x408] sm:$0xff] }
 0x1eb   : > { %v5347_v11 = vunpack.c.l.bf16 %v4955_v2  ;;  %v5348_v12 = vunpack.c.l.bf16 %v4956_v3  ;;  %v6523_v0 = vmax.f32 %v10221_v55, %v3387_v63  ;;  %v6524_v14 = vmax.f32 %v10223_v56, %v3388_v1  ;;  %v307_v2 = vld [vmem:[%s9329_s28 + $0x410] sm:$0xff] }
 0x1ec   : > { %9055 = vst [vmem:[%s9383_s8 + $0xf0] sm:$0xff] %v8689_v6   ;;  %v4564_v16 = vsel %vm4172_vm13, %v3976_v61, %v4368_v7  ;;  %v633_v18 = vunpack.c.l.bf16 %v304_v4  ;;  %v634_v19 = vunpack.c.l.bf16 %v305_v10  ;;  %v2017_v5 = vrot.slane %v304_v4, 4 }
 0x1ed   : > { %v5543_v21 = vmul.f32 %v10012_v20, %v5347_v11  ;;  %v5544_v9 = vmul.f32 %v10012_v20, %v5348_v12  ;;  %v2018_v24 = vrot.slane %v305_v10, 4  ;;  %v3585_v25 = vunpack.c.l.bf16 %v311_v17  ;;  %v313_v11 = vld [vmem:[%s9329_s28 + $0x440] sm:$0xff]  ;;  %v314_v12 = vld [vmem:[%s9329_s28 + $0x448] sm:$0xff] }
 0x1ee   : > { %v835_v13 = vmul.f32 %v10238_v26, %v633_v18  ;;  %v836_v27 = vmul.f32 %v10238_v26, %v634_v19  ;;  %v2409_v15 = vunpack.c.l.bf16 %v2017_v5  ;;  %v3586_v29 = vunpack.c.l.bf16 %v312_v23 }
 0x1ef   : > { %v5739_v30 = vadd.f32 %v10023_v28, %v5543_v21  ;;  %v5740_v31 = vadd.f32 %v10023_v28, %v5544_v9  ;;  %v2410_v32 = vunpack.c.l.bf16 %v2018_v24  ;;  %v3781_v20 = vmul.f32 %v10238_v26, %v3585_v25 }
 0x1f0   : > { %v1037_v33 = vadd.f32 %v10023_v28, %v835_v13  ;;  %v1038_v22 = vadd.f32 %v10249_v34, %v836_v27  ;;  %v2605_v35 = vmul.f32 %v10238_v26, %v2409_v15  ;;  %v3782_v36 = vmul.f32 %v10238_v26, %v3586_v29 }
 0x1f1   : > { %vm5935_vm14 = vcmp.ge.f32.partialorder %v5739_v30, 0.0  ;;  %vm5936_vm15 = vcmp.ge.f32.partialorder %v5740_v31, 0.0  ;;  %v6131_v37 = vmul.f32 0.1, %v5739_v30  ;;  %v6132_v38 = vmul.f32 0.1, %v5740_v31 }
 0x1f2   : > { %vm1233_vm0 = vcmp.ge.f32.partialorder %v1037_v33, 0.0  ;;  %vm1234_vm1 = vcmp.ge.f32.partialorder %v1038_v22, 0.0  ;;  %v1429_v39 = vmul.f32 0.1, %v1037_v33  ;;  %v1430_v40 = vmul.f32 0.1, %v1038_v22 }
 0x1f3   : > { %v6327_v28 = vsel %vm5935_vm14, %v5739_v30, %v6131_v37  ;;  %v6328_v41 = vsel %vm5936_vm15, %v5740_v31, %v6132_v38  ;;  %v2606_v42 = vmul.f32 %v10238_v26, %v2410_v32  ;;  %v2801_v43 = vadd.f32 %v10249_v34, %v2605_v35 }
 0x1f4   : > { %v6719_v44 = vmax.f32 %v4563_v8, %v6327_v28  ;;  %v6720_v45 = vmax.f32 %v4564_v16, %v6328_v41  ;;  %v10256_v46 = vsel %vm1233_vm0, %v1037_v33, %v1429_v39  ;;  %v10258_v47 = vsel %vm1234_vm1, %v1038_v22, %v1430_v40 }
 0x1f5   : > { %v2802_v48 = vadd.f32 %v10249_v34, %v2606_v42  ;;  %vm2997_vm2 = vcmp.ge.f32.partialorder %v2801_v43, 0.0  ;;  %v3193_v49 = vmul.f32 0.1, %v2801_v43  ;;  %v3977_v50 = vadd.f32 %v10249_v34, %v3781_v20 }
 0x1f6   : > { %v6915_v51 = vmax.f32 %v6523_v0, %v6719_v44  ;;  %v6916_v52 = vmax.f32 %v6524_v14, %v6720_v45  ;;  %v3978_v53 = vadd.f32 %v10249_v34, %v3782_v36  ;;  %v4957_v54 = vrot.slane %v311_v17, 4 }
 0x1f7   : > { %vm2998_vm3 = vcmp.ge.f32.partialorder %v2802_v48, 0.0  ;;  %v3194_v55 = vmul.f32 0.1, %v2802_v48  ;;  %v3389_v56 = vsel %vm2997_vm2, %v2801_v43, %v3193_v49  ;;  %vm4173_vm4 = vcmp.ge.f32.partialorder %v3977_v50, 0.0 }
 0x1f8   : > { %v8694_v57 = vpack.c.bf16 %v6916_v52, %v6915_v51  ;;  %vm4174_vm5 = vcmp.ge.f32.partialorder %v3978_v53, 0.0  ;;  %v4369_v58 = vmul.f32 0.1, %v3977_v50  ;;  %v4370_v59 = vmul.f32 0.1, %v3978_v53 }
 0x1f9   : > { %v3390_v61 = vsel %vm2998_vm3, %v2802_v48, %v3194_v55  ;;  %v4958_v62 = vrot.slane %v312_v23, 4  ;;  %v5349_v63 = vunpack.c.l.bf16 %v4957_v54  ;;  %v6525_v1 = vmax.f32 %v10256_v46, %v3389_v56  ;;  %v308_v54 = vld [vmem:[%s9329_s28 + $0x418] sm:$0xff]  ;;  %v309_v55 = vld [vmem:[%s9329_s28 + $0x420] sm:$0xff] }
 0x1fa   : > { %9056 = vst [vmem:[%s9383_s8 + $0xf8] sm:$0xff] %v8694_v57   ;;  %v4565_v3 = vsel %vm4173_vm4, %v3977_v50, %v4369_v58  ;;  %v4566_v4 = vsel %vm4174_vm5, %v3978_v53, %v4370_v59  ;;  %v6526_v6 = vmax.f32 %v10258_v47, %v3390_v61  ;;  %v635_v7 = vunpack.c.l.bf16 %v306_v60 }
 0x1fb   : > { %v5350_v8 = vunpack.c.l.bf16 %v4958_v62  ;;  %v5545_v10 = vmul.f32 %v10238_v26, %v5349_v63  ;;  %v636_v0 = vunpack.c.l.bf16 %v307_v2  ;;  %v2019_v14 = vrot.slane %v306_v60, 4  ;;  %v315_v63 = vld [vmem:[%s9329_s28 + $0x450] sm:$0xff] }
 0x1fc   : > { %v837_v16 = vmul.f32 %v10238_v26, %v635_v7  ;;  %v2020_v17 = vrot.slane %v307_v2, 4  ;;  %v3587_v18 = vunpack.c.l.bf16 %v313_v11  ;;  %v3588_v19 = vunpack.c.l.bf16 %v314_v12  ;;  %v316_v2 = vld [vmem:[%s9329_s28 + $0x458] sm:$0xff] }
 0x1fd   : > { %v5546_v5 = vmul.f32 %v10238_v26, %v5350_v8  ;;  %v5741_v21 = vadd.f32 %v10249_v34, %v5545_v10  ;;  %v838_v9 = vmul.f32 %v10238_v26, %v636_v0  ;;  %v2411_v23 = vunpack.c.l.bf16 %v2019_v14 }
 0x1fe   : > { %v1039_v24 = vadd.f32 %v10249_v34, %v837_v16  ;;  %v2412_v25 = vunpack.c.l.bf16 %v2020_v17  ;;  %v3783_v13 = vmul.f32 %v10238_v26, %v3587_v18  ;;  %v3784_v27 = vmul.f32 %v10238_v26, %v3588_v19 }
 0x1ff   : > { %v5742_v15 = vadd.f32 %v10249_v34, %v5546_v5  ;;  %vm5937_vm6 = vcmp.ge.f32.partialorder %v5741_v21, 0.0  ;;  %v6133_v29 = vmul.f32 0.1, %v5741_v21  ;;  %v1040_v30 = vadd.f32 %v10249_v34, %v838_v9 }
 0x200   : > { %vm1235_vm7 = vcmp.ge.f32.partialorder %v1039_v24, 0.0  ;;  %v1431_v31 = vmul.f32 0.1, %v1039_v24  ;;  %v2607_v32 = vmul.f32 %v10238_v26, %v2411_v23  ;;  %v2608_v20 = vmul.f32 %v10238_v26, %v2412_v25 }
 0x201   : > { %vm5938_vm8 = vcmp.ge.f32.partialorder %v5742_v15, 0.0  ;;  %v6134_v33 = vmul.f32 0.1, %v5742_v15  ;;  %v6329_v22 = vsel %vm5937_vm6, %v5741_v21, %v6133_v29  ;;  %vm1236_vm9 = vcmp.ge.f32.partialorder %v1040_v30, 0.0 }
 0x202   : > { %v6721_v35 = vmax.f32 %v4565_v3, %v6329_v22  ;;  %v1432_v36 = vmul.f32 0.1, %v1040_v30  ;;  %v10282_v37 = vsel %vm1235_vm7, %v1039_v24, %v1431_v31  ;;  %v2803_v38 = vadd.f32 %v10249_v34, %v2607_v32 }
 0x203   : > { %v6330_v39 = vsel %vm5938_vm8, %v5742_v15, %v6134_v33  ;;  %v2804_v40 = vadd.f32 %v10249_v34, %v2608_v20  ;;  %v3979_v28 = vadd.f32 %v10249_v34, %v3783_v13  ;;  %v3980_v41 = vadd.f32 %v10249_v34, %v3784_v27 }
 0x204   : > { %v6722_v42 = vmax.f32 %v4566_v4, %v6330_v39  ;;  %v6917_v43 = vmax.f32 %v6525_v1, %v6721_v35  ;;  %v10288_v44 = vsel %vm1236_vm9, %v1040_v30, %v1432_v36  ;;  %vm2999_vm10 = vcmp.ge.f32.partialorder %v2803_v38, 0.0 }
 0x205   : > { %vm3000_vm11 = vcmp.ge.f32.partialorder %v2804_v40, 0.0  ;;  %v3195_v45 = vmul.f32 0.1, %v2803_v38  ;;  %v3196_v46 = vmul.f32 0.1, %v2804_v40  ;;  %vm4175_vm12 = vcmp.ge.f32.partialorder %v3979_v28, 0.0 }
 0x206   : > { %v6918_v47 = vmax.f32 %v6526_v6, %v6722_v42  ;;  %vm4176_vm13 = vcmp.ge.f32.partialorder %v3980_v41, 0.0  ;;  %v4371_v48 = vmul.f32 0.1, %v3979_v28  ;;  %v4372_v49 = vmul.f32 0.1, %v3980_v41 }
 0x207   : > { %v3391_v50 = vsel %vm2999_vm10, %v2803_v38, %v3195_v45  ;;  %v3392_v51 = vsel %vm3000_vm11, %v2804_v40, %v3196_v46  ;;  %v4959_v52 = vrot.slane %v313_v11, 4  ;;  %v4960_v53 = vrot.slane %v314_v12, 4 }
 0x208   : > { %v8699_v56 = vpack.c.bf16 %v6918_v47, %v6917_v43  ;;  %v4567_v57 = vsel %vm4175_vm12, %v3979_v28, %v4371_v48  ;;  %v4568_v58 = vsel %vm4176_vm13, %v3980_v41, %v4372_v49  ;;  %v6527_v59 = vmax.f32 %v10282_v37, %v3391_v50  ;;  %v317_v48 = vld [vmem:[%s9329_s28 + $0x460] sm:$0xff]  ;;  %v318_v49 = vld [vmem:[%s9329_s28 + $0x468] sm:$0xff] }
 0x209   : > { %v5351_v60 = vunpack.c.l.bf16 %v4959_v52  ;;  %v5352_v61 = vunpack.c.l.bf16 %v4960_v53  ;;  %v6528_v62 = vmax.f32 %v10288_v44, %v3392_v51  ;;  %v637_v1 = vunpack.c.l.bf16 %v308_v54 }
 0x20a   : > { %9057 = vst [vmem:[%s9383_s8 + $0x100] sm:$0xff] %v8699_v56   ;;  %v638_v3 = vunpack.c.l.bf16 %v309_v55  ;;  %v2021_v4 = vrot.slane %v308_v54, 4  ;;  %v2022_v6 = vrot.slane %v309_v55, 4  ;;  %v3589_v7 = vunpack.c.l.bf16 %v315_v63  ;;  %v324_v56 = vld [vmem:[%s9329_s28 + $0x498] sm:$0xff] }
 0x20b   : > { %v5547_v8 = vmul.f32 %v10238_v26, %v5351_v60  ;;  %v5548_v10 = vmul.f32 %v10238_v26, %v5352_v61  ;;  %v839_v11 = vmul.f32 %v10238_v26, %v637_v1  ;;  %v3590_v12 = vunpack.c.l.bf16 %v316_v2  ;;  %v325_v60 = vld [vmem:[%s9329_s28 + $0x4a0] sm:$0xff] }
 0x20c   : > { %v840_v0 = vmul.f32 %v10238_v26, %v638_v3  ;;  %v2413_v14 = vunpack.c.l.bf16 %v2021_v4  ;;  %v2414_v16 = vunpack.c.l.bf16 %v2022_v6  ;;  %v3785_v17 = vmul.f32 %v10238_v26, %v3589_v7 }
 0x20d   : > { %v5743_v18 = vadd.f32 %v10249_v34, %v5547_v8  ;;  %v5744_v19 = vadd.f32 %v10249_v34, %v5548_v10  ;;  %v1041_v5 = vadd.f32 %v10249_v34, %v839_v11  ;;  %v3786_v21 = vmul.f32 %v10238_v26, %v3590_v12 }
 0x20e   : > { %v1042_v9 = vadd.f32 %v10249_v34, %v840_v0  ;;  %v2609_v23 = vmul.f32 %v10238_v26, %v2413_v14  ;;  %v2610_v24 = vmul.f32 %v10238_v26, %v2414_v16  ;;  %v3981_v25 = vadd.f32 %v10249_v34, %v3785_v17 }
 0x20f   : > { %vm5939_vm14 = vcmp.ge.f32.partialorder %v5743_v18, 0.0  ;;  %vm5940_vm15 = vcmp.ge.f32.partialorder %v5744_v19, 0.0  ;;  %v6135_v13 = vmul.f32 0.1, %v5743_v18  ;;  %v6136_v27 = vmul.f32 0.1, %v5744_v19 }
 0x210   : > { %vm1237_vm0 = vcmp.ge.f32.partialorder %v1041_v5, 0.0  ;;  %vm1238_vm1 = vcmp.ge.f32.partialorder %v1042_v9, 0.0  ;;  %v1433_v15 = vmul.f32 0.1, %v1041_v5  ;;  %v1434_v29 = vmul.f32 0.1, %v1042_v9 }
 0x211   : > { %v6331_v30 = vsel %vm5939_vm14, %v5743_v18, %v6135_v13  ;;  %v6332_v31 = vsel %vm5940_vm15, %v5744_v19, %v6136_v27  ;;  %v2805_v32 = vadd.f32 %v10249_v34, %v2609_v23  ;;  %v2806_v20 = vadd.f32 %v10249_v34, %v2610_v24 }
 0x212   : > { %v6723_v33 = vmax.f32 %v4567_v57, %v6331_v30  ;;  %v6724_v22 = vmax.f32 %v4568_v58, %v6332_v31  ;;  %v10312_v35 = vsel %vm1237_vm0, %v1041_v5, %v1433_v15  ;;  %v10314_v36 = vsel %vm1238_vm1, %v1042_v9, %v1434_v29 }
 0x213   : > { %vm3001_vm2 = vcmp.ge.f32.partialorder %v2805_v32, 0.0  ;;  %vm3002_vm3 = vcmp.ge.f32.partialorder %v2806_v20, 0.0  ;;  %v3197_v37 = vmul.f32 0.1, %v2805_v32  ;;  %v3198_v38 = vmul.f32 0.1, %v2806_v20 }
 0x214   : > { %v6919_v39 = vmax.f32 %v6527_v59, %v6723_v33  ;;  %v6920_v40 = vmax.f32 %v6528_v62, %v6724_v22  ;;  %v3982_v28 = vadd.f32 %v10249_v34, %v3786_v21  ;;  %vm4177_vm4 = vcmp.ge.f32.partialorder %v3981_v25, 0.0 }
 0x215   : > { %v3393_v41 = vsel %vm3001_vm2, %v2805_v32, %v3197_v37  ;;  %v3394_v42 = vsel %vm3002_vm3, %v2806_v20, %v3198_v38  ;;  %v4373_v43 = vmul.f32 0.1, %v3981_v25  ;;  %v4961_v44 = vrot.slane %v315_v63, 4 }
 0x216   : > { %v8704_v45 = vpack.c.bf16 %v6920_v40, %v6919_v39  ;;  %vm4178_vm5 = vcmp.ge.f32.partialorder %v3982_v28, 0.0  ;;  %v4374_v46 = vmul.f32 0.1, %v3982_v28  ;;  %v4962_v47 = vrot.slane %v316_v2, 4  ;;  %v319_v40 = vld [vmem:[%s9329_s28 + $0x470] sm:$0xff] }
 0x217   : > { %v4569_v50 = vsel %vm4177_vm4, %v3981_v25, %v4373_v43  ;;  %v5353_v51 = vunpack.c.l.bf16 %v4961_v44  ;;  %v6529_v52 = vmax.f32 %v10312_v35, %v3393_v41  ;;  %v6530_v53 = vmax.f32 %v10314_v36, %v3394_v42  ;;  %v320_v43 = vld [vmem:[%s9329_s28 + $0x478] sm:$0xff] }
 0x218   : > { %9058 = vst [vmem:[%s9383_s8 + $0x108] sm:$0xff] %v8704_v45   ;;  %v4570_v54 = vsel %vm4178_vm5, %v3982_v28, %v4374_v46  ;;  %v5354_v55 = vunpack.c.l.bf16 %v4962_v47  ;;  %v639_v57 = vunpack.c.l.bf16 %v317_v48  ;;  %v640_v58 = vunpack.c.l.bf16 %v318_v49 }
 0x219   : > { %v5549_v59 = vmul.f32 %v10238_v26, %v5353_v51  ;;  %v2023_v61 = vrot.slane %v317_v48, 4  ;;  %v2024_v62 = vrot.slane %v318_v49, 4  ;;  %v3591_v63 = vunpack.c.l.bf16 %v324_v56  ;;  %v326_v49 = vld [vmem:[%s9329_s28 + $0x4a8] sm:$0xff] }
 0x21a   : > { %v5550_v1 = vmul.f32 %v10238_v26, %v5354_v55  ;;  %v841_v2 = vmul.f32 %v10238_v26, %v639_v57  ;;  %v842_v3 = vmul.f32 %v10238_v26, %v640_v58  ;;  %v3592_v4 = vunpack.c.l.bf16 %v325_v60  ;;  %v327_v55 = vld [vmem:[%s9329_s28 + $0x4b0] sm:$0xff] }
 0x21b   : > { %v5745_v6 = vadd.f32 %v10249_v34, %v5549_v59  ;;  %v2415_v7 = vunpack.c.l.bf16 %v2023_v61  ;;  %v2416_v8 = vunpack.c.l.bf16 %v2024_v62  ;;  %v3787_v10 = vmul.f32 %v10238_v26, %v3591_v63 }
 0x21c   : > { %v5746_v11 = vadd.f32 %v10249_v34, %v5550_v1  ;;  %v1043_v12 = vadd.f32 %v10249_v34, %v841_v2  ;;  %v1044_v0 = vadd.f32 %v10249_v34, %v842_v3  ;;  %v3788_v14 = vmul.f32 %v10238_v26, %v3592_v4 }
 0x21d   : > { %vm5941_vm6 = vcmp.ge.f32.partialorder %v5745_v6, 0.0  ;;  %v6137_v16 = vmul.f32 0.1, %v5745_v6  ;;  %v2611_v17 = vmul.f32 %v10238_v26, %v2415_v7  ;;  %v2612_v18 = vmul.f32 %v10238_v26, %v2416_v8 }
 0x21e   : > { %vm5942_vm7 = vcmp.ge.f32.partialorder %v5746_v11, 0.0  ;;  %v6138_v19 = vmul.f32 0.1, %v5746_v11  ;;  %vm1239_vm8 = vcmp.ge.f32.partialorder %v1043_v12, 0.0  ;;  %vm1240_vm9 = vcmp.ge.f32.partialorder %v1044_v0, 0.0 }
 0x21f   : > { %v6333_v5 = vsel %vm5941_vm6, %v5745_v6, %v6137_v16  ;;  %v1435_v21 = vmul.f32 0.1, %v1043_v12  ;;  %v1436_v9 = vmul.f32 0.1, %v1044_v0  ;;  %v2807_v23 = vadd.f32 %v10249_v34, %v2611_v17 }
 0x220   : > { %v6334_v24 = vsel %vm5942_vm7, %v5746_v11, %v6138_v19  ;;  %v6725_v25 = vmax.f32 %v4569_v50, %v6333_v5  ;;  %v2808_v13 = vadd.f32 %v10249_v34, %v2612_v18  ;;  %v3983_v27 = vadd.f32 %v10249_v34, %v3787_v10 }
 0x221   : > { %v6726_v15 = vmax.f32 %v4570_v54, %v6334_v24  ;;  %v10339_v29 = vsel %vm1239_vm8, %v1043_v12, %v1435_v21  ;;  %v10341_v30 = vsel %vm1240_vm9, %v1044_v0, %v1436_v9  ;;  %vm3003_vm10 = vcmp.ge.f32.partialorder %v2807_v23, 0.0 }
 0x222   : > { %v6921_v31 = vmax.f32 %v6529_v52, %v6725_v25  ;;  %vm3004_vm11 = vcmp.ge.f32.partialorder %v2808_v13, 0.0  ;;  %v3199_v32 = vmul.f32 0.1, %v2807_v23  ;;  %v3200_v20 = vmul.f32 0.1, %v2808_v13 }
 0x223   : > { %v6922_v33 = vmax.f32 %v6530_v53, %v6726_v15  ;;  %v3984_v22 = vadd.f32 %v10249_v34, %v3788_v14  ;;  %vm4179_vm12 = vcmp.ge.f32.partialorder %v3983_v27, 0.0  ;;  %v4375_v35 = vmul.f32 0.1, %v3983_v27 }
 0x224   : > { %v3395_v36 = vsel %vm3003_vm10, %v2807_v23, %v3199_v32  ;;  %v3396_v37 = vsel %vm3004_vm11, %v2808_v13, %v3200_v20  ;;  %v4963_v38 = vrot.slane %v324_v56, 4  ;;  %v4964_v39 = vrot.slane %v325_v60, 4 }
 0x225   : > { %v8709_v28 = vpack.c.bf16 %v6922_v33, %v6921_v31  ;;  %vm4180_vm13 = vcmp.ge.f32.partialorder %v3984_v22, 0.0  ;;  %v4376_v41 = vmul.f32 0.1, %v3984_v22  ;;  %v4571_v42 = vsel %vm4179_vm12, %v3983_v27, %v4375_v35  ;;  %v321_v33 = vld [vmem:[%s9329_s28 + $0x480] sm:$0xff] }
 0x226   : > { %v5355_v44 = vunpack.c.l.bf16 %v4963_v38  ;;  %v5356_v45 = vunpack.c.l.bf16 %v4964_v39  ;;  %v6531_v46 = vmax.f32 %v10339_v29, %v3395_v36  ;;  %v6532_v47 = vmax.f32 %v10341_v30, %v3396_v37  ;;  %v322_v38 = vld [vmem:[%s9329_s28 + $0x488] sm:$0xff] }
 0x227   : > { %9059 = vst [vmem:[%s9383_s8 + $0x110] sm:$0xff] %v8709_v28   ;;  %v4572_v48 = vsel %vm4180_vm13, %v3984_v22, %v4376_v41  ;;  %v641_v50 = vunpack.c.l.bf16 %v319_v40  ;;  %v642_v51 = vunpack.c.l.bf16 %v320_v43  ;;  %v2025_v52 = vrot.slane %v319_v40, 4 }
 0x228   : > { %v5551_v53 = vmul.f32 %v10238_v26, %v5355_v44  ;;  %v5552_v54 = vmul.f32 %v10238_v26, %v5356_v45  ;;  %v2026_v56 = vrot.slane %v320_v43, 4  ;;  %v3593_v57 = vunpack.c.l.bf16 %v326_v49  ;;  %v328_v44 = vld [vmem:[%s9329_s28 + $0x4b8] sm:$0xff]  ;;  %v329_v45 = vld [vmem:[%s9329_s28 + $0x4c0] sm:$0xff] }
 0x229   : > { %v843_v58 = vmul.f32 %v10238_v26, %v641_v50  ;;  %v844_v59 = vmul.f32 %v10238_v26, %v642_v51  ;;  %v2417_v60 = vunpack.c.l.bf16 %v2025_v52  ;;  %v3594_v61 = vunpack.c.l.bf16 %v327_v55 }
 0x22a   : > { %v5747_v62 = vadd.f32 %v10249_v34, %v5551_v53  ;;  %v5748_v63 = vadd.f32 %v10249_v34, %v5552_v54  ;;  %v2418_v1 = vunpack.c.l.bf16 %v2026_v56  ;;  %v3789_v2 = vmul.f32 %v10238_v26, %v3593_v57 }
 0x22b   : > { %v1045_v3 = vadd.f32 %v10249_v34, %v843_v58  ;;  %v1046_v4 = vadd.f32 %v10249_v34, %v844_v59  ;;  %v2613_v6 = vmul.f32 %v10238_v26, %v2417_v60  ;;  %v3790_v7 = vmul.f32 %v10238_v26, %v3594_v61 }
 0x22c   : > { %vm5943_vm14 = vcmp.ge.f32.partialorder %v5747_v62, 0.0  ;;  %vm5944_vm15 = vcmp.ge.f32.partialorder %v5748_v63, 0.0  ;;  %v6139_v8 = vmul.f32 0.1, %v5747_v62  ;;  %v6140_v10 = vmul.f32 0.1, %v5748_v63 }
 0x22d   : > { %vm1241_vm0 = vcmp.ge.f32.partialorder %v1045_v3, 0.0  ;;  %vm1242_vm1 = vcmp.ge.f32.partialorder %v1046_v4, 0.0  ;;  %v1437_v11 = vmul.f32 0.1, %v1045_v3  ;;  %v1438_v12 = vmul.f32 0.1, %v1046_v4 }
 0x22e   : > { %v6335_v0 = vsel %vm5943_vm14, %v5747_v62, %v6139_v8  ;;  %v6336_v14 = vsel %vm5944_vm15, %v5748_v63, %v6140_v10  ;;  %v2614_v16 = vmul.f32 %v10238_v26, %v2418_v1  ;;  %v2809_v17 = vadd.f32 %v10249_v34, %v2613_v6 }
 0x22f   : > { %v6727_v18 = vmax.f32 %v4571_v42, %v6335_v0  ;;  %v6728_v19 = vmax.f32 %v4572_v48, %v6336_v14  ;;  %v10364_v5 = vsel %vm1241_vm0, %v1045_v3, %v1437_v11  ;;  %v10366_v21 = vsel %vm1242_vm1, %v1046_v4, %v1438_v12 }
 0x230   : > { %v2810_v9 = vadd.f32 %v10249_v34, %v2614_v16  ;;  %vm3005_vm2 = vcmp.ge.f32.partialorder %v2809_v17, 0.0  ;;  %v3201_v23 = vmul.f32 0.1, %v2809_v17  ;;  %v3985_v24 = vadd.f32 %v10249_v34, %v3789_v2 }
 0x231   : > { %v6923_v25 = vmax.f32 %v6531_v46, %v6727_v18  ;;  %v6924_v13 = vmax.f32 %v6532_v47, %v6728_v19  ;;  %v3986_v27 = vadd.f32 %v10249_v34, %v3790_v7  ;;  %v4965_v15 = vrot.slane %v326_v49, 4 }
 0x232   : > { %vm3006_vm3 = vcmp.ge.f32.partialorder %v2810_v9, 0.0  ;;  %v3202_v29 = vmul.f32 0.1, %v2810_v9  ;;  %v3397_v30 = vsel %vm3005_vm2, %v2809_v17, %v3201_v23  ;;  %vm4181_vm4 = vcmp.ge.f32.partialorder %v3985_v24, 0.0 }
 0x233   : > { %v8714_v31 = vpack.c.bf16 %v6924_v13, %v6923_v25  ;;  %vm4182_vm5 = vcmp.ge.f32.partialorder %v3986_v27, 0.0  ;;  %v4377_v32 = vmul.f32 0.1, %v3985_v24  ;;  %v4378_v20 = vmul.f32 0.1, %v3986_v27 }
 0x234   : > { %v3398_v22 = vsel %vm3006_vm3, %v2810_v9, %v3202_v29  ;;  %v4966_v35 = vrot.slane %v327_v55, 4  ;;  %v5357_v36 = vunpack.c.l.bf16 %v4965_v15  ;;  %v6533_v37 = vmax.f32 %v10364_v5, %v3397_v30  ;;  %v323_v15 = vld [vmem:[%s9329_s28 + $0x490] sm:$0xff] }
 0x235   : > { %9060 = vst [vmem:[%s9383_s8 + $0x118] sm:$0xff] %v8714_v31   ;;  %v4573_v39 = vsel %vm4181_vm4, %v3985_v24, %v4377_v32  ;;  %v4574_v40 = vsel %vm4182_vm5, %v3986_v27, %v4378_v20  ;;  %v6534_v28 = vmax.f32 %v10366_v21, %v3398_v22  ;;  %v643_v41 = vunpack.c.l.bf16 %v321_v33  ;;  %v331_v29 = vld [vmem:[%s9329_s28 + $0x4d0] sm:$0xff] }
 0x236   : > { %v5358_v42 = vunpack.c.l.bf16 %v4966_v35  ;;  %v5553_v43 = vmul.f32 %v10238_v26, %v5357_v36  ;;  %v644_v46 = vunpack.c.l.bf16 %v322_v38  ;;  %v2027_v47 = vrot.slane %v321_v33, 4  ;;  %v330_v36 = vld [vmem:[%s9329_s28 + $0x4c8] sm:$0xff] }
 0x237   : > { %v845_v48 = vmul.f32 %v10238_v26, %v643_v41  ;;  %v2028_v49 = vrot.slane %v322_v38, 4  ;;  %v3595_v50 = vunpack.c.l.bf16 %v328_v44  ;;  %v3596_v51 = vunpack.c.l.bf16 %v329_v45  ;;  %v338_v38 = vld [vmem:[%s9329_s28 + $0x508] sm:$0xff] }
 0x238   : > { %v5554_v52 = vmul.f32 %v10238_v26, %v5358_v42  ;;  %v5749_v53 = vadd.f32 %v10249_v34, %v5553_v43  ;;  %v846_v54 = vmul.f32 %v10238_v26, %v644_v46  ;;  %v2419_v55 = vunpack.c.l.bf16 %v2027_v47 }
 0x239   : > { %v1047_v56 = vadd.f32 %v10249_v34, %v845_v48  ;;  %v2420_v57 = vunpack.c.l.bf16 %v2028_v49  ;;  %v3791_v58 = vmul.f32 %v10238_v26, %v3595_v50  ;;  %v3792_v59 = vmul.f32 %v10238_v26, %v3596_v51 }
 0x23a   : > { %v5750_v60 = vadd.f32 %v10249_v34, %v5554_v52  ;;  %vm5945_vm6 = vcmp.ge.f32.partialorder %v5749_v53, 0.0  ;;  %v6141_v61 = vmul.f32 0.1, %v5749_v53  ;;  %v1048_v62 = vadd.f32 %v10249_v34, %v846_v54 }
 0x23b   : > { %vm1243_vm7 = vcmp.ge.f32.partialorder %v1047_v56, 0.0  ;;  %v1439_v63 = vmul.f32 0.1, %v1047_v56  ;;  %v2615_v1 = vmul.f32 %v10238_v26, %v2419_v55  ;;  %v2616_v2 = vmul.f32 %v10238_v26, %v2420_v57 }
 0x23c   : > { %vm5946_vm8 = vcmp.ge.f32.partialorder %v5750_v60, 0.0  ;;  %v6142_v3 = vmul.f32 0.1, %v5750_v60  ;;  %v6337_v4 = vsel %vm5945_vm6, %v5749_v53, %v6141_v61  ;;  %vm1244_vm9 = vcmp.ge.f32.partialorder %v1048_v62, 0.0 }
 0x23d   : > { %v6729_v6 = vmax.f32 %v4573_v39, %v6337_v4  ;;  %v1440_v7 = vmul.f32 0.1, %v1048_v62  ;;  %v10390_v8 = vsel %vm1243_vm7, %v1047_v56, %v1439_v63  ;;  %v2811_v10 = vadd.f32 %v10249_v34, %v2615_v1 }
 0x23e   : > { %v6338_v11 = vsel %vm5946_vm8, %v5750_v60, %v6142_v3  ;;  %v2812_v12 = vadd.f32 %v10249_v34, %v2616_v2  ;;  %v3987_v0 = vadd.f32 %v10249_v34, %v3791_v58  ;;  %v3988_v14 = vadd.f32 %v10249_v34, %v3792_v59 }
 0x23f   : > { %v6730_v16 = vmax.f32 %v4574_v40, %v6338_v11  ;;  %v6925_v17 = vmax.f32 %v6533_v37, %v6729_v6  ;;  %v10396_v18 = vsel %vm1244_vm9, %v1048_v62, %v1440_v7  ;;  %vm3007_vm10 = vcmp.ge.f32.partialorder %v2811_v10, 0.0 }
 0x240   : > { %vm3008_vm11 = vcmp.ge.f32.partialorder %v2812_v12, 0.0  ;;  %v3203_v19 = vmul.f32 0.1, %v2811_v10  ;;  %v3204_v5 = vmul.f32 0.1, %v2812_v12  ;;  %vm4183_vm12 = vcmp.ge.f32.partialorder %v3987_v0, 0.0 }
 0x241   : > { %v6926_v21 = vmax.f32 %v6534_v28, %v6730_v16  ;;  %vm4184_vm13 = vcmp.ge.f32.partialorder %v3988_v14, 0.0  ;;  %v4379_v9 = vmul.f32 0.1, %v3987_v0  ;;  %v4380_v23 = vmul.f32 0.1, %v3988_v14 }
 0x242   : > { %v3399_v24 = vsel %vm3007_vm10, %v2811_v10, %v3203_v19  ;;  %v3400_v25 = vsel %vm3008_vm11, %v2812_v12, %v3204_v5  ;;  %v4967_v13 = vrot.slane %v328_v44, 4  ;;  %v4968_v27 = vrot.slane %v329_v45, 4 }
 0x243   : > { %v8719_v30 = vpack.c.bf16 %v6926_v21, %v6925_v17  ;;  %v4575_v31 = vsel %vm4183_vm12, %v3987_v0, %v4379_v9  ;;  %v4576_v32 = vsel %vm4184_vm13, %v3988_v14, %v4380_v23  ;;  %v6535_v20 = vmax.f32 %v10390_v8, %v3399_v24  ;;  %v332_v9 = vld [vmem:[%s9329_s28 + $0x4d8] sm:$0xff]  ;;  %v333_v23 = vld [vmem:[%s9329_s28 + $0x4e0] sm:$0xff] }
 0x244   : > { %v5359_v33 = vunpack.c.l.bf16 %v4967_v13  ;;  %v5360_v22 = vunpack.c.l.bf16 %v4968_v27  ;;  %v6536_v35 = vmax.f32 %v10396_v18, %v3400_v25  ;;  %v645_v37 = vunpack.c.l.bf16 %v323_v15 }
 0x245   : > { %9061 = vst [vmem:[%s9383_s8 + $0x120] sm:$0xff] %v8719_v30   ;;  %v646_v39 = vunpack.c.l.bf16 %v331_v29  ;;  %v2029_v40 = vrot.slane %v323_v15, 4  ;;  %v2030_v28 = vrot.slane %v331_v29, 4  ;;  %v3597_v41 = vunpack.c.l.bf16 %v330_v36  ;;  %v339_v30 = vld [vmem:[%s9329_s28 + $0x510] sm:$0xff] }
 0x246   : > { %v5555_v42 = vmul.f32 %v10238_v26, %v5359_v33  ;;  %v5556_v43 = vmul.f32 %v10238_v26, %v5360_v22  ;;  %v847_v44 = vmul.f32 %v10238_v26, %v645_v37  ;;  %v3598_v45 = vunpack.c.l.bf16 %v338_v38  ;;  %v340_v33 = vld [vmem:[%s9329_s28 + $0x518] sm:$0xff] }
 0x247   : > { %v848_v46 = vmul.f32 %v10238_v26, %v646_v39  ;;  %v2421_v47 = vunpack.c.l.bf16 %v2029_v40  ;;  %v2422_v48 = vunpack.c.l.bf16 %v2030_v28  ;;  %v3793_v49 = vmul.f32 %v10238_v26, %v3597_v41 }
 0x248   : > { %v5751_v50 = vadd.f32 %v10249_v34, %v5555_v42  ;;  %v5752_v51 = vadd.f32 %v10249_v34, %v5556_v43  ;;  %v1049_v52 = vadd.f32 %v10249_v34, %v847_v44  ;;  %v3794_v53 = vmul.f32 %v10238_v26, %v3598_v45 }
 0x249   : > { %v1050_v54 = vadd.f32 %v10249_v34, %v848_v46  ;;  %v2617_v55 = vmul.f32 %v10238_v26, %v2421_v47  ;;  %v2618_v56 = vmul.f32 %v10238_v26, %v2422_v48  ;;  %v3989_v57 = vadd.f32 %v10249_v34, %v3793_v49 }
 0x24a   : > { %vm5947_vm14 = vcmp.ge.f32.partialorder %v5751_v50, 0.0  ;;  %vm5948_vm15 = vcmp.ge.f32.partialorder %v5752_v51, 0.0  ;;  %v6143_v58 = vmul.f32 0.1, %v5751_v50  ;;  %v6144_v59 = vmul.f32 0.1, %v5752_v51 }
 0x24b   : > { %vm1245_vm0 = vcmp.ge.f32.partialorder %v1049_v52, 0.0  ;;  %vm1246_vm1 = vcmp.ge.f32.partialorder %v1050_v54, 0.0  ;;  %v1441_v60 = vmul.f32 0.1, %v1049_v52  ;;  %v1442_v61 = vmul.f32 0.1, %v1050_v54 }
 0x24c   : > { %v6339_v62 = vsel %vm5947_vm14, %v5751_v50, %v6143_v58  ;;  %v6340_v63 = vsel %vm5948_vm15, %v5752_v51, %v6144_v59  ;;  %v2813_v1 = vadd.f32 %v10249_v34, %v2617_v55  ;;  %v2814_v2 = vadd.f32 %v10249_v34, %v2618_v56 }
 0x24d   : > { %v6731_v3 = vmax.f32 %v4575_v31, %v6339_v62  ;;  %v6732_v4 = vmax.f32 %v4576_v32, %v6340_v63  ;;  %v10420_v6 = vsel %vm1245_vm0, %v1049_v52, %v1441_v60  ;;  %v10422_v7 = vsel %vm1246_vm1, %v1050_v54, %v1442_v61 }
 0x24e   : > { %vm3009_vm2 = vcmp.ge.f32.partialorder %v2813_v1, 0.0  ;;  %vm3010_vm3 = vcmp.ge.f32.partialorder %v2814_v2, 0.0  ;;  %v3205_v8 = vmul.f32 0.1, %v2813_v1  ;;  %v3206_v10 = vmul.f32 0.1, %v2814_v2 }
 0x24f   : > { %v6927_v11 = vmax.f32 %v6535_v20, %v6731_v3  ;;  %v6928_v12 = vmax.f32 %v6536_v35, %v6732_v4  ;;  %v3990_v0 = vadd.f32 %v10249_v34, %v3794_v53  ;;  %vm4185_vm4 = vcmp.ge.f32.partialorder %v3989_v57, 0.0 }
 0x250   : > { %v3401_v14 = vsel %vm3009_vm2, %v2813_v1, %v3205_v8  ;;  %v3402_v16 = vsel %vm3010_vm3, %v2814_v2, %v3206_v10  ;;  %v4381_v17 = vmul.f32 0.1, %v3989_v57  ;;  %v4969_v18 = vrot.slane %v330_v36, 4 }
 0x251   : > { %v8724_v19 = vpack.c.bf16 %v6928_v12, %v6927_v11  ;;  %vm4186_vm5 = vcmp.ge.f32.partialorder %v3990_v0, 0.0  ;;  %v4382_v5 = vmul.f32 0.1, %v3990_v0  ;;  %v4970_v21 = vrot.slane %v338_v38, 4  ;;  %v334_v12 = vld [vmem:[%s9329_s28 + $0x4e8] sm:$0xff] }
 0x252   : > { %v4577_v24 = vsel %vm4185_vm4, %v3989_v57, %v4381_v17  ;;  %v5361_v25 = vunpack.c.l.bf16 %v4969_v18  ;;  %v6537_v13 = vmax.f32 %v10420_v6, %v3401_v14  ;;  %v6538_v27 = vmax.f32 %v10422_v7, %v3402_v16  ;;  %v335_v17 = vld [vmem:[%s9329_s28 + $0x4f0] sm:$0xff] }
 0x253   : > { %9062 = vst [vmem:[%s9383_s8 + $0x128] sm:$0xff] %v8724_v19   ;;  %v4578_v15 = vsel %vm4186_vm5, %v3990_v0, %v4382_v5  ;;  %v5362_v29 = vunpack.c.l.bf16 %v4970_v21  ;;  %v647_v31 = vunpack.c.l.bf16 %v332_v9  ;;  %v648_v32 = vunpack.c.l.bf16 %v333_v23 }
 0x254   : > { %v5557_v20 = vmul.f32 %v10238_v26, %v5361_v25  ;;  %v2031_v22 = vrot.slane %v332_v9, 4  ;;  %v2032_v35 = vrot.slane %v333_v23, 4  ;;  %v3599_v36 = vunpack.c.l.bf16 %v339_v30  ;;  %v341_v23 = vld [vmem:[%s9329_s28 + $0x520] sm:$0xff] }
 0x255   : > { %v5558_v37 = vmul.f32 %v10238_v26, %v5362_v29  ;;  %v849_v38 = vmul.f32 %v10238_v26, %v647_v31  ;;  %v850_v39 = vmul.f32 %v10238_v26, %v648_v32  ;;  %v3600_v40 = vunpack.c.l.bf16 %v340_v33  ;;  %v342_v29 = vld [vmem:[%s9329_s28 + $0x528] sm:$0xff]  ;;  %v10464_v32 = vld [vmem:[%s12137_s1] ss:$0 sm:$0xff] }
 0x256   : > { %v5753_v28 = vadd.f32 %v10249_v34, %v5557_v20  ;;  %v2423_v41 = vunpack.c.l.bf16 %v2031_v22  ;;  %v2424_v42 = vunpack.c.l.bf16 %v2032_v35  ;;  %v3795_v43 = vmul.f32 %v10238_v26, %v3599_v36 }
 0x257   : > { %v5754_v44 = vadd.f32 %v10249_v34, %v5558_v37  ;;  %v1051_v45 = vadd.f32 %v10249_v34, %v849_v38  ;;  %v1052_v46 = vadd.f32 %v10249_v34, %v850_v39  ;;  %v3796_v47 = vmul.f32 %v10238_v26, %v3600_v40  ;;  %v10475_v40 = vld [vmem:[%s12138_s2] ss:$0 sm:$0xff] }
 0x258   : > { %vm5949_vm6 = vcmp.ge.f32.partialorder %v5753_v28, 0.0  ;;  %v6145_v48 = vmul.f32 0.1, %v5753_v28  ;;  %v2619_v49 = vmul.f32 %v10238_v26, %v2423_v41  ;;  %v2620_v50 = vmul.f32 %v10238_v26, %v2424_v42 }
 0x259   : > { %vm5950_vm7 = vcmp.ge.f32.partialorder %v5754_v44, 0.0  ;;  %v6146_v51 = vmul.f32 0.1, %v5754_v44  ;;  %vm1247_vm8 = vcmp.ge.f32.partialorder %v1051_v45, 0.0  ;;  %vm1248_vm9 = vcmp.ge.f32.partialorder %v1052_v46, 0.0 }
 0x25a   : > { %v6341_v52 = vsel %vm5949_vm6, %v5753_v28, %v6145_v48  ;;  %v1443_v53 = vmul.f32 0.1, %v1051_v45  ;;  %v1444_v54 = vmul.f32 0.1, %v1052_v46  ;;  %v2815_v55 = vadd.f32 %v10249_v34, %v2619_v49 }
 0x25b   : > { %v6342_v56 = vsel %vm5950_vm7, %v5754_v44, %v6146_v51  ;;  %v6733_v57 = vmax.f32 %v4577_v24, %v6341_v52  ;;  %v2816_v58 = vadd.f32 %v10249_v34, %v2620_v50  ;;  %v3991_v59 = vadd.f32 %v10249_v34, %v3795_v43 }
 0x25c   : > { %v6734_v60 = vmax.f32 %v4578_v15, %v6342_v56  ;;  %v10447_v61 = vsel %vm1247_vm8, %v1051_v45, %v1443_v53  ;;  %v10449_v62 = vsel %vm1248_vm9, %v1052_v46, %v1444_v54  ;;  %vm3011_vm10 = vcmp.ge.f32.partialorder %v2815_v55, 0.0 }
 0x25d   : > { %v6929_v63 = vmax.f32 %v6537_v13, %v6733_v57  ;;  %vm3012_vm11 = vcmp.ge.f32.partialorder %v2816_v58, 0.0  ;;  %v3207_v1 = vmul.f32 0.1, %v2815_v55  ;;  %v3208_v2 = vmul.f32 0.1, %v2816_v58 }
 0x25e   : > { %v6930_v3 = vmax.f32 %v6538_v27, %v6734_v60  ;;  %v3992_v4 = vadd.f32 %v10249_v34, %v3796_v47  ;;  %vm4187_vm12 = vcmp.ge.f32.partialorder %v3991_v59, 0.0  ;;  %v4383_v6 = vmul.f32 0.1, %v3991_v59 }
 0x25f   : > { %v3403_v7 = vsel %vm3011_vm10, %v2815_v55, %v3207_v1  ;;  %v3404_v8 = vsel %vm3012_vm11, %v2816_v58, %v3208_v2  ;;  %v4971_v10 = vrot.slane %v339_v30, 4  ;;  %v4972_v11 = vrot.slane %v340_v33, 4 }
 0x260   : > { %v8729_v0 = vpack.c.bf16 %v6930_v3, %v6929_v63  ;;  %vm4188_vm13 = vcmp.ge.f32.partialorder %v3992_v4, 0.0  ;;  %v4384_v14 = vmul.f32 0.1, %v3992_v4  ;;  %v4579_v16 = vsel %vm4187_vm12, %v3991_v59, %v4383_v6  ;;  %v336_v3 = vld [vmem:[%s9329_s28 + $0x4f8] sm:$0xff] }
 0x261   : > { %v5363_v18 = vunpack.c.l.bf16 %v4971_v10  ;;  %v5364_v19 = vunpack.c.l.bf16 %v4972_v11  ;;  %v6539_v5 = vmax.f32 %v10447_v61, %v3403_v7  ;;  %v6540_v21 = vmax.f32 %v10449_v62, %v3404_v8  ;;  %v337_v10 = vld [vmem:[%s9329_s28 + $0x500] sm:$0xff] }
 0x262   : > { %9063 = vst [vmem:[%s9383_s8 + $0x130] sm:$0xff] %v8729_v0   ;;  %v4580_v9 = vsel %vm4188_vm13, %v3992_v4, %v4384_v14  ;;  %v649_v24 = vunpack.c.l.bf16 %v334_v12  ;;  %v650_v25 = vunpack.c.l.bf16 %v335_v17  ;;  %v2033_v13 = vrot.slane %v334_v12, 4 }
 0x263   : > { %v5559_v27 = vmul.f32 %v10238_v26, %v5363_v18  ;;  %v5560_v15 = vmul.f32 %v10238_v26, %v5364_v19  ;;  %v2034_v30 = vrot.slane %v335_v17, 4  ;;  %v3601_v31 = vunpack.c.l.bf16 %v341_v23  ;;  %v343_v18 = vld [vmem:[%s9329_s28 + $0x530] sm:$0xff]  ;;  %v344_v19 = vld [vmem:[%s9329_s28 + $0x538] sm:$0xff] }
 0x264   : > { %v851_v20 = vmul.f32 %v10464_v32, %v649_v24  ;;  %v852_v33 = vmul.f32 %v10464_v32, %v650_v25  ;;  %v2425_v22 = vunpack.c.l.bf16 %v2033_v13  ;;  %v3602_v35 = vunpack.c.l.bf16 %v342_v29 }
 0x265   : > { %v5755_v36 = vadd.f32 %v10249_v34, %v5559_v27  ;;  %v5756_v37 = vadd.f32 %v10249_v34, %v5560_v15  ;;  %v2426_v38 = vunpack.c.l.bf16 %v2034_v30  ;;  %v3797_v26 = vmul.f32 %v10464_v32, %v3601_v31 }
 0x266   : > { %v1053_v39 = vadd.f32 %v10249_v34, %v851_v20  ;;  %v1054_v28 = vadd.f32 %v10475_v40, %v852_v33  ;;  %v2621_v41 = vmul.f32 %v10464_v32, %v2425_v22  ;;  %v3798_v42 = vmul.f32 %v10464_v32, %v3602_v35 }
 0x267   : > { %vm5951_vm14 = vcmp.ge.f32.partialorder %v5755_v36, 0.0  ;;  %vm5952_vm15 = vcmp.ge.f32.partialorder %v5756_v37, 0.0  ;;  %v6147_v43 = vmul.f32 0.1, %v5755_v36  ;;  %v6148_v44 = vmul.f32 0.1, %v5756_v37 }
 0x268   : > { %vm1249_vm0 = vcmp.ge.f32.partialorder %v1053_v39, 0.0  ;;  %vm1250_vm1 = vcmp.ge.f32.partialorder %v1054_v28, 0.0  ;;  %v1445_v45 = vmul.f32 0.1, %v1053_v39  ;;  %v1446_v46 = vmul.f32 0.1, %v1054_v28 }
 0x269   : > { %v6343_v34 = vsel %vm5951_vm14, %v5755_v36, %v6147_v43  ;;  %v6344_v47 = vsel %vm5952_vm15, %v5756_v37, %v6148_v44  ;;  %v2622_v48 = vmul.f32 %v10464_v32, %v2426_v38  ;;  %v2817_v49 = vadd.f32 %v10475_v40, %v2621_v41 }
 0x26a   : > { %v6735_v50 = vmax.f32 %v4579_v16, %v6343_v34  ;;  %v6736_v51 = vmax.f32 %v4580_v9, %v6344_v47  ;;  %v10482_v52 = vsel %vm1249_vm0, %v1053_v39, %v1445_v45  ;;  %v10484_v53 = vsel %vm1250_vm1, %v1054_v28, %v1446_v46 }
 0x26b   : > { %v2818_v54 = vadd.f32 %v10475_v40, %v2622_v48  ;;  %vm3013_vm2 = vcmp.ge.f32.partialorder %v2817_v49, 0.0  ;;  %v3209_v55 = vmul.f32 0.1, %v2817_v49  ;;  %v3993_v56 = vadd.f32 %v10475_v40, %v3797_v26 }
 0x26c   : > { %v6931_v57 = vmax.f32 %v6539_v5, %v6735_v50  ;;  %v6932_v58 = vmax.f32 %v6540_v21, %v6736_v51  ;;  %v3994_v59 = vadd.f32 %v10475_v40, %v3798_v42  ;;  %v4973_v60 = vrot.slane %v341_v23, 4 }
 0x26d   : > { %vm3014_vm3 = vcmp.ge.f32.partialorder %v2818_v54, 0.0  ;;  %v3210_v61 = vmul.f32 0.1, %v2818_v54  ;;  %v3405_v62 = vsel %vm3013_vm2, %v2817_v49, %v3209_v55  ;;  %vm4189_vm4 = vcmp.ge.f32.partialorder %v3993_v56, 0.0 }
 0x26e   : > { %v8734_v63 = vpack.c.bf16 %v6932_v58, %v6931_v57  ;;  %vm4190_vm5 = vcmp.ge.f32.partialorder %v3994_v59, 0.0  ;;  %v4385_v1 = vmul.f32 0.1, %v3993_v56  ;;  %v4386_v2 = vmul.f32 0.1, %v3994_v59 }
 0x26f   : > { %v3406_v4 = vsel %vm3014_vm3, %v2818_v54, %v3210_v61  ;;  %v4974_v6 = vrot.slane %v342_v29, 4  ;;  %v5365_v7 = vunpack.c.l.bf16 %v4973_v60  ;;  %v6541_v8 = vmax.f32 %v10482_v52, %v3405_v62  ;;  %v345_v60 = vld [vmem:[%s9329_s28 + $0x540] sm:$0xff]  ;;  %v346_v61 = vld [vmem:[%s9329_s28 + $0x548] sm:$0xff] }
 0x270   : > { %9064 = vst [vmem:[%s9383_s8 + $0x138] sm:$0xff] %v8734_v63   ;;  %v4581_v11 = vsel %vm4189_vm4, %v3993_v56, %v4385_v1  ;;  %v4582_v12 = vsel %vm4190_vm5, %v3994_v59, %v4386_v2  ;;  %v6542_v0 = vmax.f32 %v10484_v53, %v3406_v4  ;;  %v651_v14 = vunpack.c.l.bf16 %v336_v3 }
 0x271   : > { %v5366_v16 = vunpack.c.l.bf16 %v4974_v6  ;;  %v5561_v17 = vmul.f32 %v10464_v32, %v5365_v7  ;;  %v652_v5 = vunpack.c.l.bf16 %v337_v10  ;;  %v2035_v21 = vrot.slane %v336_v3, 4  ;;  %v352_v7 = vld [vmem:[%s9329_s28 + $0x578] sm:$0xff] }
 0x272   : > { %v853_v9 = vmul.f32 %v10464_v32, %v651_v14  ;;  %v2036_v23 = vrot.slane %v337_v10, 4  ;;  %v3603_v24 = vunpack.c.l.bf16 %v343_v18  ;;  %v3604_v25 = vunpack.c.l.bf16 %v344_v19  ;;  %v353_v10 = vld [vmem:[%s9329_s28 + $0x580] sm:$0xff] }
 0x273   : > { %v5562_v13 = vmul.f32 %v10464_v32, %v5366_v16  ;;  %v5757_v27 = vadd.f32 %v10475_v40, %v5561_v17  ;;  %v854_v15 = vmul.f32 %v10464_v32, %v652_v5  ;;  %v2427_v29 = vunpack.c.l.bf16 %v2035_v21 }
 0x274   : > { %v1055_v30 = vadd.f32 %v10475_v40, %v853_v9  ;;  %v2428_v31 = vunpack.c.l.bf16 %v2036_v23  ;;  %v3799_v20 = vmul.f32 %v10464_v32, %v3603_v24  ;;  %v3800_v33 = vmul.f32 %v10464_v32, %v3604_v25 }
 0x275   : > { %v5758_v22 = vadd.f32 %v10475_v40, %v5562_v13  ;;  %vm5953_vm6 = vcmp.ge.f32.partialorder %v5757_v27, 0.0  ;;  %v6149_v35 = vmul.f32 0.1, %v5757_v27  ;;  %v1056_v36 = vadd.f32 %v10475_v40, %v854_v15 }
 0x276   : > { %vm1251_vm7 = vcmp.ge.f32.partialorder %v1055_v30, 0.0  ;;  %v1447_v37 = vmul.f32 0.1, %v1055_v30  ;;  %v2623_v38 = vmul.f32 %v10464_v32, %v2427_v29  ;;  %v2624_v26 = vmul.f32 %v10464_v32, %v2428_v31 }
 0x277   : > { %vm5954_vm8 = vcmp.ge.f32.partialorder %v5758_v22, 0.0  ;;  %v6150_v39 = vmul.f32 0.1, %v5758_v22  ;;  %v6345_v28 = vsel %vm5953_vm6, %v5757_v27, %v6149_v35  ;;  %vm1252_vm9 = vcmp.ge.f32.partialorder %v1056_v36, 0.0 }
 0x278   : > { %v6737_v41 = vmax.f32 %v4581_v11, %v6345_v28  ;;  %v1448_v42 = vmul.f32 0.1, %v1056_v36  ;;  %v10508_v43 = vsel %vm1251_vm7, %v1055_v30, %v1447_v37  ;;  %v2819_v44 = vadd.f32 %v10475_v40, %v2623_v38 }
 0x279   : > { %v6346_v45 = vsel %vm5954_vm8, %v5758_v22, %v6150_v39  ;;  %v2820_v46 = vadd.f32 %v10475_v40, %v2624_v26  ;;  %v3995_v34 = vadd.f32 %v10475_v40, %v3799_v20  ;;  %v3996_v47 = vadd.f32 %v10475_v40, %v3800_v33 }
 0x27a   : > { %v6738_v48 = vmax.f32 %v4582_v12, %v6346_v45  ;;  %v6933_v49 = vmax.f32 %v6541_v8, %v6737_v41  ;;  %v10514_v50 = vsel %vm1252_vm9, %v1056_v36, %v1448_v42  ;;  %vm3015_vm10 = vcmp.ge.f32.partialorder %v2819_v44, 0.0 }
 0x27b   : > { %vm3016_vm11 = vcmp.ge.f32.partialorder %v2820_v46, 0.0  ;;  %v3211_v51 = vmul.f32 0.1, %v2819_v44  ;;  %v3212_v52 = vmul.f32 0.1, %v2820_v46  ;;  %vm4191_vm12 = vcmp.ge.f32.partialorder %v3995_v34, 0.0 }
 0x27c   : > { %v6934_v53 = vmax.f32 %v6542_v0, %v6738_v48  ;;  %vm4192_vm13 = vcmp.ge.f32.partialorder %v3996_v47, 0.0  ;;  %v4387_v54 = vmul.f32 0.1, %v3995_v34  ;;  %v4388_v55 = vmul.f32 0.1, %v3996_v47 }
 0x27d   : > { %v3407_v56 = vsel %vm3015_vm10, %v2819_v44, %v3211_v51  ;;  %v3408_v57 = vsel %vm3016_vm11, %v2820_v46, %v3212_v52  ;;  %v4975_v58 = vrot.slane %v343_v18, 4  ;;  %v4976_v59 = vrot.slane %v344_v19, 4 }
 0x27e   : > { %v8739_v62 = vpack.c.bf16 %v6934_v53, %v6933_v49  ;;  %v4583_v63 = vsel %vm4191_vm12, %v3995_v34, %v4387_v54  ;;  %v4584_v1 = vsel %vm4192_vm13, %v3996_v47, %v4388_v55  ;;  %v6543_v2 = vmax.f32 %v10508_v43, %v3407_v56  ;;  %v347_v54 = vld [vmem:[%s9329_s28 + $0x550] sm:$0xff]  ;;  %v348_v55 = vld [vmem:[%s9329_s28 + $0x558] sm:$0xff] }
 0x27f   : > { %v5367_v3 = vunpack.c.l.bf16 %v4975_v58  ;;  %v5368_v4 = vunpack.c.l.bf16 %v4976_v59  ;;  %v6544_v6 = vmax.f32 %v10514_v50, %v3408_v57  ;;  %v653_v8 = vunpack.c.l.bf16 %v345_v60 }
 0x280   : > { %9065 = vst [vmem:[%s9383_s8 + $0x140] sm:$0xff] %v8739_v62   ;;  %v654_v11 = vunpack.c.l.bf16 %v346_v61  ;;  %v2037_v12 = vrot.slane %v345_v60, 4  ;;  %v2038_v0 = vrot.slane %v346_v61, 4  ;;  %v3605_v14 = vunpack.c.l.bf16 %v352_v7  ;;  %v354_v62 = vld [vmem:[%s9329_s28 + $0x588] sm:$0xff] }
 0x281   : > { %v5563_v16 = vmul.f32 %v10464_v32, %v5367_v3  ;;  %v5564_v17 = vmul.f32 %v10464_v32, %v5368_v4  ;;  %v855_v18 = vmul.f32 %v10464_v32, %v653_v8  ;;  %v3606_v19 = vunpack.c.l.bf16 %v353_v10  ;;  %v355_v3 = vld [vmem:[%s9329_s28 + $0x590] sm:$0xff] }
 0x282   : > { %v856_v5 = vmul.f32 %v10464_v32, %v654_v11  ;;  %v2429_v21 = vunpack.c.l.bf16 %v2037_v12  ;;  %v2430_v9 = vunpack.c.l.bf16 %v2038_v0  ;;  %v3801_v23 = vmul.f32 %v10464_v32, %v3605_v14 }
 0x283   : > { %v5759_v24 = vadd.f32 %v10475_v40, %v5563_v16  ;;  %v5760_v25 = vadd.f32 %v10475_v40, %v5564_v17  ;;  %v1057_v13 = vadd.f32 %v10475_v40, %v855_v18  ;;  %v3802_v27 = vmul.f32 %v10464_v32, %v3606_v19 }
 0x284   : > { %v1058_v15 = vadd.f32 %v10475_v40, %v856_v5  ;;  %v2625_v29 = vmul.f32 %v10464_v32, %v2429_v21  ;;  %v2626_v30 = vmul.f32 %v10464_v32, %v2430_v9  ;;  %v3997_v31 = vadd.f32 %v10475_v40, %v3801_v23 }
 0x285   : > { %vm5955_vm14 = vcmp.ge.f32.partialorder %v5759_v24, 0.0  ;;  %vm5956_vm15 = vcmp.ge.f32.partialorder %v5760_v25, 0.0  ;;  %v6151_v20 = vmul.f32 0.1, %v5759_v24  ;;  %v6152_v33 = vmul.f32 0.1, %v5760_v25 }
 0x286   : > { %vm1253_vm0 = vcmp.ge.f32.partialorder %v1057_v13, 0.0  ;;  %vm1254_vm1 = vcmp.ge.f32.partialorder %v1058_v15, 0.0  ;;  %v1449_v22 = vmul.f32 0.1, %v1057_v13  ;;  %v1450_v35 = vmul.f32 0.1, %v1058_v15 }
 0x287   : > { %v6347_v36 = vsel %vm5955_vm14, %v5759_v24, %v6151_v20  ;;  %v6348_v37 = vsel %vm5956_vm15, %v5760_v25, %v6152_v33  ;;  %v2821_v38 = vadd.f32 %v10475_v40, %v2625_v29  ;;  %v2822_v26 = vadd.f32 %v10475_v40, %v2626_v30 }
 0x288   : > { %v6739_v39 = vmax.f32 %v4583_v63, %v6347_v36  ;;  %v6740_v28 = vmax.f32 %v4584_v1, %v6348_v37  ;;  %v10538_v41 = vsel %vm1253_vm0, %v1057_v13, %v1449_v22  ;;  %v10540_v42 = vsel %vm1254_vm1, %v1058_v15, %v1450_v35 }
 0x289   : > { %vm3017_vm2 = vcmp.ge.f32.partialorder %v2821_v38, 0.0  ;;  %vm3018_vm3 = vcmp.ge.f32.partialorder %v2822_v26, 0.0  ;;  %v3213_v43 = vmul.f32 0.1, %v2821_v38  ;;  %v3214_v44 = vmul.f32 0.1, %v2822_v26 }
 0x28a   : > { %v6935_v45 = vmax.f32 %v6543_v2, %v6739_v39  ;;  %v6936_v46 = vmax.f32 %v6544_v6, %v6740_v28  ;;  %v3998_v34 = vadd.f32 %v10475_v40, %v3802_v27  ;;  %vm4193_vm4 = vcmp.ge.f32.partialorder %v3997_v31, 0.0 }
 0x28b   : > { %v3409_v47 = vsel %vm3017_vm2, %v2821_v38, %v3213_v43  ;;  %v3410_v48 = vsel %vm3018_vm3, %v2822_v26, %v3214_v44  ;;  %v4389_v49 = vmul.f32 0.1, %v3997_v31  ;;  %v4977_v50 = vrot.slane %v352_v7, 4 }
 0x28c   : > { %v8744_v51 = vpack.c.bf16 %v6936_v46, %v6935_v45  ;;  %vm4194_vm5 = vcmp.ge.f32.partialorder %v3998_v34, 0.0  ;;  %v4390_v52 = vmul.f32 0.1, %v3998_v34  ;;  %v4978_v53 = vrot.slane %v353_v10, 4  ;;  %v349_v46 = vld [vmem:[%s9329_s28 + $0x560] sm:$0xff] }
 0x28d   : > { %v4585_v56 = vsel %vm4193_vm4, %v3997_v31, %v4389_v49  ;;  %v5369_v57 = vunpack.c.l.bf16 %v4977_v50  ;;  %v6545_v58 = vmax.f32 %v10538_v41, %v3409_v47  ;;  %v6546_v59 = vmax.f32 %v10540_v42, %v3410_v48  ;;  %v350_v49 = vld [vmem:[%s9329_s28 + $0x568] sm:$0xff] }
 0x28e   : > { %9066 = vst [vmem:[%s9383_s8 + $0x148] sm:$0xff] %v8744_v51   ;;  %v4586_v60 = vsel %vm4194_vm5, %v3998_v34, %v4390_v52  ;;  %v5370_v61 = vunpack.c.l.bf16 %v4978_v53  ;;  %v655_v63 = vunpack.c.l.bf16 %v347_v54  ;;  %v656_v1 = vunpack.c.l.bf16 %v348_v55 }
 0x28f   : > { %v5565_v2 = vmul.f32 %v10464_v32, %v5369_v57  ;;  %v2039_v4 = vrot.slane %v347_v54, 4  ;;  %v2040_v6 = vrot.slane %v348_v55, 4  ;;  %v3607_v7 = vunpack.c.l.bf16 %v354_v62  ;;  %v356_v55 = vld [vmem:[%s9329_s28 + $0x598] sm:$0xff] }
 0x290   : > { %v5566_v8 = vmul.f32 %v10464_v32, %v5370_v61  ;;  %v857_v10 = vmul.f32 %v10464_v32, %v655_v63  ;;  %v858_v11 = vmul.f32 %v10464_v32, %v656_v1  ;;  %v3608_v12 = vunpack.c.l.bf16 %v355_v3  ;;  %v357_v61 = vld [vmem:[%s9329_s28 + $0x5a0] sm:$0xff] }
 0x291   : > { %v5761_v0 = vadd.f32 %v10475_v40, %v5565_v2  ;;  %v2431_v14 = vunpack.c.l.bf16 %v2039_v4  ;;  %v2432_v16 = vunpack.c.l.bf16 %v2040_v6  ;;  %v3803_v17 = vmul.f32 %v10464_v32, %v3607_v7 }
 0x292   : > { %v5762_v18 = vadd.f32 %v10475_v40, %v5566_v8  ;;  %v1059_v19 = vadd.f32 %v10475_v40, %v857_v10  ;;  %v1060_v5 = vadd.f32 %v10475_v40, %v858_v11  ;;  %v3804_v21 = vmul.f32 %v10464_v32, %v3608_v12 }
 0x293   : > { %vm5957_vm6 = vcmp.ge.f32.partialorder %v5761_v0, 0.0  ;;  %v6153_v9 = vmul.f32 0.1, %v5761_v0  ;;  %v2627_v23 = vmul.f32 %v10464_v32, %v2431_v14  ;;  %v2628_v24 = vmul.f32 %v10464_v32, %v2432_v16 }
 0x294   : > { %vm5958_vm7 = vcmp.ge.f32.partialorder %v5762_v18, 0.0  ;;  %v6154_v25 = vmul.f32 0.1, %v5762_v18  ;;  %vm1255_vm8 = vcmp.ge.f32.partialorder %v1059_v19, 0.0  ;;  %vm1256_vm9 = vcmp.ge.f32.partialorder %v1060_v5, 0.0 }
 0x295   : > { %v6349_v13 = vsel %vm5957_vm6, %v5761_v0, %v6153_v9  ;;  %v1451_v27 = vmul.f32 0.1, %v1059_v19  ;;  %v1452_v15 = vmul.f32 0.1, %v1060_v5  ;;  %v2823_v29 = vadd.f32 %v10475_v40, %v2627_v23 }
 0x296   : > { %v6350_v30 = vsel %vm5958_vm7, %v5762_v18, %v6154_v25  ;;  %v6741_v31 = vmax.f32 %v4585_v56, %v6349_v13  ;;  %v2824_v20 = vadd.f32 %v10475_v40, %v2628_v24  ;;  %v3999_v33 = vadd.f32 %v10475_v40, %v3803_v17 }
 0x297   : > { %v6742_v22 = vmax.f32 %v4586_v60, %v6350_v30  ;;  %v10565_v35 = vsel %vm1255_vm8, %v1059_v19, %v1451_v27  ;;  %v10567_v36 = vsel %vm1256_vm9, %v1060_v5, %v1452_v15  ;;  %vm3019_vm10 = vcmp.ge.f32.partialorder %v2823_v29, 0.0 }
 0x298   : > { %v6937_v37 = vmax.f32 %v6545_v58, %v6741_v31  ;;  %vm3020_vm11 = vcmp.ge.f32.partialorder %v2824_v20, 0.0  ;;  %v3215_v38 = vmul.f32 0.1, %v2823_v29  ;;  %v3216_v26 = vmul.f32 0.1, %v2824_v20 }
 0x299   : > { %v6938_v39 = vmax.f32 %v6546_v59, %v6742_v22  ;;  %v4000_v28 = vadd.f32 %v10475_v40, %v3804_v21  ;;  %vm4195_vm12 = vcmp.ge.f32.partialorder %v3999_v33, 0.0  ;;  %v4391_v41 = vmul.f32 0.1, %v3999_v33 }
 0x29a   : > { %v3411_v42 = vsel %vm3019_vm10, %v2823_v29, %v3215_v38  ;;  %v3412_v43 = vsel %vm3020_vm11, %v2824_v20, %v3216_v26  ;;  %v4979_v44 = vrot.slane %v354_v62, 4  ;;  %v4980_v45 = vrot.slane %v355_v3, 4 }
 0x29b   : > { %v8749_v34 = vpack.c.bf16 %v6938_v39, %v6937_v37  ;;  %vm4196_vm13 = vcmp.ge.f32.partialorder %v4000_v28, 0.0  ;;  %v4392_v47 = vmul.f32 0.1, %v4000_v28  ;;  %v4587_v48 = vsel %vm4195_vm12, %v3999_v33, %v4391_v41  ;;  %v351_v39 = vld [vmem:[%s9329_s28 + $0x570] sm:$0xff] }
 0x29c   : > { %v5371_v50 = vunpack.c.l.bf16 %v4979_v44  ;;  %v5372_v51 = vunpack.c.l.bf16 %v4980_v45  ;;  %v6547_v52 = vmax.f32 %v10565_v35, %v3411_v42  ;;  %v6548_v53 = vmax.f32 %v10567_v36, %v3412_v43  ;;  %v359_v44 = vld [vmem:[%s9329_s28 + $0x5b0] sm:$0xff] }
 0x29d   : > { %9067 = vst [vmem:[%s9383_s8 + $0x150] sm:$0xff] %v8749_v34   ;;  %v4588_v54 = vsel %vm4196_vm13, %v4000_v28, %v4392_v47  ;;  %v657_v56 = vunpack.c.l.bf16 %v349_v46  ;;  %v658_v57 = vunpack.c.l.bf16 %v350_v49  ;;  %v2041_v58 = vrot.slane %v349_v46, 4 }
 0x29e   : > { %v5567_v59 = vmul.f32 %v10464_v32, %v5371_v50  ;;  %v5568_v60 = vmul.f32 %v10464_v32, %v5372_v51  ;;  %v2042_v62 = vrot.slane %v350_v49, 4  ;;  %v3609_v63 = vunpack.c.l.bf16 %v356_v55  ;;  %v358_v50 = vld [vmem:[%s9329_s28 + $0x5a8] sm:$0xff] }
 0x29f   : > { %v859_v1 = vmul.f32 %v10464_v32, %v657_v56  ;;  %v860_v2 = vmul.f32 %v10464_v32, %v658_v57  ;;  %v2433_v3 = vunpack.c.l.bf16 %v2041_v58  ;;  %v3610_v4 = vunpack.c.l.bf16 %v357_v61  ;;  %v366_v51 = vld [vmem:[%s9329_s28 + $0x5e8] sm:$0xff] }
 0x2a0   : > { %v5763_v6 = vadd.f32 %v10475_v40, %v5567_v59  ;;  %v5764_v7 = vadd.f32 %v10475_v40, %v5568_v60  ;;  %v2434_v8 = vunpack.c.l.bf16 %v2042_v62  ;;  %v3805_v10 = vmul.f32 %v10464_v32, %v3609_v63 }
 0x2a1   : > { %v1061_v11 = vadd.f32 %v10475_v40, %v859_v1  ;;  %v1062_v12 = vadd.f32 %v10475_v40, %v860_v2  ;;  %v2629_v0 = vmul.f32 %v10464_v32, %v2433_v3  ;;  %v3806_v14 = vmul.f32 %v10464_v32, %v3610_v4 }
 0x2a2   : > { %vm5959_vm14 = vcmp.ge.f32.partialorder %v5763_v6, 0.0  ;;  %vm5960_vm15 = vcmp.ge.f32.partialorder %v5764_v7, 0.0  ;;  %v6155_v16 = vmul.f32 0.1, %v5763_v6  ;;  %v6156_v17 = vmul.f32 0.1, %v5764_v7 }
 0x2a3   : > { %vm1257_vm0 = vcmp.ge.f32.partialorder %v1061_v11, 0.0  ;;  %vm1258_vm1 = vcmp.ge.f32.partialorder %v1062_v12, 0.0  ;;  %v1453_v18 = vmul.f32 0.1, %v1061_v11  ;;  %v1454_v19 = vmul.f32 0.1, %v1062_v12 }
 0x2a4   : > { %v6351_v5 = vsel %vm5959_vm14, %v5763_v6, %v6155_v16  ;;  %v6352_v21 = vsel %vm5960_vm15, %v5764_v7, %v6156_v17  ;;  %v2630_v9 = vmul.f32 %v10464_v32, %v2434_v8  ;;  %v2825_v23 = vadd.f32 %v10475_v40, %v2629_v0 }
 0x2a5   : > { %v6743_v24 = vmax.f32 %v4587_v48, %v6351_v5  ;;  %v6744_v25 = vmax.f32 %v4588_v54, %v6352_v21  ;;  %v10590_v13 = vsel %vm1257_vm0, %v1061_v11, %v1453_v18  ;;  %v10592_v27 = vsel %vm1258_vm1, %v1062_v12, %v1454_v19 }
 0x2a6   : > { %v2826_v15 = vadd.f32 %v10475_v40, %v2630_v9  ;;  %vm3021_vm2 = vcmp.ge.f32.partialorder %v2825_v23, 0.0  ;;  %v3217_v29 = vmul.f32 0.1, %v2825_v23  ;;  %v4001_v30 = vadd.f32 %v10475_v40, %v3805_v10 }
 0x2a7   : > { %v6939_v31 = vmax.f32 %v6547_v52, %v6743_v24  ;;  %v6940_v20 = vmax.f32 %v6548_v53, %v6744_v25  ;;  %v4002_v33 = vadd.f32 %v10475_v40, %v3806_v14  ;;  %v4981_v22 = vrot.slane %v356_v55, 4 }
 0x2a8   : > { %vm3022_vm3 = vcmp.ge.f32.partialorder %v2826_v15, 0.0  ;;  %v3218_v35 = vmul.f32 0.1, %v2826_v15  ;;  %v3413_v36 = vsel %vm3021_vm2, %v2825_v23, %v3217_v29  ;;  %vm4197_vm4 = vcmp.ge.f32.partialorder %v4001_v30, 0.0 }
 0x2a9   : > { %v8754_v37 = vpack.c.bf16 %v6940_v20, %v6939_v31  ;;  %vm4198_vm5 = vcmp.ge.f32.partialorder %v4002_v33, 0.0  ;;  %v4393_v38 = vmul.f32 0.1, %v4001_v30  ;;  %v4394_v26 = vmul.f32 0.1, %v4002_v33 }
 0x2aa   : > { %v3414_v28 = vsel %vm3022_vm3, %v2826_v15, %v3218_v35  ;;  %v4982_v41 = vrot.slane %v357_v61, 4  ;;  %v5373_v42 = vunpack.c.l.bf16 %v4981_v22  ;;  %v6549_v43 = vmax.f32 %v10590_v13, %v3413_v36  ;;  %v360_v22 = vld [vmem:[%s9329_s28 + $0x5b8] sm:$0xff]  ;;  %v361_v35 = vld [vmem:[%s9329_s28 + $0x5c0] sm:$0xff] }
 0x2ab   : > { %9068 = vst [vmem:[%s9383_s8 + $0x158] sm:$0xff] %v8754_v37   ;;  %v4589_v45 = vsel %vm4197_vm4, %v4001_v30, %v4393_v38  ;;  %v4590_v46 = vsel %vm4198_vm5, %v4002_v33, %v4394_v26  ;;  %v6550_v34 = vmax.f32 %v10592_v27, %v3414_v28  ;;  %v659_v47 = vunpack.c.l.bf16 %v351_v39 }
 0x2ac   : > { %v5374_v48 = vunpack.c.l.bf16 %v4982_v41  ;;  %v5569_v49 = vmul.f32 %v10464_v32, %v5373_v42  ;;  %v660_v52 = vunpack.c.l.bf16 %v359_v44  ;;  %v2043_v53 = vrot.slane %v351_v39, 4  ;;  %v367_v42 = vld [vmem:[%s9329_s28 + $0x5f0] sm:$0xff] }
 0x2ad   : > { %v861_v54 = vmul.f32 %v10464_v32, %v659_v47  ;;  %v2044_v55 = vrot.slane %v359_v44, 4  ;;  %v3611_v56 = vunpack.c.l.bf16 %v358_v50  ;;  %v3612_v57 = vunpack.c.l.bf16 %v366_v51  ;;  %v368_v44 = vld [vmem:[%s9329_s28 + $0x5f8] sm:$0xff] }
 0x2ae   : > { %v5570_v58 = vmul.f32 %v10464_v32, %v5374_v48  ;;  %v5765_v59 = vadd.f32 %v10475_v40, %v5569_v49  ;;  %v862_v60 = vmul.f32 %v10464_v32, %v660_v52  ;;  %v2435_v61 = vunpack.c.l.bf16 %v2043_v53 }
 0x2af   : > { %v1063_v62 = vadd.f32 %v10475_v40, %v861_v54  ;;  %v2436_v63 = vunpack.c.l.bf16 %v2044_v55  ;;  %v3807_v1 = vmul.f32 %v10464_v32, %v3611_v56  ;;  %v3808_v2 = vmul.f32 %v10464_v32, %v3612_v57 }
 0x2b0   : > { %v5766_v3 = vadd.f32 %v10475_v40, %v5570_v58  ;;  %vm5961_vm6 = vcmp.ge.f32.partialorder %v5765_v59, 0.0  ;;  %v6157_v4 = vmul.f32 0.1, %v5765_v59  ;;  %v1064_v6 = vadd.f32 %v10475_v40, %v862_v60 }
 0x2b1   : > { %vm1259_vm7 = vcmp.ge.f32.partialorder %v1063_v62, 0.0  ;;  %v1455_v7 = vmul.f32 0.1, %v1063_v62  ;;  %v2631_v8 = vmul.f32 %v10464_v32, %v2435_v61  ;;  %v2632_v10 = vmul.f32 %v10464_v32, %v2436_v63 }
 0x2b2   : > { %vm5962_vm8 = vcmp.ge.f32.partialorder %v5766_v3, 0.0  ;;  %v6158_v11 = vmul.f32 0.1, %v5766_v3  ;;  %v6353_v12 = vsel %vm5961_vm6, %v5765_v59, %v6157_v4  ;;  %vm1260_vm9 = vcmp.ge.f32.partialorder %v1064_v6, 0.0 }
 0x2b3   : > { %v6745_v0 = vmax.f32 %v4589_v45, %v6353_v12  ;;  %v1456_v14 = vmul.f32 0.1, %v1064_v6  ;;  %v10616_v16 = vsel %vm1259_vm7, %v1063_v62, %v1455_v7  ;;  %v2827_v17 = vadd.f32 %v10475_v40, %v2631_v8 }
 0x2b4   : > { %v6354_v18 = vsel %vm5962_vm8, %v5766_v3, %v6158_v11  ;;  %v2828_v19 = vadd.f32 %v10475_v40, %v2632_v10  ;;  %v4003_v5 = vadd.f32 %v10475_v40, %v3807_v1  ;;  %v4004_v21 = vadd.f32 %v10475_v40, %v3808_v2 }
 0x2b5   : > { %v6746_v9 = vmax.f32 %v4590_v46, %v6354_v18  ;;  %v6941_v23 = vmax.f32 %v6549_v43, %v6745_v0  ;;  %v10622_v24 = vsel %vm1260_vm9, %v1064_v6, %v1456_v14  ;;  %vm3023_vm10 = vcmp.ge.f32.partialorder %v2827_v17, 0.0 }
 0x2b6   : > { %vm3024_vm11 = vcmp.ge.f32.partialorder %v2828_v19, 0.0  ;;  %v3219_v25 = vmul.f32 0.1, %v2827_v17  ;;  %v3220_v13 = vmul.f32 0.1, %v2828_v19  ;;  %vm4199_vm12 = vcmp.ge.f32.partialorder %v4003_v5, 0.0 }
 0x2b7   : > { %v6942_v27 = vmax.f32 %v6550_v34, %v6746_v9  ;;  %vm4200_vm13 = vcmp.ge.f32.partialorder %v4004_v21, 0.0  ;;  %v4395_v15 = vmul.f32 0.1, %v4003_v5  ;;  %v4396_v29 = vmul.f32 0.1, %v4004_v21 }
 0x2b8   : > { %v3415_v30 = vsel %vm3023_vm10, %v2827_v17, %v3219_v25  ;;  %v3416_v31 = vsel %vm3024_vm11, %v2828_v19, %v3220_v13  ;;  %v4983_v20 = vrot.slane %v358_v50, 4  ;;  %v4984_v33 = vrot.slane %v366_v51, 4 }
 0x2b9   : > { %v8759_v36 = vpack.c.bf16 %v6942_v27, %v6941_v23  ;;  %v4591_v37 = vsel %vm4199_vm12, %v4003_v5, %v4395_v15  ;;  %v4592_v38 = vsel %vm4200_vm13, %v4004_v21, %v4396_v29  ;;  %v6551_v26 = vmax.f32 %v10616_v16, %v3415_v30  ;;  %v362_v15 = vld [vmem:[%s9329_s28 + $0x5c8] sm:$0xff]  ;;  %v363_v29 = vld [vmem:[%s9329_s28 + $0x5d0] sm:$0xff] }
 0x2ba   : > { %v5375_v39 = vunpack.c.l.bf16 %v4983_v20  ;;  %v5376_v28 = vunpack.c.l.bf16 %v4984_v33  ;;  %v6552_v41 = vmax.f32 %v10622_v24, %v3416_v31  ;;  %v661_v43 = vunpack.c.l.bf16 %v360_v22 }
 0x2bb   : > { %9069 = vst [vmem:[%s9383_s8 + $0x160] sm:$0xff] %v8759_v36   ;;  %v662_v45 = vunpack.c.l.bf16 %v361_v35  ;;  %v2045_v46 = vrot.slane %v360_v22, 4  ;;  %v2046_v34 = vrot.slane %v361_v35, 4  ;;  %v3613_v47 = vunpack.c.l.bf16 %v367_v42  ;;  %v369_v36 = vld [vmem:[%s9329_s28 + $0x600] sm:$0xff] }
 0x2bc   : > { %v5571_v48 = vmul.f32 %v10464_v32, %v5375_v39  ;;  %v5572_v49 = vmul.f32 %v10464_v32, %v5376_v28  ;;  %v863_v50 = vmul.f32 %v10464_v32, %v661_v43  ;;  %v3614_v51 = vunpack.c.l.bf16 %v368_v44  ;;  %v370_v39 = vld [vmem:[%s9329_s28 + $0x608] sm:$0xff] }
 0x2bd   : > { %v864_v52 = vmul.f32 %v10464_v32, %v662_v45  ;;  %v2437_v53 = vunpack.c.l.bf16 %v2045_v46  ;;  %v2438_v54 = vunpack.c.l.bf16 %v2046_v34  ;;  %v3809_v55 = vmul.f32 %v10464_v32, %v3613_v47 }
 0x2be   : > { %v5767_v56 = vadd.f32 %v10475_v40, %v5571_v48  ;;  %v5768_v57 = vadd.f32 %v10475_v40, %v5572_v49  ;;  %v1065_v58 = vadd.f32 %v10475_v40, %v863_v50  ;;  %v3810_v59 = vmul.f32 %v10464_v32, %v3614_v51 }
 0x2bf   : > { %v1066_v60 = vadd.f32 %v10475_v40, %v864_v52  ;;  %v2633_v61 = vmul.f32 %v10464_v32, %v2437_v53  ;;  %v2634_v62 = vmul.f32 %v10464_v32, %v2438_v54  ;;  %v4005_v63 = vadd.f32 %v10475_v40, %v3809_v55 }
 0x2c0   : > { %vm5963_vm14 = vcmp.ge.f32.partialorder %v5767_v56, 0.0  ;;  %vm5964_vm15 = vcmp.ge.f32.partialorder %v5768_v57, 0.0  ;;  %v6159_v1 = vmul.f32 0.1, %v5767_v56  ;;  %v6160_v2 = vmul.f32 0.1, %v5768_v57 }
 0x2c1   : > { %vm1261_vm0 = vcmp.ge.f32.partialorder %v1065_v58, 0.0  ;;  %vm1262_vm1 = vcmp.ge.f32.partialorder %v1066_v60, 0.0  ;;  %v1457_v3 = vmul.f32 0.1, %v1065_v58  ;;  %v1458_v4 = vmul.f32 0.1, %v1066_v60 }
 0x2c2   : > { %v6355_v6 = vsel %vm5963_vm14, %v5767_v56, %v6159_v1  ;;  %v6356_v7 = vsel %vm5964_vm15, %v5768_v57, %v6160_v2  ;;  %v2829_v8 = vadd.f32 %v10475_v40, %v2633_v61  ;;  %v2830_v10 = vadd.f32 %v10475_v40, %v2634_v62 }
 0x2c3   : > { %v6747_v11 = vmax.f32 %v4591_v37, %v6355_v6  ;;  %v6748_v12 = vmax.f32 %v4592_v38, %v6356_v7  ;;  %v10646_v0 = vsel %vm1261_vm0, %v1065_v58, %v1457_v3  ;;  %v10648_v14 = vsel %vm1262_vm1, %v1066_v60, %v1458_v4 }
 0x2c4   : > { %vm3025_vm2 = vcmp.ge.f32.partialorder %v2829_v8, 0.0  ;;  %vm3026_vm3 = vcmp.ge.f32.partialorder %v2830_v10, 0.0  ;;  %v3221_v16 = vmul.f32 0.1, %v2829_v8  ;;  %v3222_v17 = vmul.f32 0.1, %v2830_v10 }
 0x2c5   : > { %v6943_v18 = vmax.f32 %v6551_v26, %v6747_v11  ;;  %v6944_v19 = vmax.f32 %v6552_v41, %v6748_v12  ;;  %v4006_v5 = vadd.f32 %v10475_v40, %v3810_v59  ;;  %vm4201_vm4 = vcmp.ge.f32.partialorder %v4005_v63, 0.0 }
 0x2c6   : > { %v3417_v21 = vsel %vm3025_vm2, %v2829_v8, %v3221_v16  ;;  %v3418_v9 = vsel %vm3026_vm3, %v2830_v10, %v3222_v17  ;;  %v4397_v23 = vmul.f32 0.1, %v4005_v63  ;;  %v4985_v24 = vrot.slane %v367_v42, 4 }
 0x2c7   : > { %v8764_v25 = vpack.c.bf16 %v6944_v19, %v6943_v18  ;;  %vm4202_vm5 = vcmp.ge.f32.partialorder %v4006_v5, 0.0  ;;  %v4398_v13 = vmul.f32 0.1, %v4006_v5  ;;  %v4986_v27 = vrot.slane %v368_v44, 4  ;;  %v364_v19 = vld [vmem:[%s9329_s28 + $0x5d8] sm:$0xff] }
 0x2c8   : > { %v4593_v30 = vsel %vm4201_vm4, %v4005_v63, %v4397_v23  ;;  %v5377_v31 = vunpack.c.l.bf16 %v4985_v24  ;;  %v6553_v20 = vmax.f32 %v10646_v0, %v3417_v21  ;;  %v6554_v33 = vmax.f32 %v10648_v14, %v3418_v9  ;;  %v365_v23 = vld [vmem:[%s9329_s28 + $0x5e0] sm:$0xff] }
 0x2c9   : > { %9070 = vst [vmem:[%s9383_s8 + $0x168] sm:$0xff] %v8764_v25   ;;  %v4594_v22 = vsel %vm4202_vm5, %v4006_v5, %v4398_v13  ;;  %v5378_v35 = vunpack.c.l.bf16 %v4986_v27  ;;  %v663_v37 = vunpack.c.l.bf16 %v362_v15  ;;  %v664_v38 = vunpack.c.l.bf16 %v363_v29 }
 0x2ca   : > { %v5573_v26 = vmul.f32 %v10464_v32, %v5377_v31  ;;  %v2047_v28 = vrot.slane %v362_v15, 4  ;;  %v2048_v41 = vrot.slane %v363_v29, 4  ;;  %v3615_v42 = vunpack.c.l.bf16 %v369_v36  ;;  %v371_v29 = vld [vmem:[%s9329_s28 + $0x610] sm:$0xff] }
 0x2cb   : > { %v5574_v43 = vmul.f32 %v10464_v32, %v5378_v35  ;;  %v865_v44 = vmul.f32 %v10464_v32, %v663_v37  ;;  %v866_v45 = vmul.f32 %v10464_v32, %v664_v38  ;;  %v3616_v46 = vunpack.c.l.bf16 %v370_v39  ;;  %v372_v35 = vld [vmem:[%s9329_s28 + $0x618] sm:$0xff]  ;;  %v10690_v38 = vld [vmem:[%s12137_s1] ss:$0 sm:$0xff] }
 0x2cc   : > { %v5769_v34 = vadd.f32 %v10475_v40, %v5573_v26  ;;  %v2439_v47 = vunpack.c.l.bf16 %v2047_v28  ;;  %v2440_v48 = vunpack.c.l.bf16 %v2048_v41  ;;  %v3811_v49 = vmul.f32 %v10464_v32, %v3615_v42 }
 0x2cd   : > { %v5770_v50 = vadd.f32 %v10475_v40, %v5574_v43  ;;  %v1067_v51 = vadd.f32 %v10475_v40, %v865_v44  ;;  %v1068_v52 = vadd.f32 %v10475_v40, %v866_v45  ;;  %v3812_v53 = vmul.f32 %v10464_v32, %v3616_v46  ;;  %v10701_v46 = vld [vmem:[%s12138_s2] ss:$0 sm:$0xff] }
 0x2ce   : > { %vm5965_vm6 = vcmp.ge.f32.partialorder %v5769_v34, 0.0  ;;  %v6161_v54 = vmul.f32 0.1, %v5769_v34  ;;  %v2635_v55 = vmul.f32 %v10464_v32, %v2439_v47  ;;  %v2636_v56 = vmul.f32 %v10464_v32, %v2440_v48 }
 0x2cf   : > { %vm5966_vm7 = vcmp.ge.f32.partialorder %v5770_v50, 0.0  ;;  %v6162_v57 = vmul.f32 0.1, %v5770_v50  ;;  %vm1263_vm8 = vcmp.ge.f32.partialorder %v1067_v51, 0.0  ;;  %vm1264_vm9 = vcmp.ge.f32.partialorder %v1068_v52, 0.0 }
 0x2d0   : > { %v6357_v58 = vsel %vm5965_vm6, %v5769_v34, %v6161_v54  ;;  %v1459_v59 = vmul.f32 0.1, %v1067_v51  ;;  %v1460_v60 = vmul.f32 0.1, %v1068_v52  ;;  %v2831_v61 = vadd.f32 %v10475_v40, %v2635_v55 }
 0x2d1   : > { %v6358_v62 = vsel %vm5966_vm7, %v5770_v50, %v6162_v57  ;;  %v6749_v63 = vmax.f32 %v4593_v30, %v6357_v58  ;;  %v2832_v1 = vadd.f32 %v10475_v40, %v2636_v56  ;;  %v4007_v2 = vadd.f32 %v10475_v40, %v3811_v49 }
 0x2d2   : > { %v6750_v3 = vmax.f32 %v4594_v22, %v6358_v62  ;;  %v10673_v4 = vsel %vm1263_vm8, %v1067_v51, %v1459_v59  ;;  %v10675_v6 = vsel %vm1264_vm9, %v1068_v52, %v1460_v60  ;;  %vm3027_vm10 = vcmp.ge.f32.partialorder %v2831_v61, 0.0 }
 0x2d3   : > { %v6945_v7 = vmax.f32 %v6553_v20, %v6749_v63  ;;  %vm3028_vm11 = vcmp.ge.f32.partialorder %v2832_v1, 0.0  ;;  %v3223_v8 = vmul.f32 0.1, %v2831_v61  ;;  %v3224_v10 = vmul.f32 0.1, %v2832_v1 }
 0x2d4   : > { %v6946_v11 = vmax.f32 %v6554_v33, %v6750_v3  ;;  %v4008_v12 = vadd.f32 %v10475_v40, %v3812_v53  ;;  %vm4203_vm12 = vcmp.ge.f32.partialorder %v4007_v2, 0.0  ;;  %v4399_v0 = vmul.f32 0.1, %v4007_v2 }
 0x2d5   : > { %v3419_v14 = vsel %vm3027_vm10, %v2831_v61, %v3223_v8  ;;  %v3420_v16 = vsel %vm3028_vm11, %v2832_v1, %v3224_v10  ;;  %v4987_v17 = vrot.slane %v369_v36, 4  ;;  %v4988_v18 = vrot.slane %v370_v39, 4 }
 0x2d6   : > { %v8769_v5 = vpack.c.bf16 %v6946_v11, %v6945_v7  ;;  %vm4204_vm13 = vcmp.ge.f32.partialorder %v4008_v12, 0.0  ;;  %v4400_v21 = vmul.f32 0.1, %v4008_v12  ;;  %v4595_v9 = vsel %vm4203_vm12, %v4007_v2, %v4399_v0  ;;  %v373_v11 = vld [vmem:[%s9329_s28 + $0x620] sm:$0xff] }
 0x2d7   : > { %v5379_v24 = vunpack.c.l.bf16 %v4987_v17  ;;  %v5380_v25 = vunpack.c.l.bf16 %v4988_v18  ;;  %v6555_v13 = vmax.f32 %v10673_v4, %v3419_v14  ;;  %v6556_v27 = vmax.f32 %v10675_v6, %v3420_v16  ;;  %v374_v17 = vld [vmem:[%s9329_s28 + $0x628] sm:$0xff] }
 0x2d8   : > { %9071 = vst [vmem:[%s9383_s8 + $0x170] sm:$0xff] %v8769_v5   ;;  %v4596_v15 = vsel %vm4204_vm13, %v4008_v12, %v4400_v21  ;;  %v665_v30 = vunpack.c.l.bf16 %v364_v19  ;;  %v666_v31 = vunpack.c.l.bf16 %v365_v23  ;;  %v2049_v20 = vrot.slane %v364_v19, 4 }
 0x2d9   : > { %v5575_v33 = vmul.f32 %v10464_v32, %v5379_v24  ;;  %v5576_v22 = vmul.f32 %v10464_v32, %v5380_v25  ;;  %v2050_v36 = vrot.slane %v365_v23, 4  ;;  %v3617_v37 = vunpack.c.l.bf16 %v371_v29  ;;  %v380_v24 = vld [vmem:[%s9329_s28 + $0x658] sm:$0xff]  ;;  %v381_v25 = vld [vmem:[%s9329_s28 + $0x660] sm:$0xff] }
 0x2da   : > { %v867_v26 = vmul.f32 %v10690_v38, %v665_v30  ;;  %v868_v39 = vmul.f32 %v10690_v38, %v666_v31  ;;  %v2441_v28 = vunpack.c.l.bf16 %v2049_v20  ;;  %v3618_v41 = vunpack.c.l.bf16 %v372_v35 }
 0x2db   : > { %v5771_v42 = vadd.f32 %v10475_v40, %v5575_v33  ;;  %v5772_v43 = vadd.f32 %v10475_v40, %v5576_v22  ;;  %v2442_v44 = vunpack.c.l.bf16 %v2050_v36  ;;  %v3813_v32 = vmul.f32 %v10690_v38, %v3617_v37 }
 0x2dc   : > { %v1069_v45 = vadd.f32 %v10475_v40, %v867_v26  ;;  %v1070_v34 = vadd.f32 %v10701_v46, %v868_v39  ;;  %v2637_v47 = vmul.f32 %v10690_v38, %v2441_v28  ;;  %v3814_v48 = vmul.f32 %v10690_v38, %v3618_v41 }
 0x2dd   : > { %vm5967_vm14 = vcmp.ge.f32.partialorder %v5771_v42, 0.0  ;;  %vm5968_vm15 = vcmp.ge.f32.partialorder %v5772_v43, 0.0  ;;  %v6163_v49 = vmul.f32 0.1, %v5771_v42  ;;  %v6164_v50 = vmul.f32 0.1, %v5772_v43 }
 0x2de   : > { %vm1265_vm0 = vcmp.ge.f32.partialorder %v1069_v45, 0.0  ;;  %vm1266_vm1 = vcmp.ge.f32.partialorder %v1070_v34, 0.0  ;;  %v1461_v51 = vmul.f32 0.1, %v1069_v45  ;;  %v1462_v52 = vmul.f32 0.1, %v1070_v34 }
 0x2df   : > { %v6359_v40 = vsel %vm5967_vm14, %v5771_v42, %v6163_v49  ;;  %v6360_v53 = vsel %vm5968_vm15, %v5772_v43, %v6164_v50  ;;  %v2638_v54 = vmul.f32 %v10690_v38, %v2442_v44  ;;  %v2833_v55 = vadd.f32 %v10701_v46, %v2637_v47 }
 0x2e0   : > { %v6751_v56 = vmax.f32 %v4595_v9, %v6359_v40  ;;  %v6752_v57 = vmax.f32 %v4596_v15, %v6360_v53  ;;  %v10708_v58 = vsel %vm1265_vm0, %v1069_v45, %v1461_v51  ;;  %v10710_v59 = vsel %vm1266_vm1, %v1070_v34, %v1462_v52 }
 0x2e1   : > { %v2834_v60 = vadd.f32 %v10701_v46, %v2638_v54  ;;  %vm3029_vm2 = vcmp.ge.f32.partialorder %v2833_v55, 0.0  ;;  %v3225_v61 = vmul.f32 0.1, %v2833_v55  ;;  %v4009_v62 = vadd.f32 %v10701_v46, %v3813_v32 }
 0x2e2   : > { %v6947_v63 = vmax.f32 %v6555_v13, %v6751_v56  ;;  %v6948_v1 = vmax.f32 %v6556_v27, %v6752_v57  ;;  %v4010_v2 = vadd.f32 %v10701_v46, %v3814_v48  ;;  %v4989_v3 = vrot.slane %v371_v29, 4 }
 0x2e3   : > { %vm3030_vm3 = vcmp.ge.f32.partialorder %v2834_v60, 0.0  ;;  %v3226_v4 = vmul.f32 0.1, %v2834_v60  ;;  %v3421_v6 = vsel %vm3029_vm2, %v2833_v55, %v3225_v61  ;;  %vm4205_vm4 = vcmp.ge.f32.partialorder %v4009_v62, 0.0 }
 0x2e4   : > { %v8774_v7 = vpack.c.bf16 %v6948_v1, %v6947_v63  ;;  %vm4206_vm5 = vcmp.ge.f32.partialorder %v4010_v2, 0.0  ;;  %v4401_v8 = vmul.f32 0.1, %v4009_v62  ;;  %v4402_v10 = vmul.f32 0.1, %v4010_v2 }
 0x2e5   : > { %v3422_v12 = vsel %vm3030_vm3, %v2834_v60, %v3226_v4  ;;  %v4990_v0 = vrot.slane %v372_v35, 4  ;;  %v5381_v14 = vunpack.c.l.bf16 %v4989_v3  ;;  %v6557_v16 = vmax.f32 %v10708_v58, %v3421_v6  ;;  %v375_v3 = vld [vmem:[%s9329_s28 + $0x630] sm:$0xff]  ;;  %v376_v4 = vld [vmem:[%s9329_s28 + $0x638] sm:$0xff] }
 0x2e6   : > { %9072 = vst [vmem:[%s9383_s8 + $0x178] sm:$0xff] %v8774_v7   ;;  %v4597_v18 = vsel %vm4205_vm4, %v4009_v62, %v4401_v8  ;;  %v4598_v19 = vsel %vm4206_vm5, %v4010_v2, %v4402_v10  ;;  %v6558_v5 = vmax.f32 %v10710_v59, %v3422_v12  ;;  %v667_v21 = vunpack.c.l.bf16 %v373_v11 }
 0x2e7   : > { %v5382_v9 = vunpack.c.l.bf16 %v4990_v0  ;;  %v5577_v23 = vmul.f32 %v10690_v38, %v5381_v14  ;;  %v668_v13 = vunpack.c.l.bf16 %v374_v17  ;;  %v2051_v27 = vrot.slane %v373_v11, 4  ;;  %v382_v14 = vld [vmem:[%s9329_s28 + $0x668] sm:$0xff] }
 0x2e8   : > { %v869_v15 = vmul.f32 %v10690_v38, %v667_v21  ;;  %v2052_v29 = vrot.slane %v374_v17, 4  ;;  %v3619_v30 = vunpack.c.l.bf16 %v380_v24  ;;  %v3620_v31 = vunpack.c.l.bf16 %v381_v25  ;;  %v383_v17 = vld [vmem:[%s9329_s28 + $0x670] sm:$0xff] }
 0x2e9   : > { %v5578_v20 = vmul.f32 %v10690_v38, %v5382_v9  ;;  %v5773_v33 = vadd.f32 %v10701_v46, %v5577_v23  ;;  %v870_v22 = vmul.f32 %v10690_v38, %v668_v13  ;;  %v2443_v35 = vunpack.c.l.bf16 %v2051_v27 }
 0x2ea   : > { %v1071_v36 = vadd.f32 %v10701_v46, %v869_v15  ;;  %v2444_v37 = vunpack.c.l.bf16 %v2052_v29  ;;  %v3815_v26 = vmul.f32 %v10690_v38, %v3619_v30  ;;  %v3816_v39 = vmul.f32 %v10690_v38, %v3620_v31 }
 0x2eb   : > { %v5774_v28 = vadd.f32 %v10701_v46, %v5578_v20  ;;  %vm5969_vm6 = vcmp.ge.f32.partialorder %v5773_v33, 0.0  ;;  %v6165_v41 = vmul.f32 0.1, %v5773_v33  ;;  %v1072_v42 = vadd.f32 %v10701_v46, %v870_v22 }
 0x2ec   : > { %vm1267_vm7 = vcmp.ge.f32.partialorder %v1071_v36, 0.0  ;;  %v1463_v43 = vmul.f32 0.1, %v1071_v36  ;;  %v2639_v44 = vmul.f32 %v10690_v38, %v2443_v35  ;;  %v2640_v32 = vmul.f32 %v10690_v38, %v2444_v37 }
 0x2ed   : > { %vm5970_vm8 = vcmp.ge.f32.partialorder %v5774_v28, 0.0  ;;  %v6166_v45 = vmul.f32 0.1, %v5774_v28  ;;  %v6361_v34 = vsel %vm5969_vm6, %v5773_v33, %v6165_v41  ;;  %vm1268_vm9 = vcmp.ge.f32.partialorder %v1072_v42, 0.0 }
 0x2ee   : > { %v6753_v47 = vmax.f32 %v4597_v18, %v6361_v34  ;;  %v1464_v48 = vmul.f32 0.1, %v1072_v42  ;;  %v10734_v49 = vsel %vm1267_vm7, %v1071_v36, %v1463_v43  ;;  %v2835_v50 = vadd.f32 %v10701_v46, %v2639_v44 }
 0x2ef   : > { %v6362_v51 = vsel %vm5970_vm8, %v5774_v28, %v6166_v45  ;;  %v2836_v52 = vadd.f32 %v10701_v46, %v2640_v32  ;;  %v4011_v40 = vadd.f32 %v10701_v46, %v3815_v26  ;;  %v4012_v53 = vadd.f32 %v10701_v46, %v3816_v39 }
 0x2f0   : > { %v6754_v54 = vmax.f32 %v4598_v19, %v6362_v51  ;;  %v6949_v55 = vmax.f32 %v6557_v16, %v6753_v47  ;;  %v10740_v56 = vsel %vm1268_vm9, %v1072_v42, %v1464_v48  ;;  %vm3031_vm10 = vcmp.ge.f32.partialorder %v2835_v50, 0.0 }
 0x2f1   : > { %vm3032_vm11 = vcmp.ge.f32.partialorder %v2836_v52, 0.0  ;;  %v3227_v57 = vmul.f32 0.1, %v2835_v50  ;;  %v3228_v58 = vmul.f32 0.1, %v2836_v52  ;;  %vm4207_vm12 = vcmp.ge.f32.partialorder %v4011_v40, 0.0 }
 0x2f2   : > { %v6950_v59 = vmax.f32 %v6558_v5, %v6754_v54  ;;  %vm4208_vm13 = vcmp.ge.f32.partialorder %v4012_v53, 0.0  ;;  %v4403_v60 = vmul.f32 0.1, %v4011_v40  ;;  %v4404_v61 = vmul.f32 0.1, %v4012_v53 }
 0x2f3   : > { %v3423_v62 = vsel %vm3031_vm10, %v2835_v50, %v3227_v57  ;;  %v3424_v63 = vsel %vm3032_vm11, %v2836_v52, %v3228_v58  ;;  %v4991_v1 = vrot.slane %v380_v24, 4  ;;  %v4992_v2 = vrot.slane %v381_v25, 4 }
 0x2f4   : > { %v8779_v6 = vpack.c.bf16 %v6950_v59, %v6949_v55  ;;  %v4599_v7 = vsel %vm4207_vm12, %v4011_v40, %v4403_v60  ;;  %v4600_v8 = vsel %vm4208_vm13, %v4012_v53, %v4404_v61  ;;  %v6559_v10 = vmax.f32 %v10734_v49, %v3423_v62  ;;  %v377_v60 = vld [vmem:[%s9329_s28 + $0x640] sm:$0xff]  ;;  %v378_v61 = vld [vmem:[%s9329_s28 + $0x648] sm:$0xff] }
 0x2f5   : > { %v5383_v11 = vunpack.c.l.bf16 %v4991_v1  ;;  %v5384_v12 = vunpack.c.l.bf16 %v4992_v2  ;;  %v6560_v0 = vmax.f32 %v10740_v56, %v3424_v63  ;;  %v669_v16 = vunpack.c.l.bf16 %v375_v3 }
 0x2f6   : > { %9073 = vst [vmem:[%s9383_s8 + $0x180] sm:$0xff] %v8779_v6   ;;  %v670_v18 = vunpack.c.l.bf16 %v376_v4  ;;  %v2053_v19 = vrot.slane %v375_v3, 4  ;;  %v2054_v5 = vrot.slane %v376_v4, 4  ;;  %v3621_v21 = vunpack.c.l.bf16 %v382_v14  ;;  %v384_v6 = vld [vmem:[%s9329_s28 + $0x678] sm:$0xff] }
 0x2f7   : > { %v5579_v9 = vmul.f32 %v10690_v38, %v5383_v11  ;;  %v5580_v23 = vmul.f32 %v10690_v38, %v5384_v12  ;;  %v871_v24 = vmul.f32 %v10690_v38, %v669_v16  ;;  %v3622_v25 = vunpack.c.l.bf16 %v383_v17  ;;  %v385_v11 = vld [vmem:[%s9329_s28 + $0x680] sm:$0xff] }
 0x2f8   : > { %v872_v13 = vmul.f32 %v10690_v38, %v670_v18  ;;  %v2445_v27 = vunpack.c.l.bf16 %v2053_v19  ;;  %v2446_v15 = vunpack.c.l.bf16 %v2054_v5  ;;  %v3817_v29 = vmul.f32 %v10690_v38, %v3621_v21 }
 0x2f9   : > { %v5775_v30 = vadd.f32 %v10701_v46, %v5579_v9  ;;  %v5776_v31 = vadd.f32 %v10701_v46, %v5580_v23  ;;  %v1073_v20 = vadd.f32 %v10701_v46, %v871_v24  ;;  %v3818_v33 = vmul.f32 %v10690_v38, %v3622_v25 }
 0x2fa   : > { %v1074_v22 = vadd.f32 %v10701_v46, %v872_v13  ;;  %v2641_v35 = vmul.f32 %v10690_v38, %v2445_v27  ;;  %v2642_v36 = vmul.f32 %v10690_v38, %v2446_v15  ;;  %v4013_v37 = vadd.f32 %v10701_v46, %v3817_v29 }
 0x2fb   : > { %vm5971_vm14 = vcmp.ge.f32.partialorder %v5775_v30, 0.0  ;;  %vm5972_vm15 = vcmp.ge.f32.partialorder %v5776_v31, 0.0  ;;  %v6167_v26 = vmul.f32 0.1, %v5775_v30  ;;  %v6168_v39 = vmul.f32 0.1, %v5776_v31 }
 0x2fc   : > { %vm1269_vm0 = vcmp.ge.f32.partialorder %v1073_v20, 0.0  ;;  %vm1270_vm1 = vcmp.ge.f32.partialorder %v1074_v22, 0.0  ;;  %v1465_v28 = vmul.f32 0.1, %v1073_v20  ;;  %v1466_v41 = vmul.f32 0.1, %v1074_v22 }
 0x2fd   : > { %v6363_v42 = vsel %vm5971_vm14, %v5775_v30, %v6167_v26  ;;  %v6364_v43 = vsel %vm5972_vm15, %v5776_v31, %v6168_v39  ;;  %v2837_v44 = vadd.f32 %v10701_v46, %v2641_v35  ;;  %v2838_v32 = vadd.f32 %v10701_v46, %v2642_v36 }
 0x2fe   : > { %v6755_v45 = vmax.f32 %v4599_v7, %v6363_v42  ;;  %v6756_v34 = vmax.f32 %v4600_v8, %v6364_v43  ;;  %v10764_v47 = vsel %vm1269_vm0, %v1073_v20, %v1465_v28  ;;  %v10766_v48 = vsel %vm1270_vm1, %v1074_v22, %v1466_v41 }
 0x2ff   : > { %vm3033_vm2 = vcmp.ge.f32.partialorder %v2837_v44, 0.0  ;;  %vm3034_vm3 = vcmp.ge.f32.partialorder %v2838_v32, 0.0  ;;  %v3229_v49 = vmul.f32 0.1, %v2837_v44  ;;  %v3230_v50 = vmul.f32 0.1, %v2838_v32 }
 0x300   : > { %v6951_v51 = vmax.f32 %v6559_v10, %v6755_v45  ;;  %v6952_v52 = vmax.f32 %v6560_v0, %v6756_v34  ;;  %v4014_v40 = vadd.f32 %v10701_v46, %v3818_v33  ;;  %vm4209_vm4 = vcmp.ge.f32.partialorder %v4013_v37, 0.0 }
 0x301   : > { %v3425_v53 = vsel %vm3033_vm2, %v2837_v44, %v3229_v49  ;;  %v3426_v54 = vsel %vm3034_vm3, %v2838_v32, %v3230_v50  ;;  %v4405_v55 = vmul.f32 0.1, %v4013_v37  ;;  %v4993_v56 = vrot.slane %v382_v14, 4 }
 0x302   : > { %v8784_v57 = vpack.c.bf16 %v6952_v52, %v6951_v51  ;;  %vm4210_vm5 = vcmp.ge.f32.partialorder %v4014_v40, 0.0  ;;  %v4406_v58 = vmul.f32 0.1, %v4014_v40  ;;  %v4994_v59 = vrot.slane %v383_v17, 4  ;;  %v379_v52 = vld [vmem:[%s9329_s28 + $0x650] sm:$0xff] }
 0x303   : > { %v4601_v62 = vsel %vm4209_vm4, %v4013_v37, %v4405_v55  ;;  %v5385_v63 = vunpack.c.l.bf16 %v4993_v56  ;;  %v6561_v1 = vmax.f32 %v10764_v47, %v3425_v53  ;;  %v6562_v2 = vmax.f32 %v10766_v48, %v3426_v54  ;;  %v387_v55 = vld [vmem:[%s9329_s28 + $0x690] sm:$0xff] }
 0x304   : > { %9074 = vst [vmem:[%s9383_s8 + $0x188] sm:$0xff] %v8784_v57   ;;  %v4602_v3 = vsel %vm4210_vm5, %v4014_v40, %v4406_v58  ;;  %v5386_v4 = vunpack.c.l.bf16 %v4994_v59  ;;  %v671_v7 = vunpack.c.l.bf16 %v377_v60  ;;  %v672_v8 = vunpack.c.l.bf16 %v378_v61 }
 0x305   : > { %v5581_v10 = vmul.f32 %v10690_v38, %v5385_v63  ;;  %v2055_v12 = vrot.slane %v377_v60, 4  ;;  %v2056_v0 = vrot.slane %v378_v61, 4  ;;  %v3623_v14 = vunpack.c.l.bf16 %v384_v6  ;;  %v386_v61 = vld [vmem:[%s9329_s28 + $0x688] sm:$0xff] }
 0x306   : > { %v5582_v16 = vmul.f32 %v10690_v38, %v5386_v4  ;;  %v873_v17 = vmul.f32 %v10690_v38, %v671_v7  ;;  %v874_v18 = vmul.f32 %v10690_v38, %v672_v8  ;;  %v3624_v19 = vunpack.c.l.bf16 %v385_v11  ;;  %v394_v4 = vld [vmem:[%s9329_s28 + $0x6c8] sm:$0xff] }
 0x307   : > { %v5777_v5 = vadd.f32 %v10701_v46, %v5581_v10  ;;  %v2447_v21 = vunpack.c.l.bf16 %v2055_v12  ;;  %v2448_v9 = vunpack.c.l.bf16 %v2056_v0  ;;  %v3819_v23 = vmul.f32 %v10690_v38, %v3623_v14 }
 0x308   : > { %v5778_v24 = vadd.f32 %v10701_v46, %v5582_v16  ;;  %v1075_v25 = vadd.f32 %v10701_v46, %v873_v17  ;;  %v1076_v13 = vadd.f32 %v10701_v46, %v874_v18  ;;  %v3820_v27 = vmul.f32 %v10690_v38, %v3624_v19 }
 0x309   : > { %vm5973_vm6 = vcmp.ge.f32.partialorder %v5777_v5, 0.0  ;;  %v6169_v15 = vmul.f32 0.1, %v5777_v5  ;;  %v2643_v29 = vmul.f32 %v10690_v38, %v2447_v21  ;;  %v2644_v30 = vmul.f32 %v10690_v38, %v2448_v9 }
 0x30a   : > { %vm5974_vm7 = vcmp.ge.f32.partialorder %v5778_v24, 0.0  ;;  %v6170_v31 = vmul.f32 0.1, %v5778_v24  ;;  %vm1271_vm8 = vcmp.ge.f32.partialorder %v1075_v25, 0.0  ;;  %vm1272_vm9 = vcmp.ge.f32.partialorder %v1076_v13, 0.0 }
 0x30b   : > { %v6365_v20 = vsel %vm5973_vm6, %v5777_v5, %v6169_v15  ;;  %v1467_v33 = vmul.f32 0.1, %v1075_v25  ;;  %v1468_v22 = vmul.f32 0.1, %v1076_v13  ;;  %v2839_v35 = vadd.f32 %v10701_v46, %v2643_v29 }
 0x30c   : > { %v6366_v36 = vsel %vm5974_vm7, %v5778_v24, %v6170_v31  ;;  %v6757_v37 = vmax.f32 %v4601_v62, %v6365_v20  ;;  %v2840_v26 = vadd.f32 %v10701_v46, %v2644_v30  ;;  %v4015_v39 = vadd.f32 %v10701_v46, %v3819_v23 }
 0x30d   : > { %v6758_v28 = vmax.f32 %v4602_v3, %v6366_v36  ;;  %v10791_v41 = vsel %vm1271_vm8, %v1075_v25, %v1467_v33  ;;  %v10793_v42 = vsel %vm1272_vm9, %v1076_v13, %v1468_v22  ;;  %vm3035_vm10 = vcmp.ge.f32.partialorder %v2839_v35, 0.0 }
 0x30e   : > { %v6953_v43 = vmax.f32 %v6561_v1, %v6757_v37  ;;  %vm3036_vm11 = vcmp.ge.f32.partialorder %v2840_v26, 0.0  ;;  %v3231_v44 = vmul.f32 0.1, %v2839_v35  ;;  %v3232_v32 = vmul.f32 0.1, %v2840_v26 }
 0x30f   : > { %v6954_v45 = vmax.f32 %v6562_v2, %v6758_v28  ;;  %v4016_v34 = vadd.f32 %v10701_v46, %v3820_v27  ;;  %vm4211_vm12 = vcmp.ge.f32.partialorder %v4015_v39, 0.0  ;;  %v4407_v47 = vmul.f32 0.1, %v4015_v39 }
 0x310   : > { %v3427_v48 = vsel %vm3035_vm10, %v2839_v35, %v3231_v44  ;;  %v3428_v49 = vsel %vm3036_vm11, %v2840_v26, %v3232_v32  ;;  %v4995_v50 = vrot.slane %v384_v6, 4  ;;  %v4996_v51 = vrot.slane %v385_v11, 4 }
 0x311   : > { %v8789_v40 = vpack.c.bf16 %v6954_v45, %v6953_v43  ;;  %vm4212_vm13 = vcmp.ge.f32.partialorder %v4016_v34, 0.0  ;;  %v4408_v53 = vmul.f32 0.1, %v4016_v34  ;;  %v4603_v54 = vsel %vm4211_vm12, %v4015_v39, %v4407_v47  ;;  %v388_v45 = vld [vmem:[%s9329_s28 + $0x698] sm:$0xff] }
 0x312   : > { %v5387_v56 = vunpack.c.l.bf16 %v4995_v50  ;;  %v5388_v57 = vunpack.c.l.bf16 %v4996_v51  ;;  %v6563_v58 = vmax.f32 %v10791_v41, %v3427_v48  ;;  %v6564_v59 = vmax.f32 %v10793_v42, %v3428_v49  ;;  %v389_v50 = vld [vmem:[%s9329_s28 + $0x6a0] sm:$0xff] }
 0x313   : > { %9075 = vst [vmem:[%s9383_s8 + $0x190] sm:$0xff] %v8789_v40   ;;  %v4604_v60 = vsel %vm4212_vm13, %v4016_v34, %v4408_v53  ;;  %v673_v62 = vunpack.c.l.bf16 %v379_v52  ;;  %v674_v63 = vunpack.c.l.bf16 %v387_v55  ;;  %v2057_v1 = vrot.slane %v379_v52, 4 }
 0x314   : > { %v5583_v2 = vmul.f32 %v10690_v38, %v5387_v56  ;;  %v5584_v3 = vmul.f32 %v10690_v38, %v5388_v57  ;;  %v2058_v6 = vrot.slane %v387_v55, 4  ;;  %v3625_v7 = vunpack.c.l.bf16 %v386_v61  ;;  %v395_v56 = vld [vmem:[%s9329_s28 + $0x6d0] sm:$0xff]  ;;  %v396_v57 = vld [vmem:[%s9329_s28 + $0x6d8] sm:$0xff] }
 0x315   : > { %v875_v8 = vmul.f32 %v10690_v38, %v673_v62  ;;  %v876_v10 = vmul.f32 %v10690_v38, %v674_v63  ;;  %v2449_v11 = vunpack.c.l.bf16 %v2057_v1  ;;  %v3626_v12 = vunpack.c.l.bf16 %v394_v4 }
 0x316   : > { %v5779_v0 = vadd.f32 %v10701_v46, %v5583_v2  ;;  %v5780_v14 = vadd.f32 %v10701_v46, %v5584_v3  ;;  %v2450_v16 = vunpack.c.l.bf16 %v2058_v6  ;;  %v3821_v17 = vmul.f32 %v10690_v38, %v3625_v7 }
 0x317   : > { %v1077_v18 = vadd.f32 %v10701_v46, %v875_v8  ;;  %v1078_v19 = vadd.f32 %v10701_v46, %v876_v10  ;;  %v2645_v5 = vmul.f32 %v10690_v38, %v2449_v11  ;;  %v3822_v21 = vmul.f32 %v10690_v38, %v3626_v12 }
 0x318   : > { %vm5975_vm14 = vcmp.ge.f32.partialorder %v5779_v0, 0.0  ;;  %vm5976_vm15 = vcmp.ge.f32.partialorder %v5780_v14, 0.0  ;;  %v6171_v9 = vmul.f32 0.1, %v5779_v0  ;;  %v6172_v23 = vmul.f32 0.1, %v5780_v14 }
 0x319   : > { %vm1273_vm0 = vcmp.ge.f32.partialorder %v1077_v18, 0.0  ;;  %vm1274_vm1 = vcmp.ge.f32.partialorder %v1078_v19, 0.0  ;;  %v1469_v24 = vmul.f32 0.1, %v1077_v18  ;;  %v1470_v25 = vmul.f32 0.1, %v1078_v19 }
 0x31a   : > { %v6367_v13 = vsel %vm5975_vm14, %v5779_v0, %v6171_v9  ;;  %v6368_v27 = vsel %vm5976_vm15, %v5780_v14, %v6172_v23  ;;  %v2646_v15 = vmul.f32 %v10690_v38, %v2450_v16  ;;  %v2841_v29 = vadd.f32 %v10701_v46, %v2645_v5 }
 0x31b   : > { %v6759_v30 = vmax.f32 %v4603_v54, %v6367_v13  ;;  %v6760_v31 = vmax.f32 %v4604_v60, %v6368_v27  ;;  %v10816_v20 = vsel %vm1273_vm0, %v1077_v18, %v1469_v24  ;;  %v10818_v33 = vsel %vm1274_vm1, %v1078_v19, %v1470_v25 }
 0x31c   : > { %v2842_v22 = vadd.f32 %v10701_v46, %v2646_v15  ;;  %vm3037_vm2 = vcmp.ge.f32.partialorder %v2841_v29, 0.0  ;;  %v3233_v35 = vmul.f32 0.1, %v2841_v29  ;;  %v4017_v36 = vadd.f32 %v10701_v46, %v3821_v17 }
 0x31d   : > { %v6955_v37 = vmax.f32 %v6563_v58, %v6759_v30  ;;  %v6956_v26 = vmax.f32 %v6564_v59, %v6760_v31  ;;  %v4018_v39 = vadd.f32 %v10701_v46, %v3822_v21  ;;  %v4997_v28 = vrot.slane %v386_v61, 4 }
 0x31e   : > { %vm3038_vm3 = vcmp.ge.f32.partialorder %v2842_v22, 0.0  ;;  %v3234_v41 = vmul.f32 0.1, %v2842_v22  ;;  %v3429_v42 = vsel %vm3037_vm2, %v2841_v29, %v3233_v35  ;;  %vm4213_vm4 = vcmp.ge.f32.partialorder %v4017_v36, 0.0 }
 0x31f   : > { %v8794_v43 = vpack.c.bf16 %v6956_v26, %v6955_v37  ;;  %vm4214_vm5 = vcmp.ge.f32.partialorder %v4018_v39, 0.0  ;;  %v4409_v44 = vmul.f32 0.1, %v4017_v36  ;;  %v4410_v32 = vmul.f32 0.1, %v4018_v39 }
 0x320   : > { %v3430_v34 = vsel %vm3038_vm3, %v2842_v22, %v3234_v41  ;;  %v4998_v47 = vrot.slane %v394_v4, 4  ;;  %v5389_v48 = vunpack.c.l.bf16 %v4997_v28  ;;  %v6565_v49 = vmax.f32 %v10816_v20, %v3429_v42  ;;  %v390_v28 = vld [vmem:[%s9329_s28 + $0x6a8] sm:$0xff]  ;;  %v391_v41 = vld [vmem:[%s9329_s28 + $0x6b0] sm:$0xff] }
 0x321   : > { %9076 = vst [vmem:[%s9383_s8 + $0x198] sm:$0xff] %v8794_v43   ;;  %v4605_v51 = vsel %vm4213_vm4, %v4017_v36, %v4409_v44  ;;  %v4606_v52 = vsel %vm4214_vm5, %v4018_v39, %v4410_v32  ;;  %v6566_v40 = vmax.f32 %v10818_v33, %v3430_v34  ;;  %v675_v53 = vunpack.c.l.bf16 %v388_v45 }
 0x322   : > { %v5390_v54 = vunpack.c.l.bf16 %v4998_v47  ;;  %v5585_v55 = vmul.f32 %v10690_v38, %v5389_v48  ;;  %v676_v58 = vunpack.c.l.bf16 %v389_v50  ;;  %v2059_v59 = vrot.slane %v388_v45, 4  ;;  %v397_v48 = vld [vmem:[%s9329_s28 + $0x6e0] sm:$0xff] }
 0x323   : > { %v877_v60 = vmul.f32 %v10690_v38, %v675_v53  ;;  %v2060_v61 = vrot.slane %v389_v50, 4  ;;  %v3627_v62 = vunpack.c.l.bf16 %v395_v56  ;;  %v3628_v63 = vunpack.c.l.bf16 %v396_v57  ;;  %v398_v50 = vld [vmem:[%s9329_s28 + $0x6e8] sm:$0xff] }
 0x324   : > { %v5586_v1 = vmul.f32 %v10690_v38, %v5390_v54  ;;  %v5781_v2 = vadd.f32 %v10701_v46, %v5585_v55  ;;  %v878_v3 = vmul.f32 %v10690_v38, %v676_v58  ;;  %v2451_v4 = vunpack.c.l.bf16 %v2059_v59 }
 0x325   : > { %v1079_v6 = vadd.f32 %v10701_v46, %v877_v60  ;;  %v2452_v7 = vunpack.c.l.bf16 %v2060_v61  ;;  %v3823_v8 = vmul.f32 %v10690_v38, %v3627_v62  ;;  %v3824_v10 = vmul.f32 %v10690_v38, %v3628_v63 }
 0x326   : > { %v5782_v11 = vadd.f32 %v10701_v46, %v5586_v1  ;;  %vm5977_vm6 = vcmp.ge.f32.partialorder %v5781_v2, 0.0  ;;  %v6173_v12 = vmul.f32 0.1, %v5781_v2  ;;  %v1080_v0 = vadd.f32 %v10701_v46, %v878_v3 }
 0x327   : > { %vm1275_vm7 = vcmp.ge.f32.partialorder %v1079_v6, 0.0  ;;  %v1471_v14 = vmul.f32 0.1, %v1079_v6  ;;  %v2647_v16 = vmul.f32 %v10690_v38, %v2451_v4  ;;  %v2648_v17 = vmul.f32 %v10690_v38, %v2452_v7 }
 0x328   : > { %vm5978_vm8 = vcmp.ge.f32.partialorder %v5782_v11, 0.0  ;;  %v6174_v18 = vmul.f32 0.1, %v5782_v11  ;;  %v6369_v19 = vsel %vm5977_vm6, %v5781_v2, %v6173_v12  ;;  %vm1276_vm9 = vcmp.ge.f32.partialorder %v1080_v0, 0.0 }
 0x329   : > { %v6761_v5 = vmax.f32 %v4605_v51, %v6369_v19  ;;  %v1472_v21 = vmul.f32 0.1, %v1080_v0  ;;  %v10842_v9 = vsel %vm1275_vm7, %v1079_v6, %v1471_v14  ;;  %v2843_v23 = vadd.f32 %v10701_v46, %v2647_v16 }
 0x32a   : > { %v6370_v24 = vsel %vm5978_vm8, %v5782_v11, %v6174_v18  ;;  %v2844_v25 = vadd.f32 %v10701_v46, %v2648_v17  ;;  %v4019_v13 = vadd.f32 %v10701_v46, %v3823_v8  ;;  %v4020_v27 = vadd.f32 %v10701_v46, %v3824_v10 }
 0x32b   : > { %v6762_v15 = vmax.f32 %v4606_v52, %v6370_v24  ;;  %v6957_v29 = vmax.f32 %v6565_v49, %v6761_v5  ;;  %v10848_v30 = vsel %vm1276_vm9, %v1080_v0, %v1472_v21  ;;  %vm3039_vm10 = vcmp.ge.f32.partialorder %v2843_v23, 0.0 }
 0x32c   : > { %vm3040_vm11 = vcmp.ge.f32.partialorder %v2844_v25, 0.0  ;;  %v3235_v31 = vmul.f32 0.1, %v2843_v23  ;;  %v3236_v20 = vmul.f32 0.1, %v2844_v25  ;;  %vm4215_vm12 = vcmp.ge.f32.partialorder %v4019_v13, 0.0 }
 0x32d   : > { %v6958_v33 = vmax.f32 %v6566_v40, %v6762_v15  ;;  %vm4216_vm13 = vcmp.ge.f32.partialorder %v4020_v27, 0.0  ;;  %v4411_v22 = vmul.f32 0.1, %v4019_v13  ;;  %v4412_v35 = vmul.f32 0.1, %v4020_v27 }
 0x32e   : > { %v3431_v36 = vsel %vm3039_vm10, %v2843_v23, %v3235_v31  ;;  %v3432_v37 = vsel %vm3040_vm11, %v2844_v25, %v3236_v20  ;;  %v4999_v26 = vrot.slane %v395_v56, 4  ;;  %v5000_v39 = vrot.slane %v396_v57, 4 }
 0x32f   : > { %v8799_v42 = vpack.c.bf16 %v6958_v33, %v6957_v29  ;;  %v4607_v43 = vsel %vm4215_vm12, %v4019_v13, %v4411_v22  ;;  %v4608_v44 = vsel %vm4216_vm13, %v4020_v27, %v4412_v35  ;;  %v6567_v32 = vmax.f32 %v10842_v9, %v3431_v36  ;;  %v392_v22 = vld [vmem:[%s9329_s28 + $0x6b8] sm:$0xff]  ;;  %v393_v35 = vld [vmem:[%s9329_s28 + $0x6c0] sm:$0xff] }
 0x330   : > { %v5391_v45 = vunpack.c.l.bf16 %v4999_v26  ;;  %v5392_v34 = vunpack.c.l.bf16 %v5000_v39  ;;  %v6568_v47 = vmax.f32 %v10848_v30, %v3432_v37  ;;  %v677_v49 = vunpack.c.l.bf16 %v390_v28 }
 0x331   : > { %9077 = vst [vmem:[%s9383_s8 + $0x1a0] sm:$0xff] %v8799_v42   ;;  %v678_v51 = vunpack.c.l.bf16 %v391_v41  ;;  %v2061_v52 = vrot.slane %v390_v28, 4  ;;  %v2062_v40 = vrot.slane %v391_v41, 4  ;;  %v3629_v53 = vunpack.c.l.bf16 %v397_v48  ;;  %v399_v42 = vld [vmem:[%s9329_s28 + $0x6f0] sm:$0xff] }
 0x332   : > { %v5587_v54 = vmul.f32 %v10690_v38, %v5391_v45  ;;  %v5588_v55 = vmul.f32 %v10690_v38, %v5392_v34  ;;  %v879_v56 = vmul.f32 %v10690_v38, %v677_v49  ;;  %v3630_v57 = vunpack.c.l.bf16 %v398_v50  ;;  %v400_v45 = vld [vmem:[%s9329_s28 + $0x6f8] sm:$0xff] }
 0x333   : > { %v880_v58 = vmul.f32 %v10690_v38, %v678_v51  ;;  %v2453_v59 = vunpack.c.l.bf16 %v2061_v52  ;;  %v2454_v60 = vunpack.c.l.bf16 %v2062_v40  ;;  %v3825_v61 = vmul.f32 %v10690_v38, %v3629_v53 }
 0x334   : > { %v5783_v62 = vadd.f32 %v10701_v46, %v5587_v54  ;;  %v5784_v63 = vadd.f32 %v10701_v46, %v5588_v55  ;;  %v1081_v1 = vadd.f32 %v10701_v46, %v879_v56  ;;  %v3826_v2 = vmul.f32 %v10690_v38, %v3630_v57 }
 0x335   : > { %v1082_v3 = vadd.f32 %v10701_v46, %v880_v58  ;;  %v2649_v4 = vmul.f32 %v10690_v38, %v2453_v59  ;;  %v2650_v6 = vmul.f32 %v10690_v38, %v2454_v60  ;;  %v4021_v7 = vadd.f32 %v10701_v46, %v3825_v61 }
 0x336   : > { %vm5979_vm14 = vcmp.ge.f32.partialorder %v5783_v62, 0.0  ;;  %vm5980_vm15 = vcmp.ge.f32.partialorder %v5784_v63, 0.0  ;;  %v6175_v8 = vmul.f32 0.1, %v5783_v62  ;;  %v6176_v10 = vmul.f32 0.1, %v5784_v63 }
 0x337   : > { %vm1277_vm0 = vcmp.ge.f32.partialorder %v1081_v1, 0.0  ;;  %vm1278_vm1 = vcmp.ge.f32.partialorder %v1082_v3, 0.0  ;;  %v1473_v11 = vmul.f32 0.1, %v1081_v1  ;;  %v1474_v12 = vmul.f32 0.1, %v1082_v3 }
 0x338   : > { %v6371_v0 = vsel %vm5979_vm14, %v5783_v62, %v6175_v8  ;;  %v6372_v14 = vsel %vm5980_vm15, %v5784_v63, %v6176_v10  ;;  %v2845_v16 = vadd.f32 %v10701_v46, %v2649_v4  ;;  %v2846_v17 = vadd.f32 %v10701_v46, %v2650_v6 }
 0x339   : > { %v6763_v18 = vmax.f32 %v4607_v43, %v6371_v0  ;;  %v6764_v19 = vmax.f32 %v4608_v44, %v6372_v14  ;;  %v10872_v5 = vsel %vm1277_vm0, %v1081_v1, %v1473_v11  ;;  %v10874_v21 = vsel %vm1278_vm1, %v1082_v3, %v1474_v12 }
 0x33a   : > { %vm3041_vm2 = vcmp.ge.f32.partialorder %v2845_v16, 0.0  ;;  %vm3042_vm3 = vcmp.ge.f32.partialorder %v2846_v17, 0.0  ;;  %v3237_v9 = vmul.f32 0.1, %v2845_v16  ;;  %v3238_v23 = vmul.f32 0.1, %v2846_v17 }
 0x33b   : > { %v6959_v24 = vmax.f32 %v6567_v32, %v6763_v18  ;;  %v6960_v25 = vmax.f32 %v6568_v47, %v6764_v19  ;;  %v4022_v13 = vadd.f32 %v10701_v46, %v3826_v2  ;;  %vm4217_vm4 = vcmp.ge.f32.partialorder %v4021_v7, 0.0 }
 0x33c   : > { %v3433_v27 = vsel %vm3041_vm2, %v2845_v16, %v3237_v9  ;;  %v3434_v15 = vsel %vm3042_vm3, %v2846_v17, %v3238_v23  ;;  %v4413_v29 = vmul.f32 0.1, %v4021_v7  ;;  %v5001_v30 = vrot.slane %v397_v48, 4 }
 0x33d   : > { %v8804_v31 = vpack.c.bf16 %v6960_v25, %v6959_v24  ;;  %vm4218_vm5 = vcmp.ge.f32.partialorder %v4022_v13, 0.0  ;;  %v4414_v20 = vmul.f32 0.1, %v4022_v13  ;;  %v5002_v33 = vrot.slane %v398_v50, 4  ;;  %v401_v25 = vld [vmem:[%s9329_s28 + $0x700] sm:$0xff] }
 0x33e   : > { %v4609_v36 = vsel %vm4217_vm4, %v4021_v7, %v4413_v29  ;;  %v5393_v37 = vunpack.c.l.bf16 %v5001_v30  ;;  %v6569_v26 = vmax.f32 %v10872_v5, %v3433_v27  ;;  %v6570_v39 = vmax.f32 %v10874_v21, %v3434_v15  ;;  %v402_v29 = vld [vmem:[%s9329_s28 + $0x708] sm:$0xff] }
 0x33f   : > { %9078 = vst [vmem:[%s9383_s8 + $0x1a8] sm:$0xff] %v8804_v31   ;;  %v4610_v28 = vsel %vm4218_vm5, %v4022_v13, %v4414_v20  ;;  %v5394_v41 = vunpack.c.l.bf16 %v5002_v33  ;;  %v679_v43 = vunpack.c.l.bf16 %v392_v22  ;;  %v680_v44 = vunpack.c.l.bf16 %v393_v35 }
 0x340   : > { %v5589_v32 = vmul.f32 %v10690_v38, %v5393_v37  ;;  %v2063_v34 = vrot.slane %v392_v22, 4  ;;  %v2064_v47 = vrot.slane %v393_v35, 4  ;;  %v3631_v48 = vunpack.c.l.bf16 %v399_v42  ;;  %v408_v35 = vld [vmem:[%s9329_s28 + $0x738] sm:$0xff] }
 0x341   : > { %v5590_v49 = vmul.f32 %v10690_v38, %v5394_v41  ;;  %v881_v50 = vmul.f32 %v10690_v38, %v679_v43  ;;  %v882_v51 = vmul.f32 %v10690_v38, %v680_v44  ;;  %v3632_v52 = vunpack.c.l.bf16 %v400_v45  ;;  %v409_v41 = vld [vmem:[%s9329_s28 + $0x740] sm:$0xff] }
 0x342   : > { %v5785_v40 = vadd.f32 %v10701_v46, %v5589_v32  ;;  %v2455_v53 = vunpack.c.l.bf16 %v2063_v34  ;;  %v2456_v54 = vunpack.c.l.bf16 %v2064_v47  ;;  %v3827_v55 = vmul.f32 %v10690_v38, %v3631_v48  ;;  %v10916_v44 = vld [vmem:[%s12137_s1] ss:$0 sm:$0xff] }
 0x343   : > { %v5786_v56 = vadd.f32 %v10701_v46, %v5590_v49  ;;  %v1083_v57 = vadd.f32 %v10701_v46, %v881_v50  ;;  %v1084_v58 = vadd.f32 %v10701_v46, %v882_v51  ;;  %v3828_v59 = vmul.f32 %v10690_v38, %v3632_v52  ;;  %v10927_v52 = vld [vmem:[%s12138_s2] ss:$0 sm:$0xff] }
 0x344   : > { %vm5981_vm6 = vcmp.ge.f32.partialorder %v5785_v40, 0.0  ;;  %v6177_v60 = vmul.f32 0.1, %v5785_v40  ;;  %v2651_v61 = vmul.f32 %v10690_v38, %v2455_v53  ;;  %v2652_v62 = vmul.f32 %v10690_v38, %v2456_v54 }
 0x345   : > { %vm5982_vm7 = vcmp.ge.f32.partialorder %v5786_v56, 0.0  ;;  %v6178_v63 = vmul.f32 0.1, %v5786_v56  ;;  %vm1279_vm8 = vcmp.ge.f32.partialorder %v1083_v57, 0.0  ;;  %vm1280_vm9 = vcmp.ge.f32.partialorder %v1084_v58, 0.0 }
 0x346   : > { %v6373_v1 = vsel %vm5981_vm6, %v5785_v40, %v6177_v60  ;;  %v1475_v2 = vmul.f32 0.1, %v1083_v57  ;;  %v1476_v3 = vmul.f32 0.1, %v1084_v58  ;;  %v2847_v4 = vadd.f32 %v10701_v46, %v2651_v61 }
 0x347   : > { %v6374_v6 = vsel %vm5982_vm7, %v5786_v56, %v6178_v63  ;;  %v6765_v7 = vmax.f32 %v4609_v36, %v6373_v1  ;;  %v2848_v8 = vadd.f32 %v10701_v46, %v2652_v62  ;;  %v4023_v10 = vadd.f32 %v10701_v46, %v3827_v55 }
 0x348   : > { %v6766_v11 = vmax.f32 %v4610_v28, %v6374_v6  ;;  %v10899_v12 = vsel %vm1279_vm8, %v1083_v57, %v1475_v2  ;;  %v10901_v0 = vsel %vm1280_vm9, %v1084_v58, %v1476_v3  ;;  %vm3043_vm10 = vcmp.ge.f32.partialorder %v2847_v4, 0.0 }
 0x349   : > { %v6961_v14 = vmax.f32 %v6569_v26, %v6765_v7  ;;  %vm3044_vm11 = vcmp.ge.f32.partialorder %v2848_v8, 0.0  ;;  %v3239_v16 = vmul.f32 0.1, %v2847_v4  ;;  %v3240_v17 = vmul.f32 0.1, %v2848_v8 }
 0x34a   : > { %v6962_v18 = vmax.f32 %v6570_v39, %v6766_v11  ;;  %v4024_v19 = vadd.f32 %v10701_v46, %v3828_v59  ;;  %vm4219_vm12 = vcmp.ge.f32.partialorder %v4023_v10, 0.0  ;;  %v4415_v5 = vmul.f32 0.1, %v4023_v10 }
 0x34b   : > { %v3435_v21 = vsel %vm3043_vm10, %v2847_v4, %v3239_v16  ;;  %v3436_v9 = vsel %vm3044_vm11, %v2848_v8, %v3240_v17  ;;  %v5003_v23 = vrot.slane %v399_v42, 4  ;;  %v5004_v24 = vrot.slane %v400_v45, 4 }
 0x34c   : > { %v8809_v13 = vpack.c.bf16 %v6962_v18, %v6961_v14  ;;  %vm4220_vm13 = vcmp.ge.f32.partialorder %v4024_v19, 0.0  ;;  %v4416_v27 = vmul.f32 0.1, %v4024_v19  ;;  %v4611_v15 = vsel %vm4219_vm12, %v4023_v10, %v4415_v5  ;;  %v403_v18 = vld [vmem:[%s9329_s28 + $0x710] sm:$0xff] }
 0x34d   : > { %v5395_v30 = vunpack.c.l.bf16 %v5003_v23  ;;  %v5396_v31 = vunpack.c.l.bf16 %v5004_v24  ;;  %v6571_v20 = vmax.f32 %v10899_v12, %v3435_v21  ;;  %v6572_v33 = vmax.f32 %v10901_v0, %v3436_v9  ;;  %v404_v23 = vld [vmem:[%s9329_s28 + $0x718] sm:$0xff] }
 0x34e   : > { %9079 = vst [vmem:[%s9383_s8 + $0x1b0] sm:$0xff] %v8809_v13   ;;  %v4612_v22 = vsel %vm4220_vm13, %v4024_v19, %v4416_v27  ;;  %v681_v36 = vunpack.c.l.bf16 %v401_v25  ;;  %v682_v37 = vunpack.c.l.bf16 %v402_v29  ;;  %v2065_v26 = vrot.slane %v401_v25, 4 }
 0x34f   : > { %v5591_v39 = vmul.f32 %v10690_v38, %v5395_v30  ;;  %v5592_v28 = vmul.f32 %v10690_v38, %v5396_v31  ;;  %v2066_v42 = vrot.slane %v402_v29, 4  ;;  %v3633_v43 = vunpack.c.l.bf16 %v408_v35  ;;  %v410_v30 = vld [vmem:[%s9329_s28 + $0x748] sm:$0xff]  ;;  %v411_v31 = vld [vmem:[%s9329_s28 + $0x750] sm:$0xff] }
 0x350   : > { %v883_v32 = vmul.f32 %v10916_v44, %v681_v36  ;;  %v884_v45 = vmul.f32 %v10916_v44, %v682_v37  ;;  %v2457_v34 = vunpack.c.l.bf16 %v2065_v26  ;;  %v3634_v47 = vunpack.c.l.bf16 %v409_v41 }
 0x351   : > { %v5787_v48 = vadd.f32 %v10701_v46, %v5591_v39  ;;  %v5788_v49 = vadd.f32 %v10701_v46, %v5592_v28  ;;  %v2458_v50 = vunpack.c.l.bf16 %v2066_v42  ;;  %v3829_v38 = vmul.f32 %v10916_v44, %v3633_v43 }
 0x352   : > { %v1085_v51 = vadd.f32 %v10701_v46, %v883_v32  ;;  %v1086_v40 = vadd.f32 %v10927_v52, %v884_v45  ;;  %v2653_v53 = vmul.f32 %v10916_v44, %v2457_v34  ;;  %v3830_v54 = vmul.f32 %v10916_v44, %v3634_v47 }
 0x353   : > { %vm5983_vm14 = vcmp.ge.f32.partialorder %v5787_v48, 0.0  ;;  %vm5984_vm15 = vcmp.ge.f32.partialorder %v5788_v49, 0.0  ;;  %v6179_v55 = vmul.f32 0.1, %v5787_v48  ;;  %v6180_v56 = vmul.f32 0.1, %v5788_v49 }
 0x354   : > { %vm1281_vm0 = vcmp.ge.f32.partialorder %v1085_v51, 0.0  ;;  %vm1282_vm1 = vcmp.ge.f32.partialorder %v1086_v40, 0.0  ;;  %v1477_v57 = vmul.f32 0.1, %v1085_v51  ;;  %v1478_v58 = vmul.f32 0.1, %v1086_v40 }
 0x355   : > { %v6375_v46 = vsel %vm5983_vm14, %v5787_v48, %v6179_v55  ;;  %v6376_v59 = vsel %vm5984_vm15, %v5788_v49, %v6180_v56  ;;  %v2654_v60 = vmul.f32 %v10916_v44, %v2458_v50  ;;  %v2849_v61 = vadd.f32 %v10927_v52, %v2653_v53 }
 0x356   : > { %v6767_v62 = vmax.f32 %v4611_v15, %v6375_v46  ;;  %v6768_v63 = vmax.f32 %v4612_v22, %v6376_v59  ;;  %v10934_v1 = vsel %vm1281_vm0, %v1085_v51, %v1477_v57  ;;  %v10936_v2 = vsel %vm1282_vm1, %v1086_v40, %v1478_v58 }
 0x357   : > { %v2850_v3 = vadd.f32 %v10927_v52, %v2654_v60  ;;  %vm3045_vm2 = vcmp.ge.f32.partialorder %v2849_v61, 0.0  ;;  %v3241_v4 = vmul.f32 0.1, %v2849_v61  ;;  %v4025_v6 = vadd.f32 %v10927_v52, %v3829_v38 }
 0x358   : > { %v6963_v7 = vmax.f32 %v6571_v20, %v6767_v62  ;;  %v6964_v8 = vmax.f32 %v6572_v33, %v6768_v63  ;;  %v4026_v10 = vadd.f32 %v10927_v52, %v3830_v54  ;;  %v5005_v11 = vrot.slane %v408_v35, 4 }
 0x359   : > { %vm3046_vm3 = vcmp.ge.f32.partialorder %v2850_v3, 0.0  ;;  %v3242_v12 = vmul.f32 0.1, %v2850_v3  ;;  %v3437_v0 = vsel %vm3045_vm2, %v2849_v61, %v3241_v4  ;;  %vm4221_vm4 = vcmp.ge.f32.partialorder %v4025_v6, 0.0 }
 0x35a   : > { %v8814_v14 = vpack.c.bf16 %v6964_v8, %v6963_v7  ;;  %vm4222_vm5 = vcmp.ge.f32.partialorder %v4026_v10, 0.0  ;;  %v4417_v16 = vmul.f32 0.1, %v4025_v6  ;;  %v4418_v17 = vmul.f32 0.1, %v4026_v10 }
 0x35b   : > { %v3438_v19 = vsel %vm3046_vm3, %v2850_v3, %v3242_v12  ;;  %v5006_v5 = vrot.slane %v409_v41, 4  ;;  %v5397_v21 = vunpack.c.l.bf16 %v5005_v11  ;;  %v6573_v9 = vmax.f32 %v10934_v1, %v3437_v0  ;;  %v405_v11 = vld [vmem:[%s9329_s28 + $0x720] sm:$0xff]  ;;  %v406_v12 = vld [vmem:[%s9329_s28 + $0x728] sm:$0xff] }
 0x35c   : > { %9080 = vst [vmem:[%s9383_s8 + $0x1b8] sm:$0xff] %v8814_v14   ;;  %v4613_v24 = vsel %vm4221_vm4, %v4025_v6, %v4417_v16  ;;  %v4614_v25 = vsel %vm4222_vm5, %v4026_v10, %v4418_v17  ;;  %v6574_v13 = vmax.f32 %v10936_v2, %v3438_v19  ;;  %v683_v27 = vunpack.c.l.bf16 %v403_v18 }
 0x35d   : > { %v5398_v15 = vunpack.c.l.bf16 %v5006_v5  ;;  %v5593_v29 = vmul.f32 %v10916_v44, %v5397_v21  ;;  %v684_v20 = vunpack.c.l.bf16 %v404_v23  ;;  %v2067_v33 = vrot.slane %v403_v18, 4  ;;  %v412_v21 = vld [vmem:[%s9329_s28 + $0x758] sm:$0xff] }
 0x35e   : > { %v885_v22 = vmul.f32 %v10916_v44, %v683_v27  ;;  %v2068_v35 = vrot.slane %v404_v23, 4  ;;  %v3635_v36 = vunpack.c.l.bf16 %v410_v30  ;;  %v3636_v37 = vunpack.c.l.bf16 %v411_v31  ;;  %v413_v23 = vld [vmem:[%s9329_s28 + $0x760] sm:$0xff] }
 0x35f   : > { %v5594_v26 = vmul.f32 %v10916_v44, %v5398_v15  ;;  %v5789_v39 = vadd.f32 %v10927_v52, %v5593_v29  ;;  %v886_v28 = vmul.f32 %v10916_v44, %v684_v20  ;;  %v2459_v41 = vunpack.c.l.bf16 %v2067_v33 }
 0x360   : > { %v1087_v42 = vadd.f32 %v10927_v52, %v885_v22  ;;  %v2460_v43 = vunpack.c.l.bf16 %v2068_v35  ;;  %v3831_v32 = vmul.f32 %v10916_v44, %v3635_v36  ;;  %v3832_v45 = vmul.f32 %v10916_v44, %v3636_v37 }
 0x361   : > { %v5790_v34 = vadd.f32 %v10927_v52, %v5594_v26  ;;  %vm5985_vm6 = vcmp.ge.f32.partialorder %v5789_v39, 0.0  ;;  %v6181_v47 = vmul.f32 0.1, %v5789_v39  ;;  %v1088_v48 = vadd.f32 %v10927_v52, %v886_v28 }
 0x362   : > { %vm1283_vm7 = vcmp.ge.f32.partialorder %v1087_v42, 0.0  ;;  %v1479_v49 = vmul.f32 0.1, %v1087_v42  ;;  %v2655_v50 = vmul.f32 %v10916_v44, %v2459_v41  ;;  %v2656_v38 = vmul.f32 %v10916_v44, %v2460_v43 }
 0x363   : > { %vm5986_vm8 = vcmp.ge.f32.partialorder %v5790_v34, 0.0  ;;  %v6182_v51 = vmul.f32 0.1, %v5790_v34  ;;  %v6377_v40 = vsel %vm5985_vm6, %v5789_v39, %v6181_v47  ;;  %vm1284_vm9 = vcmp.ge.f32.partialorder %v1088_v48, 0.0 }
 0x364   : > { %v6769_v53 = vmax.f32 %v4613_v24, %v6377_v40  ;;  %v1480_v54 = vmul.f32 0.1, %v1088_v48  ;;  %v10960_v55 = vsel %vm1283_vm7, %v1087_v42, %v1479_v49  ;;  %v2851_v56 = vadd.f32 %v10927_v52, %v2655_v50 }
 0x365   : > { %v6378_v57 = vsel %vm5986_vm8, %v5790_v34, %v6182_v51  ;;  %v2852_v58 = vadd.f32 %v10927_v52, %v2656_v38  ;;  %v4027_v46 = vadd.f32 %v10927_v52, %v3831_v32  ;;  %v4028_v59 = vadd.f32 %v10927_v52, %v3832_v45 }
 0x366   : > { %v6770_v60 = vmax.f32 %v4614_v25, %v6378_v57  ;;  %v6965_v61 = vmax.f32 %v6573_v9, %v6769_v53  ;;  %v10966_v62 = vsel %vm1284_vm9, %v1088_v48, %v1480_v54  ;;  %vm3047_vm10 = vcmp.ge.f32.partialorder %v2851_v56, 0.0 }
 0x367   : > { %vm3048_vm11 = vcmp.ge.f32.partialorder %v2852_v58, 0.0  ;;  %v3243_v63 = vmul.f32 0.1, %v2851_v56  ;;  %v3244_v1 = vmul.f32 0.1, %v2852_v58  ;;  %vm4223_vm12 = vcmp.ge.f32.partialorder %v4027_v46, 0.0 }
 0x368   : > { %v6966_v2 = vmax.f32 %v6574_v13, %v6770_v60  ;;  %vm4224_vm13 = vcmp.ge.f32.partialorder %v4028_v59, 0.0  ;;  %v4419_v3 = vmul.f32 0.1, %v4027_v46  ;;  %v4420_v4 = vmul.f32 0.1, %v4028_v59 }
 0x369   : > { %v3439_v6 = vsel %vm3047_vm10, %v2851_v56, %v3243_v63  ;;  %v3440_v7 = vsel %vm3048_vm11, %v2852_v58, %v3244_v1  ;;  %v5007_v8 = vrot.slane %v410_v30, 4  ;;  %v5008_v10 = vrot.slane %v411_v31, 4 }
 0x36a   : > { %v8819_v0 = vpack.c.bf16 %v6966_v2, %v6965_v61  ;;  %v4615_v14 = vsel %vm4223_vm12, %v4027_v46, %v4419_v3  ;;  %v4616_v16 = vsel %vm4224_vm13, %v4028_v59, %v4420_v4  ;;  %v6575_v17 = vmax.f32 %v10960_v55, %v3439_v6  ;;  %v407_v3 = vld [vmem:[%s9329_s28 + $0x730] sm:$0xff] }
 0x36b   : > { %v5399_v18 = vunpack.c.l.bf16 %v5007_v8  ;;  %v5400_v19 = vunpack.c.l.bf16 %v5008_v10  ;;  %v6576_v5 = vmax.f32 %v10966_v62, %v3440_v7  ;;  %v685_v9 = vunpack.c.l.bf16 %v405_v11  ;;  %v415_v4 = vld [vmem:[%s9329_s28 + $0x770] sm:$0xff] }
 0x36c   : > { %9081 = vst [vmem:[%s9383_s8 + $0x1c0] sm:$0xff] %v8819_v0   ;;  %v686_v24 = vunpack.c.l.bf16 %v406_v12  ;;  %v2069_v25 = vrot.slane %v405_v11, 4  ;;  %v2070_v13 = vrot.slane %v406_v12, 4  ;;  %v3637_v27 = vunpack.c.l.bf16 %v412_v21  ;;  %v414_v0 = vld [vmem:[%s9329_s28 + $0x768] sm:$0xff] }
 0x36d   : > { %v5595_v15 = vmul.f32 %v10916_v44, %v5399_v18  ;;  %v5596_v29 = vmul.f32 %v10916_v44, %v5400_v19  ;;  %v887_v30 = vmul.f32 %v10916_v44, %v685_v9  ;;  %v3638_v31 = vunpack.c.l.bf16 %v413_v23  ;;  %v422_v18 = vld [vmem:[%s9329_s28 + $0x7a8] sm:$0xff] }
 0x36e   : > { %v888_v20 = vmul.f32 %v10916_v44, %v686_v24  ;;  %v2461_v33 = vunpack.c.l.bf16 %v2069_v25  ;;  %v2462_v22 = vunpack.c.l.bf16 %v2070_v13  ;;  %v3833_v35 = vmul.f32 %v10916_v44, %v3637_v27 }
 0x36f   : > { %v5791_v36 = vadd.f32 %v10927_v52, %v5595_v15  ;;  %v5792_v37 = vadd.f32 %v10927_v52, %v5596_v29  ;;  %v1089_v26 = vadd.f32 %v10927_v52, %v887_v30  ;;  %v3834_v39 = vmul.f32 %v10916_v44, %v3638_v31 }
 0x370   : > { %v1090_v28 = vadd.f32 %v10927_v52, %v888_v20  ;;  %v2657_v41 = vmul.f32 %v10916_v44, %v2461_v33  ;;  %v2658_v42 = vmul.f32 %v10916_v44, %v2462_v22  ;;  %v4029_v43 = vadd.f32 %v10927_v52, %v3833_v35 }
 0x371   : > { %vm5987_vm14 = vcmp.ge.f32.partialorder %v5791_v36, 0.0  ;;  %vm5988_vm15 = vcmp.ge.f32.partialorder %v5792_v37, 0.0  ;;  %v6183_v32 = vmul.f32 0.1, %v5791_v36  ;;  %v6184_v45 = vmul.f32 0.1, %v5792_v37 }
 0x372   : > { %vm1285_vm0 = vcmp.ge.f32.partialorder %v1089_v26, 0.0  ;;  %vm1286_vm1 = vcmp.ge.f32.partialorder %v1090_v28, 0.0  ;;  %v1481_v34 = vmul.f32 0.1, %v1089_v26  ;;  %v1482_v47 = vmul.f32 0.1, %v1090_v28 }
 0x373   : > { %v6379_v48 = vsel %vm5987_vm14, %v5791_v36, %v6183_v32  ;;  %v6380_v49 = vsel %vm5988_vm15, %v5792_v37, %v6184_v45  ;;  %v2853_v50 = vadd.f32 %v10927_v52, %v2657_v41  ;;  %v2854_v38 = vadd.f32 %v10927_v52, %v2658_v42 }
 0x374   : > { %v6771_v51 = vmax.f32 %v4615_v14, %v6379_v48  ;;  %v6772_v40 = vmax.f32 %v4616_v16, %v6380_v49  ;;  %v10990_v53 = vsel %vm1285_vm0, %v1089_v26, %v1481_v34  ;;  %v10992_v54 = vsel %vm1286_vm1, %v1090_v28, %v1482_v47 }
 0x375   : > { %vm3049_vm2 = vcmp.ge.f32.partialorder %v2853_v50, 0.0  ;;  %vm3050_vm3 = vcmp.ge.f32.partialorder %v2854_v38, 0.0  ;;  %v3245_v55 = vmul.f32 0.1, %v2853_v50  ;;  %v3246_v56 = vmul.f32 0.1, %v2854_v38 }
 0x376   : > { %v6967_v57 = vmax.f32 %v6575_v17, %v6771_v51  ;;  %v6968_v58 = vmax.f32 %v6576_v5, %v6772_v40  ;;  %v4030_v46 = vadd.f32 %v10927_v52, %v3834_v39  ;;  %vm4225_vm4 = vcmp.ge.f32.partialorder %v4029_v43, 0.0 }
 0x377   : > { %v3441_v59 = vsel %vm3049_vm2, %v2853_v50, %v3245_v55  ;;  %v3442_v60 = vsel %vm3050_vm3, %v2854_v38, %v3246_v56  ;;  %v4421_v61 = vmul.f32 0.1, %v4029_v43  ;;  %v5009_v62 = vrot.slane %v412_v21, 4 }
 0x378   : > { %v8824_v63 = vpack.c.bf16 %v6968_v58, %v6967_v57  ;;  %vm4226_vm5 = vcmp.ge.f32.partialorder %v4030_v46, 0.0  ;;  %v4422_v1 = vmul.f32 0.1, %v4030_v46  ;;  %v5010_v2 = vrot.slane %v413_v23, 4  ;;  %v416_v58 = vld [vmem:[%s9329_s28 + $0x778] sm:$0xff] }
 0x379   : > { %v4617_v6 = vsel %vm4225_vm4, %v4029_v43, %v4421_v61  ;;  %v5401_v7 = vunpack.c.l.bf16 %v5009_v62  ;;  %v6577_v8 = vmax.f32 %v10990_v53, %v3441_v59  ;;  %v6578_v10 = vmax.f32 %v10992_v54, %v3442_v60  ;;  %v417_v61 = vld [vmem:[%s9329_s28 + $0x780] sm:$0xff] }
 0x37a   : > { %9082 = vst [vmem:[%s9383_s8 + $0x1c8] sm:$0xff] %v8824_v63   ;;  %v4618_v11 = vsel %vm4226_vm5, %v4030_v46, %v4422_v1  ;;  %v5402_v12 = vunpack.c.l.bf16 %v5010_v2  ;;  %v687_v14 = vunpack.c.l.bf16 %v407_v3  ;;  %v688_v16 = vunpack.c.l.bf16 %v415_v4 }
 0x37b   : > { %v5597_v17 = vmul.f32 %v10916_v44, %v5401_v7  ;;  %v2071_v19 = vrot.slane %v407_v3, 4  ;;  %v2072_v5 = vrot.slane %v415_v4, 4  ;;  %v3639_v21 = vunpack.c.l.bf16 %v414_v0  ;;  %v423_v4 = vld [vmem:[%s9329_s28 + $0x7b0] sm:$0xff] }
 0x37c   : > { %v5598_v9 = vmul.f32 %v10916_v44, %v5402_v12  ;;  %v889_v23 = vmul.f32 %v10916_v44, %v687_v14  ;;  %v890_v24 = vmul.f32 %v10916_v44, %v688_v16  ;;  %v3640_v25 = vunpack.c.l.bf16 %v422_v18  ;;  %v424_v12 = vld [vmem:[%s9329_s28 + $0x7b8] sm:$0xff] }
 0x37d   : > { %v5793_v13 = vadd.f32 %v10927_v52, %v5597_v17  ;;  %v2463_v27 = vunpack.c.l.bf16 %v2071_v19  ;;  %v2464_v15 = vunpack.c.l.bf16 %v2072_v5  ;;  %v3835_v29 = vmul.f32 %v10916_v44, %v3639_v21 }
 0x37e   : > { %v5794_v30 = vadd.f32 %v10927_v52, %v5598_v9  ;;  %v1091_v31 = vadd.f32 %v10927_v52, %v889_v23  ;;  %v1092_v20 = vadd.f32 %v10927_v52, %v890_v24  ;;  %v3836_v33 = vmul.f32 %v10916_v44, %v3640_v25 }
 0x37f   : > { %vm5989_vm6 = vcmp.ge.f32.partialorder %v5793_v13, 0.0  ;;  %v6185_v22 = vmul.f32 0.1, %v5793_v13  ;;  %v2659_v35 = vmul.f32 %v10916_v44, %v2463_v27  ;;  %v2660_v36 = vmul.f32 %v10916_v44, %v2464_v15 }
 0x380   : > { %vm5990_vm7 = vcmp.ge.f32.partialorder %v5794_v30, 0.0  ;;  %v6186_v37 = vmul.f32 0.1, %v5794_v30  ;;  %vm1287_vm8 = vcmp.ge.f32.partialorder %v1091_v31, 0.0  ;;  %vm1288_vm9 = vcmp.ge.f32.partialorder %v1092_v20, 0.0 }
 0x381   : > { %v6381_v26 = vsel %vm5989_vm6, %v5793_v13, %v6185_v22  ;;  %v1483_v39 = vmul.f32 0.1, %v1091_v31  ;;  %v1484_v28 = vmul.f32 0.1, %v1092_v20  ;;  %v2855_v41 = vadd.f32 %v10927_v52, %v2659_v35 }
 0x382   : > { %v6382_v42 = vsel %vm5990_vm7, %v5794_v30, %v6186_v37  ;;  %v6773_v43 = vmax.f32 %v4617_v6, %v6381_v26  ;;  %v2856_v32 = vadd.f32 %v10927_v52, %v2660_v36  ;;  %v4031_v45 = vadd.f32 %v10927_v52, %v3835_v29 }
 0x383   : > { %v6774_v34 = vmax.f32 %v4618_v11, %v6382_v42  ;;  %v11017_v47 = vsel %vm1287_vm8, %v1091_v31, %v1483_v39  ;;  %v11019_v48 = vsel %vm1288_vm9, %v1092_v20, %v1484_v28  ;;  %vm3051_vm10 = vcmp.ge.f32.partialorder %v2855_v41, 0.0 }
 0x384   : > { %v6969_v49 = vmax.f32 %v6577_v8, %v6773_v43  ;;  %vm3052_vm11 = vcmp.ge.f32.partialorder %v2856_v32, 0.0  ;;  %v3247_v50 = vmul.f32 0.1, %v2855_v41  ;;  %v3248_v38 = vmul.f32 0.1, %v2856_v32 }
 0x385   : > { %v6970_v51 = vmax.f32 %v6578_v10, %v6774_v34  ;;  %v4032_v40 = vadd.f32 %v10927_v52, %v3836_v33  ;;  %vm4227_vm12 = vcmp.ge.f32.partialorder %v4031_v45, 0.0  ;;  %v4423_v53 = vmul.f32 0.1, %v4031_v45 }
 0x386   : > { %v3443_v54 = vsel %vm3051_vm10, %v2855_v41, %v3247_v50  ;;  %v3444_v55 = vsel %vm3052_vm11, %v2856_v32, %v3248_v38  ;;  %v5011_v56 = vrot.slane %v414_v0, 4  ;;  %v5012_v57 = vrot.slane %v422_v18, 4 }
 0x387   : > { %v8829_v46 = vpack.c.bf16 %v6970_v51, %v6969_v49  ;;  %vm4228_vm13 = vcmp.ge.f32.partialorder %v4032_v40, 0.0  ;;  %v4424_v59 = vmul.f32 0.1, %v4032_v40  ;;  %v4619_v60 = vsel %vm4227_vm12, %v4031_v45, %v4423_v53  ;;  %v418_v51 = vld [vmem:[%s9329_s28 + $0x788] sm:$0xff] }
 0x388   : > { %v5403_v62 = vunpack.c.l.bf16 %v5011_v56  ;;  %v5404_v63 = vunpack.c.l.bf16 %v5012_v57  ;;  %v6579_v1 = vmax.f32 %v11017_v47, %v3443_v54  ;;  %v6580_v2 = vmax.f32 %v11019_v48, %v3444_v55  ;;  %v419_v56 = vld [vmem:[%s9329_s28 + $0x790] sm:$0xff] }
 0x389   : > { %9083 = vst [vmem:[%s9383_s8 + $0x1d0] sm:$0xff] %v8829_v46   ;;  %v4620_v3 = vsel %vm4228_vm13, %v4032_v40, %v4424_v59  ;;  %v689_v6 = vunpack.c.l.bf16 %v416_v58  ;;  %v690_v7 = vunpack.c.l.bf16 %v417_v61  ;;  %v2073_v8 = vrot.slane %v416_v58, 4 }
 0x38a   : > { %v5599_v10 = vmul.f32 %v10916_v44, %v5403_v62  ;;  %v5600_v11 = vmul.f32 %v10916_v44, %v5404_v63  ;;  %v2074_v0 = vrot.slane %v417_v61, 4  ;;  %v3641_v14 = vunpack.c.l.bf16 %v423_v4  ;;  %v425_v62 = vld [vmem:[%s9329_s28 + $0x7c0] sm:$0xff]  ;;  %v426_v63 = vld [vmem:[%s9329_s28 + $0x7c8] sm:$0xff] }
 0x38b   : > { %v891_v16 = vmul.f32 %v10916_v44, %v689_v6  ;;  %v892_v17 = vmul.f32 %v10916_v44, %v690_v7  ;;  %v2465_v18 = vunpack.c.l.bf16 %v2073_v8  ;;  %v3642_v19 = vunpack.c.l.bf16 %v424_v12 }
 0x38c   : > { %v5795_v5 = vadd.f32 %v10927_v52, %v5599_v10  ;;  %v5796_v21 = vadd.f32 %v10927_v52, %v5600_v11  ;;  %v2466_v9 = vunpack.c.l.bf16 %v2074_v0  ;;  %v3837_v23 = vmul.f32 %v10916_v44, %v3641_v14 }
 0x38d   : > { %v1093_v24 = vadd.f32 %v10927_v52, %v891_v16  ;;  %v1094_v25 = vadd.f32 %v10927_v52, %v892_v17  ;;  %v2661_v13 = vmul.f32 %v10916_v44, %v2465_v18  ;;  %v3838_v27 = vmul.f32 %v10916_v44, %v3642_v19 }
 0x38e   : > { %vm5991_vm14 = vcmp.ge.f32.partialorder %v5795_v5, 0.0  ;;  %vm5992_vm15 = vcmp.ge.f32.partialorder %v5796_v21, 0.0  ;;  %v6187_v15 = vmul.f32 0.1, %v5795_v5  ;;  %v6188_v29 = vmul.f32 0.1, %v5796_v21 }
 0x38f   : > { %vm1289_vm0 = vcmp.ge.f32.partialorder %v1093_v24, 0.0  ;;  %vm1290_vm1 = vcmp.ge.f32.partialorder %v1094_v25, 0.0  ;;  %v1485_v30 = vmul.f32 0.1, %v1093_v24  ;;  %v1486_v31 = vmul.f32 0.1, %v1094_v25 }
 0x390   : > { %v6383_v20 = vsel %vm5991_vm14, %v5795_v5, %v6187_v15  ;;  %v6384_v33 = vsel %vm5992_vm15, %v5796_v21, %v6188_v29  ;;  %v2662_v22 = vmul.f32 %v10916_v44, %v2466_v9  ;;  %v2857_v35 = vadd.f32 %v10927_v52, %v2661_v13 }
 0x391   : > { %v6775_v36 = vmax.f32 %v4619_v60, %v6383_v20  ;;  %v6776_v37 = vmax.f32 %v4620_v3, %v6384_v33  ;;  %v11042_v26 = vsel %vm1289_vm0, %v1093_v24, %v1485_v30  ;;  %v11044_v39 = vsel %vm1290_vm1, %v1094_v25, %v1486_v31 }
 0x392   : > { %v2858_v28 = vadd.f32 %v10927_v52, %v2662_v22  ;;  %vm3053_vm2 = vcmp.ge.f32.partialorder %v2857_v35, 0.0  ;;  %v3249_v41 = vmul.f32 0.1, %v2857_v35  ;;  %v4033_v42 = vadd.f32 %v10927_v52, %v3837_v23 }
 0x393   : > { %v6971_v43 = vmax.f32 %v6579_v1, %v6775_v36  ;;  %v6972_v32 = vmax.f32 %v6580_v2, %v6776_v37  ;;  %v4034_v45 = vadd.f32 %v10927_v52, %v3838_v27  ;;  %v5013_v34 = vrot.slane %v423_v4, 4 }
 0x394   : > { %vm3054_vm3 = vcmp.ge.f32.partialorder %v2858_v28, 0.0  ;;  %v3250_v47 = vmul.f32 0.1, %v2858_v28  ;;  %v3445_v48 = vsel %vm3053_vm2, %v2857_v35, %v3249_v41  ;;  %vm4229_vm4 = vcmp.ge.f32.partialorder %v4033_v42, 0.0 }
 0x395   : > { %v8834_v49 = vpack.c.bf16 %v6972_v32, %v6971_v43  ;;  %vm4230_vm5 = vcmp.ge.f32.partialorder %v4034_v45, 0.0  ;;  %v4425_v50 = vmul.f32 0.1, %v4033_v42  ;;  %v4426_v38 = vmul.f32 0.1, %v4034_v45 }
 0x396   : > { %v3446_v40 = vsel %vm3054_vm3, %v2858_v28, %v3250_v47  ;;  %v5014_v53 = vrot.slane %v424_v12, 4  ;;  %v5405_v54 = vunpack.c.l.bf16 %v5013_v34  ;;  %v6581_v55 = vmax.f32 %v11042_v26, %v3445_v48  ;;  %v420_v34 = vld [vmem:[%s9329_s28 + $0x798] sm:$0xff]  ;;  %v421_v47 = vld [vmem:[%s9329_s28 + $0x7a0] sm:$0xff] }
 0x397   : > { %9084 = vst [vmem:[%s9383_s8 + $0x1d8] sm:$0xff] %v8834_v49   ;;  %v4621_v57 = vsel %vm4229_vm4, %v4033_v42, %v4425_v50  ;;  %v4622_v58 = vsel %vm4230_vm5, %v4034_v45, %v4426_v38  ;;  %v6582_v46 = vmax.f32 %v11044_v39, %v3446_v40  ;;  %v691_v59 = vunpack.c.l.bf16 %v418_v51 }
 0x398   : > { %v5406_v60 = vunpack.c.l.bf16 %v5014_v53  ;;  %v5601_v61 = vmul.f32 %v10916_v44, %v5405_v54  ;;  %v692_v1 = vunpack.c.l.bf16 %v419_v56  ;;  %v2075_v2 = vrot.slane %v418_v51, 4  ;;  %v427_v54 = vld [vmem:[%s9329_s28 + $0x7d0] sm:$0xff] }
 0x399   : > { %v893_v3 = vmul.f32 %v10916_v44, %v691_v59  ;;  %v2076_v4 = vrot.slane %v419_v56, 4  ;;  %v3643_v6 = vunpack.c.l.bf16 %v425_v62  ;;  %v3644_v7 = vunpack.c.l.bf16 %v426_v63  ;;  %v428_v56 = vld [vmem:[%s9329_s28 + $0x7d8] sm:$0xff] }
 0x39a   : > { %v5602_v8 = vmul.f32 %v10916_v44, %v5406_v60  ;;  %v5797_v10 = vadd.f32 %v10927_v52, %v5601_v61  ;;  %v894_v11 = vmul.f32 %v10916_v44, %v692_v1  ;;  %v2467_v12 = vunpack.c.l.bf16 %v2075_v2 }
 0x39b   : > { %v1095_v0 = vadd.f32 %v10927_v52, %v893_v3  ;;  %v2468_v14 = vunpack.c.l.bf16 %v2076_v4  ;;  %v3839_v16 = vmul.f32 %v10916_v44, %v3643_v6  ;;  %v3840_v17 = vmul.f32 %v10916_v44, %v3644_v7 }
 0x39c   : > { %v5798_v18 = vadd.f32 %v10927_v52, %v5602_v8  ;;  %vm5993_vm6 = vcmp.ge.f32.partialorder %v5797_v10, 0.0  ;;  %v6189_v19 = vmul.f32 0.1, %v5797_v10  ;;  %v1096_v5 = vadd.f32 %v10927_v52, %v894_v11 }
 0x39d   : > { %vm1291_vm7 = vcmp.ge.f32.partialorder %v1095_v0, 0.0  ;;  %v1487_v21 = vmul.f32 0.1, %v1095_v0  ;;  %v2663_v9 = vmul.f32 %v10916_v44, %v2467_v12  ;;  %v2664_v23 = vmul.f32 %v10916_v44, %v2468_v14 }
 0x39e   : > { %vm5994_vm8 = vcmp.ge.f32.partialorder %v5798_v18, 0.0  ;;  %v6190_v24 = vmul.f32 0.1, %v5798_v18  ;;  %v6385_v25 = vsel %vm5993_vm6, %v5797_v10, %v6189_v19  ;;  %vm1292_vm9 = vcmp.ge.f32.partialorder %v1096_v5, 0.0 }
 0x39f   : > { %v6777_v13 = vmax.f32 %v4621_v57, %v6385_v25  ;;  %v1488_v27 = vmul.f32 0.1, %v1096_v5  ;;  %v11068_v15 = vsel %vm1291_vm7, %v1095_v0, %v1487_v21  ;;  %v2859_v29 = vadd.f32 %v10927_v52, %v2663_v9 }
 0x3a0   : > { %v6386_v30 = vsel %vm5994_vm8, %v5798_v18, %v6190_v24  ;;  %v2860_v31 = vadd.f32 %v10927_v52, %v2664_v23  ;;  %v4035_v20 = vadd.f32 %v10927_v52, %v3839_v16  ;;  %v4036_v33 = vadd.f32 %v10927_v52, %v3840_v17 }
 0x3a1   : > { %v6778_v22 = vmax.f32 %v4622_v58, %v6386_v30  ;;  %v6973_v35 = vmax.f32 %v6581_v55, %v6777_v13  ;;  %v11074_v36 = vsel %vm1292_vm9, %v1096_v5, %v1488_v27  ;;  %vm3055_vm10 = vcmp.ge.f32.partialorder %v2859_v29, 0.0 }
 0x3a2   : > { %vm3056_vm11 = vcmp.ge.f32.partialorder %v2860_v31, 0.0  ;;  %v3251_v37 = vmul.f32 0.1, %v2859_v29  ;;  %v3252_v26 = vmul.f32 0.1, %v2860_v31  ;;  %vm4231_vm12 = vcmp.ge.f32.partialorder %v4035_v20, 0.0 }
 0x3a3   : > { %v6974_v39 = vmax.f32 %v6582_v46, %v6778_v22  ;;  %vm4232_vm13 = vcmp.ge.f32.partialorder %v4036_v33, 0.0  ;;  %v4427_v28 = vmul.f32 0.1, %v4035_v20  ;;  %v4428_v41 = vmul.f32 0.1, %v4036_v33 }
 0x3a4   : > { %v3447_v42 = vsel %vm3055_vm10, %v2859_v29, %v3251_v37  ;;  %v3448_v43 = vsel %vm3056_vm11, %v2860_v31, %v3252_v26  ;;  %v5015_v32 = vrot.slane %v425_v62, 4  ;;  %v5016_v45 = vrot.slane %v426_v63, 4 }
 0x3a5   : > { %v8839_v48 = vpack.c.bf16 %v6974_v39, %v6973_v35  ;;  %v4623_v49 = vsel %vm4231_vm12, %v4035_v20, %v4427_v28  ;;  %v4624_v50 = vsel %vm4232_vm13, %v4036_v33, %v4428_v41  ;;  %v6583_v38 = vmax.f32 %v11068_v15, %v3447_v42  ;;  %v429_v28 = vld [vmem:[%s9329_s28 + $0x7e0] sm:$0xff]  ;;  %v430_v41 = vld [vmem:[%s9329_s28 + $0x7e8] sm:$0xff] }
 0x3a6   : > { %v5407_v51 = vunpack.c.l.bf16 %v5015_v32  ;;  %v5408_v40 = vunpack.c.l.bf16 %v5016_v45  ;;  %v6584_v53 = vmax.f32 %v11074_v36, %v3448_v43  ;;  %v693_v55 = vunpack.c.l.bf16 %v420_v34 }
 0x3a7   : > { %9085 = vst [vmem:[%s9383_s8 + $0x1e0] sm:$0xff] %v8839_v48   ;;  %v694_v57 = vunpack.c.l.bf16 %v421_v47  ;;  %v2077_v58 = vrot.slane %v420_v34, 4  ;;  %v2078_v46 = vrot.slane %v421_v47, 4  ;;  %v3645_v59 = vunpack.c.l.bf16 %v427_v54  ;;  %v436_v48 = vld [vmem:[%s9329_s28 + $0x818] sm:$0xff] }
 0x3a8   : > { %v5603_v60 = vmul.f32 %v10916_v44, %v5407_v51  ;;  %v5604_v61 = vmul.f32 %v10916_v44, %v5408_v40  ;;  %v895_v62 = vmul.f32 %v10916_v44, %v693_v55  ;;  %v3646_v63 = vunpack.c.l.bf16 %v428_v56  ;;  %v437_v51 = vld [vmem:[%s9329_s28 + $0x820] sm:$0xff] }
 0x3a9   : > { %v896_v1 = vmul.f32 %v10916_v44, %v694_v57  ;;  %v2469_v2 = vunpack.c.l.bf16 %v2077_v58  ;;  %v2470_v3 = vunpack.c.l.bf16 %v2078_v46  ;;  %v3841_v4 = vmul.f32 %v10916_v44, %v3645_v59 }
 0x3aa   : > { %v5799_v6 = vadd.f32 %v10927_v52, %v5603_v60  ;;  %v5800_v7 = vadd.f32 %v10927_v52, %v5604_v61  ;;  %v1097_v8 = vadd.f32 %v10927_v52, %v895_v62  ;;  %v3842_v10 = vmul.f32 %v10916_v44, %v3646_v63 }
 0x3ab   : > { %v1098_v11 = vadd.f32 %v10927_v52, %v896_v1  ;;  %v2665_v12 = vmul.f32 %v10916_v44, %v2469_v2  ;;  %v2666_v0 = vmul.f32 %v10916_v44, %v2470_v3  ;;  %v4037_v14 = vadd.f32 %v10927_v52, %v3841_v4 }
 0x3ac   : > { %vm5995_vm14 = vcmp.ge.f32.partialorder %v5799_v6, 0.0  ;;  %vm5996_vm15 = vcmp.ge.f32.partialorder %v5800_v7, 0.0  ;;  %v6191_v16 = vmul.f32 0.1, %v5799_v6  ;;  %v6192_v17 = vmul.f32 0.1, %v5800_v7 }
 0x3ad   : > { %vm1293_vm0 = vcmp.ge.f32.partialorder %v1097_v8, 0.0  ;;  %vm1294_vm1 = vcmp.ge.f32.partialorder %v1098_v11, 0.0  ;;  %v1489_v18 = vmul.f32 0.1, %v1097_v8  ;;  %v1490_v19 = vmul.f32 0.1, %v1098_v11 }
 0x3ae   : > { %v6387_v5 = vsel %vm5995_vm14, %v5799_v6, %v6191_v16  ;;  %v6388_v21 = vsel %vm5996_vm15, %v5800_v7, %v6192_v17  ;;  %v2861_v9 = vadd.f32 %v10927_v52, %v2665_v12  ;;  %v2862_v23 = vadd.f32 %v10927_v52, %v2666_v0 }
 0x3af   : > { %v6779_v24 = vmax.f32 %v4623_v49, %v6387_v5  ;;  %v6780_v25 = vmax.f32 %v4624_v50, %v6388_v21  ;;  %v11098_v13 = vsel %vm1293_vm0, %v1097_v8, %v1489_v18  ;;  %v11100_v27 = vsel %vm1294_vm1, %v1098_v11, %v1490_v19 }
 0x3b0   : > { %vm3057_vm2 = vcmp.ge.f32.partialorder %v2861_v9, 0.0  ;;  %vm3058_vm3 = vcmp.ge.f32.partialorder %v2862_v23, 0.0  ;;  %v3253_v15 = vmul.f32 0.1, %v2861_v9  ;;  %v3254_v29 = vmul.f32 0.1, %v2862_v23 }
 0x3b1   : > { %v6975_v30 = vmax.f32 %v6583_v38, %v6779_v24  ;;  %v6976_v31 = vmax.f32 %v6584_v53, %v6780_v25  ;;  %v4038_v20 = vadd.f32 %v10927_v52, %v3842_v10  ;;  %vm4233_vm4 = vcmp.ge.f32.partialorder %v4037_v14, 0.0 }
 0x3b2   : > { %v3449_v33 = vsel %vm3057_vm2, %v2861_v9, %v3253_v15  ;;  %v3450_v22 = vsel %vm3058_vm3, %v2862_v23, %v3254_v29  ;;  %v4429_v35 = vmul.f32 0.1, %v4037_v14  ;;  %v5017_v36 = vrot.slane %v427_v54, 4 }
 0x3b3   : > { %v8844_v37 = vpack.c.bf16 %v6976_v31, %v6975_v30  ;;  %vm4234_vm5 = vcmp.ge.f32.partialorder %v4038_v20, 0.0  ;;  %v4430_v26 = vmul.f32 0.1, %v4038_v20  ;;  %v5018_v39 = vrot.slane %v428_v56, 4  ;;  %v431_v31 = vld [vmem:[%s9329_s28 + $0x7f0] sm:$0xff] }
 0x3b4   : > { %v4625_v42 = vsel %vm4233_vm4, %v4037_v14, %v4429_v35  ;;  %v5409_v43 = vunpack.c.l.bf16 %v5017_v36  ;;  %v6585_v32 = vmax.f32 %v11098_v13, %v3449_v33  ;;  %v6586_v45 = vmax.f32 %v11100_v27, %v3450_v22  ;;  %v432_v35 = vld [vmem:[%s9329_s28 + $0x7f8] sm:$0xff] }
 0x3b5   : > { %9086 = vst [vmem:[%s9383_s8 + $0x1e8] sm:$0xff] %v8844_v37   ;;  %v4626_v34 = vsel %vm4234_vm5, %v4038_v20, %v4430_v26  ;;  %v5410_v47 = vunpack.c.l.bf16 %v5018_v39  ;;  %v695_v49 = vunpack.c.l.bf16 %v429_v28  ;;  %v696_v50 = vunpack.c.l.bf16 %v430_v41 }
 0x3b6   : > { %v5605_v38 = vmul.f32 %v10916_v44, %v5409_v43  ;;  %v2079_v40 = vrot.slane %v429_v28, 4  ;;  %v2080_v53 = vrot.slane %v430_v41, 4  ;;  %v3647_v54 = vunpack.c.l.bf16 %v436_v48  ;;  %v438_v41 = vld [vmem:[%s9329_s28 + $0x828] sm:$0xff] }
 0x3b7   : > { %v5606_v55 = vmul.f32 %v10916_v44, %v5410_v47  ;;  %v897_v56 = vmul.f32 %v10916_v44, %v695_v49  ;;  %v898_v57 = vmul.f32 %v10916_v44, %v696_v50  ;;  %v3648_v58 = vunpack.c.l.bf16 %v437_v51  ;;  %v439_v47 = vld [vmem:[%s9329_s28 + $0x830] sm:$0xff]  ;;  %v11142_v50 = vld [vmem:[%s12137_s1] ss:$0 sm:$0xff] }
 0x3b8   : > { %v5801_v46 = vadd.f32 %v10927_v52, %v5605_v38  ;;  %v2471_v59 = vunpack.c.l.bf16 %v2079_v40  ;;  %v2472_v60 = vunpack.c.l.bf16 %v2080_v53  ;;  %v3843_v61 = vmul.f32 %v10916_v44, %v3647_v54 }
 0x3b9   : > { %v5802_v62 = vadd.f32 %v10927_v52, %v5606_v55  ;;  %v1099_v63 = vadd.f32 %v10927_v52, %v897_v56  ;;  %v1100_v1 = vadd.f32 %v10927_v52, %v898_v57  ;;  %v3844_v2 = vmul.f32 %v10916_v44, %v3648_v58  ;;  %v11153_v58 = vld [vmem:[%s12138_s2] ss:$0 sm:$0xff] }
 0x3ba   : > { %vm5997_vm6 = vcmp.ge.f32.partialorder %v5801_v46, 0.0  ;;  %v6193_v3 = vmul.f32 0.1, %v5801_v46  ;;  %v2667_v4 = vmul.f32 %v10916_v44, %v2471_v59  ;;  %v2668_v6 = vmul.f32 %v10916_v44, %v2472_v60 }
 0x3bb   : > { %vm5998_vm7 = vcmp.ge.f32.partialorder %v5802_v62, 0.0  ;;  %v6194_v7 = vmul.f32 0.1, %v5802_v62  ;;  %vm1295_vm8 = vcmp.ge.f32.partialorder %v1099_v63, 0.0  ;;  %vm1296_vm9 = vcmp.ge.f32.partialorder %v1100_v1, 0.0 }
 0x3bc   : > { %v6389_v8 = vsel %vm5997_vm6, %v5801_v46, %v6193_v3  ;;  %v1491_v10 = vmul.f32 0.1, %v1099_v63  ;;  %v1492_v11 = vmul.f32 0.1, %v1100_v1  ;;  %v2863_v12 = vadd.f32 %v10927_v52, %v2667_v4 }
 0x3bd   : > { %v6390_v0 = vsel %vm5998_vm7, %v5802_v62, %v6194_v7  ;;  %v6781_v14 = vmax.f32 %v4625_v42, %v6389_v8  ;;  %v2864_v16 = vadd.f32 %v10927_v52, %v2668_v6  ;;  %v4039_v17 = vadd.f32 %v10927_v52, %v3843_v61 }
 0x3be   : > { %v6782_v18 = vmax.f32 %v4626_v34, %v6390_v0  ;;  %v11125_v19 = vsel %vm1295_vm8, %v1099_v63, %v1491_v10  ;;  %v11127_v5 = vsel %vm1296_vm9, %v1100_v1, %v1492_v11  ;;  %vm3059_vm10 = vcmp.ge.f32.partialorder %v2863_v12, 0.0 }
 0x3bf   : > { %v6977_v21 = vmax.f32 %v6585_v32, %v6781_v14  ;;  %vm3060_vm11 = vcmp.ge.f32.partialorder %v2864_v16, 0.0  ;;  %v3255_v9 = vmul.f32 0.1, %v2863_v12  ;;  %v3256_v23 = vmul.f32 0.1, %v2864_v16 }
 0x3c0   : > { %v6978_v24 = vmax.f32 %v6586_v45, %v6782_v18  ;;  %v4040_v25 = vadd.f32 %v10927_v52, %v3844_v2  ;;  %vm4235_vm12 = vcmp.ge.f32.partialorder %v4039_v17, 0.0  ;;  %v4431_v13 = vmul.f32 0.1, %v4039_v17 }
 0x3c1   : > { %v3451_v27 = vsel %vm3059_vm10, %v2863_v12, %v3255_v9  ;;  %v3452_v15 = vsel %vm3060_vm11, %v2864_v16, %v3256_v23  ;;  %v5019_v29 = vrot.slane %v436_v48, 4  ;;  %v5020_v30 = vrot.slane %v437_v51, 4 }
 0x3c2   : > { %v8849_v20 = vpack.c.bf16 %v6978_v24, %v6977_v21  ;;  %vm4236_vm13 = vcmp.ge.f32.partialorder %v4040_v25, 0.0  ;;  %v4432_v33 = vmul.f32 0.1, %v4040_v25  ;;  %v4627_v22 = vsel %vm4235_vm12, %v4039_v17, %v4431_v13  ;;  %v433_v24 = vld [vmem:[%s9329_s28 + $0x800] sm:$0xff] }
 0x3c3   : > { %v5411_v36 = vunpack.c.l.bf16 %v5019_v29  ;;  %v5412_v37 = vunpack.c.l.bf16 %v5020_v30  ;;  %v6587_v26 = vmax.f32 %v11125_v19, %v3451_v27  ;;  %v6588_v39 = vmax.f32 %v11127_v5, %v3452_v15  ;;  %v434_v29 = vld [vmem:[%s9329_s28 + $0x808] sm:$0xff] }
 0x3c4   : > { %9087 = vst [vmem:[%s9383_s8 + $0x1f0] sm:$0xff] %v8849_v20   ;;  %v4628_v28 = vsel %vm4236_vm13, %v4040_v25, %v4432_v33  ;;  %v697_v42 = vunpack.c.l.bf16 %v431_v31  ;;  %v698_v43 = vunpack.c.l.bf16 %v432_v35  ;;  %v2081_v32 = vrot.slane %v431_v31, 4 }
 0x3c5   : > { %v5607_v45 = vmul.f32 %v10916_v44, %v5411_v36  ;;  %v5608_v34 = vmul.f32 %v10916_v44, %v5412_v37  ;;  %v2082_v48 = vrot.slane %v432_v35, 4  ;;  %v3649_v49 = vunpack.c.l.bf16 %v438_v41  ;;  %v440_v36 = vld [vmem:[%s9329_s28 + $0x838] sm:$0xff]  ;;  %v441_v37 = vld [vmem:[%s9329_s28 + $0x840] sm:$0xff] }
 0x3c6   : > { %v899_v38 = vmul.f32 %v11142_v50, %v697_v42  ;;  %v900_v51 = vmul.f32 %v11142_v50, %v698_v43  ;;  %v2473_v40 = vunpack.c.l.bf16 %v2081_v32  ;;  %v3650_v53 = vunpack.c.l.bf16 %v439_v47 }
 0x3c7   : > { %v5803_v54 = vadd.f32 %v10927_v52, %v5607_v45  ;;  %v5804_v55 = vadd.f32 %v10927_v52, %v5608_v34  ;;  %v2474_v56 = vunpack.c.l.bf16 %v2082_v48  ;;  %v3845_v44 = vmul.f32 %v11142_v50, %v3649_v49 }
 0x3c8   : > { %v1101_v57 = vadd.f32 %v10927_v52, %v899_v38  ;;  %v1102_v46 = vadd.f32 %v11153_v58, %v900_v51  ;;  %v2669_v59 = vmul.f32 %v11142_v50, %v2473_v40  ;;  %v3846_v60 = vmul.f32 %v11142_v50, %v3650_v53 }
 0x3c9   : > { %vm5999_vm14 = vcmp.ge.f32.partialorder %v5803_v54, 0.0  ;;  %vm6000_vm15 = vcmp.ge.f32.partialorder %v5804_v55, 0.0  ;;  %v6195_v61 = vmul.f32 0.1, %v5803_v54  ;;  %v6196_v62 = vmul.f32 0.1, %v5804_v55 }
 0x3ca   : > { %vm1297_vm0 = vcmp.ge.f32.partialorder %v1101_v57, 0.0  ;;  %vm1298_vm1 = vcmp.ge.f32.partialorder %v1102_v46, 0.0  ;;  %v1493_v63 = vmul.f32 0.1, %v1101_v57  ;;  %v1494_v1 = vmul.f32 0.1, %v1102_v46 }
 0x3cb   : > { %v6391_v52 = vsel %vm5999_vm14, %v5803_v54, %v6195_v61  ;;  %v6392_v2 = vsel %vm6000_vm15, %v5804_v55, %v6196_v62  ;;  %v2670_v3 = vmul.f32 %v11142_v50, %v2474_v56  ;;  %v2865_v4 = vadd.f32 %v11153_v58, %v2669_v59 }
 0x3cc   : > { %v6783_v6 = vmax.f32 %v4627_v22, %v6391_v52  ;;  %v6784_v7 = vmax.f32 %v4628_v28, %v6392_v2  ;;  %v11160_v8 = vsel %vm1297_vm0, %v1101_v57, %v1493_v63  ;;  %v11162_v10 = vsel %vm1298_vm1, %v1102_v46, %v1494_v1 }
 0x3cd   : > { %v2866_v11 = vadd.f32 %v11153_v58, %v2670_v3  ;;  %vm3061_vm2 = vcmp.ge.f32.partialorder %v2865_v4, 0.0  ;;  %v3257_v12 = vmul.f32 0.1, %v2865_v4  ;;  %v4041_v0 = vadd.f32 %v11153_v58, %v3845_v44 }
 0x3ce   : > { %v6979_v14 = vmax.f32 %v6587_v26, %v6783_v6  ;;  %v6980_v16 = vmax.f32 %v6588_v39, %v6784_v7  ;;  %v4042_v17 = vadd.f32 %v11153_v58, %v3846_v60  ;;  %v5021_v18 = vrot.slane %v438_v41, 4 }
 0x3cf   : > { %vm3062_vm3 = vcmp.ge.f32.partialorder %v2866_v11, 0.0  ;;  %v3258_v19 = vmul.f32 0.1, %v2866_v11  ;;  %v3453_v5 = vsel %vm3061_vm2, %v2865_v4, %v3257_v12  ;;  %vm4237_vm4 = vcmp.ge.f32.partialorder %v4041_v0, 0.0 }
 0x3d0   : > { %v8854_v21 = vpack.c.bf16 %v6980_v16, %v6979_v14  ;;  %vm4238_vm5 = vcmp.ge.f32.partialorder %v4042_v17, 0.0  ;;  %v4433_v9 = vmul.f32 0.1, %v4041_v0  ;;  %v4434_v23 = vmul.f32 0.1, %v4042_v17 }
 0x3d1   : > { %v3454_v25 = vsel %vm3062_vm3, %v2866_v11, %v3258_v19  ;;  %v5022_v13 = vrot.slane %v439_v47, 4  ;;  %v5413_v27 = vunpack.c.l.bf16 %v5021_v18  ;;  %v6589_v15 = vmax.f32 %v11160_v8, %v3453_v5  ;;  %v435_v18 = vld [vmem:[%s9329_s28 + $0x810] sm:$0xff] }
 0x3d2   : > { %9088 = vst [vmem:[%s9383_s8 + $0x1f8] sm:$0xff] %v8854_v21   ;;  %v4629_v30 = vsel %vm4237_vm4, %v4041_v0, %v4433_v9  ;;  %v4630_v31 = vsel %vm4238_vm5, %v4042_v17, %v4434_v23  ;;  %v6590_v20 = vmax.f32 %v11162_v10, %v3454_v25  ;;  %v699_v33 = vunpack.c.l.bf16 %v433_v24  ;;  %v443_v19 = vld [vmem:[%s9329_s28 + $0x850] sm:$0xff] }
 0x3d3   : > { %v5414_v22 = vunpack.c.l.bf16 %v5022_v13  ;;  %v5609_v35 = vmul.f32 %v11142_v50, %v5413_v27  ;;  %v700_v26 = vunpack.c.l.bf16 %v434_v29  ;;  %v2083_v39 = vrot.slane %v433_v24, 4  ;;  %v442_v27 = vld [vmem:[%s9329_s28 + $0x848] sm:$0xff] }
 0x3d4   : > { %v901_v28 = vmul.f32 %v11142_v50, %v699_v33  ;;  %v2084_v41 = vrot.slane %v434_v29, 4  ;;  %v3651_v42 = vunpack.c.l.bf16 %v440_v36  ;;  %v3652_v43 = vunpack.c.l.bf16 %v441_v37  ;;  %v450_v29 = vld [vmem:[%s9329_s28 + $0x888] sm:$0xff] }
 0x3d5   : > { %v5610_v32 = vmul.f32 %v11142_v50, %v5414_v22  ;;  %v5805_v45 = vadd.f32 %v11153_v58, %v5609_v35  ;;  %v902_v34 = vmul.f32 %v11142_v50, %v700_v26  ;;  %v2475_v47 = vunpack.c.l.bf16 %v2083_v39 }
 0x3d6   : > { %v1103_v48 = vadd.f32 %v11153_v58, %v901_v28  ;;  %v2476_v49 = vunpack.c.l.bf16 %v2084_v41  ;;  %v3847_v38 = vmul.f32 %v11142_v50, %v3651_v42  ;;  %v3848_v51 = vmul.f32 %v11142_v50, %v3652_v43 }
 0x3d7   : > { %v5806_v40 = vadd.f32 %v11153_v58, %v5610_v32  ;;  %vm6001_vm6 = vcmp.ge.f32.partialorder %v5805_v45, 0.0  ;;  %v6197_v53 = vmul.f32 0.1, %v5805_v45  ;;  %v1104_v54 = vadd.f32 %v11153_v58, %v902_v34 }
 0x3d8   : > { %vm1299_vm7 = vcmp.ge.f32.partialorder %v1103_v48, 0.0  ;;  %v1495_v55 = vmul.f32 0.1, %v1103_v48  ;;  %v2671_v56 = vmul.f32 %v11142_v50, %v2475_v47  ;;  %v2672_v44 = vmul.f32 %v11142_v50, %v2476_v49 }
 0x3d9   : > { %vm6002_vm8 = vcmp.ge.f32.partialorder %v5806_v40, 0.0  ;;  %v6198_v57 = vmul.f32 0.1, %v5806_v40  ;;  %v6393_v46 = vsel %vm6001_vm6, %v5805_v45, %v6197_v53  ;;  %vm1300_vm9 = vcmp.ge.f32.partialorder %v1104_v54, 0.0 }
 0x3da   : > { %v6785_v59 = vmax.f32 %v4629_v30, %v6393_v46  ;;  %v1496_v60 = vmul.f32 0.1, %v1104_v54  ;;  %v11186_v61 = vsel %vm1299_vm7, %v1103_v48, %v1495_v55  ;;  %v2867_v62 = vadd.f32 %v11153_v58, %v2671_v56 }
 0x3db   : > { %v6394_v63 = vsel %vm6002_vm8, %v5806_v40, %v6198_v57  ;;  %v2868_v1 = vadd.f32 %v11153_v58, %v2672_v44  ;;  %v4043_v52 = vadd.f32 %v11153_v58, %v3847_v38  ;;  %v4044_v2 = vadd.f32 %v11153_v58, %v3848_v51 }
 0x3dc   : > { %v6786_v3 = vmax.f32 %v4630_v31, %v6394_v63  ;;  %v6981_v4 = vmax.f32 %v6589_v15, %v6785_v59  ;;  %v11192_v6 = vsel %vm1300_vm9, %v1104_v54, %v1496_v60  ;;  %vm3063_vm10 = vcmp.ge.f32.partialorder %v2867_v62, 0.0 }
 0x3dd   : > { %vm3064_vm11 = vcmp.ge.f32.partialorder %v2868_v1, 0.0  ;;  %v3259_v7 = vmul.f32 0.1, %v2867_v62  ;;  %v3260_v8 = vmul.f32 0.1, %v2868_v1  ;;  %vm4239_vm12 = vcmp.ge.f32.partialorder %v4043_v52, 0.0 }
 0x3de   : > { %v6982_v10 = vmax.f32 %v6590_v20, %v6786_v3  ;;  %vm4240_vm13 = vcmp.ge.f32.partialorder %v4044_v2, 0.0  ;;  %v4435_v11 = vmul.f32 0.1, %v4043_v52  ;;  %v4436_v12 = vmul.f32 0.1, %v4044_v2 }
 0x3df   : > { %v3455_v0 = vsel %vm3063_vm10, %v2867_v62, %v3259_v7  ;;  %v3456_v14 = vsel %vm3064_vm11, %v2868_v1, %v3260_v8  ;;  %v5023_v16 = vrot.slane %v440_v36, 4  ;;  %v5024_v17 = vrot.slane %v441_v37, 4 }
 0x3e0   : > { %v8859_v5 = vpack.c.bf16 %v6982_v10, %v6981_v4  ;;  %v4631_v21 = vsel %vm4239_vm12, %v4043_v52, %v4435_v11  ;;  %v4632_v9 = vsel %vm4240_vm13, %v4044_v2, %v4436_v12  ;;  %v6591_v23 = vmax.f32 %v11186_v61, %v3455_v0  ;;  %v444_v11 = vld [vmem:[%s9329_s28 + $0x858] sm:$0xff]  ;;  %v445_v12 = vld [vmem:[%s9329_s28 + $0x860] sm:$0xff] }
 0x3e1   : > { %v5415_v24 = vunpack.c.l.bf16 %v5023_v16  ;;  %v5416_v25 = vunpack.c.l.bf16 %v5024_v17  ;;  %v6592_v13 = vmax.f32 %v11192_v6, %v3456_v14  ;;  %v701_v15 = vunpack.c.l.bf16 %v435_v18 }
 0x3e2   : > { %9089 = vst [vmem:[%s9383_s8 + $0x200] sm:$0xff] %v8859_v5   ;;  %v702_v30 = vunpack.c.l.bf16 %v443_v19  ;;  %v2085_v31 = vrot.slane %v435_v18, 4  ;;  %v2086_v20 = vrot.slane %v443_v19, 4  ;;  %v3653_v33 = vunpack.c.l.bf16 %v442_v27  ;;  %v451_v5 = vld [vmem:[%s9329_s28 + $0x890] sm:$0xff] }
 0x3e3   : > { %v5611_v22 = vmul.f32 %v11142_v50, %v5415_v24  ;;  %v5612_v35 = vmul.f32 %v11142_v50, %v5416_v25  ;;  %v903_v36 = vmul.f32 %v11142_v50, %v701_v15  ;;  %v3654_v37 = vunpack.c.l.bf16 %v450_v29  ;;  %v452_v24 = vld [vmem:[%s9329_s28 + $0x898] sm:$0xff] }
 0x3e4   : > { %v904_v26 = vmul.f32 %v11142_v50, %v702_v30  ;;  %v2477_v39 = vunpack.c.l.bf16 %v2085_v31  ;;  %v2478_v28 = vunpack.c.l.bf16 %v2086_v20  ;;  %v3849_v41 = vmul.f32 %v11142_v50, %v3653_v33 }
 0x3e5   : > { %v5807_v42 = vadd.f32 %v11153_v58, %v5611_v22  ;;  %v5808_v43 = vadd.f32 %v11153_v58, %v5612_v35  ;;  %v1105_v32 = vadd.f32 %v11153_v58, %v903_v36  ;;  %v3850_v45 = vmul.f32 %v11142_v50, %v3654_v37 }
 0x3e6   : > { %v1106_v34 = vadd.f32 %v11153_v58, %v904_v26  ;;  %v2673_v47 = vmul.f32 %v11142_v50, %v2477_v39  ;;  %v2674_v48 = vmul.f32 %v11142_v50, %v2478_v28  ;;  %v4045_v49 = vadd.f32 %v11153_v58, %v3849_v41 }
 0x3e7   : > { %vm6003_vm14 = vcmp.ge.f32.partialorder %v5807_v42, 0.0  ;;  %vm6004_vm15 = vcmp.ge.f32.partialorder %v5808_v43, 0.0  ;;  %v6199_v38 = vmul.f32 0.1, %v5807_v42  ;;  %v6200_v51 = vmul.f32 0.1, %v5808_v43 }
 0x3e8   : > { %vm1301_vm0 = vcmp.ge.f32.partialorder %v1105_v32, 0.0  ;;  %vm1302_vm1 = vcmp.ge.f32.partialorder %v1106_v34, 0.0  ;;  %v1497_v40 = vmul.f32 0.1, %v1105_v32  ;;  %v1498_v53 = vmul.f32 0.1, %v1106_v34 }
 0x3e9   : > { %v6395_v54 = vsel %vm6003_vm14, %v5807_v42, %v6199_v38  ;;  %v6396_v55 = vsel %vm6004_vm15, %v5808_v43, %v6200_v51  ;;  %v2869_v56 = vadd.f32 %v11153_v58, %v2673_v47  ;;  %v2870_v44 = vadd.f32 %v11153_v58, %v2674_v48 }
 0x3ea   : > { %v6787_v57 = vmax.f32 %v4631_v21, %v6395_v54  ;;  %v6788_v46 = vmax.f32 %v4632_v9, %v6396_v55  ;;  %v11216_v59 = vsel %vm1301_vm0, %v1105_v32, %v1497_v40  ;;  %v11218_v60 = vsel %vm1302_vm1, %v1106_v34, %v1498_v53 }
 0x3eb   : > { %vm3065_vm2 = vcmp.ge.f32.partialorder %v2869_v56, 0.0  ;;  %vm3066_vm3 = vcmp.ge.f32.partialorder %v2870_v44, 0.0  ;;  %v3261_v61 = vmul.f32 0.1, %v2869_v56  ;;  %v3262_v62 = vmul.f32 0.1, %v2870_v44 }
 0x3ec   : > { %v6983_v63 = vmax.f32 %v6591_v23, %v6787_v57  ;;  %v6984_v1 = vmax.f32 %v6592_v13, %v6788_v46  ;;  %v4046_v52 = vadd.f32 %v11153_v58, %v3850_v45  ;;  %vm4241_vm4 = vcmp.ge.f32.partialorder %v4045_v49, 0.0 }
 0x3ed   : > { %v3457_v2 = vsel %vm3065_vm2, %v2869_v56, %v3261_v61  ;;  %v3458_v3 = vsel %vm3066_vm3, %v2870_v44, %v3262_v62  ;;  %v4437_v4 = vmul.f32 0.1, %v4045_v49  ;;  %v5025_v6 = vrot.slane %v442_v27, 4 }
 0x3ee   : > { %v8864_v7 = vpack.c.bf16 %v6984_v1, %v6983_v63  ;;  %vm4242_vm5 = vcmp.ge.f32.partialorder %v4046_v52, 0.0  ;;  %v4438_v8 = vmul.f32 0.1, %v4046_v52  ;;  %v5026_v10 = vrot.slane %v450_v29, 4  ;;  %v446_v1 = vld [vmem:[%s9329_s28 + $0x868] sm:$0xff] }
 0x3ef   : > { %v4633_v0 = vsel %vm4241_vm4, %v4045_v49, %v4437_v4  ;;  %v5417_v14 = vunpack.c.l.bf16 %v5025_v6  ;;  %v6593_v16 = vmax.f32 %v11216_v59, %v3457_v2  ;;  %v6594_v17 = vmax.f32 %v11218_v60, %v3458_v3  ;;  %v447_v4 = vld [vmem:[%s9329_s28 + $0x870] sm:$0xff] }
 0x3f0   : > { %9090 = vst [vmem:[%s9383_s8 + $0x208] sm:$0xff] %v8864_v7   ;;  %v4634_v18 = vsel %vm4242_vm5, %v4046_v52, %v4438_v8  ;;  %v5418_v19 = vunpack.c.l.bf16 %v5026_v10  ;;  %v703_v21 = vunpack.c.l.bf16 %v444_v11  ;;  %v704_v9 = vunpack.c.l.bf16 %v445_v12 }
 0x3f1   : > { %v5613_v23 = vmul.f32 %v11142_v50, %v5417_v14  ;;  %v2087_v25 = vrot.slane %v444_v11, 4  ;;  %v2088_v13 = vrot.slane %v445_v12, 4  ;;  %v3655_v27 = vunpack.c.l.bf16 %v451_v5  ;;  %v453_v12 = vld [vmem:[%s9329_s28 + $0x8a0] sm:$0xff] }
 0x3f2   : > { %v5614_v15 = vmul.f32 %v11142_v50, %v5418_v19  ;;  %v905_v29 = vmul.f32 %v11142_v50, %v703_v21  ;;  %v906_v30 = vmul.f32 %v11142_v50, %v704_v9  ;;  %v3656_v31 = vunpack.c.l.bf16 %v452_v24  ;;  %v454_v19 = vld [vmem:[%s9329_s28 + $0x8a8] sm:$0xff] }
 0x3f3   : > { %v5809_v20 = vadd.f32 %v11153_v58, %v5613_v23  ;;  %v2479_v33 = vunpack.c.l.bf16 %v2087_v25  ;;  %v2480_v22 = vunpack.c.l.bf16 %v2088_v13  ;;  %v3851_v35 = vmul.f32 %v11142_v50, %v3655_v27 }
 0x3f4   : > { %v5810_v36 = vadd.f32 %v11153_v58, %v5614_v15  ;;  %v1107_v37 = vadd.f32 %v11153_v58, %v905_v29  ;;  %v1108_v26 = vadd.f32 %v11153_v58, %v906_v30  ;;  %v3852_v39 = vmul.f32 %v11142_v50, %v3656_v31 }
 0x3f5   : > { %vm6005_vm6 = vcmp.ge.f32.partialorder %v5809_v20, 0.0  ;;  %v6201_v28 = vmul.f32 0.1, %v5809_v20  ;;  %v2675_v41 = vmul.f32 %v11142_v50, %v2479_v33  ;;  %v2676_v42 = vmul.f32 %v11142_v50, %v2480_v22 }
 0x3f6   : > { %vm6006_vm7 = vcmp.ge.f32.partialorder %v5810_v36, 0.0  ;;  %v6202_v43 = vmul.f32 0.1, %v5810_v36  ;;  %vm1303_vm8 = vcmp.ge.f32.partialorder %v1107_v37, 0.0  ;;  %vm1304_vm9 = vcmp.ge.f32.partialorder %v1108_v26, 0.0 }
 0x3f7   : > { %v6397_v32 = vsel %vm6005_vm6, %v5809_v20, %v6201_v28  ;;  %v1499_v45 = vmul.f32 0.1, %v1107_v37  ;;  %v1500_v34 = vmul.f32 0.1, %v1108_v26  ;;  %v2871_v47 = vadd.f32 %v11153_v58, %v2675_v41 }
 0x3f8   : > { %v6398_v48 = vsel %vm6006_vm7, %v5810_v36, %v6202_v43  ;;  %v6789_v49 = vmax.f32 %v4633_v0, %v6397_v32  ;;  %v2872_v38 = vadd.f32 %v11153_v58, %v2676_v42  ;;  %v4047_v51 = vadd.f32 %v11153_v58, %v3851_v35 }
 0x3f9   : > { %v6790_v40 = vmax.f32 %v4634_v18, %v6398_v48  ;;  %v11243_v53 = vsel %vm1303_vm8, %v1107_v37, %v1499_v45  ;;  %v11245_v54 = vsel %vm1304_vm9, %v1108_v26, %v1500_v34  ;;  %vm3067_vm10 = vcmp.ge.f32.partialorder %v2871_v47, 0.0 }
 0x3fa   : > { %v6985_v55 = vmax.f32 %v6593_v16, %v6789_v49  ;;  %vm3068_vm11 = vcmp.ge.f32.partialorder %v2872_v38, 0.0  ;;  %v3263_v56 = vmul.f32 0.1, %v2871_v47  ;;  %v3264_v44 = vmul.f32 0.1, %v2872_v38 }
 0x3fb   : > { %v6986_v57 = vmax.f32 %v6594_v17, %v6790_v40  ;;  %v4048_v46 = vadd.f32 %v11153_v58, %v3852_v39  ;;  %vm4243_vm12 = vcmp.ge.f32.partialorder %v4047_v51, 0.0  ;;  %v4439_v59 = vmul.f32 0.1, %v4047_v51 }
 0x3fc   : > { %v3459_v60 = vsel %vm3067_vm10, %v2871_v47, %v3263_v56  ;;  %v3460_v61 = vsel %vm3068_vm11, %v2872_v38, %v3264_v44  ;;  %v5027_v62 = vrot.slane %v451_v5, 4  ;;  %v5028_v63 = vrot.slane %v452_v24, 4 }
 0x3fd   : > { %v8869_v52 = vpack.c.bf16 %v6986_v57, %v6985_v55  ;;  %vm4244_vm13 = vcmp.ge.f32.partialorder %v4048_v46, 0.0  ;;  %v4440_v2 = vmul.f32 0.1, %v4048_v46  ;;  %v4635_v3 = vsel %vm4243_vm12, %v4047_v51, %v4439_v59  ;;  %v448_v57 = vld [vmem:[%s9329_s28 + $0x878] sm:$0xff] }
 0x3fe   : > { %v5419_v6 = vunpack.c.l.bf16 %v5027_v62  ;;  %v5420_v7 = vunpack.c.l.bf16 %v5028_v63  ;;  %v6595_v8 = vmax.f32 %v11243_v53, %v3459_v60  ;;  %v6596_v10 = vmax.f32 %v11245_v54, %v3460_v61  ;;  %v449_v62 = vld [vmem:[%s9329_s28 + $0x880] sm:$0xff] }
 0x3ff   : > { %9091 = vst [vmem:[%s9383_s8 + $0x210] sm:$0xff] %v8869_v52   ;;  %v4636_v11 = vsel %vm4244_vm13, %v4048_v46, %v4440_v2  ;;  %v705_v0 = vunpack.c.l.bf16 %v446_v1  ;;  %v706_v14 = vunpack.c.l.bf16 %v447_v4  ;;  %v2089_v16 = vrot.slane %v446_v1, 4 }
 0x400   : > { %v5615_v17 = vmul.f32 %v11142_v50, %v5419_v6  ;;  %v5616_v18 = vmul.f32 %v11142_v50, %v5420_v7  ;;  %v2090_v5 = vrot.slane %v447_v4, 4  ;;  %v3657_v21 = vunpack.c.l.bf16 %v453_v12  ;;  %v455_v6 = vld [vmem:[%s9329_s28 + $0x8b0] sm:$0xff]  ;;  %v456_v7 = vld [vmem:[%s9329_s28 + $0x8b8] sm:$0xff] }
 0x401   : > { %v907_v9 = vmul.f32 %v11142_v50, %v705_v0  ;;  %v908_v23 = vmul.f32 %v11142_v50, %v706_v14  ;;  %v2481_v24 = vunpack.c.l.bf16 %v2089_v16  ;;  %v3658_v25 = vunpack.c.l.bf16 %v454_v19 }
 0x402   : > { %v5811_v13 = vadd.f32 %v11153_v58, %v5615_v17  ;;  %v5812_v27 = vadd.f32 %v11153_v58, %v5616_v18  ;;  %v2482_v15 = vunpack.c.l.bf16 %v2090_v5  ;;  %v3853_v29 = vmul.f32 %v11142_v50, %v3657_v21 }
 0x403   : > { %v1109_v30 = vadd.f32 %v11153_v58, %v907_v9  ;;  %v1110_v31 = vadd.f32 %v11153_v58, %v908_v23  ;;  %v2677_v20 = vmul.f32 %v11142_v50, %v2481_v24  ;;  %v3854_v33 = vmul.f32 %v11142_v50, %v3658_v25 }
 0x404   : > { %vm6007_vm14 = vcmp.ge.f32.partialorder %v5811_v13, 0.0  ;;  %vm6008_vm15 = vcmp.ge.f32.partialorder %v5812_v27, 0.0  ;;  %v6203_v22 = vmul.f32 0.1, %v5811_v13  ;;  %v6204_v35 = vmul.f32 0.1, %v5812_v27 }
 0x405   : > { %vm1305_vm0 = vcmp.ge.f32.partialorder %v1109_v30, 0.0  ;;  %vm1306_vm1 = vcmp.ge.f32.partialorder %v1110_v31, 0.0  ;;  %v1501_v36 = vmul.f32 0.1, %v1109_v30  ;;  %v1502_v37 = vmul.f32 0.1, %v1110_v31 }
 0x406   : > { %v6399_v26 = vsel %vm6007_vm14, %v5811_v13, %v6203_v22  ;;  %v6400_v39 = vsel %vm6008_vm15, %v5812_v27, %v6204_v35  ;;  %v2678_v28 = vmul.f32 %v11142_v50, %v2482_v15  ;;  %v2873_v41 = vadd.f32 %v11153_v58, %v2677_v20 }
 0x407   : > { %v6791_v42 = vmax.f32 %v4635_v3, %v6399_v26  ;;  %v6792_v43 = vmax.f32 %v4636_v11, %v6400_v39  ;;  %v11268_v32 = vsel %vm1305_vm0, %v1109_v30, %v1501_v36  ;;  %v11270_v45 = vsel %vm1306_vm1, %v1110_v31, %v1502_v37 }
 0x408   : > { %v2874_v34 = vadd.f32 %v11153_v58, %v2678_v28  ;;  %vm3069_vm2 = vcmp.ge.f32.partialorder %v2873_v41, 0.0  ;;  %v3265_v47 = vmul.f32 0.1, %v2873_v41  ;;  %v4049_v48 = vadd.f32 %v11153_v58, %v3853_v29 }
 0x409   : > { %v6987_v49 = vmax.f32 %v6595_v8, %v6791_v42  ;;  %v6988_v38 = vmax.f32 %v6596_v10, %v6792_v43  ;;  %v4050_v51 = vadd.f32 %v11153_v58, %v3854_v33  ;;  %v5029_v40 = vrot.slane %v453_v12, 4 }
 0x40a   : > { %vm3070_vm3 = vcmp.ge.f32.partialorder %v2874_v34, 0.0  ;;  %v3266_v53 = vmul.f32 0.1, %v2874_v34  ;;  %v3461_v54 = vsel %vm3069_vm2, %v2873_v41, %v3265_v47  ;;  %vm4245_vm4 = vcmp.ge.f32.partialorder %v4049_v48, 0.0 }
 0x40b   : > { %v8874_v55 = vpack.c.bf16 %v6988_v38, %v6987_v49  ;;  %vm4246_vm5 = vcmp.ge.f32.partialorder %v4050_v51, 0.0  ;;  %v4441_v56 = vmul.f32 0.1, %v4049_v48  ;;  %v4442_v44 = vmul.f32 0.1, %v4050_v51 }
 0x40c   : > { %v3462_v46 = vsel %vm3070_vm3, %v2874_v34, %v3266_v53  ;;  %v5030_v59 = vrot.slane %v454_v19, 4  ;;  %v5421_v60 = vunpack.c.l.bf16 %v5029_v40  ;;  %v6597_v61 = vmax.f32 %v11268_v32, %v3461_v54  ;;  %v457_v40 = vld [vmem:[%s9329_s28 + $0x8c0] sm:$0xff]  ;;  %v458_v53 = vld [vmem:[%s9329_s28 + $0x8c8] sm:$0xff] }
 0x40d   : > { %9092 = vst [vmem:[%s9383_s8 + $0x218] sm:$0xff] %v8874_v55   ;;  %v4637_v63 = vsel %vm4245_vm4, %v4049_v48, %v4441_v56  ;;  %v4638_v1 = vsel %vm4246_vm5, %v4050_v51, %v4442_v44  ;;  %v6598_v52 = vmax.f32 %v11270_v45, %v3462_v46  ;;  %v707_v2 = vunpack.c.l.bf16 %v448_v57 }
 0x40e   : > { %v5422_v3 = vunpack.c.l.bf16 %v5030_v59  ;;  %v5617_v4 = vmul.f32 %v11142_v50, %v5421_v60  ;;  %v708_v8 = vunpack.c.l.bf16 %v449_v62  ;;  %v2091_v10 = vrot.slane %v448_v57, 4  ;;  %v464_v60 = vld [vmem:[%s9329_s28 + $0x8f8] sm:$0xff] }
 0x40f   : > { %v909_v11 = vmul.f32 %v11142_v50, %v707_v2  ;;  %v2092_v12 = vrot.slane %v449_v62, 4  ;;  %v3659_v0 = vunpack.c.l.bf16 %v455_v6  ;;  %v3660_v14 = vunpack.c.l.bf16 %v456_v7  ;;  %v465_v62 = vld [vmem:[%s9329_s28 + $0x900] sm:$0xff] }
 0x410   : > { %v5618_v16 = vmul.f32 %v11142_v50, %v5422_v3  ;;  %v5813_v17 = vadd.f32 %v11153_v58, %v5617_v4  ;;  %v910_v18 = vmul.f32 %v11142_v50, %v708_v8  ;;  %v2483_v19 = vunpack.c.l.bf16 %v2091_v10 }
 0x411   : > { %v1111_v5 = vadd.f32 %v11153_v58, %v909_v11  ;;  %v2484_v21 = vunpack.c.l.bf16 %v2092_v12  ;;  %v3855_v9 = vmul.f32 %v11142_v50, %v3659_v0  ;;  %v3856_v23 = vmul.f32 %v11142_v50, %v3660_v14 }
 0x412   : > { %v5814_v24 = vadd.f32 %v11153_v58, %v5618_v16  ;;  %vm6009_vm6 = vcmp.ge.f32.partialorder %v5813_v17, 0.0  ;;  %v6205_v25 = vmul.f32 0.1, %v5813_v17  ;;  %v1112_v13 = vadd.f32 %v11153_v58, %v910_v18 }
 0x413   : > { %vm1307_vm7 = vcmp.ge.f32.partialorder %v1111_v5, 0.0  ;;  %v1503_v27 = vmul.f32 0.1, %v1111_v5  ;;  %v2679_v15 = vmul.f32 %v11142_v50, %v2483_v19  ;;  %v2680_v29 = vmul.f32 %v11142_v50, %v2484_v21 }
 0x414   : > { %vm6010_vm8 = vcmp.ge.f32.partialorder %v5814_v24, 0.0  ;;  %v6206_v30 = vmul.f32 0.1, %v5814_v24  ;;  %v6401_v31 = vsel %vm6009_vm6, %v5813_v17, %v6205_v25  ;;  %vm1308_vm9 = vcmp.ge.f32.partialorder %v1112_v13, 0.0 }
 0x415   : > { %v6793_v20 = vmax.f32 %v4637_v63, %v6401_v31  ;;  %v1504_v33 = vmul.f32 0.1, %v1112_v13  ;;  %v11294_v22 = vsel %vm1307_vm7, %v1111_v5, %v1503_v27  ;;  %v2875_v35 = vadd.f32 %v11153_v58, %v2679_v15 }
 0x416   : > { %v6402_v36 = vsel %vm6010_vm8, %v5814_v24, %v6206_v30  ;;  %v2876_v37 = vadd.f32 %v11153_v58, %v2680_v29  ;;  %v4051_v26 = vadd.f32 %v11153_v58, %v3855_v9  ;;  %v4052_v39 = vadd.f32 %v11153_v58, %v3856_v23 }
 0x417   : > { %v6794_v28 = vmax.f32 %v4638_v1, %v6402_v36  ;;  %v6989_v41 = vmax.f32 %v6597_v61, %v6793_v20  ;;  %v11300_v42 = vsel %vm1308_vm9, %v1112_v13, %v1504_v33  ;;  %vm3071_vm10 = vcmp.ge.f32.partialorder %v2875_v35, 0.0 }
 0x418   : > { %vm3072_vm11 = vcmp.ge.f32.partialorder %v2876_v37, 0.0  ;;  %v3267_v43 = vmul.f32 0.1, %v2875_v35  ;;  %v3268_v32 = vmul.f32 0.1, %v2876_v37  ;;  %vm4247_vm12 = vcmp.ge.f32.partialorder %v4051_v26, 0.0 }
 0x419   : > { %v6990_v45 = vmax.f32 %v6598_v52, %v6794_v28  ;;  %vm4248_vm13 = vcmp.ge.f32.partialorder %v4052_v39, 0.0  ;;  %v4443_v34 = vmul.f32 0.1, %v4051_v26  ;;  %v4444_v47 = vmul.f32 0.1, %v4052_v39 }
 0x41a   : > { %v3463_v48 = vsel %vm3071_vm10, %v2875_v35, %v3267_v43  ;;  %v3464_v49 = vsel %vm3072_vm11, %v2876_v37, %v3268_v32  ;;  %v5031_v38 = vrot.slane %v455_v6, 4  ;;  %v5032_v51 = vrot.slane %v456_v7, 4 }
 0x41b   : > { %v8879_v54 = vpack.c.bf16 %v6990_v45, %v6989_v41  ;;  %v4639_v55 = vsel %vm4247_vm12, %v4051_v26, %v4443_v34  ;;  %v4640_v56 = vsel %vm4248_vm13, %v4052_v39, %v4444_v47  ;;  %v6599_v44 = vmax.f32 %v11294_v22, %v3463_v48  ;;  %v459_v34 = vld [vmem:[%s9329_s28 + $0x8d0] sm:$0xff]  ;;  %v460_v47 = vld [vmem:[%s9329_s28 + $0x8d8] sm:$0xff] }
 0x41c   : > { %v5423_v57 = vunpack.c.l.bf16 %v5031_v38  ;;  %v5424_v46 = vunpack.c.l.bf16 %v5032_v51  ;;  %v6600_v59 = vmax.f32 %v11300_v42, %v3464_v49  ;;  %v709_v61 = vunpack.c.l.bf16 %v457_v40 }
 0x41d   : > { %9093 = vst [vmem:[%s9383_s8 + $0x220] sm:$0xff] %v8879_v54   ;;  %v710_v63 = vunpack.c.l.bf16 %v458_v53  ;;  %v2093_v1 = vrot.slane %v457_v40, 4  ;;  %v2094_v52 = vrot.slane %v458_v53, 4  ;;  %v3661_v2 = vunpack.c.l.bf16 %v464_v60  ;;  %v466_v54 = vld [vmem:[%s9329_s28 + $0x908] sm:$0xff] }
 0x41e   : > { %v5619_v3 = vmul.f32 %v11142_v50, %v5423_v57  ;;  %v5620_v4 = vmul.f32 %v11142_v50, %v5424_v46  ;;  %v911_v6 = vmul.f32 %v11142_v50, %v709_v61  ;;  %v3662_v7 = vunpack.c.l.bf16 %v465_v62  ;;  %v467_v57 = vld [vmem:[%s9329_s28 + $0x910] sm:$0xff] }
 0x41f   : > { %v912_v8 = vmul.f32 %v11142_v50, %v710_v63  ;;  %v2485_v10 = vunpack.c.l.bf16 %v2093_v1  ;;  %v2486_v11 = vunpack.c.l.bf16 %v2094_v52  ;;  %v3857_v12 = vmul.f32 %v11142_v50, %v3661_v2 }
 0x420   : > { %v5815_v0 = vadd.f32 %v11153_v58, %v5619_v3  ;;  %v5816_v14 = vadd.f32 %v11153_v58, %v5620_v4  ;;  %v1113_v16 = vadd.f32 %v11153_v58, %v911_v6  ;;  %v3858_v17 = vmul.f32 %v11142_v50, %v3662_v7 }
 0x421   : > { %v1114_v18 = vadd.f32 %v11153_v58, %v912_v8  ;;  %v2681_v19 = vmul.f32 %v11142_v50, %v2485_v10  ;;  %v2682_v5 = vmul.f32 %v11142_v50, %v2486_v11  ;;  %v4053_v21 = vadd.f32 %v11153_v58, %v3857_v12 }
 0x422   : > { %vm6011_vm14 = vcmp.ge.f32.partialorder %v5815_v0, 0.0  ;;  %vm6012_vm15 = vcmp.ge.f32.partialorder %v5816_v14, 0.0  ;;  %v6207_v9 = vmul.f32 0.1, %v5815_v0  ;;  %v6208_v23 = vmul.f32 0.1, %v5816_v14 }
 0x423   : > { %vm1309_vm0 = vcmp.ge.f32.partialorder %v1113_v16, 0.0  ;;  %vm1310_vm1 = vcmp.ge.f32.partialorder %v1114_v18, 0.0  ;;  %v1505_v24 = vmul.f32 0.1, %v1113_v16  ;;  %v1506_v25 = vmul.f32 0.1, %v1114_v18 }
 0x424   : > { %v6403_v13 = vsel %vm6011_vm14, %v5815_v0, %v6207_v9  ;;  %v6404_v27 = vsel %vm6012_vm15, %v5816_v14, %v6208_v23  ;;  %v2877_v15 = vadd.f32 %v11153_v58, %v2681_v19  ;;  %v2878_v29 = vadd.f32 %v11153_v58, %v2682_v5 }
 0x425   : > { %v6795_v30 = vmax.f32 %v4639_v55, %v6403_v13  ;;  %v6796_v31 = vmax.f32 %v4640_v56, %v6404_v27  ;;  %v11324_v20 = vsel %vm1309_vm0, %v1113_v16, %v1505_v24  ;;  %v11326_v33 = vsel %vm1310_vm1, %v1114_v18, %v1506_v25 }
 0x426   : > { %vm3073_vm2 = vcmp.ge.f32.partialorder %v2877_v15, 0.0  ;;  %vm3074_vm3 = vcmp.ge.f32.partialorder %v2878_v29, 0.0  ;;  %v3269_v22 = vmul.f32 0.1, %v2877_v15  ;;  %v3270_v35 = vmul.f32 0.1, %v2878_v29 }
 0x427   : > { %v6991_v36 = vmax.f32 %v6599_v44, %v6795_v30  ;;  %v6992_v37 = vmax.f32 %v6600_v59, %v6796_v31  ;;  %v4054_v26 = vadd.f32 %v11153_v58, %v3858_v17  ;;  %vm4249_vm4 = vcmp.ge.f32.partialorder %v4053_v21, 0.0 }
 0x428   : > { %v3465_v39 = vsel %vm3073_vm2, %v2877_v15, %v3269_v22  ;;  %v3466_v28 = vsel %vm3074_vm3, %v2878_v29, %v3270_v35  ;;  %v4445_v41 = vmul.f32 0.1, %v4053_v21  ;;  %v5033_v42 = vrot.slane %v464_v60, 4 }
 0x429   : > { %v8884_v43 = vpack.c.bf16 %v6992_v37, %v6991_v36  ;;  %vm4250_vm5 = vcmp.ge.f32.partialorder %v4054_v26, 0.0  ;;  %v4446_v32 = vmul.f32 0.1, %v4054_v26  ;;  %v5034_v45 = vrot.slane %v465_v62, 4  ;;  %v461_v37 = vld [vmem:[%s9329_s28 + $0x8e0] sm:$0xff] }
 0x42a   : > { %v4641_v48 = vsel %vm4249_vm4, %v4053_v21, %v4445_v41  ;;  %v5425_v49 = vunpack.c.l.bf16 %v5033_v42  ;;  %v6601_v38 = vmax.f32 %v11324_v20, %v3465_v39  ;;  %v6602_v51 = vmax.f32 %v11326_v33, %v3466_v28  ;;  %v462_v41 = vld [vmem:[%s9329_s28 + $0x8e8] sm:$0xff] }
 0x42b   : > { %9094 = vst [vmem:[%s9383_s8 + $0x228] sm:$0xff] %v8884_v43   ;;  %v4642_v40 = vsel %vm4250_vm5, %v4054_v26, %v4446_v32  ;;  %v5426_v53 = vunpack.c.l.bf16 %v5034_v45  ;;  %v711_v55 = vunpack.c.l.bf16 %v459_v34  ;;  %v712_v56 = vunpack.c.l.bf16 %v460_v47 }
 0x42c   : > { %v5621_v44 = vmul.f32 %v11142_v50, %v5425_v49  ;;  %v2095_v46 = vrot.slane %v459_v34, 4  ;;  %v2096_v59 = vrot.slane %v460_v47, 4  ;;  %v3663_v60 = vunpack.c.l.bf16 %v466_v54  ;;  %v468_v47 = vld [vmem:[%s9329_s28 + $0x918] sm:$0xff] }
 0x42d   : > { %v5622_v61 = vmul.f32 %v11142_v50, %v5426_v53  ;;  %v913_v62 = vmul.f32 %v11142_v50, %v711_v55  ;;  %v914_v63 = vmul.f32 %v11142_v50, %v712_v56  ;;  %v3664_v1 = vunpack.c.l.bf16 %v467_v57  ;;  %v469_v53 = vld [vmem:[%s9329_s28 + $0x920] sm:$0xff] }
 0x42e   : > { %v5817_v52 = vadd.f32 %v11153_v58, %v5621_v44  ;;  %v2487_v2 = vunpack.c.l.bf16 %v2095_v46  ;;  %v2488_v3 = vunpack.c.l.bf16 %v2096_v59  ;;  %v3859_v4 = vmul.f32 %v11142_v50, %v3663_v60  ;;  %v11368_v56 = vld [vmem:[%s12137_s1] ss:$0 sm:$0xff] }
 0x42f   : > { %v5818_v6 = vadd.f32 %v11153_v58, %v5622_v61  ;;  %v1115_v7 = vadd.f32 %v11153_v58, %v913_v62  ;;  %v1116_v8 = vadd.f32 %v11153_v58, %v914_v63  ;;  %v3860_v10 = vmul.f32 %v11142_v50, %v3664_v1  ;;  %v11379_v1 = vld [vmem:[%s12138_s2] ss:$0 sm:$0xff] }
 0x430   : > { %vm6013_vm6 = vcmp.ge.f32.partialorder %v5817_v52, 0.0  ;;  %v6209_v11 = vmul.f32 0.1, %v5817_v52  ;;  %v2683_v12 = vmul.f32 %v11142_v50, %v2487_v2  ;;  %v2684_v0 = vmul.f32 %v11142_v50, %v2488_v3 }
 0x431   : > { %vm6014_vm7 = vcmp.ge.f32.partialorder %v5818_v6, 0.0  ;;  %v6210_v14 = vmul.f32 0.1, %v5818_v6  ;;  %vm1311_vm8 = vcmp.ge.f32.partialorder %v1115_v7, 0.0  ;;  %vm1312_vm9 = vcmp.ge.f32.partialorder %v1116_v8, 0.0 }
 0x432   : > { %v6405_v16 = vsel %vm6013_vm6, %v5817_v52, %v6209_v11  ;;  %v1507_v17 = vmul.f32 0.1, %v1115_v7  ;;  %v1508_v18 = vmul.f32 0.1, %v1116_v8  ;;  %v2879_v19 = vadd.f32 %v11153_v58, %v2683_v12 }
 0x433   : > { %v6406_v5 = vsel %vm6014_vm7, %v5818_v6, %v6210_v14  ;;  %v6797_v21 = vmax.f32 %v4641_v48, %v6405_v16  ;;  %v2880_v9 = vadd.f32 %v11153_v58, %v2684_v0  ;;  %v4055_v23 = vadd.f32 %v11153_v58, %v3859_v4 }
 0x434   : > { %v6798_v24 = vmax.f32 %v4642_v40, %v6406_v5  ;;  %v11351_v25 = vsel %vm1311_vm8, %v1115_v7, %v1507_v17  ;;  %v11353_v13 = vsel %vm1312_vm9, %v1116_v8, %v1508_v18  ;;  %vm3075_vm10 = vcmp.ge.f32.partialorder %v2879_v19, 0.0 }
 0x435   : > { %v6993_v27 = vmax.f32 %v6601_v38, %v6797_v21  ;;  %vm3076_vm11 = vcmp.ge.f32.partialorder %v2880_v9, 0.0  ;;  %v3271_v15 = vmul.f32 0.1, %v2879_v19  ;;  %v3272_v29 = vmul.f32 0.1, %v2880_v9 }
 0x436   : > { %v6994_v30 = vmax.f32 %v6602_v51, %v6798_v24  ;;  %v4056_v31 = vadd.f32 %v11153_v58, %v3860_v10  ;;  %vm4251_vm12 = vcmp.ge.f32.partialorder %v4055_v23, 0.0  ;;  %v4447_v20 = vmul.f32 0.1, %v4055_v23 }
 0x437   : > { %v3467_v33 = vsel %vm3075_vm10, %v2879_v19, %v3271_v15  ;;  %v3468_v22 = vsel %vm3076_vm11, %v2880_v9, %v3272_v29  ;;  %v5035_v35 = vrot.slane %v466_v54, 4  ;;  %v5036_v36 = vrot.slane %v467_v57, 4 }
 0x438   : > { %v8889_v26 = vpack.c.bf16 %v6994_v30, %v6993_v27  ;;  %vm4252_vm13 = vcmp.ge.f32.partialorder %v4056_v31, 0.0  ;;  %v4448_v39 = vmul.f32 0.1, %v4056_v31  ;;  %v4643_v28 = vsel %vm4251_vm12, %v4055_v23, %v4447_v20  ;;  %v463_v30 = vld [vmem:[%s9329_s28 + $0x8f0] sm:$0xff] }
 0x439   : > { %v5427_v42 = vunpack.c.l.bf16 %v5035_v35  ;;  %v5428_v43 = vunpack.c.l.bf16 %v5036_v36  ;;  %v6603_v32 = vmax.f32 %v11351_v25, %v3467_v33  ;;  %v6604_v45 = vmax.f32 %v11353_v13, %v3468_v22  ;;  %v471_v35 = vld [vmem:[%s9329_s28 + $0x930] sm:$0xff] }
 0x43a   : > { %9095 = vst [vmem:[%s9383_s8 + $0x230] sm:$0xff] %v8889_v26   ;;  %v4644_v34 = vsel %vm4252_vm13, %v4056_v31, %v4448_v39  ;;  %v713_v48 = vunpack.c.l.bf16 %v461_v37  ;;  %v714_v49 = vunpack.c.l.bf16 %v462_v41  ;;  %v2097_v38 = vrot.slane %v461_v37, 4 }
 0x43b   : > { %v5623_v51 = vmul.f32 %v11142_v50, %v5427_v42  ;;  %v5624_v40 = vmul.f32 %v11142_v50, %v5428_v43  ;;  %v2098_v54 = vrot.slane %v462_v41, 4  ;;  %v3665_v55 = vunpack.c.l.bf16 %v468_v47  ;;  %v470_v42 = vld [vmem:[%s9329_s28 + $0x928] sm:$0xff] }
 0x43c   : > { %v915_v44 = vmul.f32 %v11368_v56, %v713_v48  ;;  %v916_v57 = vmul.f32 %v11368_v56, %v714_v49  ;;  %v2489_v46 = vunpack.c.l.bf16 %v2097_v38  ;;  %v3666_v59 = vunpack.c.l.bf16 %v469_v53  ;;  %v478_v43 = vld [vmem:[%s9329_s28 + $0x968] sm:$0xff] }
 0x43d   : > { %v5819_v60 = vadd.f32 %v11153_v58, %v5623_v51  ;;  %v5820_v61 = vadd.f32 %v11153_v58, %v5624_v40  ;;  %v2490_v62 = vunpack.c.l.bf16 %v2098_v54  ;;  %v3861_v50 = vmul.f32 %v11368_v56, %v3665_v55 }
 0x43e   : > { %v1117_v63 = vadd.f32 %v11153_v58, %v915_v44  ;;  %v1118_v52 = vadd.f32 %v11379_v1, %v916_v57  ;;  %v2685_v2 = vmul.f32 %v11368_v56, %v2489_v46  ;;  %v3862_v3 = vmul.f32 %v11368_v56, %v3666_v59 }
 0x43f   : > { %vm6015_vm14 = vcmp.ge.f32.partialorder %v5819_v60, 0.0  ;;  %vm6016_vm15 = vcmp.ge.f32.partialorder %v5820_v61, 0.0  ;;  %v6211_v4 = vmul.f32 0.1, %v5819_v60  ;;  %v6212_v6 = vmul.f32 0.1, %v5820_v61 }
 0x440   : > { %vm1313_vm0 = vcmp.ge.f32.partialorder %v1117_v63, 0.0  ;;  %vm1314_vm1 = vcmp.ge.f32.partialorder %v1118_v52, 0.0  ;;  %v1509_v7 = vmul.f32 0.1, %v1117_v63  ;;  %v1510_v8 = vmul.f32 0.1, %v1118_v52 }
 0x441   : > { %v6407_v58 = vsel %vm6015_vm14, %v5819_v60, %v6211_v4  ;;  %v6408_v10 = vsel %vm6016_vm15, %v5820_v61, %v6212_v6  ;;  %v2686_v11 = vmul.f32 %v11368_v56, %v2490_v62  ;;  %v2881_v12 = vadd.f32 %v11379_v1, %v2685_v2 }
 0x442   : > { %v6799_v0 = vmax.f32 %v4643_v28, %v6407_v58  ;;  %v6800_v14 = vmax.f32 %v4644_v34, %v6408_v10  ;;  %v11386_v16 = vsel %vm1313_vm0, %v1117_v63, %v1509_v7  ;;  %v11388_v17 = vsel %vm1314_vm1, %v1118_v52, %v1510_v8 }
 0x443   : > { %v2882_v18 = vadd.f32 %v11379_v1, %v2686_v11  ;;  %vm3077_vm2 = vcmp.ge.f32.partialorder %v2881_v12, 0.0  ;;  %v3273_v19 = vmul.f32 0.1, %v2881_v12  ;;  %v4057_v5 = vadd.f32 %v11379_v1, %v3861_v50 }
 0x444   : > { %v6995_v21 = vmax.f32 %v6603_v32, %v6799_v0  ;;  %v6996_v9 = vmax.f32 %v6604_v45, %v6800_v14  ;;  %v4058_v23 = vadd.f32 %v11379_v1, %v3862_v3  ;;  %v5037_v24 = vrot.slane %v468_v47, 4 }
 0x445   : > { %vm3078_vm3 = vcmp.ge.f32.partialorder %v2882_v18, 0.0  ;;  %v3274_v25 = vmul.f32 0.1, %v2882_v18  ;;  %v3469_v13 = vsel %vm3077_vm2, %v2881_v12, %v3273_v19  ;;  %vm4253_vm4 = vcmp.ge.f32.partialorder %v4057_v5, 0.0 }
 0x446   : > { %v8894_v27 = vpack.c.bf16 %v6996_v9, %v6995_v21  ;;  %vm4254_vm5 = vcmp.ge.f32.partialorder %v4058_v23, 0.0  ;;  %v4449_v15 = vmul.f32 0.1, %v4057_v5  ;;  %v4450_v29 = vmul.f32 0.1, %v4058_v23 }
 0x447   : > { %v3470_v31 = vsel %vm3078_vm3, %v2882_v18, %v3274_v25  ;;  %v5038_v20 = vrot.slane %v469_v53, 4  ;;  %v5429_v33 = vunpack.c.l.bf16 %v5037_v24  ;;  %v6605_v22 = vmax.f32 %v11386_v16, %v3469_v13  ;;  %v472_v24 = vld [vmem:[%s9329_s28 + $0x938] sm:$0xff]  ;;  %v473_v25 = vld [vmem:[%s9329_s28 + $0x940] sm:$0xff] }
 0x448   : > { %9096 = vst [vmem:[%s9383_s8 + $0x238] sm:$0xff] %v8894_v27   ;;  %v4645_v36 = vsel %vm4253_vm4, %v4057_v5, %v4449_v15  ;;  %v4646_v37 = vsel %vm4254_vm5, %v4058_v23, %v4450_v29  ;;  %v6606_v26 = vmax.f32 %v11388_v17, %v3470_v31  ;;  %v715_v39 = vunpack.c.l.bf16 %v463_v30 }
 0x449   : > { %v5430_v28 = vunpack.c.l.bf16 %v5038_v20  ;;  %v5625_v41 = vmul.f32 %v11368_v56, %v5429_v33  ;;  %v716_v32 = vunpack.c.l.bf16 %v471_v35  ;;  %v2099_v45 = vrot.slane %v463_v30, 4  ;;  %v479_v33 = vld [vmem:[%s9329_s28 + $0x970] sm:$0xff] }
 0x44a   : > { %v917_v34 = vmul.f32 %v11368_v56, %v715_v39  ;;  %v2100_v47 = vrot.slane %v471_v35, 4  ;;  %v3667_v48 = vunpack.c.l.bf16 %v470_v42  ;;  %v3668_v49 = vunpack.c.l.bf16 %v478_v43  ;;  %v480_v35 = vld [vmem:[%s9329_s28 + $0x978] sm:$0xff] }
 0x44b   : > { %v5626_v38 = vmul.f32 %v11368_v56, %v5430_v28  ;;  %v5821_v51 = vadd.f32 %v11379_v1, %v5625_v41  ;;  %v918_v40 = vmul.f32 %v11368_v56, %v716_v32  ;;  %v2491_v53 = vunpack.c.l.bf16 %v2099_v45 }
 0x44c   : > { %v1119_v54 = vadd.f32 %v11379_v1, %v917_v34  ;;  %v2492_v55 = vunpack.c.l.bf16 %v2100_v47  ;;  %v3863_v44 = vmul.f32 %v11368_v56, %v3667_v48  ;;  %v3864_v57 = vmul.f32 %v11368_v56, %v3668_v49 }
 0x44d   : > { %v5822_v46 = vadd.f32 %v11379_v1, %v5626_v38  ;;  %vm6017_vm6 = vcmp.ge.f32.partialorder %v5821_v51, 0.0  ;;  %v6213_v59 = vmul.f32 0.1, %v5821_v51  ;;  %v1120_v60 = vadd.f32 %v11379_v1, %v918_v40 }
 0x44e   : > { %vm1315_vm7 = vcmp.ge.f32.partialorder %v1119_v54, 0.0  ;;  %v1511_v61 = vmul.f32 0.1, %v1119_v54  ;;  %v2687_v62 = vmul.f32 %v11368_v56, %v2491_v53  ;;  %v2688_v50 = vmul.f32 %v11368_v56, %v2492_v55 }
 0x44f   : > { %vm6018_vm8 = vcmp.ge.f32.partialorder %v5822_v46, 0.0  ;;  %v6214_v63 = vmul.f32 0.1, %v5822_v46  ;;  %v6409_v52 = vsel %vm6017_vm6, %v5821_v51, %v6213_v59  ;;  %vm1316_vm9 = vcmp.ge.f32.partialorder %v1120_v60, 0.0 }
 0x450   : > { %v6801_v2 = vmax.f32 %v4645_v36, %v6409_v52  ;;  %v1512_v3 = vmul.f32 0.1, %v1120_v60  ;;  %v11412_v4 = vsel %vm1315_vm7, %v1119_v54, %v1511_v61  ;;  %v2883_v6 = vadd.f32 %v11379_v1, %v2687_v62 }
 0x451   : > { %v6410_v7 = vsel %vm6018_vm8, %v5822_v46, %v6214_v63  ;;  %v2884_v8 = vadd.f32 %v11379_v1, %v2688_v50  ;;  %v4059_v58 = vadd.f32 %v11379_v1, %v3863_v44  ;;  %v4060_v10 = vadd.f32 %v11379_v1, %v3864_v57 }
 0x452   : > { %v6802_v11 = vmax.f32 %v4646_v37, %v6410_v7  ;;  %v6997_v12 = vmax.f32 %v6605_v22, %v6801_v2  ;;  %v11418_v0 = vsel %vm1316_vm9, %v1120_v60, %v1512_v3  ;;  %vm3079_vm10 = vcmp.ge.f32.partialorder %v2883_v6, 0.0 }
 0x453   : > { %vm3080_vm11 = vcmp.ge.f32.partialorder %v2884_v8, 0.0  ;;  %v3275_v14 = vmul.f32 0.1, %v2883_v6  ;;  %v3276_v16 = vmul.f32 0.1, %v2884_v8  ;;  %vm4255_vm12 = vcmp.ge.f32.partialorder %v4059_v58, 0.0 }
 0x454   : > { %v6998_v17 = vmax.f32 %v6606_v26, %v6802_v11  ;;  %vm4256_vm13 = vcmp.ge.f32.partialorder %v4060_v10, 0.0  ;;  %v4451_v18 = vmul.f32 0.1, %v4059_v58  ;;  %v4452_v19 = vmul.f32 0.1, %v4060_v10 }
 0x455   : > { %v3471_v5 = vsel %vm3079_vm10, %v2883_v6, %v3275_v14  ;;  %v3472_v21 = vsel %vm3080_vm11, %v2884_v8, %v3276_v16  ;;  %v5039_v9 = vrot.slane %v470_v42, 4  ;;  %v5040_v23 = vrot.slane %v478_v43, 4 }
 0x456   : > { %v8899_v13 = vpack.c.bf16 %v6998_v17, %v6997_v12  ;;  %v4647_v27 = vsel %vm4255_vm12, %v4059_v58, %v4451_v18  ;;  %v4648_v15 = vsel %vm4256_vm13, %v4060_v10, %v4452_v19  ;;  %v6607_v29 = vmax.f32 %v11412_v4, %v3471_v5  ;;  %v474_v18 = vld [vmem:[%s9329_s28 + $0x948] sm:$0xff]  ;;  %v475_v19 = vld [vmem:[%s9329_s28 + $0x950] sm:$0xff] }
 0x457   : > { %v5431_v30 = vunpack.c.l.bf16 %v5039_v9  ;;  %v5432_v31 = vunpack.c.l.bf16 %v5040_v23  ;;  %v6608_v20 = vmax.f32 %v11418_v0, %v3472_v21  ;;  %v717_v22 = vunpack.c.l.bf16 %v472_v24 }
 0x458   : > { %9097 = vst [vmem:[%s9383_s8 + $0x240] sm:$0xff] %v8899_v13   ;;  %v718_v36 = vunpack.c.l.bf16 %v473_v25  ;;  %v2101_v37 = vrot.slane %v472_v24, 4  ;;  %v2102_v26 = vrot.slane %v473_v25, 4  ;;  %v3669_v39 = vunpack.c.l.bf16 %v479_v33  ;;  %v481_v13 = vld [vmem:[%s9329_s28 + $0x980] sm:$0xff] }
 0x459   : > { %v5627_v28 = vmul.f32 %v11368_v56, %v5431_v30  ;;  %v5628_v41 = vmul.f32 %v11368_v56, %v5432_v31  ;;  %v919_v42 = vmul.f32 %v11368_v56, %v717_v22  ;;  %v3670_v43 = vunpack.c.l.bf16 %v480_v35  ;;  %v482_v30 = vld [vmem:[%s9329_s28 + $0x988] sm:$0xff] }
 0x45a   : > { %v920_v32 = vmul.f32 %v11368_v56, %v718_v36  ;;  %v2493_v45 = vunpack.c.l.bf16 %v2101_v37  ;;  %v2494_v34 = vunpack.c.l.bf16 %v2102_v26  ;;  %v3865_v47 = vmul.f32 %v11368_v56, %v3669_v39 }
 0x45b   : > { %v5823_v48 = vadd.f32 %v11379_v1, %v5627_v28  ;;  %v5824_v49 = vadd.f32 %v11379_v1, %v5628_v41  ;;  %v1121_v38 = vadd.f32 %v11379_v1, %v919_v42  ;;  %v3866_v51 = vmul.f32 %v11368_v56, %v3670_v43 }
 0x45c   : > { %v1122_v40 = vadd.f32 %v11379_v1, %v920_v32  ;;  %v2689_v53 = vmul.f32 %v11368_v56, %v2493_v45  ;;  %v2690_v54 = vmul.f32 %v11368_v56, %v2494_v34  ;;  %v4061_v55 = vadd.f32 %v11379_v1, %v3865_v47 }
 0x45d   : > { %vm6019_vm14 = vcmp.ge.f32.partialorder %v5823_v48, 0.0  ;;  %vm6020_vm15 = vcmp.ge.f32.partialorder %v5824_v49, 0.0  ;;  %v6215_v44 = vmul.f32 0.1, %v5823_v48  ;;  %v6216_v57 = vmul.f32 0.1, %v5824_v49 }
 0x45e   : > { %vm1317_vm0 = vcmp.ge.f32.partialorder %v1121_v38, 0.0  ;;  %vm1318_vm1 = vcmp.ge.f32.partialorder %v1122_v40, 0.0  ;;  %v1513_v46 = vmul.f32 0.1, %v1121_v38  ;;  %v1514_v59 = vmul.f32 0.1, %v1122_v40 }
 0x45f   : > { %v6411_v60 = vsel %vm6019_vm14, %v5823_v48, %v6215_v44  ;;  %v6412_v61 = vsel %vm6020_vm15, %v5824_v49, %v6216_v57  ;;  %v2885_v62 = vadd.f32 %v11379_v1, %v2689_v53  ;;  %v2886_v50 = vadd.f32 %v11379_v1, %v2690_v54 }
 0x460   : > { %v6803_v63 = vmax.f32 %v4647_v27, %v6411_v60  ;;  %v6804_v52 = vmax.f32 %v4648_v15, %v6412_v61  ;;  %v11442_v2 = vsel %vm1317_vm0, %v1121_v38, %v1513_v46  ;;  %v11444_v3 = vsel %vm1318_vm1, %v1122_v40, %v1514_v59 }
 0x461   : > { %vm3081_vm2 = vcmp.ge.f32.partialorder %v2885_v62, 0.0  ;;  %vm3082_vm3 = vcmp.ge.f32.partialorder %v2886_v50, 0.0  ;;  %v3277_v4 = vmul.f32 0.1, %v2885_v62  ;;  %v3278_v6 = vmul.f32 0.1, %v2886_v50 }
 0x462   : > { %v6999_v7 = vmax.f32 %v6607_v29, %v6803_v63  ;;  %v7000_v8 = vmax.f32 %v6608_v20, %v6804_v52  ;;  %v4062_v58 = vadd.f32 %v11379_v1, %v3866_v51  ;;  %vm4257_vm4 = vcmp.ge.f32.partialorder %v4061_v55, 0.0 }
 0x463   : > { %v3473_v10 = vsel %vm3081_vm2, %v2885_v62, %v3277_v4  ;;  %v3474_v11 = vsel %vm3082_vm3, %v2886_v50, %v3278_v6  ;;  %v4453_v12 = vmul.f32 0.1, %v4061_v55  ;;  %v5041_v0 = vrot.slane %v479_v33, 4 }
 0x464   : > { %v8904_v14 = vpack.c.bf16 %v7000_v8, %v6999_v7  ;;  %vm4258_vm5 = vcmp.ge.f32.partialorder %v4062_v58, 0.0  ;;  %v4454_v16 = vmul.f32 0.1, %v4062_v58  ;;  %v5042_v17 = vrot.slane %v480_v35, 4  ;;  %v476_v8 = vld [vmem:[%s9329_s28 + $0x958] sm:$0xff] }
 0x465   : > { %v4649_v5 = vsel %vm4257_vm4, %v4061_v55, %v4453_v12  ;;  %v5433_v21 = vunpack.c.l.bf16 %v5041_v0  ;;  %v6609_v9 = vmax.f32 %v11442_v2, %v3473_v10  ;;  %v6610_v23 = vmax.f32 %v11444_v3, %v3474_v11  ;;  %v477_v12 = vld [vmem:[%s9329_s28 + $0x960] sm:$0xff] }
 0x466   : > { %9098 = vst [vmem:[%s9383_s8 + $0x248] sm:$0xff] %v8904_v14   ;;  %v4650_v24 = vsel %vm4258_vm5, %v4062_v58, %v4454_v16  ;;  %v5434_v25 = vunpack.c.l.bf16 %v5042_v17  ;;  %v719_v27 = vunpack.c.l.bf16 %v474_v18  ;;  %v720_v15 = vunpack.c.l.bf16 %v475_v19 }
 0x467   : > { %v5629_v29 = vmul.f32 %v11368_v56, %v5433_v21  ;;  %v2103_v31 = vrot.slane %v474_v18, 4  ;;  %v2104_v20 = vrot.slane %v475_v19, 4  ;;  %v3671_v33 = vunpack.c.l.bf16 %v481_v13  ;;  %v483_v19 = vld [vmem:[%s9329_s28 + $0x990] sm:$0xff] }
 0x468   : > { %v5630_v22 = vmul.f32 %v11368_v56, %v5434_v25  ;;  %v921_v35 = vmul.f32 %v11368_v56, %v719_v27  ;;  %v922_v36 = vmul.f32 %v11368_v56, %v720_v15  ;;  %v3672_v37 = vunpack.c.l.bf16 %v482_v30  ;;  %v484_v25 = vld [vmem:[%s9329_s28 + $0x998] sm:$0xff] }
 0x469   : > { %v5825_v26 = vadd.f32 %v11379_v1, %v5629_v29  ;;  %v2495_v39 = vunpack.c.l.bf16 %v2103_v31  ;;  %v2496_v28 = vunpack.c.l.bf16 %v2104_v20  ;;  %v3867_v41 = vmul.f32 %v11368_v56, %v3671_v33 }
 0x46a   : > { %v5826_v42 = vadd.f32 %v11379_v1, %v5630_v22  ;;  %v1123_v43 = vadd.f32 %v11379_v1, %v921_v35  ;;  %v1124_v32 = vadd.f32 %v11379_v1, %v922_v36  ;;  %v3868_v45 = vmul.f32 %v11368_v56, %v3672_v37 }
 0x46b   : > { %vm6021_vm6 = vcmp.ge.f32.partialorder %v5825_v26, 0.0  ;;  %v6217_v34 = vmul.f32 0.1, %v5825_v26  ;;  %v2691_v47 = vmul.f32 %v11368_v56, %v2495_v39  ;;  %v2692_v48 = vmul.f32 %v11368_v56, %v2496_v28 }
 0x46c   : > { %vm6022_vm7 = vcmp.ge.f32.partialorder %v5826_v42, 0.0  ;;  %v6218_v49 = vmul.f32 0.1, %v5826_v42  ;;  %vm1319_vm8 = vcmp.ge.f32.partialorder %v1123_v43, 0.0  ;;  %vm1320_vm9 = vcmp.ge.f32.partialorder %v1124_v32, 0.0 }
 0x46d   : > { %v6413_v38 = vsel %vm6021_vm6, %v5825_v26, %v6217_v34  ;;  %v1515_v51 = vmul.f32 0.1, %v1123_v43  ;;  %v1516_v40 = vmul.f32 0.1, %v1124_v32  ;;  %v2887_v53 = vadd.f32 %v11379_v1, %v2691_v47 }
 0x46e   : > { %v6414_v54 = vsel %vm6022_vm7, %v5826_v42, %v6218_v49  ;;  %v6805_v55 = vmax.f32 %v4649_v5, %v6413_v38  ;;  %v2888_v44 = vadd.f32 %v11379_v1, %v2692_v48  ;;  %v4063_v57 = vadd.f32 %v11379_v1, %v3867_v41 }
 0x46f   : > { %v6806_v46 = vmax.f32 %v4650_v24, %v6414_v54  ;;  %v11469_v59 = vsel %vm1319_vm8, %v1123_v43, %v1515_v51  ;;  %v11471_v60 = vsel %vm1320_vm9, %v1124_v32, %v1516_v40  ;;  %vm3083_vm10 = vcmp.ge.f32.partialorder %v2887_v53, 0.0 }
 0x470   : > { %v7001_v61 = vmax.f32 %v6609_v9, %v6805_v55  ;;  %vm3084_vm11 = vcmp.ge.f32.partialorder %v2888_v44, 0.0  ;;  %v3279_v62 = vmul.f32 0.1, %v2887_v53  ;;  %v3280_v50 = vmul.f32 0.1, %v2888_v44 }
 0x471   : > { %v7002_v63 = vmax.f32 %v6610_v23, %v6806_v46  ;;  %v4064_v52 = vadd.f32 %v11379_v1, %v3868_v45  ;;  %vm4259_vm12 = vcmp.ge.f32.partialorder %v4063_v57, 0.0  ;;  %v4455_v2 = vmul.f32 0.1, %v4063_v57 }
 0x472   : > { %v3475_v3 = vsel %vm3083_vm10, %v2887_v53, %v3279_v62  ;;  %v3476_v4 = vsel %vm3084_vm11, %v2888_v44, %v3280_v50  ;;  %v5043_v6 = vrot.slane %v481_v13, 4  ;;  %v5044_v7 = vrot.slane %v482_v30, 4 }
 0x473   : > { %v8909_v58 = vpack.c.bf16 %v7002_v63, %v7001_v61  ;;  %vm4260_vm13 = vcmp.ge.f32.partialorder %v4064_v52, 0.0  ;;  %v4456_v10 = vmul.f32 0.1, %v4064_v52  ;;  %v4651_v11 = vsel %vm4259_vm12, %v4063_v57, %v4455_v2  ;;  %v485_v63 = vld [vmem:[%s9329_s28 + $0x9a0] sm:$0xff] }
 0x474   : > { %v5435_v0 = vunpack.c.l.bf16 %v5043_v6  ;;  %v5436_v14 = vunpack.c.l.bf16 %v5044_v7  ;;  %v6611_v16 = vmax.f32 %v11469_v59, %v3475_v3  ;;  %v6612_v17 = vmax.f32 %v11471_v60, %v3476_v4  ;;  %v486_v6 = vld [vmem:[%s9329_s28 + $0x9a8] sm:$0xff] }
 0x475   : > { %9099 = vst [vmem:[%s9383_s8 + $0x250] sm:$0xff] %v8909_v58   ;;  %v4652_v18 = vsel %vm4260_vm13, %v4064_v52, %v4456_v10  ;;  %v721_v5 = vunpack.c.l.bf16 %v476_v8  ;;  %v722_v21 = vunpack.c.l.bf16 %v477_v12  ;;  %v2105_v9 = vrot.slane %v476_v8, 4 }
 0x476   : > { %v5631_v23 = vmul.f32 %v11368_v56, %v5435_v0  ;;  %v5632_v24 = vmul.f32 %v11368_v56, %v5436_v14  ;;  %v2106_v13 = vrot.slane %v477_v12, 4  ;;  %v3673_v27 = vunpack.c.l.bf16 %v483_v19  ;;  %v492_v0 = vld [vmem:[%s9329_s28 + $0x9d8] sm:$0xff]  ;;  %v493_v14 = vld [vmem:[%s9329_s28 + $0x9e0] sm:$0xff] }
 0x477   : > { %v923_v15 = vmul.f32 %v11368_v56, %v721_v5  ;;  %v924_v29 = vmul.f32 %v11368_v56, %v722_v21  ;;  %v2497_v30 = vunpack.c.l.bf16 %v2105_v9  ;;  %v3674_v31 = vunpack.c.l.bf16 %v484_v25 }
 0x478   : > { %v5827_v20 = vadd.f32 %v11379_v1, %v5631_v23  ;;  %v5828_v33 = vadd.f32 %v11379_v1, %v5632_v24  ;;  %v2498_v22 = vunpack.c.l.bf16 %v2106_v13  ;;  %v3869_v35 = vmul.f32 %v11368_v56, %v3673_v27 }
 0x479   : > { %v1125_v36 = vadd.f32 %v11379_v1, %v923_v15  ;;  %v1126_v37 = vadd.f32 %v11379_v1, %v924_v29  ;;  %v2693_v26 = vmul.f32 %v11368_v56, %v2497_v30  ;;  %v3870_v39 = vmul.f32 %v11368_v56, %v3674_v31 }
 0x47a   : > { %vm6023_vm14 = vcmp.ge.f32.partialorder %v5827_v20, 0.0  ;;  %vm6024_vm15 = vcmp.ge.f32.partialorder %v5828_v33, 0.0  ;;  %v6219_v28 = vmul.f32 0.1, %v5827_v20  ;;  %v6220_v41 = vmul.f32 0.1, %v5828_v33 }
 0x47b   : > { %vm1321_vm0 = vcmp.ge.f32.partialorder %v1125_v36, 0.0  ;;  %vm1322_vm1 = vcmp.ge.f32.partialorder %v1126_v37, 0.0  ;;  %v1517_v42 = vmul.f32 0.1, %v1125_v36  ;;  %v1518_v43 = vmul.f32 0.1, %v1126_v37 }
 0x47c   : > { %v6415_v32 = vsel %vm6023_vm14, %v5827_v20, %v6219_v28  ;;  %v6416_v45 = vsel %vm6024_vm15, %v5828_v33, %v6220_v41  ;;  %v2694_v34 = vmul.f32 %v11368_v56, %v2498_v22  ;;  %v2889_v47 = vadd.f32 %v11379_v1, %v2693_v26 }
 0x47d   : > { %v6807_v48 = vmax.f32 %v4651_v11, %v6415_v32  ;;  %v6808_v49 = vmax.f32 %v4652_v18, %v6416_v45  ;;  %v11494_v38 = vsel %vm1321_vm0, %v1125_v36, %v1517_v42  ;;  %v11496_v51 = vsel %vm1322_vm1, %v1126_v37, %v1518_v43 }
 0x47e   : > { %v2890_v40 = vadd.f32 %v11379_v1, %v2694_v34  ;;  %vm3085_vm2 = vcmp.ge.f32.partialorder %v2889_v47, 0.0  ;;  %v3281_v53 = vmul.f32 0.1, %v2889_v47  ;;  %v4065_v54 = vadd.f32 %v11379_v1, %v3869_v35 }
 0x47f   : > { %v7003_v55 = vmax.f32 %v6611_v16, %v6807_v48  ;;  %v7004_v44 = vmax.f32 %v6612_v17, %v6808_v49  ;;  %v4066_v57 = vadd.f32 %v11379_v1, %v3870_v39  ;;  %v5045_v46 = vrot.slane %v483_v19, 4 }
 0x480   : > { %vm3086_vm3 = vcmp.ge.f32.partialorder %v2890_v40, 0.0  ;;  %v3282_v59 = vmul.f32 0.1, %v2890_v40  ;;  %v3477_v60 = vsel %vm3085_vm2, %v2889_v47, %v3281_v53  ;;  %vm4261_vm4 = vcmp.ge.f32.partialorder %v4065_v54, 0.0 }
 0x481   : > { %v8914_v61 = vpack.c.bf16 %v7004_v44, %v7003_v55  ;;  %vm4262_vm5 = vcmp.ge.f32.partialorder %v4066_v57, 0.0  ;;  %v4457_v62 = vmul.f32 0.1, %v4065_v54  ;;  %v4458_v50 = vmul.f32 0.1, %v4066_v57 }
 0x482   : > { %v3478_v52 = vsel %vm3086_vm3, %v2890_v40, %v3282_v59  ;;  %v5046_v2 = vrot.slane %v484_v25, 4  ;;  %v5437_v3 = vunpack.c.l.bf16 %v5045_v46  ;;  %v6613_v4 = vmax.f32 %v11494_v38, %v3477_v60  ;;  %v487_v46 = vld [vmem:[%s9329_s28 + $0x9b0] sm:$0xff]  ;;  %v488_v59 = vld [vmem:[%s9329_s28 + $0x9b8] sm:$0xff] }
 0x483   : > { %9100 = vst [vmem:[%s9383_s8 + $0x258] sm:$0xff] %v8914_v61   ;;  %v4653_v7 = vsel %vm4261_vm4, %v4065_v54, %v4457_v62  ;;  %v4654_v8 = vsel %vm4262_vm5, %v4066_v57, %v4458_v50  ;;  %v6614_v58 = vmax.f32 %v11496_v51, %v3478_v52  ;;  %v723_v10 = vunpack.c.l.bf16 %v485_v63 }
 0x484   : > { %v5438_v11 = vunpack.c.l.bf16 %v5046_v2  ;;  %v5633_v12 = vmul.f32 %v11368_v56, %v5437_v3  ;;  %v724_v16 = vunpack.c.l.bf16 %v486_v6  ;;  %v2107_v17 = vrot.slane %v485_v63, 4  ;;  %v494_v3 = vld [vmem:[%s9329_s28 + $0x9e8] sm:$0xff] }
 0x485   : > { %v925_v18 = vmul.f32 %v11368_v56, %v723_v10  ;;  %v2108_v19 = vrot.slane %v486_v6, 4  ;;  %v3675_v5 = vunpack.c.l.bf16 %v492_v0  ;;  %v3676_v21 = vunpack.c.l.bf16 %v493_v14  ;;  %v495_v6 = vld [vmem:[%s9329_s28 + $0x9f0] sm:$0xff] }
 0x486   : > { %v5634_v9 = vmul.f32 %v11368_v56, %v5438_v11  ;;  %v5829_v23 = vadd.f32 %v11379_v1, %v5633_v12  ;;  %v926_v24 = vmul.f32 %v11368_v56, %v724_v16  ;;  %v2499_v25 = vunpack.c.l.bf16 %v2107_v17 }
 0x487   : > { %v1127_v13 = vadd.f32 %v11379_v1, %v925_v18  ;;  %v2500_v27 = vunpack.c.l.bf16 %v2108_v19  ;;  %v3871_v15 = vmul.f32 %v11368_v56, %v3675_v5  ;;  %v3872_v29 = vmul.f32 %v11368_v56, %v3676_v21 }
 0x488   : > { %v5830_v30 = vadd.f32 %v11379_v1, %v5634_v9  ;;  %vm6025_vm6 = vcmp.ge.f32.partialorder %v5829_v23, 0.0  ;;  %v6221_v31 = vmul.f32 0.1, %v5829_v23  ;;  %v1128_v20 = vadd.f32 %v11379_v1, %v926_v24 }
 0x489   : > { %vm1323_vm7 = vcmp.ge.f32.partialorder %v1127_v13, 0.0  ;;  %v1519_v33 = vmul.f32 0.1, %v1127_v13  ;;  %v2695_v22 = vmul.f32 %v11368_v56, %v2499_v25  ;;  %v2696_v35 = vmul.f32 %v11368_v56, %v2500_v27 }
 0x48a   : > { %vm6026_vm8 = vcmp.ge.f32.partialorder %v5830_v30, 0.0  ;;  %v6222_v36 = vmul.f32 0.1, %v5830_v30  ;;  %v6417_v37 = vsel %vm6025_vm6, %v5829_v23, %v6221_v31  ;;  %vm1324_vm9 = vcmp.ge.f32.partialorder %v1128_v20, 0.0 }
 0x48b   : > { %v6809_v26 = vmax.f32 %v4653_v7, %v6417_v37  ;;  %v1520_v39 = vmul.f32 0.1, %v1128_v20  ;;  %v11520_v28 = vsel %vm1323_vm7, %v1127_v13, %v1519_v33  ;;  %v2891_v41 = vadd.f32 %v11379_v1, %v2695_v22 }
 0x48c   : > { %v6418_v42 = vsel %vm6026_vm8, %v5830_v30, %v6222_v36  ;;  %v2892_v43 = vadd.f32 %v11379_v1, %v2696_v35  ;;  %v4067_v32 = vadd.f32 %v11379_v1, %v3871_v15  ;;  %v4068_v45 = vadd.f32 %v11379_v1, %v3872_v29 }
 0x48d   : > { %v6810_v34 = vmax.f32 %v4654_v8, %v6418_v42  ;;  %v7005_v47 = vmax.f32 %v6613_v4, %v6809_v26  ;;  %v11526_v48 = vsel %vm1324_vm9, %v1128_v20, %v1520_v39  ;;  %vm3087_vm10 = vcmp.ge.f32.partialorder %v2891_v41, 0.0 }
 0x48e   : > { %vm3088_vm11 = vcmp.ge.f32.partialorder %v2892_v43, 0.0  ;;  %v3283_v49 = vmul.f32 0.1, %v2891_v41  ;;  %v3284_v38 = vmul.f32 0.1, %v2892_v43  ;;  %vm4263_vm12 = vcmp.ge.f32.partialorder %v4067_v32, 0.0 }
 0x48f   : > { %v7006_v51 = vmax.f32 %v6614_v58, %v6810_v34  ;;  %vm4264_vm13 = vcmp.ge.f32.partialorder %v4068_v45, 0.0  ;;  %v4459_v40 = vmul.f32 0.1, %v4067_v32  ;;  %v4460_v53 = vmul.f32 0.1, %v4068_v45 }
 0x490   : > { %v3479_v54 = vsel %vm3087_vm10, %v2891_v41, %v3283_v49  ;;  %v3480_v55 = vsel %vm3088_vm11, %v2892_v43, %v3284_v38  ;;  %v5047_v44 = vrot.slane %v492_v0, 4  ;;  %v5048_v57 = vrot.slane %v493_v14, 4 }
 0x491   : > { %v8919_v60 = vpack.c.bf16 %v7006_v51, %v7005_v47  ;;  %v4655_v61 = vsel %vm4263_vm12, %v4067_v32, %v4459_v40  ;;  %v4656_v62 = vsel %vm4264_vm13, %v4068_v45, %v4460_v53  ;;  %v6615_v50 = vmax.f32 %v11520_v28, %v3479_v54  ;;  %v489_v40 = vld [vmem:[%s9329_s28 + $0x9c0] sm:$0xff]  ;;  %v490_v53 = vld [vmem:[%s9329_s28 + $0x9c8] sm:$0xff] }
 0x492   : > { %v5439_v63 = vunpack.c.l.bf16 %v5047_v44  ;;  %v5440_v52 = vunpack.c.l.bf16 %v5048_v57  ;;  %v6616_v2 = vmax.f32 %v11526_v48, %v3480_v55  ;;  %v725_v4 = vunpack.c.l.bf16 %v487_v46 }
 0x493   : > { %9101 = vst [vmem:[%s9383_s8 + $0x260] sm:$0xff] %v8919_v60   ;;  %v726_v7 = vunpack.c.l.bf16 %v488_v59  ;;  %v2109_v8 = vrot.slane %v487_v46, 4  ;;  %v2110_v58 = vrot.slane %v488_v59, 4  ;;  %v3677_v10 = vunpack.c.l.bf16 %v494_v3  ;;  %v496_v60 = vld [vmem:[%s9329_s28 + $0x9f8] sm:$0xff] }
 0x494   : > { %v5635_v11 = vmul.f32 %v11368_v56, %v5439_v63  ;;  %v5636_v12 = vmul.f32 %v11368_v56, %v5440_v52  ;;  %v927_v0 = vmul.f32 %v11368_v56, %v725_v4  ;;  %v3678_v14 = vunpack.c.l.bf16 %v495_v6  ;;  %v497_v63 = vld [vmem:[%s9329_s28 + $0xa00] sm:$0xff] }
 0x495   : > { %v928_v16 = vmul.f32 %v11368_v56, %v726_v7  ;;  %v2501_v17 = vunpack.c.l.bf16 %v2109_v8  ;;  %v2502_v18 = vunpack.c.l.bf16 %v2110_v58  ;;  %v3873_v19 = vmul.f32 %v11368_v56, %v3677_v10 }
 0x496   : > { %v5831_v5 = vadd.f32 %v11379_v1, %v5635_v11  ;;  %v5832_v21 = vadd.f32 %v11379_v1, %v5636_v12  ;;  %v1129_v9 = vadd.f32 %v11379_v1, %v927_v0  ;;  %v3874_v23 = vmul.f32 %v11368_v56, %v3678_v14 }
 0x497   : > { %v1130_v24 = vadd.f32 %v11379_v1, %v928_v16  ;;  %v2697_v25 = vmul.f32 %v11368_v56, %v2501_v17  ;;  %v2698_v13 = vmul.f32 %v11368_v56, %v2502_v18  ;;  %v4069_v27 = vadd.f32 %v11379_v1, %v3873_v19 }
 0x498   : > { %vm6027_vm14 = vcmp.ge.f32.partialorder %v5831_v5, 0.0  ;;  %vm6028_vm15 = vcmp.ge.f32.partialorder %v5832_v21, 0.0  ;;  %v6223_v15 = vmul.f32 0.1, %v5831_v5  ;;  %v6224_v29 = vmul.f32 0.1, %v5832_v21 }
 0x499   : > { %vm1325_vm0 = vcmp.ge.f32.partialorder %v1129_v9, 0.0  ;;  %vm1326_vm1 = vcmp.ge.f32.partialorder %v1130_v24, 0.0  ;;  %v1521_v30 = vmul.f32 0.1, %v1129_v9  ;;  %v1522_v31 = vmul.f32 0.1, %v1130_v24 }
 0x49a   : > { %v6419_v20 = vsel %vm6027_vm14, %v5831_v5, %v6223_v15  ;;  %v6420_v33 = vsel %vm6028_vm15, %v5832_v21, %v6224_v29  ;;  %v2893_v22 = vadd.f32 %v11379_v1, %v2697_v25  ;;  %v2894_v35 = vadd.f32 %v11379_v1, %v2698_v13 }
 0x49b   : > { %v6811_v36 = vmax.f32 %v4655_v61, %v6419_v20  ;;  %v6812_v37 = vmax.f32 %v4656_v62, %v6420_v33  ;;  %v11550_v26 = vsel %vm1325_vm0, %v1129_v9, %v1521_v30  ;;  %v11552_v39 = vsel %vm1326_vm1, %v1130_v24, %v1522_v31 }
 0x49c   : > { %vm3089_vm2 = vcmp.ge.f32.partialorder %v2893_v22, 0.0  ;;  %vm3090_vm3 = vcmp.ge.f32.partialorder %v2894_v35, 0.0  ;;  %v3285_v28 = vmul.f32 0.1, %v2893_v22  ;;  %v3286_v41 = vmul.f32 0.1, %v2894_v35 }
 0x49d   : > { %v7007_v42 = vmax.f32 %v6615_v50, %v6811_v36  ;;  %v7008_v43 = vmax.f32 %v6616_v2, %v6812_v37  ;;  %v4070_v32 = vadd.f32 %v11379_v1, %v3874_v23  ;;  %vm4265_vm4 = vcmp.ge.f32.partialorder %v4069_v27, 0.0 }
 0x49e   : > { %v3481_v45 = vsel %vm3089_vm2, %v2893_v22, %v3285_v28  ;;  %v3482_v34 = vsel %vm3090_vm3, %v2894_v35, %v3286_v41  ;;  %v4461_v47 = vmul.f32 0.1, %v4069_v27  ;;  %v5049_v48 = vrot.slane %v494_v3, 4 }
 0x49f   : > { %v8924_v49 = vpack.c.bf16 %v7008_v43, %v7007_v42  ;;  %vm4266_vm5 = vcmp.ge.f32.partialorder %v4070_v32, 0.0  ;;  %v4462_v38 = vmul.f32 0.1, %v4070_v32  ;;  %v5050_v51 = vrot.slane %v495_v6, 4  ;;  %v491_v43 = vld [vmem:[%s9329_s28 + $0x9d0] sm:$0xff] }
 0x4a0   : > { %v4657_v54 = vsel %vm4265_vm4, %v4069_v27, %v4461_v47  ;;  %v5441_v55 = vunpack.c.l.bf16 %v5049_v48  ;;  %v6617_v44 = vmax.f32 %v11550_v26, %v3481_v45  ;;  %v6618_v57 = vmax.f32 %v11552_v39, %v3482_v34  ;;  %v499_v47 = vld [vmem:[%s9329_s28 + $0xa10] sm:$0xff] }
 0x4a1   : > { %9102 = vst [vmem:[%s9383_s8 + $0x268] sm:$0xff] %v8924_v49   ;;  %v4658_v46 = vsel %vm4266_vm5, %v4070_v32, %v4462_v38  ;;  %v5442_v59 = vunpack.c.l.bf16 %v5050_v51  ;;  %v727_v61 = vunpack.c.l.bf16 %v489_v40  ;;  %v728_v62 = vunpack.c.l.bf16 %v490_v53 }
 0x4a2   : > { %v5637_v50 = vmul.f32 %v11368_v56, %v5441_v55  ;;  %v2111_v52 = vrot.slane %v489_v40, 4  ;;  %v2112_v2 = vrot.slane %v490_v53, 4  ;;  %v3679_v3 = vunpack.c.l.bf16 %v496_v60  ;;  %v498_v53 = vld [vmem:[%s9329_s28 + $0xa08] sm:$0xff] }
 0x4a3   : > { %v5638_v4 = vmul.f32 %v11368_v56, %v5442_v59  ;;  %v929_v6 = vmul.f32 %v11368_v56, %v727_v61  ;;  %v930_v7 = vmul.f32 %v11368_v56, %v728_v62  ;;  %v3680_v8 = vunpack.c.l.bf16 %v497_v63  ;;  %v506_v59 = vld [vmem:[%s9329_s28 + $0xa48] sm:$0xff]  ;;  %v11594_v62 = vld [vmem:[%s12137_s1] ss:$0 sm:$0xff] }
 0x4a4   : > { %v5833_v58 = vadd.f32 %v11379_v1, %v5637_v50  ;;  %v2503_v10 = vunpack.c.l.bf16 %v2111_v52  ;;  %v2504_v11 = vunpack.c.l.bf16 %v2112_v2  ;;  %v3875_v12 = vmul.f32 %v11368_v56, %v3679_v3 }
 0x4a5   : > { %v5834_v0 = vadd.f32 %v11379_v1, %v5638_v4  ;;  %v1131_v14 = vadd.f32 %v11379_v1, %v929_v6  ;;  %v1132_v16 = vadd.f32 %v11379_v1, %v930_v7  ;;  %v3876_v17 = vmul.f32 %v11368_v56, %v3680_v8  ;;  %v11605_v8 = vld [vmem:[%s12138_s2] ss:$0 sm:$0xff] }
 0x4a6   : > { %vm6029_vm6 = vcmp.ge.f32.partialorder %v5833_v58, 0.0  ;;  %v6225_v18 = vmul.f32 0.1, %v5833_v58  ;;  %v2699_v19 = vmul.f32 %v11368_v56, %v2503_v10  ;;  %v2700_v5 = vmul.f32 %v11368_v56, %v2504_v11 }
 0x4a7   : > { %vm6030_vm7 = vcmp.ge.f32.partialorder %v5834_v0, 0.0  ;;  %v6226_v21 = vmul.f32 0.1, %v5834_v0  ;;  %vm1327_vm8 = vcmp.ge.f32.partialorder %v1131_v14, 0.0  ;;  %vm1328_vm9 = vcmp.ge.f32.partialorder %v1132_v16, 0.0 }
 0x4a8   : > { %v6421_v9 = vsel %vm6029_vm6, %v5833_v58, %v6225_v18  ;;  %v1523_v23 = vmul.f32 0.1, %v1131_v14  ;;  %v1524_v24 = vmul.f32 0.1, %v1132_v16  ;;  %v2895_v25 = vadd.f32 %v11379_v1, %v2699_v19 }
 0x4a9   : > { %v6422_v13 = vsel %vm6030_vm7, %v5834_v0, %v6226_v21  ;;  %v6813_v27 = vmax.f32 %v4657_v54, %v6421_v9  ;;  %v2896_v15 = vadd.f32 %v11379_v1, %v2700_v5  ;;  %v4071_v29 = vadd.f32 %v11379_v1, %v3875_v12 }
 0x4aa   : > { %v6814_v30 = vmax.f32 %v4658_v46, %v6422_v13  ;;  %v11577_v31 = vsel %vm1327_vm8, %v1131_v14, %v1523_v23  ;;  %v11579_v20 = vsel %vm1328_vm9, %v1132_v16, %v1524_v24  ;;  %vm3091_vm10 = vcmp.ge.f32.partialorder %v2895_v25, 0.0 }
 0x4ab   : > { %v7009_v33 = vmax.f32 %v6617_v44, %v6813_v27  ;;  %vm3092_vm11 = vcmp.ge.f32.partialorder %v2896_v15, 0.0  ;;  %v3287_v22 = vmul.f32 0.1, %v2895_v25  ;;  %v3288_v35 = vmul.f32 0.1, %v2896_v15 }
 0x4ac   : > { %v7010_v36 = vmax.f32 %v6618_v57, %v6814_v30  ;;  %v4072_v37 = vadd.f32 %v11379_v1, %v3876_v17  ;;  %vm4267_vm12 = vcmp.ge.f32.partialorder %v4071_v29, 0.0  ;;  %v4463_v26 = vmul.f32 0.1, %v4071_v29 }
 0x4ad   : > { %v3483_v39 = vsel %vm3091_vm10, %v2895_v25, %v3287_v22  ;;  %v3484_v28 = vsel %vm3092_vm11, %v2896_v15, %v3288_v35  ;;  %v5051_v41 = vrot.slane %v496_v60, 4  ;;  %v5052_v42 = vrot.slane %v497_v63, 4 }
 0x4ae   : > { %v8929_v32 = vpack.c.bf16 %v7010_v36, %v7009_v33  ;;  %vm4268_vm13 = vcmp.ge.f32.partialorder %v4072_v37, 0.0  ;;  %v4464_v45 = vmul.f32 0.1, %v4072_v37  ;;  %v4659_v34 = vsel %vm4267_vm12, %v4071_v29, %v4463_v26  ;;  %v500_v36 = vld [vmem:[%s9329_s28 + $0xa18] sm:$0xff] }
 0x4af   : > { %v5443_v48 = vunpack.c.l.bf16 %v5051_v41  ;;  %v5444_v49 = vunpack.c.l.bf16 %v5052_v42  ;;  %v6619_v38 = vmax.f32 %v11577_v31, %v3483_v39  ;;  %v6620_v51 = vmax.f32 %v11579_v20, %v3484_v28  ;;  %v501_v41 = vld [vmem:[%s9329_s28 + $0xa20] sm:$0xff] }
 0x4b0   : > { %9103 = vst [vmem:[%s9383_s8 + $0x270] sm:$0xff] %v8929_v32   ;;  %v4660_v40 = vsel %vm4268_vm13, %v4072_v37, %v4464_v45  ;;  %v729_v54 = vunpack.c.l.bf16 %v491_v43  ;;  %v730_v55 = vunpack.c.l.bf16 %v499_v47  ;;  %v2113_v44 = vrot.slane %v491_v43, 4 }
 0x4b1   : > { %v5639_v57 = vmul.f32 %v11368_v56, %v5443_v48  ;;  %v5640_v46 = vmul.f32 %v11368_v56, %v5444_v49  ;;  %v2114_v60 = vrot.slane %v499_v47, 4  ;;  %v3681_v61 = vunpack.c.l.bf16 %v498_v53  ;;  %v507_v48 = vld [vmem:[%s9329_s28 + $0xa50] sm:$0xff]  ;;  %v508_v49 = vld [vmem:[%s9329_s28 + $0xa58] sm:$0xff] }
 0x4b2   : > { %v931_v50 = vmul.f32 %v11594_v62, %v729_v54  ;;  %v932_v63 = vmul.f32 %v11594_v62, %v730_v55  ;;  %v2505_v52 = vunpack.c.l.bf16 %v2113_v44  ;;  %v3682_v2 = vunpack.c.l.bf16 %v506_v59 }
 0x4b3   : > { %v5835_v3 = vadd.f32 %v11379_v1, %v5639_v57  ;;  %v5836_v4 = vadd.f32 %v11379_v1, %v5640_v46  ;;  %v2506_v6 = vunpack.c.l.bf16 %v2114_v60  ;;  %v3877_v56 = vmul.f32 %v11594_v62, %v3681_v61 }
 0x4b4   : > { %v1133_v7 = vadd.f32 %v11379_v1, %v931_v50  ;;  %v1134_v58 = vadd.f32 %v11605_v8, %v932_v63  ;;  %v2701_v10 = vmul.f32 %v11594_v62, %v2505_v52  ;;  %v3878_v11 = vmul.f32 %v11594_v62, %v3682_v2 }
 0x4b5   : > { %vm6031_vm14 = vcmp.ge.f32.partialorder %v5835_v3, 0.0  ;;  %vm6032_vm15 = vcmp.ge.f32.partialorder %v5836_v4, 0.0  ;;  %v6227_v12 = vmul.f32 0.1, %v5835_v3  ;;  %v6228_v0 = vmul.f32 0.1, %v5836_v4 }
 0x4b6   : > { %vm1329_vm0 = vcmp.ge.f32.partialorder %v1133_v7, 0.0  ;;  %vm1330_vm1 = vcmp.ge.f32.partialorder %v1134_v58, 0.0  ;;  %v1525_v14 = vmul.f32 0.1, %v1133_v7  ;;  %v1526_v16 = vmul.f32 0.1, %v1134_v58 }
 0x4b7   : > { %v6423_v1 = vsel %vm6031_vm14, %v5835_v3, %v6227_v12  ;;  %v6424_v17 = vsel %vm6032_vm15, %v5836_v4, %v6228_v0  ;;  %v2702_v18 = vmul.f32 %v11594_v62, %v2506_v6  ;;  %v2897_v19 = vadd.f32 %v11605_v8, %v2701_v10 }
 0x4b8   : > { %v6815_v5 = vmax.f32 %v4659_v34, %v6423_v1  ;;  %v6816_v21 = vmax.f32 %v4660_v40, %v6424_v17  ;;  %v11612_v9 = vsel %vm1329_vm0, %v1133_v7, %v1525_v14  ;;  %v11614_v23 = vsel %vm1330_vm1, %v1134_v58, %v1526_v16 }
 0x4b9   : > { %v2898_v24 = vadd.f32 %v11605_v8, %v2702_v18  ;;  %vm3093_vm2 = vcmp.ge.f32.partialorder %v2897_v19, 0.0  ;;  %v3289_v25 = vmul.f32 0.1, %v2897_v19  ;;  %v4073_v13 = vadd.f32 %v11605_v8, %v3877_v56 }
 0x4ba   : > { %v7011_v27 = vmax.f32 %v6619_v38, %v6815_v5  ;;  %v7012_v15 = vmax.f32 %v6620_v51, %v6816_v21  ;;  %v4074_v29 = vadd.f32 %v11605_v8, %v3878_v11  ;;  %v5053_v30 = vrot.slane %v498_v53, 4 }
 0x4bb   : > { %vm3094_vm3 = vcmp.ge.f32.partialorder %v2898_v24, 0.0  ;;  %v3290_v31 = vmul.f32 0.1, %v2898_v24  ;;  %v3485_v20 = vsel %vm3093_vm2, %v2897_v19, %v3289_v25  ;;  %vm4269_vm4 = vcmp.ge.f32.partialorder %v4073_v13, 0.0 }
 0x4bc   : > { %v8934_v33 = vpack.c.bf16 %v7012_v15, %v7011_v27  ;;  %vm4270_vm5 = vcmp.ge.f32.partialorder %v4074_v29, 0.0  ;;  %v4465_v22 = vmul.f32 0.1, %v4073_v13  ;;  %v4466_v35 = vmul.f32 0.1, %v4074_v29 }
 0x4bd   : > { %v3486_v37 = vsel %vm3094_vm3, %v2898_v24, %v3290_v31  ;;  %v5054_v26 = vrot.slane %v506_v59, 4  ;;  %v5445_v39 = vunpack.c.l.bf16 %v5053_v30  ;;  %v6621_v28 = vmax.f32 %v11612_v9, %v3485_v20  ;;  %v502_v30 = vld [vmem:[%s9329_s28 + $0xa28] sm:$0xff]  ;;  %v503_v31 = vld [vmem:[%s9329_s28 + $0xa30] sm:$0xff] }
 0x4be   : > { %9104 = vst [vmem:[%s9383_s8 + $0x278] sm:$0xff] %v8934_v33   ;;  %v4661_v42 = vsel %vm4269_vm4, %v4073_v13, %v4465_v22  ;;  %v4662_v43 = vsel %vm4270_vm5, %v4074_v29, %v4466_v35  ;;  %v6622_v32 = vmax.f32 %v11614_v23, %v3486_v37  ;;  %v731_v45 = vunpack.c.l.bf16 %v500_v36 }
 0x4bf   : > { %v5446_v34 = vunpack.c.l.bf16 %v5054_v26  ;;  %v5641_v47 = vmul.f32 %v11594_v62, %v5445_v39  ;;  %v732_v38 = vunpack.c.l.bf16 %v501_v41  ;;  %v2115_v51 = vrot.slane %v500_v36, 4  ;;  %v509_v39 = vld [vmem:[%s9329_s28 + $0xa60] sm:$0xff] }
 0x4c0   : > { %v933_v40 = vmul.f32 %v11594_v62, %v731_v45  ;;  %v2116_v53 = vrot.slane %v501_v41, 4  ;;  %v3683_v54 = vunpack.c.l.bf16 %v507_v48  ;;  %v3684_v55 = vunpack.c.l.bf16 %v508_v49  ;;  %v510_v41 = vld [vmem:[%s9329_s28 + $0xa68] sm:$0xff] }
 0x4c1   : > { %v5642_v44 = vmul.f32 %v11594_v62, %v5446_v34  ;;  %v5837_v57 = vadd.f32 %v11605_v8, %v5641_v47  ;;  %v934_v46 = vmul.f32 %v11594_v62, %v732_v38  ;;  %v2507_v59 = vunpack.c.l.bf16 %v2115_v51 }
 0x4c2   : > { %v1135_v60 = vadd.f32 %v11605_v8, %v933_v40  ;;  %v2508_v61 = vunpack.c.l.bf16 %v2116_v53  ;;  %v3879_v50 = vmul.f32 %v11594_v62, %v3683_v54  ;;  %v3880_v63 = vmul.f32 %v11594_v62, %v3684_v55 }
 0x4c3   : > { %v5838_v52 = vadd.f32 %v11605_v8, %v5642_v44  ;;  %vm6033_vm6 = vcmp.ge.f32.partialorder %v5837_v57, 0.0  ;;  %v6229_v2 = vmul.f32 0.1, %v5837_v57  ;;  %v1136_v3 = vadd.f32 %v11605_v8, %v934_v46 }
 0x4c4   : > { %vm1331_vm7 = vcmp.ge.f32.partialorder %v1135_v60, 0.0  ;;  %v1527_v4 = vmul.f32 0.1, %v1135_v60  ;;  %v2703_v6 = vmul.f32 %v11594_v62, %v2507_v59  ;;  %v2704_v56 = vmul.f32 %v11594_v62, %v2508_v61 }
 0x4c5   : > { %vm6034_vm8 = vcmp.ge.f32.partialorder %v5838_v52, 0.0  ;;  %v6230_v7 = vmul.f32 0.1, %v5838_v52  ;;  %v6425_v58 = vsel %vm6033_vm6, %v5837_v57, %v6229_v2  ;;  %vm1332_vm9 = vcmp.ge.f32.partialorder %v1136_v3, 0.0 }
 0x4c6   : > { %v6817_v10 = vmax.f32 %v4661_v42, %v6425_v58  ;;  %v1528_v11 = vmul.f32 0.1, %v1136_v3  ;;  %v11638_v12 = vsel %vm1331_vm7, %v1135_v60, %v1527_v4  ;;  %v2899_v0 = vadd.f32 %v11605_v8, %v2703_v6 }
 0x4c7   : > { %v6426_v14 = vsel %vm6034_vm8, %v5838_v52, %v6230_v7  ;;  %v2900_v16 = vadd.f32 %v11605_v8, %v2704_v56  ;;  %v4075_v1 = vadd.f32 %v11605_v8, %v3879_v50  ;;  %v4076_v17 = vadd.f32 %v11605_v8, %v3880_v63 }
 0x4c8   : > { %v6818_v18 = vmax.f32 %v4662_v43, %v6426_v14  ;;  %v7013_v19 = vmax.f32 %v6621_v28, %v6817_v10  ;;  %v11644_v5 = vsel %vm1332_vm9, %v1136_v3, %v1528_v11  ;;  %vm3095_vm10 = vcmp.ge.f32.partialorder %v2899_v0, 0.0 }
 0x4c9   : > { %vm3096_vm11 = vcmp.ge.f32.partialorder %v2900_v16, 0.0  ;;  %v3291_v21 = vmul.f32 0.1, %v2899_v0  ;;  %v3292_v9 = vmul.f32 0.1, %v2900_v16  ;;  %vm4271_vm12 = vcmp.ge.f32.partialorder %v4075_v1, 0.0 }
 0x4ca   : > { %v7014_v23 = vmax.f32 %v6622_v32, %v6818_v18  ;;  %vm4272_vm13 = vcmp.ge.f32.partialorder %v4076_v17, 0.0  ;;  %v4467_v24 = vmul.f32 0.1, %v4075_v1  ;;  %v4468_v25 = vmul.f32 0.1, %v4076_v17 }
 0x4cb   : > { %v3487_v13 = vsel %vm3095_vm10, %v2899_v0, %v3291_v21  ;;  %v3488_v27 = vsel %vm3096_vm11, %v2900_v16, %v3292_v9  ;;  %v5055_v15 = vrot.slane %v507_v48, 4  ;;  %v5056_v29 = vrot.slane %v508_v49, 4 }
 0x4cc   : > { %v8939_v20 = vpack.c.bf16 %v7014_v23, %v7013_v19  ;;  %v4663_v33 = vsel %vm4271_vm12, %v4075_v1, %v4467_v24  ;;  %v4664_v22 = vsel %vm4272_vm13, %v4076_v17, %v4468_v25  ;;  %v6623_v35 = vmax.f32 %v11638_v12, %v3487_v13  ;;  %v504_v24 = vld [vmem:[%s9329_s28 + $0xa38] sm:$0xff]  ;;  %v505_v25 = vld [vmem:[%s9329_s28 + $0xa40] sm:$0xff] }
 0x4cd   : > { %v5447_v36 = vunpack.c.l.bf16 %v5055_v15  ;;  %v5448_v37 = vunpack.c.l.bf16 %v5056_v29  ;;  %v6624_v26 = vmax.f32 %v11644_v5, %v3488_v27  ;;  %v733_v28 = vunpack.c.l.bf16 %v502_v30 }
 0x4ce   : > { %9105 = vst [vmem:[%s9383_s8 + $0x280] sm:$0xff] %v8939_v20   ;;  %v734_v42 = vunpack.c.l.bf16 %v503_v31  ;;  %v2117_v43 = vrot.slane %v502_v30, 4  ;;  %v2118_v32 = vrot.slane %v503_v31, 4  ;;  %v3685_v45 = vunpack.c.l.bf16 %v509_v39  ;;  %v511_v20 = vld [vmem:[%s9329_s28 + $0xa70] sm:$0xff] }
 0x4cf   : > { %v5643_v34 = vmul.f32 %v11594_v62, %v5447_v36  ;;  %v5644_v47 = vmul.f32 %v11594_v62, %v5448_v37  ;;  %v935_v48 = vmul.f32 %v11594_v62, %v733_v28  ;;  %v3686_v49 = vunpack.c.l.bf16 %v510_v41  ;;  %v512_v36 = vld [vmem:[%s9329_s28 + $0xa78] sm:$0xff] }
 0x4d0   : > { %v936_v38 = vmul.f32 %v11594_v62, %v734_v42  ;;  %v2509_v51 = vunpack.c.l.bf16 %v2117_v43  ;;  %v2510_v40 = vunpack.c.l.bf16 %v2118_v32  ;;  %v3881_v53 = vmul.f32 %v11594_v62, %v3685_v45 }
 0x4d1   : > { %v5839_v54 = vadd.f32 %v11605_v8, %v5643_v34  ;;  %v5840_v55 = vadd.f32 %v11605_v8, %v5644_v47  ;;  %v1137_v44 = vadd.f32 %v11605_v8, %v935_v48  ;;  %v3882_v57 = vmul.f32 %v11594_v62, %v3686_v49 }
 0x4d2   : > { %v1138_v46 = vadd.f32 %v11605_v8, %v936_v38  ;;  %v2705_v59 = vmul.f32 %v11594_v62, %v2509_v51  ;;  %v2706_v60 = vmul.f32 %v11594_v62, %v2510_v40  ;;  %v4077_v61 = vadd.f32 %v11605_v8, %v3881_v53 }
 0x4d3   : > { %vm6035_vm14 = vcmp.ge.f32.partialorder %v5839_v54, 0.0  ;;  %vm6036_vm15 = vcmp.ge.f32.partialorder %v5840_v55, 0.0  ;;  %v6231_v50 = vmul.f32 0.1, %v5839_v54  ;;  %v6232_v63 = vmul.f32 0.1, %v5840_v55 }
 0x4d4   : > { %vm1333_vm0 = vcmp.ge.f32.partialorder %v1137_v44, 0.0  ;;  %vm1334_vm1 = vcmp.ge.f32.partialorder %v1138_v46, 0.0  ;;  %v1529_v52 = vmul.f32 0.1, %v1137_v44  ;;  %v1530_v2 = vmul.f32 0.1, %v1138_v46 }
 0x4d5   : > { %v6427_v3 = vsel %vm6035_vm14, %v5839_v54, %v6231_v50  ;;  %v6428_v4 = vsel %vm6036_vm15, %v5840_v55, %v6232_v63  ;;  %v2901_v6 = vadd.f32 %v11605_v8, %v2705_v59  ;;  %v2902_v56 = vadd.f32 %v11605_v8, %v2706_v60 }
 0x4d6   : > { %v6819_v7 = vmax.f32 %v4663_v33, %v6427_v3  ;;  %v6820_v58 = vmax.f32 %v4664_v22, %v6428_v4  ;;  %v11668_v10 = vsel %vm1333_vm0, %v1137_v44, %v1529_v52  ;;  %v11670_v11 = vsel %vm1334_vm1, %v1138_v46, %v1530_v2 }
 0x4d7   : > { %vm3097_vm2 = vcmp.ge.f32.partialorder %v2901_v6, 0.0  ;;  %vm3098_vm3 = vcmp.ge.f32.partialorder %v2902_v56, 0.0  ;;  %v3293_v12 = vmul.f32 0.1, %v2901_v6  ;;  %v3294_v0 = vmul.f32 0.1, %v2902_v56 }
 0x4d8   : > { %v7015_v14 = vmax.f32 %v6623_v35, %v6819_v7  ;;  %v7016_v16 = vmax.f32 %v6624_v26, %v6820_v58  ;;  %v4078_v1 = vadd.f32 %v11605_v8, %v3882_v57  ;;  %vm4273_vm4 = vcmp.ge.f32.partialorder %v4077_v61, 0.0 }
 0x4d9   : > { %v3489_v17 = vsel %vm3097_vm2, %v2901_v6, %v3293_v12  ;;  %v3490_v18 = vsel %vm3098_vm3, %v2902_v56, %v3294_v0  ;;  %v4469_v19 = vmul.f32 0.1, %v4077_v61  ;;  %v5057_v5 = vrot.slane %v509_v39, 4 }
 0x4da   : > { %v8944_v21 = vpack.c.bf16 %v7016_v16, %v7015_v14  ;;  %vm4274_vm5 = vcmp.ge.f32.partialorder %v4078_v1, 0.0  ;;  %v4470_v9 = vmul.f32 0.1, %v4078_v1  ;;  %v5058_v23 = vrot.slane %v510_v41, 4  ;;  %v513_v16 = vld [vmem:[%s9329_s28 + $0xa80] sm:$0xff] }
 0x4db   : > { %v4665_v13 = vsel %vm4273_vm4, %v4077_v61, %v4469_v19  ;;  %v5449_v27 = vunpack.c.l.bf16 %v5057_v5  ;;  %v6625_v15 = vmax.f32 %v11668_v10, %v3489_v17  ;;  %v6626_v29 = vmax.f32 %v11670_v11, %v3490_v18  ;;  %v514_v19 = vld [vmem:[%s9329_s28 + $0xa88] sm:$0xff] }
 0x4dc   : > { %9106 = vst [vmem:[%s9383_s8 + $0x288] sm:$0xff] %v8944_v21   ;;  %v4666_v30 = vsel %vm4274_vm5, %v4078_v1, %v4470_v9  ;;  %v5450_v31 = vunpack.c.l.bf16 %v5058_v23  ;;  %v735_v33 = vunpack.c.l.bf16 %v504_v24  ;;  %v736_v22 = vunpack.c.l.bf16 %v505_v25 }
 0x4dd   : > { %v5645_v35 = vmul.f32 %v11594_v62, %v5449_v27  ;;  %v2119_v37 = vrot.slane %v504_v24, 4  ;;  %v2120_v26 = vrot.slane %v505_v25, 4  ;;  %v3687_v39 = vunpack.c.l.bf16 %v511_v20  ;;  %v520_v25 = vld [vmem:[%s9329_s28 + $0xab8] sm:$0xff] }
 0x4de   : > { %v5646_v28 = vmul.f32 %v11594_v62, %v5450_v31  ;;  %v937_v41 = vmul.f32 %v11594_v62, %v735_v33  ;;  %v938_v42 = vmul.f32 %v11594_v62, %v736_v22  ;;  %v3688_v43 = vunpack.c.l.bf16 %v512_v36  ;;  %v521_v31 = vld [vmem:[%s9329_s28 + $0xac0] sm:$0xff] }
 0x4df   : > { %v5841_v32 = vadd.f32 %v11605_v8, %v5645_v35  ;;  %v2511_v45 = vunpack.c.l.bf16 %v2119_v37  ;;  %v2512_v34 = vunpack.c.l.bf16 %v2120_v26  ;;  %v3883_v47 = vmul.f32 %v11594_v62, %v3687_v39 }
 0x4e0   : > { %v5842_v48 = vadd.f32 %v11605_v8, %v5646_v28  ;;  %v1139_v49 = vadd.f32 %v11605_v8, %v937_v41  ;;  %v1140_v38 = vadd.f32 %v11605_v8, %v938_v42  ;;  %v3884_v51 = vmul.f32 %v11594_v62, %v3688_v43 }
 0x4e1   : > { %vm6037_vm6 = vcmp.ge.f32.partialorder %v5841_v32, 0.0  ;;  %v6233_v40 = vmul.f32 0.1, %v5841_v32  ;;  %v2707_v53 = vmul.f32 %v11594_v62, %v2511_v45  ;;  %v2708_v54 = vmul.f32 %v11594_v62, %v2512_v34 }
 0x4e2   : > { %vm6038_vm7 = vcmp.ge.f32.partialorder %v5842_v48, 0.0  ;;  %v6234_v55 = vmul.f32 0.1, %v5842_v48  ;;  %vm1335_vm8 = vcmp.ge.f32.partialorder %v1139_v49, 0.0  ;;  %vm1336_vm9 = vcmp.ge.f32.partialorder %v1140_v38, 0.0 }
 0x4e3   : > { %v6429_v44 = vsel %vm6037_vm6, %v5841_v32, %v6233_v40  ;;  %v1531_v57 = vmul.f32 0.1, %v1139_v49  ;;  %v1532_v46 = vmul.f32 0.1, %v1140_v38  ;;  %v2903_v59 = vadd.f32 %v11605_v8, %v2707_v53 }
 0x4e4   : > { %v6430_v60 = vsel %vm6038_vm7, %v5842_v48, %v6234_v55  ;;  %v6821_v61 = vmax.f32 %v4665_v13, %v6429_v44  ;;  %v2904_v50 = vadd.f32 %v11605_v8, %v2708_v54  ;;  %v4079_v63 = vadd.f32 %v11605_v8, %v3883_v47 }
 0x4e5   : > { %v6822_v52 = vmax.f32 %v4666_v30, %v6430_v60  ;;  %v11695_v2 = vsel %vm1335_vm8, %v1139_v49, %v1531_v57  ;;  %v11697_v3 = vsel %vm1336_vm9, %v1140_v38, %v1532_v46  ;;  %vm3099_vm10 = vcmp.ge.f32.partialorder %v2903_v59, 0.0 }
 0x4e6   : > { %v7017_v4 = vmax.f32 %v6625_v15, %v6821_v61  ;;  %vm3100_vm11 = vcmp.ge.f32.partialorder %v2904_v50, 0.0  ;;  %v3295_v6 = vmul.f32 0.1, %v2903_v59  ;;  %v3296_v56 = vmul.f32 0.1, %v2904_v50 }
 0x4e7   : > { %v7018_v7 = vmax.f32 %v6626_v29, %v6822_v52  ;;  %v4080_v58 = vadd.f32 %v11605_v8, %v3884_v51  ;;  %vm4275_vm12 = vcmp.ge.f32.partialorder %v4079_v63, 0.0  ;;  %v4471_v10 = vmul.f32 0.1, %v4079_v63 }
 0x4e8   : > { %v3491_v11 = vsel %vm3099_vm10, %v2903_v59, %v3295_v6  ;;  %v3492_v12 = vsel %vm3100_vm11, %v2904_v50, %v3296_v56  ;;  %v5059_v0 = vrot.slane %v511_v20, 4  ;;  %v5060_v14 = vrot.slane %v512_v36, 4 }
 0x4e9   : > { %v8949_v1 = vpack.c.bf16 %v7018_v7, %v7017_v4  ;;  %vm4276_vm13 = vcmp.ge.f32.partialorder %v4080_v58, 0.0  ;;  %v4472_v17 = vmul.f32 0.1, %v4080_v58  ;;  %v4667_v18 = vsel %vm4275_vm12, %v4079_v63, %v4471_v10  ;;  %v515_v7 = vld [vmem:[%s9329_s28 + $0xa90] sm:$0xff] }
 0x4ea   : > { %v5451_v5 = vunpack.c.l.bf16 %v5059_v0  ;;  %v5452_v21 = vunpack.c.l.bf16 %v5060_v14  ;;  %v6627_v9 = vmax.f32 %v11695_v2, %v3491_v11  ;;  %v6628_v23 = vmax.f32 %v11697_v3, %v3492_v12  ;;  %v516_v0 = vld [vmem:[%s9329_s28 + $0xa98] sm:$0xff] }
 0x4eb   : > { %9107 = vst [vmem:[%s9383_s8 + $0x290] sm:$0xff] %v8949_v1   ;;  %v4668_v24 = vsel %vm4276_vm13, %v4080_v58, %v4472_v17  ;;  %v737_v13 = vunpack.c.l.bf16 %v513_v16  ;;  %v738_v27 = vunpack.c.l.bf16 %v514_v19  ;;  %v2121_v15 = vrot.slane %v513_v16, 4 }
 0x4ec   : > { %v5647_v29 = vmul.f32 %v11594_v62, %v5451_v5  ;;  %v5648_v30 = vmul.f32 %v11594_v62, %v5452_v21  ;;  %v2122_v20 = vrot.slane %v514_v19, 4  ;;  %v3689_v33 = vunpack.c.l.bf16 %v520_v25  ;;  %v522_v5 = vld [vmem:[%s9329_s28 + $0xac8] sm:$0xff]  ;;  %v523_v21 = vld [vmem:[%s9329_s28 + $0xad0] sm:$0xff] }
 0x4ed   : > { %v939_v22 = vmul.f32 %v11594_v62, %v737_v13  ;;  %v940_v35 = vmul.f32 %v11594_v62, %v738_v27  ;;  %v2513_v36 = vunpack.c.l.bf16 %v2121_v15  ;;  %v3690_v37 = vunpack.c.l.bf16 %v521_v31 }
 0x4ee   : > { %v5843_v26 = vadd.f32 %v11605_v8, %v5647_v29  ;;  %v5844_v39 = vadd.f32 %v11605_v8, %v5648_v30  ;;  %v2514_v28 = vunpack.c.l.bf16 %v2122_v20  ;;  %v3885_v41 = vmul.f32 %v11594_v62, %v3689_v33 }
 0x4ef   : > { %v1141_v42 = vadd.f32 %v11605_v8, %v939_v22  ;;  %v1142_v43 = vadd.f32 %v11605_v8, %v940_v35  ;;  %v2709_v32 = vmul.f32 %v11594_v62, %v2513_v36  ;;  %v3886_v45 = vmul.f32 %v11594_v62, %v3690_v37 }
 0x4f0   : > { %vm6039_vm14 = vcmp.ge.f32.partialorder %v5843_v26, 0.0  ;;  %vm6040_vm15 = vcmp.ge.f32.partialorder %v5844_v39, 0.0  ;;  %v6235_v34 = vmul.f32 0.1, %v5843_v26  ;;  %v6236_v47 = vmul.f32 0.1, %v5844_v39 }
 0x4f1   : > { %vm1337_vm0 = vcmp.ge.f32.partialorder %v1141_v42, 0.0  ;;  %vm1338_vm1 = vcmp.ge.f32.partialorder %v1142_v43, 0.0  ;;  %v1533_v48 = vmul.f32 0.1, %v1141_v42  ;;  %v1534_v49 = vmul.f32 0.1, %v1142_v43 }
 0x4f2   : > { %v6431_v38 = vsel %vm6039_vm14, %v5843_v26, %v6235_v34  ;;  %v6432_v51 = vsel %vm6040_vm15, %v5844_v39, %v6236_v47  ;;  %v2710_v40 = vmul.f32 %v11594_v62, %v2514_v28  ;;  %v2905_v53 = vadd.f32 %v11605_v8, %v2709_v32 }
 0x4f3   : > { %v6823_v54 = vmax.f32 %v4667_v18, %v6431_v38  ;;  %v6824_v55 = vmax.f32 %v4668_v24, %v6432_v51  ;;  %v11720_v44 = vsel %vm1337_vm0, %v1141_v42, %v1533_v48  ;;  %v11722_v57 = vsel %vm1338_vm1, %v1142_v43, %v1534_v49 }
 0x4f4   : > { %v2906_v46 = vadd.f32 %v11605_v8, %v2710_v40  ;;  %vm3101_vm2 = vcmp.ge.f32.partialorder %v2905_v53, 0.0  ;;  %v3297_v59 = vmul.f32 0.1, %v2905_v53  ;;  %v4081_v60 = vadd.f32 %v11605_v8, %v3885_v41 }
 0x4f5   : > { %v7019_v61 = vmax.f32 %v6627_v9, %v6823_v54  ;;  %v7020_v50 = vmax.f32 %v6628_v23, %v6824_v55  ;;  %v4082_v63 = vadd.f32 %v11605_v8, %v3886_v45  ;;  %v5061_v52 = vrot.slane %v520_v25, 4 }
 0x4f6   : > { %vm3102_vm3 = vcmp.ge.f32.partialorder %v2906_v46, 0.0  ;;  %v3298_v2 = vmul.f32 0.1, %v2906_v46  ;;  %v3493_v3 = vsel %vm3101_vm2, %v2905_v53, %v3297_v59  ;;  %vm4277_vm4 = vcmp.ge.f32.partialorder %v4081_v60, 0.0 }
 0x4f7   : > { %v8954_v4 = vpack.c.bf16 %v7020_v50, %v7019_v61  ;;  %vm4278_vm5 = vcmp.ge.f32.partialorder %v4082_v63, 0.0  ;;  %v4473_v6 = vmul.f32 0.1, %v4081_v60  ;;  %v4474_v56 = vmul.f32 0.1, %v4082_v63 }
 0x4f8   : > { %v3494_v58 = vsel %vm3102_vm3, %v2906_v46, %v3298_v2  ;;  %v5062_v10 = vrot.slane %v521_v31, 4  ;;  %v5453_v11 = vunpack.c.l.bf16 %v5061_v52  ;;  %v6629_v12 = vmax.f32 %v11720_v44, %v3493_v3  ;;  %v517_v52 = vld [vmem:[%s9329_s28 + $0xaa0] sm:$0xff]  ;;  %v518_v2 = vld [vmem:[%s9329_s28 + $0xaa8] sm:$0xff] }
 0x4f9   : > { %9108 = vst [vmem:[%s9383_s8 + $0x298] sm:$0xff] %v8954_v4   ;;  %v4669_v14 = vsel %vm4277_vm4, %v4081_v60, %v4473_v6  ;;  %v4670_v16 = vsel %vm4278_vm5, %v4082_v63, %v4474_v56  ;;  %v6630_v1 = vmax.f32 %v11722_v57, %v3494_v58  ;;  %v739_v17 = vunpack.c.l.bf16 %v515_v7 }
 0x4fa   : > { %v5454_v18 = vunpack.c.l.bf16 %v5062_v10  ;;  %v5649_v19 = vmul.f32 %v11594_v62, %v5453_v11  ;;  %v740_v9 = vunpack.c.l.bf16 %v516_v0  ;;  %v2123_v23 = vrot.slane %v515_v7, 4  ;;  %v524_v11 = vld [vmem:[%s9329_s28 + $0xad8] sm:$0xff] }
 0x4fb   : > { %v941_v24 = vmul.f32 %v11594_v62, %v739_v17  ;;  %v2124_v25 = vrot.slane %v516_v0, 4  ;;  %v3691_v13 = vunpack.c.l.bf16 %v522_v5  ;;  %v3692_v27 = vunpack.c.l.bf16 %v523_v21  ;;  %v525_v0 = vld [vmem:[%s9329_s28 + $0xae0] sm:$0xff] }
 0x4fc   : > { %v5650_v15 = vmul.f32 %v11594_v62, %v5454_v18  ;;  %v5845_v29 = vadd.f32 %v11605_v8, %v5649_v19  ;;  %v942_v30 = vmul.f32 %v11594_v62, %v740_v9  ;;  %v2515_v31 = vunpack.c.l.bf16 %v2123_v23 }
 0x4fd   : > { %v1143_v20 = vadd.f32 %v11605_v8, %v941_v24  ;;  %v2516_v33 = vunpack.c.l.bf16 %v2124_v25  ;;  %v3887_v22 = vmul.f32 %v11594_v62, %v3691_v13  ;;  %v3888_v35 = vmul.f32 %v11594_v62, %v3692_v27 }
 0x4fe   : > { %v5846_v36 = vadd.f32 %v11605_v8, %v5650_v15  ;;  %vm6041_vm6 = vcmp.ge.f32.partialorder %v5845_v29, 0.0  ;;  %v6237_v37 = vmul.f32 0.1, %v5845_v29  ;;  %v1144_v26 = vadd.f32 %v11605_v8, %v942_v30 }
 0x4ff   : > { %vm1339_vm7 = vcmp.ge.f32.partialorder %v1143_v20, 0.0  ;;  %v1535_v39 = vmul.f32 0.1, %v1143_v20  ;;  %v2711_v28 = vmul.f32 %v11594_v62, %v2515_v31  ;;  %v2712_v41 = vmul.f32 %v11594_v62, %v2516_v33 }
 0x500   : > { %vm6042_vm8 = vcmp.ge.f32.partialorder %v5846_v36, 0.0  ;;  %v6238_v42 = vmul.f32 0.1, %v5846_v36  ;;  %v6433_v43 = vsel %vm6041_vm6, %v5845_v29, %v6237_v37  ;;  %vm1340_vm9 = vcmp.ge.f32.partialorder %v1144_v26, 0.0 }
 0x501   : > { %v6825_v32 = vmax.f32 %v4669_v14, %v6433_v43  ;;  %v1536_v45 = vmul.f32 0.1, %v1144_v26  ;;  %v11746_v34 = vsel %vm1339_vm7, %v1143_v20, %v1535_v39  ;;  %v2907_v47 = vadd.f32 %v11605_v8, %v2711_v28 }
 0x502   : > { %v6434_v48 = vsel %vm6042_vm8, %v5846_v36, %v6238_v42  ;;  %v2908_v49 = vadd.f32 %v11605_v8, %v2712_v41  ;;  %v4083_v38 = vadd.f32 %v11605_v8, %v3887_v22  ;;  %v4084_v51 = vadd.f32 %v11605_v8, %v3888_v35 }
 0x503   : > { %v6826_v40 = vmax.f32 %v4670_v16, %v6434_v48  ;;  %v7021_v53 = vmax.f32 %v6629_v12, %v6825_v32  ;;  %v11752_v54 = vsel %vm1340_vm9, %v1144_v26, %v1536_v45  ;;  %vm3103_vm10 = vcmp.ge.f32.partialorder %v2907_v47, 0.0 }
 0x504   : > { %vm3104_vm11 = vcmp.ge.f32.partialorder %v2908_v49, 0.0  ;;  %v3299_v55 = vmul.f32 0.1, %v2907_v47  ;;  %v3300_v44 = vmul.f32 0.1, %v2908_v49  ;;  %vm4279_vm12 = vcmp.ge.f32.partialorder %v4083_v38, 0.0 }
 0x505   : > { %v7022_v57 = vmax.f32 %v6630_v1, %v6826_v40  ;;  %vm4280_vm13 = vcmp.ge.f32.partialorder %v4084_v51, 0.0  ;;  %v4475_v46 = vmul.f32 0.1, %v4083_v38  ;;  %v4476_v59 = vmul.f32 0.1, %v4084_v51 }
 0x506   : > { %v3495_v60 = vsel %vm3103_vm10, %v2907_v47, %v3299_v55  ;;  %v3496_v61 = vsel %vm3104_vm11, %v2908_v49, %v3300_v44  ;;  %v5063_v50 = vrot.slane %v522_v5, 4  ;;  %v5064_v63 = vrot.slane %v523_v21, 4 }
 0x507   : > { %v8959_v3 = vpack.c.bf16 %v7022_v57, %v7021_v53  ;;  %v4671_v4 = vsel %vm4279_vm12, %v4083_v38, %v4475_v46  ;;  %v4672_v6 = vsel %vm4280_vm13, %v4084_v51, %v4476_v59  ;;  %v6631_v56 = vmax.f32 %v11746_v34, %v3495_v60  ;;  %v519_v46 = vld [vmem:[%s9329_s28 + $0xab0] sm:$0xff] }
 0x508   : > { %v5455_v7 = vunpack.c.l.bf16 %v5063_v50  ;;  %v5456_v58 = vunpack.c.l.bf16 %v5064_v63  ;;  %v6632_v10 = vmax.f32 %v11752_v54, %v3496_v61  ;;  %v741_v12 = vunpack.c.l.bf16 %v517_v52  ;;  %v527_v59 = vld [vmem:[%s9329_s28 + $0xaf0] sm:$0xff] }
 0x509   : > { %9109 = vst [vmem:[%s9383_s8 + $0x2a0] sm:$0xff] %v8959_v3   ;;  %v742_v14 = vunpack.c.l.bf16 %v518_v2  ;;  %v2125_v16 = vrot.slane %v517_v52, 4  ;;  %v2126_v1 = vrot.slane %v518_v2, 4  ;;  %v3693_v17 = vunpack.c.l.bf16 %v524_v11  ;;  %v526_v3 = vld [vmem:[%s9329_s28 + $0xae8] sm:$0xff] }
 0x50a   : > { %v5651_v18 = vmul.f32 %v11594_v62, %v5455_v7  ;;  %v5652_v19 = vmul.f32 %v11594_v62, %v5456_v58  ;;  %v943_v5 = vmul.f32 %v11594_v62, %v741_v12  ;;  %v3694_v21 = vunpack.c.l.bf16 %v525_v0  ;;  %v534_v7 = vld [vmem:[%s9329_s28 + $0xb28] sm:$0xff] }
 0x50b   : > { %v944_v9 = vmul.f32 %v11594_v62, %v742_v14  ;;  %v2517_v23 = vunpack.c.l.bf16 %v2125_v16  ;;  %v2518_v24 = vunpack.c.l.bf16 %v2126_v1  ;;  %v3889_v25 = vmul.f32 %v11594_v62, %v3693_v17 }
 0x50c   : > { %v5847_v13 = vadd.f32 %v11605_v8, %v5651_v18  ;;  %v5848_v27 = vadd.f32 %v11605_v8, %v5652_v19  ;;  %v1145_v15 = vadd.f32 %v11605_v8, %v943_v5  ;;  %v3890_v29 = vmul.f32 %v11594_v62, %v3694_v21 }
 0x50d   : > { %v1146_v30 = vadd.f32 %v11605_v8, %v944_v9  ;;  %v2713_v31 = vmul.f32 %v11594_v62, %v2517_v23  ;;  %v2714_v20 = vmul.f32 %v11594_v62, %v2518_v24  ;;  %v4085_v33 = vadd.f32 %v11605_v8, %v3889_v25 }
 0x50e   : > { %vm6043_vm14 = vcmp.ge.f32.partialorder %v5847_v13, 0.0  ;;  %vm6044_vm15 = vcmp.ge.f32.partialorder %v5848_v27, 0.0  ;;  %v6239_v22 = vmul.f32 0.1, %v5847_v13  ;;  %v6240_v35 = vmul.f32 0.1, %v5848_v27 }
 0x50f   : > { %vm1341_vm0 = vcmp.ge.f32.partialorder %v1145_v15, 0.0  ;;  %vm1342_vm1 = vcmp.ge.f32.partialorder %v1146_v30, 0.0  ;;  %v1537_v36 = vmul.f32 0.1, %v1145_v15  ;;  %v1538_v37 = vmul.f32 0.1, %v1146_v30 }
 0x510   : > { %v6435_v26 = vsel %vm6043_vm14, %v5847_v13, %v6239_v22  ;;  %v6436_v39 = vsel %vm6044_vm15, %v5848_v27, %v6240_v35  ;;  %v2909_v28 = vadd.f32 %v11605_v8, %v2713_v31  ;;  %v2910_v41 = vadd.f32 %v11605_v8, %v2714_v20 }
 0x511   : > { %v6827_v42 = vmax.f32 %v4671_v4, %v6435_v26  ;;  %v6828_v43 = vmax.f32 %v4672_v6, %v6436_v39  ;;  %v11776_v32 = vsel %vm1341_vm0, %v1145_v15, %v1537_v36  ;;  %v11778_v45 = vsel %vm1342_vm1, %v1146_v30, %v1538_v37 }
 0x512   : > { %vm3105_vm2 = vcmp.ge.f32.partialorder %v2909_v28, 0.0  ;;  %vm3106_vm3 = vcmp.ge.f32.partialorder %v2910_v41, 0.0  ;;  %v3301_v34 = vmul.f32 0.1, %v2909_v28  ;;  %v3302_v47 = vmul.f32 0.1, %v2910_v41 }
 0x513   : > { %v7023_v48 = vmax.f32 %v6631_v56, %v6827_v42  ;;  %v7024_v49 = vmax.f32 %v6632_v10, %v6828_v43  ;;  %v4086_v38 = vadd.f32 %v11605_v8, %v3890_v29  ;;  %vm4281_vm4 = vcmp.ge.f32.partialorder %v4085_v33, 0.0 }
 0x514   : > { %v3497_v51 = vsel %vm3105_vm2, %v2909_v28, %v3301_v34  ;;  %v3498_v40 = vsel %vm3106_vm3, %v2910_v41, %v3302_v47  ;;  %v4477_v53 = vmul.f32 0.1, %v4085_v33  ;;  %v5065_v54 = vrot.slane %v524_v11, 4 }
 0x515   : > { %v8964_v55 = vpack.c.bf16 %v7024_v49, %v7023_v48  ;;  %vm4282_vm5 = vcmp.ge.f32.partialorder %v4086_v38, 0.0  ;;  %v4478_v44 = vmul.f32 0.1, %v4086_v38  ;;  %v5066_v57 = vrot.slane %v525_v0, 4  ;;  %v528_v49 = vld [vmem:[%s9329_s28 + $0xaf8] sm:$0xff] }
 0x516   : > { %v4673_v60 = vsel %vm4281_vm4, %v4085_v33, %v4477_v53  ;;  %v5457_v61 = vunpack.c.l.bf16 %v5065_v54  ;;  %v6633_v50 = vmax.f32 %v11776_v32, %v3497_v51  ;;  %v6634_v63 = vmax.f32 %v11778_v45, %v3498_v40  ;;  %v529_v53 = vld [vmem:[%s9329_s28 + $0xb00] sm:$0xff] }
 0x517   : > { %9110 = vst [vmem:[%s9383_s8 + $0x2a8] sm:$0xff] %v8964_v55   ;;  %v4674_v52 = vsel %vm4282_vm5, %v4086_v38, %v4478_v44  ;;  %v5458_v2 = vunpack.c.l.bf16 %v5066_v57  ;;  %v743_v4 = vunpack.c.l.bf16 %v519_v46  ;;  %v744_v6 = vunpack.c.l.bf16 %v527_v59 }
 0x518   : > { %v5653_v56 = vmul.f32 %v11594_v62, %v5457_v61  ;;  %v2127_v58 = vrot.slane %v519_v46, 4  ;;  %v2128_v10 = vrot.slane %v527_v59, 4  ;;  %v3695_v11 = vunpack.c.l.bf16 %v526_v3  ;;  %v535_v59 = vld [vmem:[%s9329_s28 + $0xb30] sm:$0xff] }
 0x519   : > { %v5654_v12 = vmul.f32 %v11594_v62, %v5458_v2  ;;  %v945_v0 = vmul.f32 %v11594_v62, %v743_v4  ;;  %v946_v14 = vmul.f32 %v11594_v62, %v744_v6  ;;  %v3696_v16 = vunpack.c.l.bf16 %v534_v7  ;;  %v536_v2 = vld [vmem:[%s9329_s28 + $0xb38] sm:$0xff]  ;;  %v11820_v6 = vld [vmem:[%s12137_s1] ss:$0 sm:$0xff] }
 0x51a   : > { %v5849_v1 = vadd.f32 %v11605_v8, %v5653_v56  ;;  %v2519_v17 = vunpack.c.l.bf16 %v2127_v58  ;;  %v2520_v18 = vunpack.c.l.bf16 %v2128_v10  ;;  %v3891_v19 = vmul.f32 %v11594_v62, %v3695_v11 }
 0x51b   : > { %v5850_v5 = vadd.f32 %v11605_v8, %v5654_v12  ;;  %v1147_v21 = vadd.f32 %v11605_v8, %v945_v0  ;;  %v1148_v9 = vadd.f32 %v11605_v8, %v946_v14  ;;  %v3892_v23 = vmul.f32 %v11594_v62, %v3696_v16  ;;  %v11831_v16 = vld [vmem:[%s12138_s2] ss:$0 sm:$0xff] }
 0x51c   : > { %vm6045_vm6 = vcmp.ge.f32.partialorder %v5849_v1, 0.0  ;;  %v6241_v24 = vmul.f32 0.1, %v5849_v1  ;;  %v2715_v25 = vmul.f32 %v11594_v62, %v2519_v17  ;;  %v2716_v13 = vmul.f32 %v11594_v62, %v2520_v18 }
 0x51d   : > { %vm6046_vm7 = vcmp.ge.f32.partialorder %v5850_v5, 0.0  ;;  %v6242_v27 = vmul.f32 0.1, %v5850_v5  ;;  %vm1343_vm8 = vcmp.ge.f32.partialorder %v1147_v21, 0.0  ;;  %vm1344_vm9 = vcmp.ge.f32.partialorder %v1148_v9, 0.0 }
 0x51e   : > { %v6437_v15 = vsel %vm6045_vm6, %v5849_v1, %v6241_v24  ;;  %v1539_v29 = vmul.f32 0.1, %v1147_v21  ;;  %v1540_v30 = vmul.f32 0.1, %v1148_v9  ;;  %v2911_v31 = vadd.f32 %v11605_v8, %v2715_v25 }
 0x51f   : > { %v6438_v20 = vsel %vm6046_vm7, %v5850_v5, %v6242_v27  ;;  %v6829_v33 = vmax.f32 %v4673_v60, %v6437_v15  ;;  %v2912_v22 = vadd.f32 %v11605_v8, %v2716_v13  ;;  %v4087_v35 = vadd.f32 %v11605_v8, %v3891_v19 }
 0x520   : > { %v6830_v36 = vmax.f32 %v4674_v52, %v6438_v20  ;;  %v11803_v37 = vsel %vm1343_vm8, %v1147_v21, %v1539_v29  ;;  %v11805_v26 = vsel %vm1344_vm9, %v1148_v9, %v1540_v30  ;;  %vm3107_vm10 = vcmp.ge.f32.partialorder %v2911_v31, 0.0 }
 0x521   : > { %v7025_v39 = vmax.f32 %v6633_v50, %v6829_v33  ;;  %vm3108_vm11 = vcmp.ge.f32.partialorder %v2912_v22, 0.0  ;;  %v3303_v28 = vmul.f32 0.1, %v2911_v31  ;;  %v3304_v41 = vmul.f32 0.1, %v2912_v22 }
 0x522   : > { %v7026_v42 = vmax.f32 %v6634_v63, %v6830_v36  ;;  %v4088_v43 = vadd.f32 %v11605_v8, %v3892_v23  ;;  %vm4283_vm12 = vcmp.ge.f32.partialorder %v4087_v35, 0.0  ;;  %v4479_v32 = vmul.f32 0.1, %v4087_v35 }
 0x523   : > { %v3499_v45 = vsel %vm3107_vm10, %v2911_v31, %v3303_v28  ;;  %v3500_v34 = vsel %vm3108_vm11, %v2912_v22, %v3304_v41  ;;  %v5067_v47 = vrot.slane %v526_v3, 4  ;;  %v5068_v48 = vrot.slane %v534_v7, 4 }
 0x524   : > { %v8969_v38 = vpack.c.bf16 %v7026_v42, %v7025_v39  ;;  %vm4284_vm13 = vcmp.ge.f32.partialorder %v4088_v43, 0.0  ;;  %v4480_v51 = vmul.f32 0.1, %v4088_v43  ;;  %v4675_v40 = vsel %vm4283_vm12, %v4087_v35, %v4479_v32  ;;  %v530_v42 = vld [vmem:[%s9329_s28 + $0xb08] sm:$0xff] }
 0x525   : > { %v5459_v54 = vunpack.c.l.bf16 %v5067_v47  ;;  %v5460_v55 = vunpack.c.l.bf16 %v5068_v48  ;;  %v6635_v44 = vmax.f32 %v11803_v37, %v3499_v45  ;;  %v6636_v57 = vmax.f32 %v11805_v26, %v3500_v34  ;;  %v531_v47 = vld [vmem:[%s9329_s28 + $0xb10] sm:$0xff] }
 0x526   : > { %9111 = vst [vmem:[%s9383_s8 + $0x2b0] sm:$0xff] %v8969_v38   ;;  %v4676_v46 = vsel %vm4284_vm13, %v4088_v43, %v4480_v51  ;;  %v745_v60 = vunpack.c.l.bf16 %v528_v49  ;;  %v746_v61 = vunpack.c.l.bf16 %v529_v53  ;;  %v2129_v50 = vrot.slane %v528_v49, 4 }
 0x527   : > { %v5655_v63 = vmul.f32 %v11594_v62, %v5459_v54  ;;  %v5656_v52 = vmul.f32 %v11594_v62, %v5460_v55  ;;  %v2130_v3 = vrot.slane %v529_v53, 4  ;;  %v3697_v4 = vunpack.c.l.bf16 %v535_v59  ;;  %v537_v54 = vld [vmem:[%s9329_s28 + $0xb40] sm:$0xff]  ;;  %v538_v55 = vld [vmem:[%s9329_s28 + $0xb48] sm:$0xff] }
 0x528   : > { %v947_v56 = vmul.f32 %v11820_v6, %v745_v60  ;;  %v948_v7 = vmul.f32 %v11820_v6, %v746_v61  ;;  %v2521_v58 = vunpack.c.l.bf16 %v2129_v50  ;;  %v3698_v10 = vunpack.c.l.bf16 %v536_v2 }
 0x529   : > { %v5851_v11 = vadd.f32 %v11605_v8, %v5655_v63  ;;  %v5852_v12 = vadd.f32 %v11605_v8, %v5656_v52  ;;  %v2522_v0 = vunpack.c.l.bf16 %v2130_v3  ;;  %v3893_v62 = vmul.f32 %v11820_v6, %v3697_v4 }
 0x52a   : > { %v1149_v14 = vadd.f32 %v11605_v8, %v947_v56  ;;  %v1150_v1 = vadd.f32 %v11831_v16, %v948_v7  ;;  %v2717_v17 = vmul.f32 %v11820_v6, %v2521_v58  ;;  %v3894_v18 = vmul.f32 %v11820_v6, %v3698_v10 }
 0x52b   : > { %vm6047_vm14 = vcmp.ge.f32.partialorder %v5851_v11, 0.0  ;;  %vm6048_vm15 = vcmp.ge.f32.partialorder %v5852_v12, 0.0  ;;  %v6243_v19 = vmul.f32 0.1, %v5851_v11  ;;  %v6244_v5 = vmul.f32 0.1, %v5852_v12 }
 0x52c   : > { %vm1345_vm0 = vcmp.ge.f32.partialorder %v1149_v14, 0.0  ;;  %vm1346_vm1 = vcmp.ge.f32.partialorder %v1150_v1, 0.0  ;;  %v1541_v21 = vmul.f32 0.1, %v1149_v14  ;;  %v1542_v9 = vmul.f32 0.1, %v1150_v1 }
 0x52d   : > { %v6439_v8 = vsel %vm6047_vm14, %v5851_v11, %v6243_v19  ;;  %v6440_v23 = vsel %vm6048_vm15, %v5852_v12, %v6244_v5  ;;  %v2718_v24 = vmul.f32 %v11820_v6, %v2522_v0  ;;  %v2913_v25 = vadd.f32 %v11831_v16, %v2717_v17 }
 0x52e   : > { %v6831_v13 = vmax.f32 %v4675_v40, %v6439_v8  ;;  %v6832_v27 = vmax.f32 %v4676_v46, %v6440_v23  ;;  %v11838_v15 = vsel %vm1345_vm0, %v1149_v14, %v1541_v21  ;;  %v11840_v29 = vsel %vm1346_vm1, %v1150_v1, %v1542_v9 }
 0x52f   : > { %v2914_v30 = vadd.f32 %v11831_v16, %v2718_v24  ;;  %vm3109_vm2 = vcmp.ge.f32.partialorder %v2913_v25, 0.0  ;;  %v3305_v31 = vmul.f32 0.1, %v2913_v25  ;;  %v4089_v20 = vadd.f32 %v11831_v16, %v3893_v62 }
 0x530   : > { %v7027_v33 = vmax.f32 %v6635_v44, %v6831_v13  ;;  %v7028_v22 = vmax.f32 %v6636_v57, %v6832_v27  ;;  %v4090_v35 = vadd.f32 %v11831_v16, %v3894_v18  ;;  %v5069_v36 = vrot.slane %v535_v59, 4 }
 0x531   : > { %vm3110_vm3 = vcmp.ge.f32.partialorder %v2914_v30, 0.0  ;;  %v3306_v37 = vmul.f32 0.1, %v2914_v30  ;;  %v3501_v26 = vsel %vm3109_vm2, %v2913_v25, %v3305_v31  ;;  %vm4285_vm4 = vcmp.ge.f32.partialorder %v4089_v20, 0.0 }
 0x532   : > { %v8974_v39 = vpack.c.bf16 %v7028_v22, %v7027_v33  ;;  %vm4286_vm5 = vcmp.ge.f32.partialorder %v4090_v35, 0.0  ;;  %v4481_v28 = vmul.f32 0.1, %v4089_v20  ;;  %v4482_v41 = vmul.f32 0.1, %v4090_v35 }
 0x533   : > { %v3502_v43 = vsel %vm3110_vm3, %v2914_v30, %v3306_v37  ;;  %v5070_v32 = vrot.slane %v536_v2, 4  ;;  %v5461_v45 = vunpack.c.l.bf16 %v5069_v36  ;;  %v6637_v34 = vmax.f32 %v11838_v15, %v3501_v26  ;;  %v532_v36 = vld [vmem:[%s9329_s28 + $0xb18] sm:$0xff]  ;;  %v533_v37 = vld [vmem:[%s9329_s28 + $0xb20] sm:$0xff] }
 0x534   : > { %9112 = vst [vmem:[%s9383_s8 + $0x2b8] sm:$0xff] %v8974_v39   ;;  %v4677_v48 = vsel %vm4285_vm4, %v4089_v20, %v4481_v28  ;;  %v4678_v49 = vsel %vm4286_vm5, %v4090_v35, %v4482_v41  ;;  %v6638_v38 = vmax.f32 %v11840_v29, %v3502_v43  ;;  %v747_v51 = vunpack.c.l.bf16 %v530_v42 }
 0x535   : > { %v5462_v40 = vunpack.c.l.bf16 %v5070_v32  ;;  %v5657_v53 = vmul.f32 %v11820_v6, %v5461_v45  ;;  %v748_v44 = vunpack.c.l.bf16 %v531_v47  ;;  %v2131_v57 = vrot.slane %v530_v42, 4  ;;  %v539_v45 = vld [vmem:[%s9329_s28 + $0xb50] sm:$0xff] }
 0x536   : > { %v949_v46 = vmul.f32 %v11820_v6, %v747_v51  ;;  %v2132_v59 = vrot.slane %v531_v47, 4  ;;  %v3699_v60 = vunpack.c.l.bf16 %v537_v54  ;;  %v3700_v61 = vunpack.c.l.bf16 %v538_v55  ;;  %v540_v47 = vld [vmem:[%s9329_s28 + $0xb58] sm:$0xff] }
 0x537   : > { %v5658_v50 = vmul.f32 %v11820_v6, %v5462_v40  ;;  %v5853_v63 = vadd.f32 %v11831_v16, %v5657_v53  ;;  %v950_v52 = vmul.f32 %v11820_v6, %v748_v44  ;;  %v2523_v2 = vunpack.c.l.bf16 %v2131_v57 }
 0x538   : > { %v1151_v3 = vadd.f32 %v11831_v16, %v949_v46  ;;  %v2524_v4 = vunpack.c.l.bf16 %v2132_v59  ;;  %v3895_v56 = vmul.f32 %v11820_v6, %v3699_v60  ;;  %v3896_v7 = vmul.f32 %v11820_v6, %v3700_v61 }
 0x539   : > { %v5854_v58 = vadd.f32 %v11831_v16, %v5658_v50  ;;  %vm6049_vm6 = vcmp.ge.f32.partialorder %v5853_v63, 0.0  ;;  %v6245_v10 = vmul.f32 0.1, %v5853_v63  ;;  %v1152_v11 = vadd.f32 %v11831_v16, %v950_v52 }
 0x53a   : > { %vm1347_vm7 = vcmp.ge.f32.partialorder %v1151_v3, 0.0  ;;  %v1543_v12 = vmul.f32 0.1, %v1151_v3  ;;  %v2719_v0 = vmul.f32 %v11820_v6, %v2523_v2  ;;  %v2720_v62 = vmul.f32 %v11820_v6, %v2524_v4 }
 0x53b   : > { %vm6050_vm8 = vcmp.ge.f32.partialorder %v5854_v58, 0.0  ;;  %v6246_v14 = vmul.f32 0.1, %v5854_v58  ;;  %v6441_v1 = vsel %vm6049_vm6, %v5853_v63, %v6245_v10  ;;  %vm1348_vm9 = vcmp.ge.f32.partialorder %v1152_v11, 0.0 }
 0x53c   : > { %v6833_v17 = vmax.f32 %v4677_v48, %v6441_v1  ;;  %v1544_v18 = vmul.f32 0.1, %v1152_v11  ;;  %v11864_v19 = vsel %vm1347_vm7, %v1151_v3, %v1543_v12  ;;  %v2915_v5 = vadd.f32 %v11831_v16, %v2719_v0 }
 0x53d   : > { %v6442_v21 = vsel %vm6050_vm8, %v5854_v58, %v6246_v14  ;;  %v2916_v9 = vadd.f32 %v11831_v16, %v2720_v62  ;;  %v4091_v8 = vadd.f32 %v11831_v16, %v3895_v56  ;;  %v4092_v23 = vadd.f32 %v11831_v16, %v3896_v7 }
 0x53e   : > { %v6834_v24 = vmax.f32 %v4678_v49, %v6442_v21  ;;  %v7029_v25 = vmax.f32 %v6637_v34, %v6833_v17  ;;  %v11870_v13 = vsel %vm1348_vm9, %v1152_v11, %v1544_v18  ;;  %vm3111_vm10 = vcmp.ge.f32.partialorder %v2915_v5, 0.0 }
 0x53f   : > { %vm3112_vm11 = vcmp.ge.f32.partialorder %v2916_v9, 0.0  ;;  %v3307_v27 = vmul.f32 0.1, %v2915_v5  ;;  %v3308_v15 = vmul.f32 0.1, %v2916_v9  ;;  %vm4287_vm12 = vcmp.ge.f32.partialorder %v4091_v8, 0.0 }
 0x540   : > { %v7030_v29 = vmax.f32 %v6638_v38, %v6834_v24  ;;  %vm4288_vm13 = vcmp.ge.f32.partialorder %v4092_v23, 0.0  ;;  %v4483_v30 = vmul.f32 0.1, %v4091_v8  ;;  %v4484_v31 = vmul.f32 0.1, %v4092_v23 }
 0x541   : > { %v3503_v20 = vsel %vm3111_vm10, %v2915_v5, %v3307_v27  ;;  %v3504_v33 = vsel %vm3112_vm11, %v2916_v9, %v3308_v15  ;;  %v5071_v22 = vrot.slane %v537_v54, 4  ;;  %v5072_v35 = vrot.slane %v538_v55, 4 }
 0x542   : > { %v8979_v26 = vpack.c.bf16 %v7030_v29, %v7029_v25  ;;  %v4679_v39 = vsel %vm4287_vm12, %v4091_v8, %v4483_v30  ;;  %v4680_v28 = vsel %vm4288_vm13, %v4092_v23, %v4484_v31  ;;  %v6639_v41 = vmax.f32 %v11864_v19, %v3503_v20  ;;  %v541_v30 = vld [vmem:[%s9329_s28 + $0xb60] sm:$0xff]  ;;  %v542_v31 = vld [vmem:[%s9329_s28 + $0xb68] sm:$0xff] }
 0x543   : > { %v5463_v42 = vunpack.c.l.bf16 %v5071_v22  ;;  %v5464_v43 = vunpack.c.l.bf16 %v5072_v35  ;;  %v6640_v32 = vmax.f32 %v11870_v13, %v3504_v33  ;;  %v749_v34 = vunpack.c.l.bf16 %v532_v36 }
 0x544   : > { %9113 = vst [vmem:[%s9383_s8 + $0x2c0] sm:$0xff] %v8979_v26   ;;  %v750_v48 = vunpack.c.l.bf16 %v533_v37  ;;  %v2133_v49 = vrot.slane %v532_v36, 4  ;;  %v2134_v38 = vrot.slane %v533_v37, 4  ;;  %v3701_v51 = vunpack.c.l.bf16 %v539_v45  ;;  %v548_v26 = vld [vmem:[%s9329_s28 + $0xb98] sm:$0xff] }
 0x545   : > { %v5659_v40 = vmul.f32 %v11820_v6, %v5463_v42  ;;  %v5660_v53 = vmul.f32 %v11820_v6, %v5464_v43  ;;  %v951_v54 = vmul.f32 %v11820_v6, %v749_v34  ;;  %v3702_v55 = vunpack.c.l.bf16 %v540_v47  ;;  %v549_v42 = vld [vmem:[%s9329_s28 + $0xba0] sm:$0xff] }
 0x546   : > { %v952_v44 = vmul.f32 %v11820_v6, %v750_v48  ;;  %v2525_v57 = vunpack.c.l.bf16 %v2133_v49  ;;  %v2526_v46 = vunpack.c.l.bf16 %v2134_v38  ;;  %v3897_v59 = vmul.f32 %v11820_v6, %v3701_v51 }
 0x547   : > { %v5855_v60 = vadd.f32 %v11831_v16, %v5659_v40  ;;  %v5856_v61 = vadd.f32 %v11831_v16, %v5660_v53  ;;  %v1153_v50 = vadd.f32 %v11831_v16, %v951_v54  ;;  %v3898_v63 = vmul.f32 %v11820_v6, %v3702_v55 }
 0x548   : > { %v1154_v52 = vadd.f32 %v11831_v16, %v952_v44  ;;  %v2721_v2 = vmul.f32 %v11820_v6, %v2525_v57  ;;  %v2722_v3 = vmul.f32 %v11820_v6, %v2526_v46  ;;  %v4093_v4 = vadd.f32 %v11831_v16, %v3897_v59 }
 0x549   : > { %vm6051_vm14 = vcmp.ge.f32.partialorder %v5855_v60, 0.0  ;;  %vm6052_vm15 = vcmp.ge.f32.partialorder %v5856_v61, 0.0  ;;  %v6247_v56 = vmul.f32 0.1, %v5855_v60  ;;  %v6248_v7 = vmul.f32 0.1, %v5856_v61 }
 0x54a   : > { %vm1349_vm0 = vcmp.ge.f32.partialorder %v1153_v50, 0.0  ;;  %vm1350_vm1 = vcmp.ge.f32.partialorder %v1154_v52, 0.0  ;;  %v1545_v58 = vmul.f32 0.1, %v1153_v50  ;;  %v1546_v10 = vmul.f32 0.1, %v1154_v52 }
 0x54b   : > { %v6443_v11 = vsel %vm6051_vm14, %v5855_v60, %v6247_v56  ;;  %v6444_v12 = vsel %vm6052_vm15, %v5856_v61, %v6248_v7  ;;  %v2917_v0 = vadd.f32 %v11831_v16, %v2721_v2  ;;  %v2918_v62 = vadd.f32 %v11831_v16, %v2722_v3 }
 0x54c   : > { %v6835_v14 = vmax.f32 %v4679_v39, %v6443_v11  ;;  %v6836_v1 = vmax.f32 %v4680_v28, %v6444_v12  ;;  %v11894_v17 = vsel %vm1349_vm0, %v1153_v50, %v1545_v58  ;;  %v11896_v18 = vsel %vm1350_vm1, %v1154_v52, %v1546_v10 }
 0x54d   : > { %vm3113_vm2 = vcmp.ge.f32.partialorder %v2917_v0, 0.0  ;;  %vm3114_vm3 = vcmp.ge.f32.partialorder %v2918_v62, 0.0  ;;  %v3309_v19 = vmul.f32 0.1, %v2917_v0  ;;  %v3310_v5 = vmul.f32 0.1, %v2918_v62 }
 0x54e   : > { %v7031_v21 = vmax.f32 %v6639_v41, %v6835_v14  ;;  %v7032_v9 = vmax.f32 %v6640_v32, %v6836_v1  ;;  %v4094_v8 = vadd.f32 %v11831_v16, %v3898_v63  ;;  %vm4289_vm4 = vcmp.ge.f32.partialorder %v4093_v4, 0.0 }
 0x54f   : > { %v3505_v23 = vsel %vm3113_vm2, %v2917_v0, %v3309_v19  ;;  %v3506_v24 = vsel %vm3114_vm3, %v2918_v62, %v3310_v5  ;;  %v4485_v25 = vmul.f32 0.1, %v4093_v4  ;;  %v5073_v13 = vrot.slane %v539_v45, 4 }
 0x550   : > { %v8984_v27 = vpack.c.bf16 %v7032_v9, %v7031_v21  ;;  %vm4290_vm5 = vcmp.ge.f32.partialorder %v4094_v8, 0.0  ;;  %v4486_v15 = vmul.f32 0.1, %v4094_v8  ;;  %v5074_v29 = vrot.slane %v540_v47, 4  ;;  %v543_v9 = vld [vmem:[%s9329_s28 + $0xb70] sm:$0xff] }
 0x551   : > { %v4681_v20 = vsel %vm4289_vm4, %v4093_v4, %v4485_v25  ;;  %v5465_v33 = vunpack.c.l.bf16 %v5073_v13  ;;  %v6641_v22 = vmax.f32 %v11894_v17, %v3505_v23  ;;  %v6642_v35 = vmax.f32 %v11896_v18, %v3506_v24  ;;  %v544_v24 = vld [vmem:[%s9329_s28 + $0xb78] sm:$0xff] }
 0x552   : > { %9114 = vst [vmem:[%s9383_s8 + $0x2c8] sm:$0xff] %v8984_v27   ;;  %v4682_v36 = vsel %vm4290_vm5, %v4094_v8, %v4486_v15  ;;  %v5466_v37 = vunpack.c.l.bf16 %v5074_v29  ;;  %v751_v39 = vunpack.c.l.bf16 %v541_v30  ;;  %v752_v28 = vunpack.c.l.bf16 %v542_v31 }
 0x553   : > { %v5661_v41 = vmul.f32 %v11820_v6, %v5465_v33  ;;  %v2135_v43 = vrot.slane %v541_v30, 4  ;;  %v2136_v32 = vrot.slane %v542_v31, 4  ;;  %v3703_v45 = vunpack.c.l.bf16 %v548_v26  ;;  %v550_v30 = vld [vmem:[%s9329_s28 + $0xba8] sm:$0xff] }
 0x554   : > { %v5662_v34 = vmul.f32 %v11820_v6, %v5466_v37  ;;  %v953_v47 = vmul.f32 %v11820_v6, %v751_v39  ;;  %v954_v48 = vmul.f32 %v11820_v6, %v752_v28  ;;  %v3704_v49 = vunpack.c.l.bf16 %v549_v42 }
 0x555   : > { %v5857_v38 = vadd.f32 %v11831_v16, %v5661_v41  ;;  %v2527_v51 = vunpack.c.l.bf16 %v2135_v43  ;;  %v2528_v40 = vunpack.c.l.bf16 %v2136_v32  ;;  %v3899_v53 = vmul.f32 %v11820_v6, %v3703_v45 }
 0x556   : > { %v5858_v54 = vadd.f32 %v11831_v16, %v5662_v34  ;;  %v1155_v55 = vadd.f32 %v11831_v16, %v953_v47  ;;  %v1156_v44 = vadd.f32 %v11831_v16, %v954_v48  ;;  %v3900_v57 = vmul.f32 %v11820_v6, %v3704_v49 }
 0x557   : > { %vm6053_vm6 = vcmp.ge.f32.partialorder %v5857_v38, 0.0  ;;  %v6249_v46 = vmul.f32 0.1, %v5857_v38  ;;  %v2723_v59 = vmul.f32 %v11820_v6, %v2527_v51  ;;  %v2724_v60 = vmul.f32 %v11820_v6, %v2528_v40 }
 0x558   : > { %vm6054_vm7 = vcmp.ge.f32.partialorder %v5858_v54, 0.0  ;;  %v6250_v61 = vmul.f32 0.1, %v5858_v54  ;;  %vm1351_vm8 = vcmp.ge.f32.partialorder %v1155_v55, 0.0  ;;  %vm1352_vm9 = vcmp.ge.f32.partialorder %v1156_v44, 0.0 }
 0x559   : > { %v6445_v50 = vsel %vm6053_vm6, %v5857_v38, %v6249_v46  ;;  %v1547_v63 = vmul.f32 0.1, %v1155_v55  ;;  %v1548_v52 = vmul.f32 0.1, %v1156_v44  ;;  %v2919_v2 = vadd.f32 %v11831_v16, %v2723_v59 }
 0x55a   : > { %v6446_v3 = vsel %vm6054_vm7, %v5858_v54, %v6250_v61  ;;  %v6837_v4 = vmax.f32 %v4681_v20, %v6445_v50  ;;  %v2920_v56 = vadd.f32 %v11831_v16, %v2724_v60  ;;  %v4095_v7 = vadd.f32 %v11831_v16, %v3899_v53 }
 0x55b   : > { %v6838_v58 = vmax.f32 %v4682_v36, %v6446_v3  ;;  %v11921_v10 = vsel %vm1351_vm8, %v1155_v55, %v1547_v63  ;;  %v11923_v11 = vsel %vm1352_vm9, %v1156_v44, %v1548_v52  ;;  %vm3115_vm10 = vcmp.ge.f32.partialorder %v2919_v2, 0.0  ;;  %v551_v36 = vld [vmem:[%s9329_s28 + $0xbb0] sm:$0xff] }
 0x55c   : > { %v7033_v12 = vmax.f32 %v6641_v22, %v6837_v4  ;;  %vm3116_vm11 = vcmp.ge.f32.partialorder %v2920_v56, 0.0  ;;  %v3311_v0 = vmul.f32 0.1, %v2919_v2  ;;  %v3312_v62 = vmul.f32 0.1, %v2920_v56 }
 0x55d   : > { %v7034_v14 = vmax.f32 %v6642_v35, %v6838_v58  ;;  %v4096_v1 = vadd.f32 %v11831_v16, %v3900_v57  ;;  %vm4291_vm12 = vcmp.ge.f32.partialorder %v4095_v7, 0.0  ;;  %v4487_v17 = vmul.f32 0.1, %v4095_v7 }
 0x55e   : > { %v3507_v18 = vsel %vm3115_vm10, %v2919_v2, %v3311_v0  ;;  %v3508_v19 = vsel %vm3116_vm11, %v2920_v56, %v3312_v62  ;;  %v5075_v5 = vrot.slane %v548_v26, 4  ;;  %v5076_v21 = vrot.slane %v549_v42, 4  ;;  %v545_v62 = vld [vmem:[%s9329_s28 + $0xb80] sm:$0xff] }
 0x55f   : > { %v8989_v8 = vpack.c.bf16 %v7034_v14, %v7033_v12  ;;  %vm4292_vm13 = vcmp.ge.f32.partialorder %v4096_v1, 0.0  ;;  %v4488_v23 = vmul.f32 0.1, %v4096_v1  ;;  %v4683_v25 = vsel %vm4291_vm12, %v4095_v7, %v4487_v17 }
 0x560   : > { %v5467_v13 = vunpack.c.l.bf16 %v5075_v5  ;;  %v5468_v27 = vunpack.c.l.bf16 %v5076_v21  ;;  %v6643_v15 = vmax.f32 %v11921_v10, %v3507_v18  ;;  %v6644_v29 = vmax.f32 %v11923_v11, %v3508_v19  ;;  %v546_v18 = vld [vmem:[%s9329_s28 + $0xb88] sm:$0xff] }
 0x561   : > { %9115 = vst [vmem:[%s9383_s8 + $0x2d0] sm:$0xff] %v8989_v8   ;;  %v753_v31 = vunpack.c.l.bf16 %v543_v9  ;;  %v754_v20 = vunpack.c.l.bf16 %v544_v24  ;;  %v2137_v33 = vrot.slane %v543_v9, 4  ;;  %v2138_v37 = vrot.slane %v544_v24, 4  ;;  %v552_v24 = vld [vmem:[%s9329_s28 + $0xbb8] sm:$0xff] }
 0x562   : > { %v5663_v22 = vmul.f32 %v11820_v6, %v5467_v13  ;;  %v5664_v35 = vmul.f32 %v11820_v6, %v5468_v27  ;;  %v3705_v26 = vunpack.c.l.bf16 %v550_v30  ;;  %v3706_v42 = vunpack.c.l.bf16 %v551_v36 }
 0x563   : > { %v955_v39 = vmul.f32 %v11820_v6, %v753_v31  ;;  %v956_v28 = vmul.f32 %v11820_v6, %v754_v20  ;;  %v2529_v41 = vunpack.c.l.bf16 %v2137_v33  ;;  %v4684_v43 = vsel %vm4292_vm13, %v4096_v1, %v4488_v23 }
 0x564   : > { %v5859_v32 = vadd.f32 %v11831_v16, %v5663_v22  ;;  %v5860_v45 = vadd.f32 %v11831_v16, %v5664_v35  ;;  %v2530_v34 = vunpack.c.l.bf16 %v2138_v37  ;;  %v3901_v38 = vmul.f32 %v11820_v6, %v3705_v26 }
 0x565   : > { %v1157_v47 = vadd.f32 %v11831_v16, %v955_v39  ;;  %v1158_v48 = vadd.f32 %v11831_v16, %v956_v28  ;;  %v2725_v49 = vmul.f32 %v11820_v6, %v2529_v41  ;;  %v3902_v54 = vmul.f32 %v11820_v6, %v3706_v42 }
 0x566   : > { %vm6055_vm14 = vcmp.ge.f32.partialorder %v5859_v32, 0.0  ;;  %vm6056_vm15 = vcmp.ge.f32.partialorder %v5860_v45, 0.0  ;;  %v6251_v51 = vmul.f32 0.1, %v5859_v32  ;;  %v6252_v40 = vmul.f32 0.1, %v5860_v45 }
 0x567   : > { %vm1353_vm0 = vcmp.ge.f32.partialorder %v1157_v47, 0.0  ;;  %vm1354_vm1 = vcmp.ge.f32.partialorder %v1158_v48, 0.0  ;;  %v1549_v53 = vmul.f32 0.1, %v1157_v47  ;;  %v2726_v57 = vmul.f32 %v11820_v6, %v2530_v34 }
 0x568   : > { %v6447_v55 = vsel %vm6055_vm14, %v5859_v32, %v6251_v51  ;;  %v6448_v44 = vsel %vm6056_vm15, %v5860_v45, %v6252_v40  ;;  %v2921_v46 = vadd.f32 %v11831_v16, %v2725_v49  ;;  %v1550_v61 = vmul.f32 0.1, %v1158_v48 }
 0x569   : > { %v6839_v59 = vmax.f32 %v4683_v25, %v6447_v55  ;;  %v6840_v60 = vmax.f32 %v4684_v43, %v6448_v44  ;;  %v11947_v50 = vsel %vm1353_vm0, %v1157_v47, %v1549_v53  ;;  %v2922_v63 = vadd.f32 %v11831_v16, %v2726_v57  ;;  %v553_v25 = vld [vmem:[%s9329_s28 + $0xbc0] sm:$0xff] }
 0x56a   : > { %vm3117_vm2 = vcmp.ge.f32.partialorder %v2921_v46, 0.0  ;;  %v3313_v52 = vmul.f32 0.1, %v2921_v46  ;;  %v4097_v2 = vadd.f32 %v11831_v16, %v3901_v38  ;;  %v4098_v56 = vadd.f32 %v11831_v16, %v3902_v54 }
 0x56b   : > { %v7035_v3 = vmax.f32 %v6643_v15, %v6839_v59  ;;  %v7036_v4 = vmax.f32 %v6644_v29, %v6840_v60  ;;  %v5077_v7 = vrot.slane %v550_v30, 4  ;;  %vm3118_vm3 = vcmp.ge.f32.partialorder %v2922_v63, 0.0 }
 0x56c   : > { %v3314_v58 = vmul.f32 0.1, %v2922_v63  ;;  %v3509_v10 = vsel %vm3117_vm2, %v2921_v46, %v3313_v52  ;;  %vm4293_vm4 = vcmp.ge.f32.partialorder %v4097_v2, 0.0  ;;  %v1746_v12 = vsel %vm1354_vm1, %v1158_v48, %v1550_v61 }
 0x56d   : > { %v8994_v11 = vpack.c.bf16 %v7036_v4, %v7035_v3  ;;  %v4489_v0 = vmul.f32 0.1, %v4097_v2  ;;  %vm4294_vm5 = vcmp.ge.f32.partialorder %v4098_v56, 0.0  ;;  %v4490_v14 = vmul.f32 0.1, %v4098_v56  ;;  %v547_v4 = vld [vmem:[%s9329_s28 + $0xb90] sm:$0xff] }
 0x56e   : > { %v5078_v1 = vrot.slane %v551_v36, 4  ;;  %v5469_v17 = vunpack.c.l.bf16 %v5077_v7  ;;  %v3510_v19 = vsel %vm3118_vm3, %v2922_v63, %v3314_v58  ;;  %v6645_v21 = vmax.f32 %v11947_v50, %v3509_v10 }
 0x56f   : > { %9116 = vst [vmem:[%s9383_s8 + $0x2d8] sm:$0xff] %v8994_v11   ;;  %v4685_v5 = vsel %vm4293_vm4, %v4097_v2, %v4489_v0  ;;  %v755_v9 = vunpack.c.l.bf16 %v545_v62  ;;  %v756_v13 = vunpack.c.l.bf16 %v546_v18  ;;  %v2139_v27 = vrot.slane %v545_v62, 4 }
 0x570   : > { %v5470_v8 = vunpack.c.l.bf16 %v5078_v1  ;;  %v5665_v23 = vmul.f32 %v11820_v6, %v5469_v17  ;;  %v2140_v29 = vrot.slane %v546_v18, 4  ;;  %v3707_v30 = vunpack.c.l.bf16 %v552_v24  ;;  %v562_v17 = vld [vmem:[%s9329_s28 + $0xc08] sm:$0xff] }
 0x571   : > { %v957_v15 = vmul.f32 %v11820_v6, %v755_v9  ;;  %v3708_v31 = vunpack.c.l.bf16 %v553_v25  ;;  %v958_v22 = vmul.f32 %v11820_v6, %v756_v13  ;;  %v2531_v35 = vunpack.c.l.bf16 %v2139_v27 }
 0x572   : > { %v5666_v20 = vmul.f32 %v11820_v6, %v5470_v8  ;;  %v5861_v33 = vadd.f32 %v11831_v16, %v5665_v23  ;;  %v2532_v37 = vunpack.c.l.bf16 %v2140_v29  ;;  %v3903_v26 = vmul.f32 %v11820_v6, %v3707_v30 }
 0x573   : > { %v1159_v36 = vadd.f32 %v11831_v16, %v957_v15  ;;  %v3904_v39 = vmul.f32 %v11820_v6, %v3708_v31  ;;  %v1160_v42 = vadd.f32 %v11831_v16, %v958_v22  ;;  %v4686_v43 = vsel %vm4294_vm5, %v4098_v56, %v4490_v14  ;;  %v555_v56 = vld [vmem:[%s9329_s28 + $0xbd0] sm:$0xff]  ;;  %v554_v14 = vld [vmem:[%s9329_s28 + $0xbc8] sm:$0xff] }
 0x574   : > { %v5862_v28 = vadd.f32 %v11831_v16, %v5666_v20  ;;  %vm6057_vm6 = vcmp.ge.f32.partialorder %v5861_v33, 0.0  ;;  %v6253_v41 = vmul.f32 0.1, %v5861_v33  ;;  %v6646_v32 = vmax.f32 %v1746_v12, %v3510_v19 }
 0x575   : > { %v2727_v45 = vmul.f32 %v11820_v6, %v2531_v35  ;;  %v2728_v34 = vmul.f32 %v11820_v6, %v2532_v37  ;;  %vm1355_vm8 = vcmp.ge.f32.partialorder %v1159_v36, 0.0  ;;  %v1551_v38 = vmul.f32 0.1, %v1159_v36 }
 0x576   : > { %vm6058_vm7 = vcmp.ge.f32.partialorder %v5862_v28, 0.0  ;;  %v6254_v47 = vmul.f32 0.1, %v5862_v28  ;;  %v6449_v48 = vsel %vm6057_vm6, %v5861_v33, %v6253_v41  ;;  %v1552_v51 = vmul.f32 0.1, %v1160_v42 }
 0x577   : > { %v6841_v49 = vmax.f32 %v4685_v5, %v6449_v48  ;;  %v2923_v40 = vadd.f32 %v11831_v16, %v2727_v45  ;;  %v2924_v54 = vadd.f32 %v11831_v16, %v2728_v34  ;;  %v4099_v55 = vadd.f32 %v11831_v16, %v3903_v26 }
 0x578   : > { %v6450_v53 = vsel %vm6058_vm7, %v5862_v28, %v6254_v47  ;;  %v4100_v44 = vadd.f32 %v11831_v16, %v3904_v39  ;;  %vm1356_vm9 = vcmp.ge.f32.partialorder %v1160_v42, 0.0  ;;  %v1747_v50 = vsel %vm1355_vm8, %v1159_v36, %v1551_v38 }
 0x579   : > { %v6842_v57 = vmax.f32 %v4686_v43, %v6450_v53  ;;  %v7037_v46 = vmax.f32 %v6645_v21, %v6841_v49  ;;  %vm3119_vm10 = vcmp.ge.f32.partialorder %v2923_v40, 0.0  ;;  %vm3120_vm11 = vcmp.ge.f32.partialorder %v2924_v54, 0.0 }
 0x57a   : > { %v3315_v59 = vmul.f32 0.1, %v2923_v40  ;;  %v3316_v60 = vmul.f32 0.1, %v2924_v54  ;;  %vm4295_vm12 = vcmp.ge.f32.partialorder %v4099_v55, 0.0  ;;  %v1748_v52 = vsel %vm1356_vm9, %v1160_v42, %v1552_v51 }
 0x57b   : > { %v7038_v61 = vmax.f32 %v6646_v32, %v6842_v57  ;;  %v4491_v63 = vmul.f32 0.1, %v4099_v55  ;;  %vm4296_vm13 = vcmp.ge.f32.partialorder %v4100_v44, 0.0  ;;  %v5079_v2 = vrot.slane %v552_v24, 4 }
 0x57c   : > { %v5080_v3 = vrot.slane %v553_v25, 4  ;;  %v3511_v58 = vsel %vm3119_vm10, %v2923_v40, %v3315_v59  ;;  %v3512_v10 = vsel %vm3120_vm11, %v2924_v54, %v3316_v60  ;;  %v4492_v11 = vmul.f32 0.1, %v4100_v44 }
 0x57d   : > { %v8999_v7 = vpack.c.bf16 %v7038_v61, %v7037_v46  ;;  %v4687_v12 = vsel %vm4295_vm12, %v4099_v55, %v4491_v63  ;;  %v5471_v0 = vunpack.c.l.bf16 %v5079_v2  ;;  %v757_v1 = vunpack.c.l.bf16 %v547_v4  ;;  %v557_v63 = vld [vmem:[%s9329_s28 + $0xbe0] sm:$0xff] }
 0x57e   : > { %v5472_v62 = vunpack.c.l.bf16 %v5080_v3  ;;  %v758_v18 = vunpack.c.l.bf16 %v555_v56  ;;  %v2141_v19 = vrot.slane %v547_v4, 4  ;;  %v2142_v5 = vrot.slane %v555_v56, 4 }
 0x57f   : > { %9117 = vst [vmem:[%s9383_s8 + $0x2e0] sm:$0xff] %v8999_v7   ;;  %v3709_v21 = vunpack.c.l.bf16 %v554_v14  ;;  %v5667_v9 = vmul.f32 %v11820_v6, %v5471_v0  ;;  %v959_v23 = vmul.f32 %v11820_v6, %v757_v1  ;;  %v3710_v24 = vunpack.c.l.bf16 %v562_v17  ;;  %v563_v7 = vld [vmem:[%s9329_s28 + $0xc10] sm:$0xff] }
 0x580   : > { %v5668_v8 = vmul.f32 %v11820_v6, %v5472_v62  ;;  %v960_v25 = vmul.f32 %v11820_v6, %v758_v18  ;;  %v2533_v13 = vunpack.c.l.bf16 %v2141_v19  ;;  %v2534_v27 = vunpack.c.l.bf16 %v2142_v5 }
 0x581   : > { %v3905_v15 = vmul.f32 %v11820_v6, %v3709_v21  ;;  %v4688_v29 = vsel %vm4296_vm13, %v4100_v44, %v4492_v11  ;;  %v5863_v30 = vadd.f32 %v11831_v16, %v5667_v9  ;;  %v1161_v20 = vadd.f32 %v11831_v16, %v959_v23 }
 0x582   : > { %v5864_v31 = vadd.f32 %v11831_v16, %v5668_v8  ;;  %v6647_v33 = vmax.f32 %v1747_v50, %v3511_v58  ;;  %v1162_v22 = vadd.f32 %v11831_v16, %v960_v25  ;;  %v2729_v35 = vmul.f32 %v11820_v6, %v2533_v13  ;;  %v556_v50 = vld [vmem:[%s9329_s28 + $0xbd8] sm:$0xff] }
 0x583   : > { %v2730_v36 = vmul.f32 %v11820_v6, %v2534_v27  ;;  %vm6059_vm14 = vcmp.ge.f32.partialorder %v5863_v30, 0.0  ;;  %v6255_v37 = vmul.f32 0.1, %v5863_v30  ;;  %v6648_v39 = vmax.f32 %v1748_v52, %v3512_v10 }
 0x584   : > { %vm6060_vm15 = vcmp.ge.f32.partialorder %v5864_v31, 0.0  ;;  %v6256_v26 = vmul.f32 0.1, %v5864_v31  ;;  %v1553_v28 = vmul.f32 0.1, %v1161_v20  ;;  %v3906_v41 = vmul.f32 %v11820_v6, %v3710_v24 }
 0x585   : > { %v4101_v42 = vadd.f32 %v11831_v16, %v3905_v15  ;;  %v6451_v43 = vsel %vm6059_vm14, %v5863_v30, %v6255_v37  ;;  %v2925_v45 = vadd.f32 %v11831_v16, %v2729_v35  ;;  %v2926_v34 = vadd.f32 %v11831_v16, %v2730_v36 }
 0x586   : > { %v6452_v32 = vsel %vm6060_vm15, %v5864_v31, %v6256_v26  ;;  %v6843_v47 = vmax.f32 %v4687_v12, %v6451_v43  ;;  %vm1357_vm0 = vcmp.ge.f32.partialorder %v1161_v20, 0.0  ;;  %v1554_v49 = vmul.f32 0.1, %v1162_v22 }
 0x587   : > { %v6844_v48 = vmax.f32 %v4688_v29, %v6452_v32  ;;  %vm1358_vm1 = vcmp.ge.f32.partialorder %v1162_v22, 0.0  ;;  %vm3121_vm2 = vcmp.ge.f32.partialorder %v2925_v45, 0.0  ;;  %v3317_v38 = vmul.f32 0.1, %v2925_v45 }
 0x588   : > { %v3318_v51 = vmul.f32 0.1, %v2926_v34  ;;  %v7039_v40 = vmax.f32 %v6647_v33, %v6843_v47  ;;  %vm3122_vm3 = vcmp.ge.f32.partialorder %v2926_v34, 0.0  ;;  %v4102_v54 = vadd.f32 %v11831_v16, %v3906_v41 }
 0x589   : > { %v7040_v53 = vmax.f32 %v6648_v39, %v6844_v48  ;;  %v1749_v55 = vsel %vm1357_vm0, %v1161_v20, %v1553_v28  ;;  %vm4297_vm4 = vcmp.ge.f32.partialorder %v4101_v42, 0.0  ;;  %v4493_v44 = vmul.f32 0.1, %v4101_v42 }
 0x58a   : > { %v5081_v57 = vrot.slane %v554_v14, 4  ;;  %v1750_v59 = vsel %vm1358_vm1, %v1162_v22, %v1554_v49  ;;  %v3513_v60 = vsel %vm3121_vm2, %v2925_v45, %v3317_v38  ;;  %v5082_v61 = vrot.slane %v562_v17, 4  ;;  %v564_v17 = vld [vmem:[%s9329_s28 + $0xc18] sm:$0xff] }
 0x58b   : > { %v9004_v46 = vpack.c.bf16 %v7040_v53, %v7039_v40  ;;  %v3514_v52 = vsel %vm3122_vm3, %v2926_v34, %v3318_v51  ;;  %vm4298_vm5 = vcmp.ge.f32.partialorder %v4102_v54, 0.0  ;;  %v4494_v2 = vmul.f32 0.1, %v4102_v54  ;;  %v558_v40 = vld [vmem:[%s9329_s28 + $0xbe8] sm:$0xff] }
 0x58c   : > { %v5473_v3 = vunpack.c.l.bf16 %v5081_v57  ;;  %v4689_v4 = vsel %vm4297_vm4, %v4101_v42, %v4493_v44  ;;  %v5474_v56 = vunpack.c.l.bf16 %v5082_v61  ;;  %v759_v58 = vunpack.c.l.bf16 %v556_v50  ;;  %v559_v44 = vld [vmem:[%s9329_s28 + $0xbf0] sm:$0xff]  ;;  %v565_v61 = vld [vmem:[%s9329_s28 + $0xc20] sm:$0xff] }
 0x58d   : > { %9118 = vst [vmem:[%s9383_s8 + $0x2e8] sm:$0xff] %v9004_v46   ;;  %v760_v10 = vunpack.c.l.bf16 %v557_v63  ;;  %v2143_v12 = vrot.slane %v556_v50, 4  ;;  %v2144_v0 = vrot.slane %v557_v63, 4  ;;  %v3711_v62 = vunpack.c.l.bf16 %v563_v7 }
 0x58e   : > { %v5669_v11 = vmul.f32 %v11820_v6, %v5473_v3  ;;  %v5670_v14 = vmul.f32 %v11820_v6, %v5474_v56  ;;  %v6649_v1 = vmax.f32 %v1749_v55, %v3513_v60  ;;  %v961_v18 = vmul.f32 %v11820_v6, %v759_v58 }
 0x58f   : > { %v962_v19 = vmul.f32 %v11820_v6, %v760_v10  ;;  %v2535_v21 = vunpack.c.l.bf16 %v2143_v12  ;;  %v2536_v9 = vunpack.c.l.bf16 %v2144_v0  ;;  %v3712_v8 = vunpack.c.l.bf16 %v564_v17 }
 0x590   : > { %v5865_v5 = vadd.f32 %v11831_v16, %v5669_v11  ;;  %v5866_v23 = vadd.f32 %v11831_v16, %v5670_v14  ;;  %v1163_v24 = vadd.f32 %v11831_v16, %v961_v18  ;;  %v3907_v13 = vmul.f32 %v11820_v6, %v3711_v62 }
 0x591   : > { %v1164_v25 = vadd.f32 %v11831_v16, %v962_v19  ;;  %v2731_v15 = vmul.f32 %v11820_v6, %v2535_v21  ;;  %v2732_v29 = vmul.f32 %v11820_v6, %v2536_v9  ;;  %v4690_v30 = vsel %vm4298_vm5, %v4102_v54, %v4494_v2 }
 0x592   : > { %vm6061_vm6 = vcmp.ge.f32.partialorder %v5865_v5, 0.0  ;;  %v6257_v27 = vmul.f32 0.1, %v5865_v5  ;;  %vm6062_vm7 = vcmp.ge.f32.partialorder %v5866_v23, 0.0  ;;  %v6258_v31 = vmul.f32 0.1, %v5866_v23 }
 0x593   : > { %v6650_v20 = vmax.f32 %v1750_v59, %v3514_v52  ;;  %v1555_v22 = vmul.f32 0.1, %v1163_v24  ;;  %v2927_v35 = vadd.f32 %v11831_v16, %v2731_v15  ;;  %v3908_v36 = vmul.f32 %v11820_v6, %v3712_v8  ;;  %v12048_v15 = vld [vmem:[%s12138_s2] ss:$0 sm:$0xff] }
 0x594   : > { %v6453_v33 = vsel %vm6061_vm6, %v5865_v5, %v6257_v27  ;;  %v6454_v37 = vsel %vm6062_vm7, %v5866_v23, %v6258_v31  ;;  %v1556_v39 = vmul.f32 0.1, %v1164_v25  ;;  %v2928_v28 = vadd.f32 %v11831_v16, %v2732_v29  ;;  %v12039_v5 = vld [vmem:[%s12137_s1] ss:$0 sm:$0xff] }
 0x595   : > { %v6845_v26 = vmax.f32 %v4689_v4, %v6453_v33  ;;  %v6846_v41 = vmax.f32 %v4690_v30, %v6454_v37  ;;  %vm1359_vm8 = vcmp.ge.f32.partialorder %v1163_v24, 0.0  ;;  %vm1360_vm9 = vcmp.ge.f32.partialorder %v1164_v25, 0.0  ;;  %v566_v4 = vld [vmem:[%s9329_s28 + $0xc28] sm:$0xff] }
 0x596   : > { %v4103_v42 = vadd.f32 %v11831_v16, %v3907_v13  ;;  %vm3123_vm10 = vcmp.ge.f32.partialorder %v2927_v35, 0.0  ;;  %v3319_v32 = vmul.f32 0.1, %v2927_v35  ;;  %v3320_v45 = vmul.f32 0.1, %v2928_v28 }
 0x597   : > { %v7041_v43 = vmax.f32 %v6649_v1, %v6845_v26  ;;  %v7042_v34 = vmax.f32 %v6650_v20, %v6846_v41  ;;  %vm3124_vm11 = vcmp.ge.f32.partialorder %v2928_v28, 0.0  ;;  %v4104_v47 = vadd.f32 %v11831_v16, %v3908_v36 }
 0x598   : > { %v1751_v48 = vsel %vm1359_vm8, %v1163_v24, %v1555_v22  ;;  %v1752_v49 = vsel %vm1360_vm9, %v1164_v25, %v1556_v39  ;;  %v5083_v38 = vrot.slane %v563_v7, 4  ;;  %v5084_v51 = vrot.slane %v564_v17, 4 }
 0x599   : > { %v9009_v53 = vpack.c.bf16 %v7042_v34, %v7041_v43  ;;  %v3515_v54 = vsel %vm3123_vm10, %v2927_v35, %v3319_v32  ;;  %vm4299_vm12 = vcmp.ge.f32.partialorder %v4103_v42, 0.0  ;;  %v4495_v55 = vmul.f32 0.1, %v4103_v42  ;;  %v560_v43 = vld [vmem:[%s9329_s28 + $0xbf8] sm:$0xff] }
 0x59a   : > { %v3516_v57 = vsel %vm3124_vm11, %v2928_v28, %v3320_v45  ;;  %vm4300_vm13 = vcmp.ge.f32.partialorder %v4104_v47, 0.0  ;;  %v5475_v46 = vunpack.c.l.bf16 %v5083_v38  ;;  %v5476_v59 = vunpack.c.l.bf16 %v5084_v51 }
 0x59b   : > { %9119 = vst [vmem:[%s9383_s8 + $0x2f0] sm:$0xff] %v9009_v53   ;;  %v4496_v60 = vmul.f32 0.1, %v4104_v47  ;;  %v761_v50 = vunpack.c.l.bf16 %v558_v40  ;;  %v762_v63 = vunpack.c.l.bf16 %v559_v44  ;;  %v2145_v52 = vrot.slane %v558_v40, 4 }
 0x59c   : > { %v5671_v2 = vmul.f32 %v11820_v6, %v5475_v46  ;;  %v5672_v3 = vmul.f32 %v11820_v6, %v5476_v59  ;;  %v2146_v56 = vrot.slane %v559_v44, 4  ;;  %v3713_v7 = vunpack.c.l.bf16 %v565_v61 }
 0x59d   : > { %v963_v58 = vmul.f32 %v11820_v6, %v761_v50  ;;  %v964_v10 = vmul.f32 %v11820_v6, %v762_v63  ;;  %v2537_v11 = vunpack.c.l.bf16 %v2145_v52  ;;  %v3714_v12 = vunpack.c.l.bf16 %v566_v4  ;;  %v568_v50 = vld [vmem:[%s9329_s28 + $0xc38] sm:$0xff] }
 0x59e   : > { %v4691_v0 = vsel %vm4299_vm12, %v4103_v42, %v4495_v55  ;;  %v5867_v62 = vadd.f32 %v11831_v16, %v5671_v2  ;;  %v5868_v14 = vadd.f32 %v11831_v16, %v5672_v3  ;;  %v2538_v1 = vunpack.c.l.bf16 %v2146_v56 }
 0x59f   : > { %v4692_v17 = vsel %vm4300_vm13, %v4104_v47, %v4496_v60  ;;  %v1165_v18 = vadd.f32 %v11831_v16, %v963_v58  ;;  %v1166_v19 = vadd.f32 %v11831_v16, %v964_v10  ;;  %v2733_v6 = vmul.f32 %v12039_v5, %v2537_v11 }
 0x5a0   : > { %vm6063_vm14 = vcmp.ge.f32.partialorder %v5867_v62, 0.0  ;;  %vm6064_vm15 = vcmp.ge.f32.partialorder %v5868_v14, 0.0  ;;  %v6259_v21 = vmul.f32 0.1, %v5867_v62  ;;  %v6260_v9 = vmul.f32 0.1, %v5868_v14 }
 0x5a1   : > { %v6651_v8 = vmax.f32 %v1751_v48, %v3515_v54  ;;  %v6652_v23 = vmax.f32 %v1752_v49, %v3516_v57  ;;  %v3909_v24 = vmul.f32 %v12039_v5, %v3713_v7  ;;  %v3910_v25 = vmul.f32 %v12039_v5, %v3714_v12  ;;  %v561_v48 = vld [vmem:[%s9329_s28 + $0xc00] sm:$0xff] }
 0x5a2   : > { %v6455_v13 = vsel %vm6063_vm14, %v5867_v62, %v6259_v21  ;;  %v6456_v27 = vsel %vm6064_vm15, %v5868_v14, %v6260_v9  ;;  %v2734_v16 = vmul.f32 %v12039_v5, %v2538_v1  ;;  %v2929_v29 = vadd.f32 %v12048_v15, %v2733_v6 }
 0x5a3   : > { %v6847_v30 = vmax.f32 %v4691_v0, %v6455_v13  ;;  %v6848_v31 = vmax.f32 %v4692_v17, %v6456_v27  ;;  %vm1361_vm0 = vcmp.ge.f32.partialorder %v1165_v18, 0.0  ;;  %v1557_v20 = vmul.f32 0.1, %v1165_v18 }
 0x5a4   : > { %vm1362_vm1 = vcmp.ge.f32.partialorder %v1166_v19, 0.0  ;;  %v1558_v33 = vmul.f32 0.1, %v1166_v19  ;;  %v2930_v22 = vadd.f32 %v12048_v15, %v2734_v16  ;;  %v3321_v35 = vmul.f32 0.1, %v2929_v29 }
 0x5a5   : > { %v7043_v36 = vmax.f32 %v6651_v8, %v6847_v30  ;;  %v7044_v37 = vmax.f32 %v6652_v23, %v6848_v31  ;;  %v4105_v26 = vadd.f32 %v12048_v15, %v3909_v24  ;;  %v5085_v39 = vrot.slane %v565_v61, 4  ;;  %v567_v61 = vld [vmem:[%s9329_s28 + $0xc30] sm:$0xff]  ;;  %s9132_s28 = smul.u32 12544, %s9298_s16  ;;  %s9192_s16 = scalar_lea.vmem %s12091_s17, 12544 }
 0x5a6   : > { %vm3125_vm2 = vcmp.ge.f32.partialorder %v2929_v29, 0.0  ;;  %v1753_v41 = vsel %vm1361_vm0, %v1165_v18, %v1557_v20  ;;  %v4106_v42 = vadd.f32 %v12048_v15, %v3910_v25  ;;  %v1754_v32 = vsel %vm1362_vm1, %v1166_v19, %v1558_v33  ;;  %p9193_p11 = scmp.ne.s32.totalorder %s12091_s17, %s9192_s16  ;;  %p9200_p1 = scmp.lt.s32.totalorder %s9198_s29, %s9192_s16 }
 0x5a7   : > { %v9014_v28 = vpack.c.bf16 %v7044_v37, %v7043_v36  ;;  %v3322_v45 = vmul.f32 0.1, %v2930_v22  ;;  %v5086_v34 = vrot.slane %v566_v4, 4  ;;  %v5477_v47 = vunpack.c.l.bf16 %v5085_v39  ;;  %s12089_s24 = scalar_lea.hbm %s12139_s3, %s9132_s28 }
 0x5a8   : > { %vm3126_vm3 = vcmp.ge.f32.partialorder %v2930_v22, 0.0  ;;  %v3517_v49 = vsel %vm3125_vm2, %v2929_v29, %v3321_v35  ;;  %vm4301_vm4 = vcmp.ge.f32.partialorder %v4105_v26, 0.0  ;;  %v4497_v38 = vmul.f32 0.1, %v4105_v26  ;;  %p9194_p12 = pnand %p9193_p11, %p9315_p5  ;;  %p9201_p2 = por %p9200_p1, %p9199_p0 }
 0x5a9   : > { %9120 = vst [vmem:[%s9383_s8 + $0x2f8] sm:$0xff] %v9014_v28   ;;  %v5478_v51 = vunpack.c.l.bf16 %v5086_v34  ;;  %v5673_v40 = vmul.f32 %v12039_v5, %v5477_v47  ;;  %v763_v53 = vunpack.c.l.bf16 %v560_v43  ;;  %v2147_v54 = vrot.slane %v560_v43, 4 }
 0x5aa   : > { %vm4302_vm5 = vcmp.ge.f32.partialorder %v4106_v42, 0.0  ;;  %v4498_v55 = vmul.f32 0.1, %v4106_v42  ;;  %v764_v44 = vunpack.c.l.bf16 %v561_v48  ;;  %v2148_v57 = vrot.slane %v561_v48, 4  ;;  %p9195_p13 = pneg %p9194_p12 }
 0x5ab   : > { %v3518_v46 = vsel %vm3126_vm3, %v2930_v22, %v3322_v45  ;;  %v5674_v59 = vmul.f32 %v12039_v5, %v5478_v51  ;;  %v5869_v60 = vadd.f32 %v12048_v15, %v5673_v40  ;;  %v2539_v63 = vunpack.c.l.bf16 %v2147_v54 }
 0x5ac   : > { %v4693_v52 = vsel %vm4301_vm4, %v4105_v26, %v4497_v38  ;;  %v2540_v2 = vunpack.c.l.bf16 %v2148_v57  ;;  %v3715_v3 = vunpack.c.l.bf16 %v567_v61  ;;  %v3716_v4 = vunpack.c.l.bf16 %v568_v50  ;;  %p9202_p3 = pnand %p9201_p2, %p9195_p13 }
 0x5ad   : > { %v5870_v56 = vadd.f32 %v12048_v15, %v5674_v59  ;;  %vm6065_vm6 = vcmp.ge.f32.partialorder %v5869_v60, 0.0  ;;  %v6261_v7 = vmul.f32 0.1, %v5869_v60  ;;  %v965_v58 = vmul.f32 %v12039_v5, %v763_v53 }
 0x5ae   : > { %v4694_v10 = vsel %vm4302_vm5, %v4106_v42, %v4498_v55  ;;  %v6653_v11 = vmax.f32 %v1753_v41, %v3517_v49  ;;  %v966_v12 = vmul.f32 %v12039_v5, %v764_v44  ;;  %v2735_v0 = vmul.f32 %v12039_v5, %v2539_v63 }
 0x5af   : > { %vm6066_vm7 = vcmp.ge.f32.partialorder %v5870_v56, 0.0  ;;  %v6262_v62 = vmul.f32 0.1, %v5870_v56  ;;  %v6457_v14 = vsel %vm6065_vm6, %v5869_v60, %v6261_v7  ;;  %v2736_v1 = vmul.f32 %v12039_v5, %v2540_v2 }
 0x5b0   : > { %v6654_v17 = vmax.f32 %v1754_v32, %v3518_v46  ;;  %v6849_v18 = vmax.f32 %v4693_v52, %v6457_v14  ;;  %v3911_v19 = vmul.f32 %v12039_v5, %v3715_v3  ;;  %v3912_v6 = vmul.f32 %v12039_v5, %v3716_v4 }
 0x5b1   : > { %v6458_v21 = vsel %vm6066_vm7, %v5870_v56, %v6262_v62  ;;  %v1167_v9 = vadd.f32 %v12048_v15, %v965_v58  ;;  %v1168_v24 = vadd.f32 %v12048_v15, %v966_v12  ;;  %v2931_v25 = vadd.f32 %v12048_v15, %v2735_v0 }
 0x5b2   : > { %v6850_v8 = vmax.f32 %v4694_v10, %v6458_v21  ;;  %v7045_v23 = vmax.f32 %v6653_v11, %v6849_v18  ;;  %v2932_v13 = vadd.f32 %v12048_v15, %v2736_v1  ;;  %v4107_v16 = vadd.f32 %v12048_v15, %v3911_v19 }
 0x5b3   : > { %v4108_v29 = vadd.f32 %v12048_v15, %v3912_v6  ;;  %vm1363_vm8 = vcmp.ge.f32.partialorder %v1167_v9, 0.0  ;;  %v5087_v30 = vrot.slane %v567_v61, 4  ;;  %v5088_v31 = vrot.slane %v568_v50, 4 }
 0x5b4   : > { %v7046_v27 = vmax.f32 %v6654_v17, %v6850_v8  ;;  %vm1364_vm9 = vcmp.ge.f32.partialorder %v1168_v24, 0.0  ;;  %v1559_v33 = vmul.f32 0.1, %v1167_v9  ;;  %v1560_v22 = vmul.f32 0.1, %v1168_v24 }
 0x5b5   : > { %v3323_v35 = vmul.f32 0.1, %v2931_v25  ;;  %v3324_v36 = vmul.f32 0.1, %v2932_v13  ;;  %v5479_v37 = vunpack.c.l.bf16 %v5087_v30  ;;  %v5480_v26 = vunpack.c.l.bf16 %v5088_v31 }
 0x5b6   : > { %v9019_v20 = vpack.c.bf16 %v7046_v27, %v7045_v23  ;;  %vm3127_vm10 = vcmp.ge.f32.partialorder %v2931_v25, 0.0  ;;  %vm3128_vm11 = vcmp.ge.f32.partialorder %v2932_v13, 0.0  ;;  %v4499_v39 = vmul.f32 0.1, %v4107_v16 }
 0x5b7   : > { %v4500_v28 = vmul.f32 0.1, %v4108_v29  ;;  %vm4303_vm12 = vcmp.ge.f32.partialorder %v4107_v16, 0.0  ;;  %vm4304_vm13 = vcmp.ge.f32.partialorder %v4108_v29, 0.0  ;;  %v5675_v41 = vmul.f32 %v12039_v5, %v5479_v37 }
 0x5b8   : > { %9121 = vst [vmem:[%s9383_s8 + $0x300] sm:$0xff] %v9019_v20   ;;  %v5676_v42 = vmul.f32 %v12039_v5, %v5480_v26  ;;  %v1755_v43 = vsel %vm1363_vm8, %v1167_v9, %v1559_v33  ;;  %v1756_v32 = vsel %vm1364_vm9, %v1168_v24, %v1560_v22  ;;  %v3519_v45 = vsel %vm3127_vm10, %v2931_v25, %v3323_v35 }
 0x5b9   : > { %v3520_v34 = vsel %vm3128_vm11, %v2932_v13, %v3324_v36  ;;  %v5871_v47 = vadd.f32 %v12048_v15, %v5675_v41  ;;  %v4695_v49 = vsel %vm4303_vm12, %v4107_v16, %v4499_v39  ;;  %v4696_v38 = vsel %vm4304_vm13, %v4108_v29, %v4500_v28 }
 0x5ba   : > { %v5872_v48 = vadd.f32 %v12048_v15, %v5676_v42  ;;  %v6655_v40 = vmax.f32 %v1755_v43, %v3519_v45  ;;  %v6656_v53 = vmax.f32 %v1756_v32, %v3520_v34 }
 0x5bb   : > { %vm6067_vm14 = vcmp.ge.f32.partialorder %v5871_v47, 0.0  ;;  %v6263_v51 = vmul.f32 0.1, %v5871_v47 }
 0x5bc   : > { %vm6068_vm15 = vcmp.ge.f32.partialorder %v5872_v48, 0.0  ;;  %v6264_v5 = vmul.f32 0.1, %v5872_v48 }
 0x5bd   : > { %v6459_v54 = vsel %vm6067_vm14, %v5871_v47, %v6263_v51 }
 0x5be   : > { %v6460_v55 = vsel %vm6068_vm15, %v5872_v48, %v6264_v5  ;;  %v6851_v44 = vmax.f32 %v4695_v49, %v6459_v54 }
 0x5bf   : > { %v6852_v57 = vmax.f32 %v4696_v38, %v6460_v55 }
 0x5c0   : > { %v7047_v46 = vmax.f32 %v6655_v40, %v6851_v44 }
 0x5c1   : > { %v7048_v59 = vmax.f32 %v6656_v53, %v6852_v57 }
 0x5c3   : > { %v9024_v15 = vpack.c.bf16 %v7048_v59, %v7047_v46 }
 0x5c5   : > { %9122 = vst [vmem:[%s9383_s8 + $0x308] sm:$0xff] %v9024_v15  }
 0x5c6   : > { %9205 = shalt.err (!%p9202_p3)
}
 0x5c7   : > { %s9206_s6 = scalar_lea.hbm %s12089_s24, 12544  ;;  %s9210_s4 = scalar_lea.hbm %s12139_s3, 50176 }
 0x5c8   : > { %p9207_p4 = scmp.ne.s32.totalorder %s12089_s24, %s9206_s6  ;;  %p9211_p9 = scmp.lt.s32.totalorder %s12089_s24, %s12139_s3 }
 0x5c9   : > { %p9212_p10 = scmp.lt.s32.totalorder %s9210_s4, %s9206_s6 }
 0x5ca   : > { %p9208_p7 = pnand %p9207_p4, %p9315_p5 }
 0x5cb   : > { %p9213_p11 = por %p9212_p10, %p9211_p9 }
 0x5cc   : > { %p9209_p8 = pneg %p9208_p7 }
 0x5ce   : > { %p9214_p12 = pnand %p9213_p11, %p9209_p8 }
 0x5d0   : > { %9217 = shalt.err (!%p9214_p12)
}
 0x5d1   : > { %s9255_s9 = smov 64   ;;  %s9256_s10 = smov 4  }
 0x5d2   : > { %9126 = dma.vmem_to_hbm [thread:$0]  (%p9315_p5), %s12091_s17, 12544, %s12089_s24, %s12096_s25, %s9255_s9, %s9255_s9, %s9256_s10  }
 0x5d3 PF: > { %p9133_p13 = scmp.ge.s32.totalorder %s9252_s15, 2  ;;  %s8087_s11 = sand.u32 1, %s9240_s12  }
 0x5d4   : > { %s8088_s28 = scalar_lea.sflag [#allocation3], %s8087_s11 }
 0x5d5   : > { %p9129_p0 = pnand %p9133_p13, %p9319_p6 }
 0x5d7   : > { %p9130_p1 = pneg %p9129_p0 }
 0x5d9   : > { %9235 = dma.done.wait (%p9130_p1), %s8088_s28, 12544  }
 0x5da   : > { %9237 = vsyncadd (%p9130_p1), %s8088_s28, 4294954752  ;;  %p13_p2 = scmp.ge.s32.totalorder %s9302_s18, 6   ;;  %s12142_s12 = smov %s9244_s13 }
 0x5db   : > { %s12143_s13 = smov %s9248_s14  ;;  %s12144_s14 = smov %s9313_s21 }
 0x5dc   : > { %s12145_s15 = smov %s9302_s18  ;;  %15 = sbr.rel (!%p13_p2) target bundleno = 3 (0x3), region = 67 }
 0x5e1   :  { %8093 = vsyncpa [#allocation3], 1 }
 0x5e2   :  { %8095 = vsyncpa [#allocation3 + $0x1], 1 }

</bundles_post_ra>
